<compile_context>
chip_gen: v7x
topology: tpu7x:2x2x1
jax: 0.10.0
libtpu: 0.0.40
codegen_flags: <defaults>
</compile_context>

<pallas_src>
import functools

import jax
import jax.numpy as jnp
from jax.experimental import pallas as pl
from jax.experimental.pallas import tpu as pltpu

C = 128  # padded channel width (lane-dense)


def _round_up(x, m):
    return (x + m - 1) // m * m


# -----------------------------------------------------------------------------
# The fused LeNet kernel.  One batch block per grid step; everything in VMEM.
#
# Layouts: activations are kept as 2-D (rows, 128) values with rows flattened
# in (n, y, x) order (x fastest).  Because the flattening is row-major, a conv
# tap at spatial offset (dy, dx) is simply the same tensor shifted by
# (dy*W + dx) rows, so im2col is a handful of contiguous row slices
# concatenated along lanes.  Rows that straddle an image edge are garbage but
# are never selected by any downstream (shift-indexed) consumer.
# -----------------------------------------------------------------------------
def _lenet_kernel(p6_ref, w1_ref, b1_ref, w2_ref, b2_ref, w3_ref, b3_ref,
                  fw1_ref, fb1_ref, fw2_ref, fb2_ref, out_ref, *, nb):
    f32 = jnp.float32

    # ---- conv1 + bias + ReLU + maxpool -------------------------------------
    # p6 rows = (n, iy, ix) over the 14x14 pooled grid; K = 6x6 receptive
    # field (stride 2).  w1 holds the 5x5 conv weights scattered into the 6x6
    # window once per pool tap, stacked along output lanes (4 x 128).
    a1 = jnp.dot(p6_ref[...], w1_ref[...], preferred_element_type=f32)  # (nb*196, 512)
    h1 = jnp.maximum(jnp.maximum(a1[:, 0:128], a1[:, 128:256]),
                     jnp.maximum(a1[:, 256:384], a1[:, 384:512]))       # pool taps
    h1 = jnp.maximum(h1 + b1_ref[...], 0.0)          # (nb*196, 128), 6 real channels

    # ---- conv2 + bias + ReLU ------------------------------------------------
    # im2col by global row shifts on the flat (n,iy,ix) layout (W = 14):
    #   K index (dy, dx, ci) <- h1[row + 14*dy + dx, ci]
    h1c = h1[:, 0:8]                                  # 6 real channels (+2 zero)
    r1 = nb * 196
    lx = r1 - 4
    xw = jnp.concatenate([h1c[dx:dx + lx, :] for dx in range(5)], axis=1)        # (lx, 40)
    ly = lx - 56
    yw = jnp.concatenate([xw[14 * dy:14 * dy + ly, :] for dy in range(5)], axis=1)  # (ly, 200)
    a2 = jnp.dot(yw, w2_ref[...], preferred_element_type=f32)
    a2 = jnp.maximum(a2 + b2_ref[...], 0.0)           # valid rows: y, x in 0..9

    # ---- maxpool 2x2 on conv2: max of row shifts {0, 1, 14, 15} -------------
    lp = ly - 15
    pm = jnp.maximum(jnp.maximum(a2[0:lp], a2[1:1 + lp]),
                     jnp.maximum(a2[14:14 + lp], a2[15:15 + lp]))                # (lp, 128)

    # ---- conv3 (5x5 over the pooled 5x5 map -> 1x1) + bias + ReLU ------------
    # Pooled grid positions sit at strides 2 (x) / 28 (y) of the flat rows.
    pmc = pm[:, 0:16]
    lzf = lp - 8
    zf = jnp.concatenate([pmc[2 * f:2 * f + lzf, :] for f in range(5)], axis=1)  # (lzf, 80)
    lz = lzf - 112
    z = jnp.concatenate([zf[28 * e:28 * e + lz, :] for e in range(5)], axis=1)   # (lz, 400)
    # one valid row per sample: flat row n*196  (== x.view(-1, 120))
    zr = jnp.concatenate([z[n * 196:n * 196 + 1, :] for n in range(nb)], axis=0)  # (nb, 400)
    h3 = jnp.maximum(jnp.dot(zr, w3_ref[...], preferred_element_type=f32)
                     + b3_ref[...], 0.0)              # (nb, 128), 120 real

    # ---- fc1 + ReLU, fc2 -----------------------------------------------------
    h4 = jnp.maximum(jnp.dot(h3, fw1_ref[...], preferred_element_type=f32)
                     + fb1_ref[...], 0.0)
    out = jnp.dot(h4, fw2_ref[...], preferred_element_type=f32) + fb2_ref[...]
    out_ref[...] = out.astype(out_ref.dtype)


# -----------------------------------------------------------------------------
# Wrapper: conv1 patch extraction (on the HBM input only), weight padding, and
# the single pallas_call.
# -----------------------------------------------------------------------------
def lenet_forward(x_nchw, params):
    (w1, b1, w2, b2, w3, b3, fw1, fb1, fw2, fb2) = params
    N = x_nchw.shape[0]
    n_out = fw2.shape[0]
    assert x_nchw.shape[1:] == (1, 32, 32), "LeNet expects 1x32x32 inputs"

    x = x_nchw.astype(jnp.float32)

    # conv1 + pool receptive field is 6x6 with stride 2 -> one patches call.
    # Output (N, 36, 14, 14); channel k = dy6*6 + dx6 (row-major, Cin=1).
    p6 = jax.lax.conv_general_dilated_patches(
        x, (6, 6), (2, 2), "VALID",
        dimension_numbers=("NCHW", "OIHW", "NCHW"))
    p6 = jnp.transpose(p6, (0, 2, 3, 1)).reshape(N * 196, 36)   # rows (n, iy, ix)
    p6 = jnp.pad(p6, ((0, 0), (0, 4)))                          # K: 36 -> 40

    # ---- weight / bias padding (one-time layout plumbing) --------------------
    # conv1: scatter the 5x5 kernel into the 6x6 window once per pool tap and
    # stack the 4 taps along output lanes -> (40, 4*128).
    w1_t = jnp.transpose(w1, (2, 3, 1, 0)).reshape(5, 5, 6).astype(jnp.float32)
    mats = []
    for di in range(2):
        for dj in range(2):
            m = jnp.pad(w1_t, ((di, 1 - di), (dj, 1 - dj), (0, C - 6)))
            mats.append(m.reshape(36, C))
    w1cat = jnp.pad(jnp.concatenate(mats, axis=1), ((0, 4), (0, 0)))  # (40, 512)
    b1p = jnp.pad(b1.astype(jnp.float32).reshape(1, 6), ((0, 0), (0, C - 6)))

    # conv2: K ordering (dy, dx, ci) with ci padded 6 -> 8.
    w2_t = jnp.transpose(w2, (2, 3, 1, 0)).astype(jnp.float32)        # (5,5,6,16)
    w2p = jnp.pad(w2_t, ((0, 0), (0, 0), (0, 2), (0, C - 16))).reshape(200, C)
    b2p = jnp.pad(b2.astype(jnp.float32).reshape(1, 16), ((0, 0), (0, C - 16)))

    # conv3: K ordering (e, f, ci) with ci = 16.
    w3_t = jnp.transpose(w3, (2, 3, 1, 0)).astype(jnp.float32)        # (5,5,16,120)
    w3p = jnp.pad(w3_t, ((0, 0), (0, 0), (0, 0), (0, C - 120))).reshape(400, C)
    b3p = jnp.pad(b3.astype(jnp.float32).reshape(1, 120), ((0, 0), (0, C - 120)))

    fw1p = jnp.pad(fw1.T.astype(jnp.float32), ((0, C - 120), (0, C - 84)))
    fb1p = jnp.pad(fb1.astype(jnp.float32).reshape(1, 84), ((0, 0), (0, C - 84)))
    fw2p = jnp.pad(fw2.T.astype(jnp.float32), ((0, C - 84), (0, C - n_out)))
    fb2p = jnp.pad(fb2.astype(jnp.float32).reshape(1, n_out),
                   ((0, 0), (0, C - n_out)))

    # ---- batch blocking (one grid step at N=2; parallel axis for big N) ------
    nb = N if N <= 8 else 8
    npad = _round_up(N, nb)
    if npad != N:
        p6 = jnp.pad(p6, ((0, (npad - N) * 196), (0, 0)))
    grid = (npad // nb,)

    out = pl.pallas_call(
        functools.partial(_lenet_kernel, nb=nb),
        out_shape=jax.ShapeDtypeStruct((npad, C), jnp.float32),
        grid=grid,
        in_specs=[
            pl.BlockSpec((nb * 196, 40), lambda i: (i, 0)),   # conv1 patches
            pl.BlockSpec((40, 4 * C), lambda i: (0, 0)),      # w1 (4 pool taps)
            pl.BlockSpec((1, C), lambda i: (0, 0)),           # b1
            pl.BlockSpec((200, C), lambda i: (0, 0)),          # w2
            pl.BlockSpec((1, C), lambda i: (0, 0)),            # b2
            pl.BlockSpec((400, C), lambda i: (0, 0)),          # w3
            pl.BlockSpec((1, C), lambda i: (0, 0)),            # b3
            pl.BlockSpec((C, C), lambda i: (0, 0)),             # fc1 weight
            pl.BlockSpec((1, C), lambda i: (0, 0)),             # fc1 bias
            pl.BlockSpec((C, C), lambda i: (0, 0)),              # fc2 weight
            pl.BlockSpec((1, C), lambda i: (0, 0)),              # fc2 bias
        ],
        out_specs=pl.BlockSpec((nb, C), lambda i: (i, 0)),
        compiler_params=pltpu.CompilerParams(
            dimension_semantics=("parallel",)),
    )(p6, w1cat, b1p, w2p, b2p, w3p, b3p, fw1p, fb1p, fw2p, fb2p)

    out = out[:N, :n_out]
    # torch .squeeze(): also drops the class dim when n_out == 1.
    return jnp.squeeze(out)


# -----------------------------------------------------------------------------
# Pure-JAX reference for verification.
# -----------------------------------------------------------------------------
def _reference(x_nchw, params):
    (w1, b1, w2, b2, w3, b3, fw1, fb1, fw2, fb2) = params
    hi = jax.lax.Precision.HIGHEST

    def conv(x, w, b):
        y = jax.lax.conv_general_dilated(
            x, w, (1, 1), "VALID",
            dimension_numbers=("NCHW", "OIHW", "NCHW"), precision=hi)
        return y + b.reshape(1, -1, 1, 1)

    def pool(x):
        n, c, hh, ww = x.shape
        return x.reshape(n, c, hh // 2, 2, ww // 2, 2).max(axis=(3, 5))

    h = pool(jax.nn.relu(conv(x_nchw, w1, b1)))
    h = pool(jax.nn.relu(conv(h, w2, b2)))
    h = jax.nn.relu(conv(h, w3, b3))
    h = h.reshape(h.shape[0], 120)
    h = jax.nn.relu(jnp.dot(h, fw1.T, precision=hi) + fb1)
    out = jnp.dot(h, fw2.T, precision=hi) + fb2
    return jnp.squeeze(out)


if __name__ == "__main__":
    key = jax.random.PRNGKey(0)
    ks = jax.random.split(key, 11)
    N, n_out = 2, 10
    # LeNet expects 1x32x32 inputs so conv3's output is 1x1 (view(-1, 120)).
    x = jax.random.normal(ks[0], (N, 1, 32, 32), jnp.float32)

    def winit(k, shape, fan_in):
        return jax.random.normal(k, shape, jnp.float32) / jnp.sqrt(float(fan_in))

    params = (
        winit(ks[1], (6, 1, 5, 5), 25),
        0.1 * jax.random.normal(ks[2], (6,), jnp.float32),
        winit(ks[3], (16, 6, 5, 5), 150),
        0.1 * jax.random.normal(ks[4], (16,), jnp.float32),
        winit(ks[5], (120, 16, 5, 5), 400),
        0.1 * jax.random.normal(ks[6], (120,), jnp.float32),
        winit(ks[7], (84, 120), 120),
        0.1 * jax.random.normal(ks[8], (84,), jnp.float32),
        winit(ks[9], (n_out, 84), 84),
        0.1 * jax.random.normal(ks[10], (n_out,), jnp.float32),
    )

    fwd = jax.jit(lenet_forward)
    out = fwd(x, params)
    out = jax.block_until_ready(out)

    ref = _reference(x, params)
    assert out.shape == (N, n_out), out.shape
    assert jnp.allclose(out, ref, atol=1e-3, rtol=1e-3), float(
        jnp.max(jnp.abs(out - ref)))
    print("KERNEL_OK")
</pallas_src>

<mosaic_0001>
module attributes {stable_mosaic.version = 11 : i64} {
  func.func @_lenet_kernel(%arg0: i32, %arg1: memref<392x40xf32, #tpu.memory_space<vmem>>, %arg2: memref<40x512xf32, #tpu.memory_space<vmem>>, %arg3: memref<1x128xf32, #tpu.memory_space<vmem>>, %arg4: memref<200x128xf32, #tpu.memory_space<vmem>>, %arg5: memref<1x128xf32, #tpu.memory_space<vmem>>, %arg6: memref<400x128xf32, #tpu.memory_space<vmem>>, %arg7: memref<1x128xf32, #tpu.memory_space<vmem>>, %arg8: memref<128x128xf32, #tpu.memory_space<vmem>>, %arg9: memref<1x128xf32, #tpu.memory_space<vmem>>, %arg10: memref<128x128xf32, #tpu.memory_space<vmem>>, %arg11: memref<1x128xf32, #tpu.memory_space<vmem>>, %arg12: memref<2x128xf32, #tpu.memory_space<vmem>>) attributes {dimension_semantics = [#tpu.dimension_semantics<parallel>], iteration_bounds = array<i64: 1>, scalar_prefetch = 0 : i64, scratch_operands = 0 : i64, tpu.core_type = #tpu.core_type<tc>, window_params = [{transform_indices = @transform_0, window_bounds = array<i64: 392, 40>}, {pipeline_mode = #tpu.pipeline_mode<synchronous>, transform_indices = @transform_1, window_bounds = array<i64: 40, 512>}, {pipeline_mode = #tpu.pipeline_mode<synchronous>, transform_indices = @transform_2, window_bounds = array<i64: 1, 128>}, {pipeline_mode = #tpu.pipeline_mode<synchronous>, transform_indices = @transform_3, window_bounds = array<i64: 200, 128>}, {pipeline_mode = #tpu.pipeline_mode<synchronous>, transform_indices = @transform_4, window_bounds = array<i64: 1, 128>}, {pipeline_mode = #tpu.pipeline_mode<synchronous>, transform_indices = @transform_5, window_bounds = array<i64: 400, 128>}, {pipeline_mode = #tpu.pipeline_mode<synchronous>, transform_indices = @transform_6, window_bounds = array<i64: 1, 128>}, {pipeline_mode = #tpu.pipeline_mode<synchronous>, transform_indices = @transform_7, window_bounds = array<i64: 128, 128>}, {pipeline_mode = #tpu.pipeline_mode<synchronous>, transform_indices = @transform_8, window_bounds = array<i64: 1, 128>}, {pipeline_mode = #tpu.pipeline_mode<synchronous>, transform_indices = @transform_9, window_bounds = array<i64: 128, 128>}, {pipeline_mode = #tpu.pipeline_mode<synchronous>, transform_indices = @transform_10, window_bounds = array<i64: 1, 128>}, {transform_indices = @transform_11, window_bounds = array<i64: 2, 128>}]} {
    %c0 = arith.constant 0 : index
    %c0_0 = arith.constant 0 : index
    %0 = vector.load %arg1[%c0, %c0_0] : memref<392x40xf32, #tpu.memory_space<vmem>>, vector<392x40xf32>
    %c0_1 = arith.constant 0 : index
    %c0_2 = arith.constant 0 : index
    %1 = vector.load %arg2[%c0_1, %c0_2] : memref<40x512xf32, #tpu.memory_space<vmem>>, vector<40x512xf32>
    %cst = arith.constant dense<0.000000e+00> : vector<392x512xf32>
    %2 = tpu.matmul %0, %1, %cst {dimension_numbers = #tpu.dot_dimension_numbers<[1], [0], [0], [1], [0, 0, 1, 1], [], []>} : vector<392x40xf32>, vector<40x512xf32>, vector<392x512xf32> -> vector<392x512xf32>
    %3 = vector.extract_strided_slice %2 {offsets = [0, 0], sizes = [392, 128], strides = [1, 1]} : vector<392x512xf32> to vector<392x128xf32>
    %4 = vector.extract_strided_slice %2 {offsets = [0, 128], sizes = [392, 128], strides = [1, 1]} : vector<392x512xf32> to vector<392x128xf32>
    %5 = arith.maximumf %3, %4 : vector<392x128xf32>
    %6 = vector.extract_strided_slice %2 {offsets = [0, 256], sizes = [392, 128], strides = [1, 1]} : vector<392x512xf32> to vector<392x128xf32>
    %7 = vector.extract_strided_slice %2 {offsets = [0, 384], sizes = [392, 128], strides = [1, 1]} : vector<392x512xf32> to vector<392x128xf32>
    %8 = arith.maximumf %6, %7 : vector<392x128xf32>
    %9 = arith.maximumf %5, %8 : vector<392x128xf32>
    %c0_3 = arith.constant 0 : index
    %c0_4 = arith.constant 0 : index
    %10 = vector.load %arg3[%c0_3, %c0_4] : memref<1x128xf32, #tpu.memory_space<vmem>>, vector<1x128xf32>
    %11 = vector.broadcast %10 : vector<1x128xf32> to vector<392x128xf32>
    %12 = arith.addf %9, %11 : vector<392x128xf32>
    %cst_5 = arith.constant 0.000000e+00 : f32
    %13 = vector.broadcast %cst_5 : f32 to vector<392x128xf32>
    %14 = arith.maximumf %12, %13 : vector<392x128xf32>
    %15 = vector.extract_strided_slice %14 {offsets = [0, 0], sizes = [392, 8], strides = [1, 1]} : vector<392x128xf32> to vector<392x8xf32>
    %16 = vector.extract_strided_slice %15 {offsets = [0, 0], sizes = [388, 8], strides = [1, 1]} : vector<392x8xf32> to vector<388x8xf32>
    %17 = vector.extract_strided_slice %15 {offsets = [1, 0], sizes = [388, 8], strides = [1, 1]} : vector<392x8xf32> to vector<388x8xf32>
    %18 = vector.extract_strided_slice %15 {offsets = [2, 0], sizes = [388, 8], strides = [1, 1]} : vector<392x8xf32> to vector<388x8xf32>
    %19 = vector.extract_strided_slice %15 {offsets = [3, 0], sizes = [388, 8], strides = [1, 1]} : vector<392x8xf32> to vector<388x8xf32>
    %20 = vector.extract_strided_slice %15 {offsets = [4, 0], sizes = [388, 8], strides = [1, 1]} : vector<392x8xf32> to vector<388x8xf32>
    %21 = tpu.concatenate %16, %17, %18, %19, %20 in 1 : vector<388x8xf32>, vector<388x8xf32>, vector<388x8xf32>, vector<388x8xf32>, vector<388x8xf32> -> vector<388x40xf32>
    %22 = vector.extract_strided_slice %21 {offsets = [0, 0], sizes = [332, 40], strides = [1, 1]} : vector<388x40xf32> to vector<332x40xf32>
    %23 = vector.extract_strided_slice %21 {offsets = [14, 0], sizes = [332, 40], strides = [1, 1]} : vector<388x40xf32> to vector<332x40xf32>
    %24 = vector.extract_strided_slice %21 {offsets = [28, 0], sizes = [332, 40], strides = [1, 1]} : vector<388x40xf32> to vector<332x40xf32>
    %25 = vector.extract_strided_slice %21 {offsets = [42, 0], sizes = [332, 40], strides = [1, 1]} : vector<388x40xf32> to vector<332x40xf32>
    %26 = vector.extract_strided_slice %21 {offsets = [56, 0], sizes = [332, 40], strides = [1, 1]} : vector<388x40xf32> to vector<332x40xf32>
    %27 = tpu.concatenate %22, %23, %24, %25, %26 in 1 : vector<332x40xf32>, vector<332x40xf32>, vector<332x40xf32>, vector<332x40xf32>, vector<332x40xf32> -> vector<332x200xf32>
    %c0_6 = arith.constant 0 : index
    %c0_7 = arith.constant 0 : index
    %28 = vector.load %arg4[%c0_6, %c0_7] : memref<200x128xf32, #tpu.memory_space<vmem>>, vector<200x128xf32>
    %cst_8 = arith.constant dense<0.000000e+00> : vector<332x128xf32>
    %29 = tpu.matmul %27, %28, %cst_8 {dimension_numbers = #tpu.dot_dimension_numbers<[1], [0], [0], [1], [0, 0, 1, 1], [], []>} : vector<332x200xf32>, vector<200x128xf32>, vector<332x128xf32> -> vector<332x128xf32>
    %c0_9 = arith.constant 0 : index
    %c0_10 = arith.constant 0 : index
    %30 = vector.load %arg5[%c0_9, %c0_10] : memref<1x128xf32, #tpu.memory_space<vmem>>, vector<1x128xf32>
    %31 = vector.broadcast %30 : vector<1x128xf32> to vector<332x128xf32>
    %32 = arith.addf %29, %31 : vector<332x128xf32>
    %cst_11 = arith.constant 0.000000e+00 : f32
    %33 = vector.broadcast %cst_11 : f32 to vector<332x128xf32>
    %34 = arith.maximumf %32, %33 : vector<332x128xf32>
    %35 = vector.extract_strided_slice %34 {offsets = [0, 0], sizes = [317, 128], strides = [1, 1]} : vector<332x128xf32> to vector<317x128xf32>
    %36 = vector.extract_strided_slice %34 {offsets = [1, 0], sizes = [317, 128], strides = [1, 1]} : vector<332x128xf32> to vector<317x128xf32>
    %37 = arith.maximumf %35, %36 : vector<317x128xf32>
    %38 = vector.extract_strided_slice %34 {offsets = [14, 0], sizes = [317, 128], strides = [1, 1]} : vector<332x128xf32> to vector<317x128xf32>
    %39 = vector.extract_strided_slice %34 {offsets = [15, 0], sizes = [317, 128], strides = [1, 1]} : vector<332x128xf32> to vector<317x128xf32>
    %40 = arith.maximumf %38, %39 : vector<317x128xf32>
    %41 = arith.maximumf %37, %40 : vector<317x128xf32>
    %42 = vector.extract_strided_slice %41 {offsets = [0, 0], sizes = [317, 16], strides = [1, 1]} : vector<317x128xf32> to vector<317x16xf32>
    %43 = vector.extract_strided_slice %42 {offsets = [0, 0], sizes = [309, 16], strides = [1, 1]} : vector<317x16xf32> to vector<309x16xf32>
    %44 = vector.extract_strided_slice %42 {offsets = [2, 0], sizes = [309, 16], strides = [1, 1]} : vector<317x16xf32> to vector<309x16xf32>
    %45 = vector.extract_strided_slice %42 {offsets = [4, 0], sizes = [309, 16], strides = [1, 1]} : vector<317x16xf32> to vector<309x16xf32>
    %46 = vector.extract_strided_slice %42 {offsets = [6, 0], sizes = [309, 16], strides = [1, 1]} : vector<317x16xf32> to vector<309x16xf32>
    %47 = vector.extract_strided_slice %42 {offsets = [8, 0], sizes = [309, 16], strides = [1, 1]} : vector<317x16xf32> to vector<309x16xf32>
    %48 = tpu.concatenate %43, %44, %45, %46, %47 in 1 : vector<309x16xf32>, vector<309x16xf32>, vector<309x16xf32>, vector<309x16xf32>, vector<309x16xf32> -> vector<309x80xf32>
    %49 = vector.extract_strided_slice %48 {offsets = [0, 0], sizes = [197, 80], strides = [1, 1]} : vector<309x80xf32> to vector<197x80xf32>
    %50 = vector.extract_strided_slice %48 {offsets = [28, 0], sizes = [197, 80], strides = [1, 1]} : vector<309x80xf32> to vector<197x80xf32>
    %51 = vector.extract_strided_slice %48 {offsets = [56, 0], sizes = [197, 80], strides = [1, 1]} : vector<309x80xf32> to vector<197x80xf32>
    %52 = vector.extract_strided_slice %48 {offsets = [84, 0], sizes = [197, 80], strides = [1, 1]} : vector<309x80xf32> to vector<197x80xf32>
    %53 = vector.extract_strided_slice %48 {offsets = [112, 0], sizes = [197, 80], strides = [1, 1]} : vector<309x80xf32> to vector<197x80xf32>
    %54 = tpu.concatenate %49, %50, %51, %52, %53 in 1 : vector<197x80xf32>, vector<197x80xf32>, vector<197x80xf32>, vector<197x80xf32>, vector<197x80xf32> -> vector<197x400xf32>
    %55 = vector.extract_strided_slice %54 {offsets = [0, 0], sizes = [1, 400], strides = [1, 1]} : vector<197x400xf32> to vector<1x400xf32>
    %56 = vector.extract_strided_slice %54 {offsets = [196, 0], sizes = [1, 400], strides = [1, 1]} : vector<197x400xf32> to vector<1x400xf32>
    %57 = tpu.concatenate %55, %56 in 0 : vector<1x400xf32>, vector<1x400xf32> -> vector<2x400xf32>
    %c0_12 = arith.constant 0 : index
    %c0_13 = arith.constant 0 : index
    %58 = vector.load %arg6[%c0_12, %c0_13] : memref<400x128xf32, #tpu.memory_space<vmem>>, vector<400x128xf32>
    %cst_14 = arith.constant dense<0.000000e+00> : vector<2x128xf32>
    %59 = tpu.matmul %57, %58, %cst_14 {dimension_numbers = #tpu.dot_dimension_numbers<[1], [0], [0], [1], [0, 0, 1, 1], [], []>} : vector<2x400xf32>, vector<400x128xf32>, vector<2x128xf32> -> vector<2x128xf32>
    %c0_15 = arith.constant 0 : index
    %c0_16 = arith.constant 0 : index
    %60 = vector.load %arg7[%c0_15, %c0_16] : memref<1x128xf32, #tpu.memory_space<vmem>>, vector<1x128xf32>
    %61 = vector.broadcast %60 : vector<1x128xf32> to vector<2x128xf32>
    %62 = arith.addf %59, %61 : vector<2x128xf32>
    %cst_17 = arith.constant 0.000000e+00 : f32
    %63 = vector.broadcast %cst_17 : f32 to vector<2x128xf32>
    %64 = arith.maximumf %62, %63 : vector<2x128xf32>
    %c0_18 = arith.constant 0 : index
    %c0_19 = arith.constant 0 : index
    %65 = vector.load %arg8[%c0_18, %c0_19] : memref<128x128xf32, #tpu.memory_space<vmem>>, vector<128x128xf32>
    %cst_20 = arith.constant dense<0.000000e+00> : vector<2x128xf32>
    %66 = tpu.matmul %64, %65, %cst_20 {dimension_numbers = #tpu.dot_dimension_numbers<[1], [0], [0], [1], [0, 0, 1, 1], [], []>} : vector<2x128xf32>, vector<128x128xf32>, vector<2x128xf32> -> vector<2x128xf32>
    %c0_21 = arith.constant 0 : index
    %c0_22 = arith.constant 0 : index
    %67 = vector.load %arg9[%c0_21, %c0_22] : memref<1x128xf32, #tpu.memory_space<vmem>>, vector<1x128xf32>
    %68 = vector.broadcast %67 : vector<1x128xf32> to vector<2x128xf32>
    %69 = arith.addf %66, %68 : vector<2x128xf32>
    %cst_23 = arith.constant 0.000000e+00 : f32
    %70 = vector.broadcast %cst_23 : f32 to vector<2x128xf32>
    %71 = arith.maximumf %69, %70 : vector<2x128xf32>
    %c0_24 = arith.constant 0 : index
    %c0_25 = arith.constant 0 : index
    %72 = vector.load %arg10[%c0_24, %c0_25] : memref<128x128xf32, #tpu.memory_space<vmem>>, vector<128x128xf32>
    %cst_26 = arith.constant dense<0.000000e+00> : vector<2x128xf32>
    %73 = tpu.matmul %71, %72, %cst_26 {dimension_numbers = #tpu.dot_dimension_numbers<[1], [0], [0], [1], [0, 0, 1, 1], [], []>} : vector<2x128xf32>, vector<128x128xf32>, vector<2x128xf32> -> vector<2x128xf32>
    %c0_27 = arith.constant 0 : index
    %c0_28 = arith.constant 0 : index
    %74 = vector.load %arg11[%c0_27, %c0_28] : memref<1x128xf32, #tpu.memory_space<vmem>>, vector<1x128xf32>
    %75 = vector.broadcast %74 : vector<1x128xf32> to vector<2x128xf32>
    %76 = arith.addf %73, %75 : vector<2x128xf32>
    %c0_29 = arith.constant 0 : index
    %c0_30 = arith.constant 0 : index
    %77 = vector.load %arg12[%c0_29, %c0_30] : memref<2x128xf32, #tpu.memory_space<vmem>>, vector<2x128xf32>
    tpu.vector_store %arg12[%c0_29, %c0_30], %76 {strides = array<i32>} : memref<2x128xf32, #tpu.memory_space<vmem>>, vector<2x128xf32>,
    return
  }
  func.func @transform_0(%arg0: i32) -> (i32, i32) {
    %c0_i32 = arith.constant 0 : i32
    %c0_i32_0 = arith.constant 0 : i32
    return %arg0, %c0_i32 : i32, i32
  }
  func.func @transform_1(%arg0: i32) -> (i32, i32) {
    %c0_i32 = arith.constant 0 : i32
    %c0_i32_0 = arith.constant 0 : i32
    %c0_i32_1 = arith.constant 0 : i32
    return %c0_i32, %c0_i32_0 : i32, i32
  }
  func.func @transform_2(%arg0: i32) -> (i32, i32) {
    %c0_i32 = arith.constant 0 : i32
    %c0_i32_0 = arith.constant 0 : i32
    %c0_i32_1 = arith.constant 0 : i32
    return %c0_i32, %c0_i32_0 : i32, i32
  }
  func.func @transform_3(%arg0: i32) -> (i32, i32) {
    %c0_i32 = arith.constant 0 : i32
    %c0_i32_0 = arith.constant 0 : i32
    %c0_i32_1 = arith.constant 0 : i32
    return %c0_i32, %c0_i32_0 : i32, i32
  }
  func.func @transform_4(%arg0: i32) -> (i32, i32) {
    %c0_i32 = arith.constant 0 : i32
    %c0_i32_0 = arith.constant 0 : i32
    %c0_i32_1 = arith.constant 0 : i32
    return %c0_i32, %c0_i32_0 : i32, i32
  }
  func.func @transform_5(%arg0: i32) -> (i32, i32) {
    %c0_i32 = arith.constant 0 : i32
    %c0_i32_0 = arith.constant 0 : i32
    %c0_i32_1 = arith.constant 0 : i32
    return %c0_i32, %c0_i32_0 : i32, i32
  }
  func.func @transform_6(%arg0: i32) -> (i32, i32) {
    %c0_i32 = arith.constant 0 : i32
    %c0_i32_0 = arith.constant 0 : i32
    %c0_i32_1 = arith.constant 0 : i32
    return %c0_i32, %c0_i32_0 : i32, i32
  }
  func.func @transform_7(%arg0: i32) -> (i32, i32) {
    %c0_i32 = arith.constant 0 : i32
    %c0_i32_0 = arith.constant 0 : i32
    %c0_i32_1 = arith.constant 0 : i32
    return %c0_i32, %c0_i32_0 : i32, i32
  }
  func.func @transform_8(%arg0: i32) -> (i32, i32) {
    %c0_i32 = arith.constant 0 : i32
    %c0_i32_0 = arith.constant 0 : i32
    %c0_i32_1 = arith.constant 0 : i32
    return %c0_i32, %c0_i32_0 : i32, i32
  }
  func.func @transform_9(%arg0: i32) -> (i32, i32) {
    %c0_i32 = arith.constant 0 : i32
    %c0_i32_0 = arith.constant 0 : i32
    %c0_i32_1 = arith.constant 0 : i32
    return %c0_i32, %c0_i32_0 : i32, i32
  }
  func.func @transform_10(%arg0: i32) -> (i32, i32) {
    %c0_i32 = arith.constant 0 : i32
    %c0_i32_0 = arith.constant 0 : i32
    %c0_i32_1 = arith.constant 0 : i32
    return %c0_i32, %c0_i32_0 : i32, i32
  }
  func.func @transform_11(%arg0: i32) -> (i32, i32) {
    %c0_i32 = arith.constant 0 : i32
    %c0_i32_0 = arith.constant 0 : i32
    return %arg0, %c0_i32 : i32, i32
  }
}

</mosaic_0001>

<bundles_post_ra>
// kernel: lenet_forward.1
= control target key start
LH: loop header
LB: loop body
LE: loop exit
PB: predicated region body
PF: predicated region fallthrough
CT: control target
= control target key end

     0   :  { %v10603_v7 = vmov 0.0   ;;  %vm108_vm0 = vcmask 326656   ;;  %s10591_s0 = inlined_call_operand.vmem [shape: f32[392,40], index: 0, kind: input, shape index: {}]   ;;  %s10592_s1 = inlined_call_operand.vmem [shape: f32[40,512], index: 1, kind: input, shape index: {}]   ;;  %s10593_s2 = inlined_call_operand.vmem [shape: f32[1,128], index: 2, kind: input, shape index: {}]   ;;  %s10594_s3 = inlined_call_operand.vmem [shape: f32[200,128], index: 3, kind: input, shape index: {}]   ;;  %s10595_s4 = inlined_call_operand.vmem [shape: f32[1,128], index: 4, kind: input, shape index: {}]   ;;  %s10596_s5 = inlined_call_operand.vmem [shape: f32[400,128], index: 5, kind: input, shape index: {}]   ;;  %s10597_s6 = inlined_call_operand.vmem [shape: f32[1,128], index: 6, kind: input, shape index: {}]   ;;  %s10598_s7 = inlined_call_operand.vmem [shape: f32[128,128], index: 7, kind: input, shape index: {}]   ;;  %s10599_s8 = inlined_call_operand.vmem [shape: f32[1,128], index: 8, kind: input, shape index: {}]   ;;  %s10600_s9 = inlined_call_operand.vmem [shape: f32[128,128], index: 9, kind: input, shape index: {}]   ;;  %s10601_s10 = inlined_call_operand.vmem [shape: f32[1,128], index: 10, kind: input, shape index: {}]   ;;  %s10602_s11 = inlined_call_operand.hbm [shape: f32[2,128], index: 11, kind: output, shape index: {}]  }
   0x1   :  { %v89_v0 = vld [vmem:[%s10592_s1 + $0x8] sm:$0xff]  ;;  %v88_v2 = vld [vmem:[%s10592_s1] sm:$0xff]  ;;  %566 = vmatprep.mubr.f32.mxu1 %v10603_v7  ;;  %320 = vmatprep.mubr.f32.mxu0 %v10603_v7  ;;  %v91_v14 = vld [vmem:[%s10592_s1 + $0x18] sm:$0xff] }
   0x2   :  { %v93_v1 = vld [vmem:[%s10592_s1 + $0x28] sm:$0xff]  ;;  %v92_v4 = vld [vmem:[%s10592_s1 + $0x20] sm:$0xff]  ;;  %v95_v15 = vld [vmem:[%s10592_s1 + $0x38] sm:$0xff] }
   0x3   :  { %v5341_v3 = vpack.c.bf16 %v93_v1, %v89_v0  ;;  %v97_v5 = vld [vmem:[%s10592_s1 + $0x48] sm:$0xff]  ;;  %v5343_v8 = vpack.c.bf16 %v92_v4, %v88_v2  ;;  %v96_v10 = vld [vmem:[%s10592_s1 + $0x40] sm:$0xff]  ;;  %v90_v16 = vld [vmem:[%s10592_s1 + $0x10] sm:$0xff]  ;;  %v5349_v21 = vpack.c.bf16 %v95_v15, %v91_v14 }
   0x4   :  { %v101_v6 = vld [vmem:[%s10592_s1 + $0x68] sm:$0xff]  ;;  %v100_v11 = vld [vmem:[%s10592_s1 + $0x60] sm:$0xff]  ;;  %v94_v17 = vld [vmem:[%s10592_s1 + $0x30] sm:$0xff] }
   0x5   :  { %v5345_v9 = vpack.c.bf16 %v101_v6, %v97_v5  ;;  %5500 = vmatprep.subr.bf16.mxu1 %v5341_v3  ;;  %5342 = vmatprep.subr.bf16.mxu0 %v5341_v3  ;;  %v5347_v12 = vpack.c.bf16 %v100_v11, %v96_v10  ;;  %v105_v13 = vld [vmem:[%s10592_s1 + $0x88] sm:$0xff]  ;;  %v99_v18 = vld [vmem:[%s10592_s1 + $0x58] sm:$0xff]  ;;  %v104_v20 = vld [vmem:[%s10592_s1 + $0x80] sm:$0xff]  ;;  %v5351_v23 = vpack.c.bf16 %v94_v17, %v90_v16 }
   0x6   :  { %5503 = vmatpush1.bf16.msra.mxu1 %v5343_v8  ;;  %5344 = vmatpush1.bf16.msra.mxu0 %v5343_v8  ;;  %v103_v19 = vld [vmem:[%s10592_s1 + $0x78] sm:$0xff]  ;;  %v6050_v22 = vld [vmem:[%s10591_s0 + $0x148] sm:$0xff]  ;;  %v98_v25 = vld [vmem:[%s10592_s1 + $0x50] sm:$0xff] }
   0x7   :  { %5501 = vmatprep.subr.bf16.mxu1 %v5345_v9  ;;  %5346 = vmatprep.subr.bf16.mxu0 %v5345_v9  ;;  %v5353_v24 = vpack.c.bf16 %v103_v19, %v99_v18  ;;  %v102_v26 = vld [vmem:[%s10592_s1 + $0x70] sm:$0xff]  ;;  %v39_v27 = vld [vmem:[%s10591_s0] sm:$0xff]  ;;  %v107_v30 = vld [vmem:[%s10592_s1 + $0x98] sm:$0xff] }
   0x8   :  { %v6067_v28 = vld [vmem:[%s10591_s0 + $0x150] sm:$0xff]  ;;  %v5355_v29 = vpack.c.bf16 %v102_v26, %v98_v25  ;;  %v40_v31 = vld [vmem:[%s10591_s0 + $0x8] sm:$0xff]  ;;  %v6083_v32 = vld [vmem:[%s10591_s0 + $0x158] sm:$0xff] }
   0xa   :  { %5504 = vmatpush1.bf16.msra.mxu1 %v5347_v12  ;;  %5348 = vmatpush1.bf16.msra.mxu0 %v5347_v12 }
   0xb   :  { %5502 = vmatprep.subr.mxu1 %v105_v13  ;;  %264 = vmatprep.subr.mxu0 %v105_v13 }
   0xe   :  { %5505 = vmatpush1.msra.mxu1 %v104_v20  ;;  %265 = vmatpush1.msra.mxu0 %v104_v20 }
   0xf   :  { %5097 = vmatmul.mubr.msk.f32.vlgmr.msra.gmra.mrb[0].mxu1 %vm108_vm0, %v6050_v22  ;;  %5350 = vmatprep.subr.bf16.mxu1 %v5349_v21 }
  0x10   :  { %5352 = vmatpush1.bf16.msra.mxu1 %v5351_v23  ;;  %572 = vmatprep.mubr.f32.mxu1 %v10603_v7 }
  0x11   :  { %5354 = vmatprep.subr.bf16.mxu1 %v5353_v24  ;;  %5056 = vmatmul.mubr.msk.f32.vlgmr.msra.gmra.mrb[0].mxu0 %vm108_vm0, %v39_v27 }
  0x12   :  { %326 = vmatprep.mubr.f32.mxu0 %v10603_v7 }
  0x13   :  { %5098 = vmatmul.mubr.msk.f32.gmra.mrb[2].mxu1 %vm108_vm0, %v6067_v28 }
  0x14   :  { %578 = vmatprep.mubr.f32.mxu1 %v10603_v7  ;;  %5356 = vmatpush1.bf16.msra.mxu1 %v5355_v29 }
  0x15   :  { %16 = vsyncpa [#allocation3], 0  ;;  %623 = vmatprep.subr.mxu1 %v107_v30  ;;  %v106_v33 = vld [vmem:[%s10592_s1 + $0x90] sm:$0xff]  ;;  %5057 = vmatmul.mubr.msk.f32.gmra.mrb[2].mxu0 %vm108_vm0, %v40_v31  ;;  %v6099_v35 = vld [vmem:[%s10591_s0 + $0x160] sm:$0xff]  ;;  %vm2010_vm1 = vcmask 1043456   ;;  %vm1275_vm2 = vcmask 1046528  }
  0x16   :  { %332 = vmatprep.mubr.f32.mxu0 %v10603_v7  ;;  %v41_v34 = vld [vmem:[%s10591_s0 + $0x10] sm:$0xff]  ;;  %v42_v36 = vld [vmem:[%s10591_s0 + $0x18] sm:$0xff]  ;;  %v6112_v37 = vld [vmem:[%s10591_s0 + $0x168] sm:$0xff]  ;;  %s5924_s18 = smov 32   ;;  %s5925_s19 = smov 8   ;;  %vm1520_vm3 = vcmask 1045504  }
  0x17   :  { %5099 = vmatmul.mubr.msk.f32.gmra.mrb[4].mxu1 %vm108_vm0, %v6083_v32  ;;  %v43_v38 = vld [vmem:[%s10591_s0 + $0x20] sm:$0xff]  ;;  %v6125_v39 = vld [vmem:[%s10591_s0 + $0x170] sm:$0xff]  ;;  %v44_v40 = vld [vmem:[%s10591_s0 + $0x28] sm:$0xff]  ;;  %vm1765_vm4 = vcmask 1044480   ;;  %s5926_s20 = smov 16   ;;  %s5927_s21 = smov 24  }
  0x18   :  { %584 = vmatprep.mubr.f32.mxu1 %v10603_v7  ;;  %624 = vmatpush1.msra.mxu1 %v106_v33  ;;  %v6138_v41 = vld [vmem:[%s10591_s0 + $0x178] sm:$0xff]  ;;  %v45_v42 = vld [vmem:[%s10591_s0 + $0x30] sm:$0xff]  ;;  %v6151_v43 = vld [vmem:[%s10591_s0 + $0x180] sm:$0xff]  ;;  %vm2255_vm5 = vcmask 64512   ;;  %vm2305_vm6 = vcmask 130048   ;;  %vm2355_vm7 = vcmask 195584  }
  0x19   :  { %5058 = vmatmul.mubr.msk.f32.gmra.mrb[4].mxu0 %vm108_vm0, %v41_v34  ;;  %v46_v44 = vld [vmem:[%s10591_s0 + $0x38] sm:$0xff]  ;;  %v47_v45 = vld [vmem:[%s10591_s0 + $0x40] sm:$0xff]  ;;  %v48_v46 = vld [vmem:[%s10591_s0 + $0x48] sm:$0xff]  ;;  %vm2405_vm8 = vcmask 261120   ;;  %vm2498_vm9 = vcmask 1041408   ;;  %s5928_s24 = smov 40  }
  0x1a   :  { %338 = vmatprep.mubr.f32.mxu0 %v10603_v7  ;;  %v49_v47 = vld [vmem:[%s10591_s0 + $0x50] sm:$0xff]  ;;  %v50_v48 = vld [vmem:[%s10591_s0 + $0x58] sm:$0xff]  ;;  %v51_v49 = vld [vmem:[%s10591_s0 + $0x60] sm:$0xff]  ;;  %s5929_s25 = smov 80   ;;  %vm3301_vm10 = vcmask 654336   ;;  %vm3344_vm11 = vcmask 982016  }
  0x1b   :  { %5100 = vmatmul.mubr.msk.f32.gmra.mrb[6].mxu1 %vm108_vm0, %v6099_v35  ;;  %v52_v50 = vld [vmem:[%s10591_s0 + $0x68] sm:$0xff]  ;;  %v53_v51 = vld [vmem:[%s10591_s0 + $0x70] sm:$0xff]  ;;  %v54_v52 = vld [vmem:[%s10591_s0 + $0x78] sm:$0xff]  ;;  %vm3461_vm12 = vcmask 588800   ;;  %vm4550_vm13 = vcmask 392192   ;;  %vm4565_vm14 = vcmask 523264  }
  0x1c   :  { %590 = vmatprep.mubr.f32.mxu1 %v10603_v7  ;;  %v55_v53 = vld [vmem:[%s10591_s0 + $0x80] sm:$0xff]  ;;  %v56_v54 = vld [vmem:[%s10591_s0 + $0x88] sm:$0xff]  ;;  %v57_v55 = vld [vmem:[%s10591_s0 + $0x90] sm:$0xff]  ;;  %s5934_s23 = smov 112   ;;  %vm4632_vm15 = vcmask 916480   ;;  %s5936_s27 = smov [#allocation2]  }
  0x1d   :  { %5059 = vmatmul.mubr.msk.f32.gmra.mrb[6].mxu0 %vm108_vm0, %v42_v36  ;;  %v58_v56 = vld [vmem:[%s10591_s0 + $0x98] sm:$0xff]  ;;  %v59_v57 = vld [vmem:[%s10591_s0 + $0xa0] sm:$0xff]  ;;  %v60_v58 = vld [vmem:[%s10591_s0 + $0xa8] sm:$0xff]  ;;  %s5048_s28 = sshll.u32 %s5936_s27, 4  ;;  %s5049_s28 = int_to_ptr.vmem [resolvable:$true] %s5048_s28 }
  0x1e   :  { %344 = vmatprep.mubr.f32.mxu0 %v10603_v7  ;;  %v61_v59 = vld [vmem:[%s10591_s0 + $0xb0] sm:$0xff]  ;;  %v62_v60 = vld [vmem:[%s10591_s0 + $0xb8] sm:$0xff]  ;;  %v63_v61 = vld [vmem:[%s10591_s0 + $0xc0] sm:$0xff]  ;;  %p5904_p1 = scmp.lt.s32.totalorder %s5049_s28, %s5049_s28 }
  0x1f   :  { %5101 = vmatmul.mubr.msk.f32.gmra.mrb[8].mxu1 %vm108_vm0, %v6112_v37  ;;  %v64_v62 = vld [vmem:[%s10591_s0 + $0xc8] sm:$0xff]  ;;  %v65_v63 = vld [vmem:[%s10591_s0 + $0xd0] sm:$0xff]  ;;  %v66_v0 = vld [vmem:[%s10591_s0 + $0xd8] sm:$0xff] }
  0x20   :  { %596 = vmatprep.mubr.f32.mxu1 %v10603_v7  ;;  %v67_v1 = vld [vmem:[%s10591_s0 + $0xe0] sm:$0xff]  ;;  %v68_v2 = vld [vmem:[%s10591_s0 + $0xe8] sm:$0xff]  ;;  %v69_v3 = vld [vmem:[%s10591_s0 + $0xf0] sm:$0xff] }
  0x21   :  { %5060 = vmatmul.mubr.msk.f32.gmra.mrb[8].mxu0 %vm108_vm0, %v43_v38  ;;  %v70_v4 = vld [vmem:[%s10591_s0 + $0xf8] sm:$0xff]  ;;  %v71_v5 = vld [vmem:[%s10591_s0 + $0x100] sm:$0xff]  ;;  %v72_v6 = vld [vmem:[%s10591_s0 + $0x108] sm:$0xff] }
  0x22   :  { %350 = vmatprep.mubr.f32.mxu0 %v10603_v7  ;;  %v73_v8 = vld [vmem:[%s10591_s0 + $0x110] sm:$0xff]  ;;  %v74_v9 = vld [vmem:[%s10591_s0 + $0x118] sm:$0xff]  ;;  %v75_v10 = vld [vmem:[%s10591_s0 + $0x120] sm:$0xff] }
  0x23   :  { %5102 = vmatmul.mubr.msk.f32.gmra.mrb[10].mxu1 %vm108_vm0, %v6125_v39  ;;  %v76_v11 = vld [vmem:[%s10591_s0 + $0x128] sm:$0xff]  ;;  %v77_v12 = vld [vmem:[%s10591_s0 + $0x130] sm:$0xff]  ;;  %v78_v13 = vld [vmem:[%s10591_s0 + $0x138] sm:$0xff] }
  0x24   :  { %602 = vmatprep.mubr.f32.mxu1 %v10603_v7  ;;  %v79_v14 = vld [vmem:[%s10591_s0 + $0x140] sm:$0xff] }
  0x25   :  { %5061 = vmatmul.mubr.msk.f32.gmra.mrb[10].mxu0 %vm108_vm0, %v44_v40 }
  0x26   :  { %356 = vmatprep.mubr.f32.mxu0 %v10603_v7 }
  0x27   :  { %5103 = vmatmul.mubr.msk.f32.gmra.mrb[12].mxu1 %vm108_vm0, %v6138_v41 }
  0x28   :  { %608 = vmatprep.mubr.f32.mxu1 %v10603_v7 }
  0x29   :  { %5062 = vmatmul.mubr.msk.f32.gmra.mrb[12].mxu0 %vm108_vm0, %v45_v42 }
  0x2a   :  { %362 = vmatprep.mubr.f32.mxu0 %v10603_v7 }
  0x2b   :  { %5104 = vmatmul.mubr.msk.f32.gmra.mrb[14].mxu1 %vm108_vm0, %v6151_v43 }
  0x2c   :  { %679 = vmatprep.mubr.f32.mxu1 %v10603_v7 }
  0x2d   :  { %5063 = vmatmul.mubr.msk.f32.gmra.mrb[14].mxu0 %vm108_vm0, %v46_v44 }
  0x2e   :  { %368 = vmatprep.mubr.f32.mxu0 %v10603_v7 }
  0x2f   :  { %5105 = vmatmul.mubr.msk.f32.vlgmr.msra.gmra.mrb[16].mxu1 %vm108_vm0, %v39_v27 }
  0x30   :  { %685 = vmatprep.mubr.f32.mxu1 %v10603_v7 }
  0x31   :  { %5064 = vmatmul.mubr.msk.f32.gmra.mrb[16].mxu0 %vm108_vm0, %v47_v45 }
  0x32   :  { %374 = vmatprep.mubr.f32.mxu0 %v10603_v7 }
  0x33   :  { %5106 = vmatmul.mubr.msk.f32.gmra.mrb[18].mxu1 %vm108_vm0, %v40_v31 }
  0x34   :  { %691 = vmatprep.mubr.f32.mxu1 %v10603_v7 }
  0x35   :  { %5065 = vmatmul.mubr.msk.f32.gmra.mrb[18].mxu0 %vm108_vm0, %v48_v46 }
  0x36   :  { %380 = vmatprep.mubr.f32.mxu0 %v10603_v7 }
  0x37   :  { %5107 = vmatmul.mubr.msk.f32.gmra.mrb[20].mxu1 %vm108_vm0, %v41_v34 }
  0x38   :  { %697 = vmatprep.mubr.f32.mxu1 %v10603_v7 }
  0x39   :  { %5066 = vmatmul.mubr.msk.f32.gmra.mrb[20].mxu0 %vm108_vm0, %v49_v47 }
  0x3a   :  { %386 = vmatprep.mubr.f32.mxu0 %v10603_v7 }
  0x3b   :  { %5108 = vmatmul.mubr.msk.f32.gmra.mrb[22].mxu1 %vm108_vm0, %v42_v36 }
  0x3c   :  { %703 = vmatprep.mubr.f32.mxu1 %v10603_v7 }
  0x3d   :  { %5067 = vmatmul.mubr.msk.f32.gmra.mrb[22].mxu0 %vm108_vm0, %v50_v48 }
  0x3e   :  { %392 = vmatprep.mubr.f32.mxu0 %v10603_v7 }
  0x3f   :  { %5109 = vmatmul.mubr.msk.f32.gmra.mrb[24].mxu1 %vm108_vm0, %v43_v38 }
  0x40   :  { %709 = vmatprep.mubr.f32.mxu1 %v10603_v7 }
  0x41   :  { %5068 = vmatmul.mubr.msk.f32.gmra.mrb[24].mxu0 %vm108_vm0, %v51_v49 }
  0x42   :  { %398 = vmatprep.mubr.f32.mxu0 %v10603_v7 }
  0x43   :  { %5110 = vmatmul.mubr.msk.f32.gmra.mrb[26].mxu1 %vm108_vm0, %v44_v40 }
  0x44   :  { %715 = vmatprep.mubr.f32.mxu1 %v10603_v7 }
  0x45   :  { %5069 = vmatmul.mubr.msk.f32.gmra.mrb[26].mxu0 %vm108_vm0, %v52_v50 }
  0x46   :  { %404 = vmatprep.mubr.f32.mxu0 %v10603_v7 }
  0x47   :  { %5111 = vmatmul.mubr.msk.f32.gmra.mrb[28].mxu1 %vm108_vm0, %v45_v42 }
  0x48   :  { %721 = vmatprep.mubr.f32.mxu1 %v10603_v7 }
  0x49   :  { %5070 = vmatmul.mubr.msk.f32.gmra.mrb[28].mxu0 %vm108_vm0, %v53_v51 }
  0x4a   :  { %410 = vmatprep.mubr.f32.mxu0 %v10603_v7 }
  0x4b   :  { %5112 = vmatmul.mubr.msk.f32.gmra.mrb[30].mxu1 %vm108_vm0, %v46_v44 }
  0x4c   :  { %727 = vmatprep.mubr.f32.mxu1 %v10603_v7 }
  0x4d   :  { %5071 = vmatmul.mubr.msk.f32.gmra.mrb[30].mxu0 %vm108_vm0, %v54_v52 }
  0x4e   :  { %416 = vmatprep.mubr.f32.mxu0 %v10603_v7 }
  0x4f   :  { %5113 = vmatmul.mubr.msk.f32.gmra.mrb[32].mxu1 %vm108_vm0, %v47_v45 }
  0x50   :  { %733 = vmatprep.mubr.f32.mxu1 %v10603_v7 }
  0x51   :  { %5072 = vmatmul.mubr.msk.f32.gmra.mrb[32].mxu0 %vm108_vm0, %v55_v53 }
  0x52   :  { %422 = vmatprep.mubr.f32.mxu0 %v10603_v7 }
  0x53   :  { %5114 = vmatmul.mubr.msk.f32.gmra.mrb[34].mxu1 %vm108_vm0, %v48_v46 }
  0x54   :  { %739 = vmatprep.mubr.f32.mxu1 %v10603_v7 }
  0x55   :  { %5073 = vmatmul.mubr.msk.f32.gmra.mrb[34].mxu0 %vm108_vm0, %v56_v54 }
  0x56   :  { %428 = vmatprep.mubr.f32.mxu0 %v10603_v7 }
  0x57   :  { %5115 = vmatmul.mubr.msk.f32.gmra.mrb[36].mxu1 %vm108_vm0, %v49_v47 }
  0x58   :  { %745 = vmatprep.mubr.f32.mxu1 %v10603_v7 }
  0x59   :  { %5074 = vmatmul.mubr.msk.f32.gmra.mrb[36].mxu0 %vm108_vm0, %v57_v55 }
  0x5a   :  { %434 = vmatprep.mubr.f32.mxu0 %v10603_v7 }
  0x5b   :  { %5116 = vmatmul.mubr.msk.f32.gmra.mrb[38].mxu1 %vm108_vm0, %v50_v48 }
  0x5c   :  { %751 = vmatprep.mubr.f32.mxu1 %v10603_v7 }
  0x5d   :  { %5075 = vmatmul.mubr.msk.f32.gmra.mrb[38].mxu0 %vm108_vm0, %v58_v56 }
  0x5e   :  { %440 = vmatprep.mubr.f32.mxu0 %v10603_v7 }
  0x5f   :  { %5117 = vmatmul.mubr.msk.f32.gmra.mrb[40].mxu1 %vm108_vm0, %v51_v49 }
  0x60   :  { %757 = vmatprep.mubr.f32.mxu1 %v10603_v7 }
  0x61   :  { %5076 = vmatmul.mubr.msk.f32.gmra.mrb[40].mxu0 %vm108_vm0, %v59_v57 }
  0x62   :  { %446 = vmatprep.mubr.f32.mxu0 %v10603_v7 }
  0x63   :  { %5118 = vmatmul.mubr.msk.f32.gmra.mrb[42].mxu1 %vm108_vm0, %v52_v50 }
  0x64   :  { %763 = vmatprep.mubr.f32.mxu1 %v10603_v7 }
  0x65   :  { %5077 = vmatmul.mubr.msk.f32.gmra.mrb[42].mxu0 %vm108_vm0, %v60_v58 }
  0x66   :  { %452 = vmatprep.mubr.f32.mxu0 %v10603_v7 }
  0x67   :  { %5119 = vmatmul.mubr.msk.f32.gmra.mrb[44].mxu1 %vm108_vm0, %v53_v51 }
  0x68   :  { %769 = vmatprep.mubr.f32.mxu1 %v10603_v7 }
  0x69   :  { %5078 = vmatmul.mubr.msk.f32.gmra.mrb[44].mxu0 %vm108_vm0, %v61_v59 }
  0x6a   :  { %458 = vmatprep.mubr.f32.mxu0 %v10603_v7 }
  0x6b   :  { %5120 = vmatmul.mubr.msk.f32.gmra.mrb[46].mxu1 %vm108_vm0, %v54_v52 }
  0x6c   :  { %775 = vmatprep.mubr.f32.mxu1 %v10603_v7 }
  0x6d   :  { %5079 = vmatmul.mubr.msk.f32.gmra.mrb[46].mxu0 %vm108_vm0, %v62_v60 }
  0x6e   :  { %464 = vmatprep.mubr.f32.mxu0 %v10603_v7 }
  0x6f   :  { %5121 = vmatmul.mubr.msk.f32.gmra.mrb[48].mxu1 %vm108_vm0, %v55_v53 }
  0x70   :  { %781 = vmatprep.mubr.f32.mxu1 %v10603_v7 }
  0x71   :  { %5080 = vmatmul.mubr.msk.f32.gmra.mrb[48].mxu0 %vm108_vm0, %v63_v61 }
  0x72   :  { %470 = vmatprep.mubr.f32.mxu0 %v10603_v7 }
  0x73   :  { %5122 = vmatmul.mubr.msk.f32.gmra.mrb[50].mxu1 %vm108_vm0, %v56_v54 }
  0x74   :  { %787 = vmatprep.mubr.f32.mxu1 %v10603_v7 }
  0x75   :  { %5081 = vmatmul.mubr.msk.f32.gmra.mrb[50].mxu0 %vm108_vm0, %v64_v62 }
  0x76   :  { %476 = vmatprep.mubr.f32.mxu0 %v10603_v7 }
  0x77   :  { %5123 = vmatmul.mubr.msk.f32.gmra.mrb[52].mxu1 %vm108_vm0, %v57_v55 }
  0x78   :  { %793 = vmatprep.mubr.f32.mxu1 %v10603_v7 }
  0x79   :  { %5082 = vmatmul.mubr.msk.f32.gmra.mrb[52].mxu0 %vm108_vm0, %v65_v63 }
  0x7a   :  { %482 = vmatprep.mubr.f32.mxu0 %v10603_v7 }
  0x7b   :  { %5124 = vmatmul.mubr.msk.f32.gmra.mrb[54].mxu1 %vm108_vm0, %v58_v56 }
  0x7c   :  { %799 = vmatprep.mubr.f32.mxu1 %v10603_v7 }
  0x7d   :  { %5083 = vmatmul.mubr.msk.f32.gmra.mrb[54].mxu0 %vm108_vm0, %v66_v0 }
  0x7e   :  { %488 = vmatprep.mubr.f32.mxu0 %v10603_v7 }
  0x7f   :  { %5125 = vmatmul.mubr.msk.f32.gmra.mrb[56].mxu1 %vm108_vm0, %v59_v57 }
  0x80   :  { %805 = vmatprep.mubr.f32.mxu1 %v10603_v7 }
  0x81   :  { %5084 = vmatmul.mubr.msk.f32.gmra.mrb[56].mxu0 %vm108_vm0, %v67_v1 }
  0x82   :  { %494 = vmatprep.mubr.f32.mxu0 %v10603_v7 }
  0x83   :  { %5126 = vmatmul.mubr.msk.f32.gmra.mrb[58].mxu1 %vm108_vm0, %v60_v58 }
  0x84   :  { %811 = vmatprep.mubr.f32.mxu1 %v10603_v7 }
  0x85   :  { %5085 = vmatmul.mubr.msk.f32.gmra.mrb[58].mxu0 %vm108_vm0, %v68_v2 }
  0x86   :  { %500 = vmatprep.mubr.f32.mxu0 %v10603_v7 }
  0x87   :  { %5127 = vmatmul.mubr.msk.f32.gmra.mrb[60].mxu1 %vm108_vm0, %v61_v59 }
  0x88   :  { %817 = vmatprep.mubr.f32.mxu1 %v10603_v7 }
  0x89   :  { %5086 = vmatmul.mubr.msk.f32.gmra.mrb[60].mxu0 %vm108_vm0, %v69_v3 }
  0x8a   :  { %506 = vmatprep.mubr.f32.mxu0 %v10603_v7 }
  0x8b   :  { %5128 = vmatmul.mubr.msk.f32.gmra.mrb[62].mxu1 %vm108_vm0, %v62_v60 }
  0x8c   :  { %823 = vmatprep.mubr.f32.mxu1 %v10603_v7 }
  0x8d   :  { %5087 = vmatmul.mubr.msk.f32.gmra.mrb[62].mxu0 %vm108_vm0, %v70_v4 }
  0x8e   :  { %512 = vmatprep.mubr.f32.mxu0 %v10603_v7 }
  0x8f   :  { %5129 = vmatmul.mubr.msk.f32.gmra.mrb[64].mxu1 %vm108_vm0, %v63_v61 }
  0x90   :  { %829 = vmatprep.mubr.f32.mxu1 %v10603_v7 }
  0x91   :  { %5088 = vmatmul.mubr.msk.f32.gmra.mrb[64].mxu0 %vm108_vm0, %v71_v5 }
  0x92   :  { %518 = vmatprep.mubr.f32.mxu0 %v10603_v7 }
  0x93   :  { %5130 = vmatmul.mubr.msk.f32.gmra.mrb[66].mxu1 %vm108_vm0, %v64_v62 }
  0x94   :  { %835 = vmatprep.mubr.f32.mxu1 %v10603_v7 }
  0x95   :  { %5089 = vmatmul.mubr.msk.f32.gmra.mrb[66].mxu0 %vm108_vm0, %v72_v6 }
  0x96   :  { %524 = vmatprep.mubr.f32.mxu0 %v10603_v7 }
  0x97   :  { %5131 = vmatmul.mubr.msk.f32.gmra.mrb[68].mxu1 %vm108_vm0, %v65_v63 }
  0x98   :  { %841 = vmatprep.mubr.f32.mxu1 %v10603_v7 }
  0x99   :  { %5090 = vmatmul.mubr.msk.f32.gmra.mrb[68].mxu0 %vm108_vm0, %v73_v8 }
  0x9a   :  { %530 = vmatprep.mubr.f32.mxu0 %v10603_v7 }
  0x9b   :  { %5132 = vmatmul.mubr.msk.f32.gmra.mrb[70].mxu1 %vm108_vm0, %v66_v0 }
  0x9c   :  { %847 = vmatprep.mubr.f32.mxu1 %v10603_v7 }
  0x9d   :  { %5091 = vmatmul.mubr.msk.f32.gmra.mrb[70].mxu0 %vm108_vm0, %v74_v9 }
  0x9e   :  { %536 = vmatprep.mubr.f32.mxu0 %v10603_v7 }
  0x9f   :  { %5133 = vmatmul.mubr.msk.f32.gmra.mrb[72].mxu1 %vm108_vm0, %v67_v1 }
  0xa0   :  { %853 = vmatprep.mubr.f32.mxu1 %v10603_v7 }
  0xa1   :  { %5092 = vmatmul.mubr.msk.f32.gmra.mrb[72].mxu0 %vm108_vm0, %v75_v10 }
  0xa2   :  { %542 = vmatprep.mubr.f32.mxu0 %v10603_v7 }
  0xa3   :  { %5134 = vmatmul.mubr.msk.f32.gmra.mrb[74].mxu1 %vm108_vm0, %v68_v2 }
  0xa4   :  { %859 = vmatprep.mubr.f32.mxu1 %v10603_v7 }
  0xa5   :  { %5093 = vmatmul.mubr.msk.f32.gmra.mrb[74].mxu0 %vm108_vm0, %v76_v11 }
  0xa6   :  { %548 = vmatprep.mubr.f32.mxu0 %v10603_v7 }
  0xa7   :  { %5135 = vmatmul.mubr.msk.f32.gmra.mrb[76].mxu1 %vm108_vm0, %v69_v3  ;;  %v6515_v3 = vld [vmem:[%s10593_s2] ss:$0 sm:$0xff] }
  0xa8   :  { %865 = vmatprep.mubr.f32.mxu1 %v10603_v7 }
  0xa9   :  { %5094 = vmatmul.mubr.msk.f32.gmra.mrb[76].mxu0 %vm108_vm0, %v77_v12 }
  0xaa   :  { %554 = vmatprep.mubr.f32.mxu0 %v10603_v7 }
  0xab   :  { %5136 = vmatmul.mubr.msk.f32.gmra.mrb[78].mxu1 %vm108_vm0, %v70_v4 }
  0xac   :  { %871 = vmatprep.mubr.f32.mxu1 %v10603_v7 }
  0xad   :  { %5095 = vmatmul.mubr.msk.f32.gmra.mrb[78].mxu0 %vm108_vm0, %v78_v13 }
  0xae   :  { %560 = vmatprep.mubr.f32.mxu0 %v10603_v7 }
  0xaf   :  { %5137 = vmatmul.mubr.msk.f32.gmra.mrb[80].mxu1 %vm108_vm0, %v71_v5 }
  0xb0   :  { %877 = vmatprep.mubr.f32.mxu1 %v10603_v7 }
  0xb1   :  { %5096 = vmatmul.mubr.msk.f32.gmra.mrb[80].mxu0 %vm108_vm0, %v79_v14 }
  0xb3   :  { %5138 = vmatmul.mubr.msk.f32.gmra.mrb[82].mxu1 %vm108_vm0, %v72_v6 }
  0xb4   :  { %883 = vmatprep.mubr.f32.mxu1 %v10603_v7 }
  0xb7   :  { %5139 = vmatmul.mubr.msk.f32.gmra.mrb[84].mxu1 %vm108_vm0, %v73_v8 }
  0xb8   :  { %889 = vmatprep.mubr.f32.mxu1 %v10603_v7 }
  0xbb   :  { %5140 = vmatmul.mubr.msk.f32.gmra.mrb[86].mxu1 %vm108_vm0, %v74_v9 }
  0xbc   :  { %895 = vmatprep.mubr.f32.mxu1 %v10603_v7 }
  0xbf   :  { %5141 = vmatmul.mubr.msk.f32.gmra.mrb[88].mxu1 %vm108_vm0, %v75_v10 }
  0xc0   :  { %901 = vmatprep.mubr.f32.mxu1 %v10603_v7 }
  0xc3   :  { %5142 = vmatmul.mubr.msk.f32.gmra.mrb[90].mxu1 %vm108_vm0, %v76_v11 }
  0xc4   :  { %907 = vmatprep.mubr.f32.mxu1 %v10603_v7 }
  0xc7   :  { %5143 = vmatmul.mubr.msk.f32.gmra.mrb[92].mxu1 %vm108_vm0, %v77_v12 }
  0xc8   :  { %913 = vmatprep.mubr.f32.mxu1 %v10603_v7 }
  0xcb   :  { %5144 = vmatmul.mubr.msk.f32.gmra.mrb[94].mxu1 %vm108_vm0, %v78_v13 }
  0xcc   :  { %919 = vmatprep.mubr.f32.mxu1 %v10603_v7 }
  0xcf   :  { %5145 = vmatmul.mubr.msk.f32.gmra.mrb[96].mxu1 %vm108_vm0, %v79_v14 }
  0xd0   :  { %925 = vmatprep.mubr.f32.mxu1 %v10603_v7 }
  0xd3   :  { %5146 = vmatmul.mubr.msk.f32.gmra.mrb[98].mxu1 %vm108_vm0, %v6050_v22 }
  0xd4   :  { %931 = vmatprep.mubr.f32.mxu1 %v10603_v7 }
  0xd7   :  { %5147 = vmatmul.mubr.msk.f32.gmra.mrb[100].mxu1 %vm108_vm0, %v6067_v28 }
  0xd8   :  { %937 = vmatprep.mubr.f32.mxu1 %v10603_v7 }
  0xdb   :  { %5148 = vmatmul.mubr.msk.f32.gmra.mrb[102].mxu1 %vm108_vm0, %v6083_v32 }
  0xdc   :  { %943 = vmatprep.mubr.f32.mxu1 %v10603_v7 }
  0xdf   :  { %5149 = vmatmul.mubr.msk.f32.gmra.mrb[104].mxu1 %vm108_vm0, %v6099_v35 }
  0xe0   :  { %949 = vmatprep.mubr.f32.mxu1 %v10603_v7 }
  0xe2   :  { %v6421_v15 = vpop.f32.mrb[0].mxu1 }
  0xe3   :  { %v6423_v16 = vpop.f32.mrb[1].mxu1  ;;  %5150 = vmatmul.mubr.msk.f32.gmra.mrb[106].mxu1 %vm108_vm0, %v6112_v37 }
  0xe4   :  { %955 = vmatprep.mubr.f32.mxu1 %v10603_v7  ;;  %v322_v18 = vpop.f32.mrb[0].mxu0 }
  0xe5   :  { %v324_v19 = vpop.f32.mrb[1].mxu0 }
  0xe6   :  { %v6430_v20 = vpop.f32.mrb[2].mxu1  ;;  %v974_v21 = vmax.f32 %v322_v18, %v324_v19 }
  0xe7   :  { %v6432_v22 = vpop.f32.mrb[3].mxu1  ;;  %5151 = vmatmul.mubr.msk.f32.gmra.mrb[108].mxu1 %vm108_vm0, %v6125_v39 }
  0xe8   :  { %961 = vmatprep.mubr.f32.mxu1 %v10603_v7  ;;  %v328_v24 = vpop.f32.mrb[2].mxu0 }
  0xe9   :  { %v330_v25 = vpop.f32.mrb[3].mxu0 }
  0xea   :  { %v6439_v26 = vpop.f32.mrb[4].mxu1  ;;  %v975_v27 = vmax.f32 %v328_v24, %v330_v25 }
  0xeb   :  { %v6441_v28 = vpop.f32.mrb[5].mxu1  ;;  %5152 = vmatmul.mubr.msk.f32.gmra.mrb[110].mxu1 %vm108_vm0, %v6138_v41 }
  0xec   :  { %967 = vmatprep.mubr.f32.mxu1 %v10603_v7  ;;  %v334_v30 = vpop.f32.mrb[4].mxu0 }
  0xed   :  { %v336_v31 = vpop.f32.mrb[5].mxu0 }
  0xee   :  { %v6448_v32 = vpop.f32.mrb[6].mxu1  ;;  %v976_v33 = vmax.f32 %v334_v30, %v336_v31 }
  0xef   :  { %v6450_v34 = vpop.f32.mrb[7].mxu1  ;;  %5153 = vmatmul.mubr.msk.f32.gmra.mrb[112].mxu1 %vm108_vm0, %v6151_v43 }
  0xf0   :  { %v6456_v36 = vpop.f32.mrb[6].mxu0 }
  0xf1   :  { %v6458_v37 = vpop.f32.mrb[7].mxu0 }
  0xf2   :  { %v6460_v38 = vpop.f32.mrb[8].mxu1  ;;  %v977_v39 = vmax.f32 %v6456_v36, %v6458_v37 }
  0xf3   :  { %v6464_v40 = vpop.f32.mrb[9].mxu1 }
  0xf4   :  { %v6468_v42 = vpop.f32.mrb[8].mxu0 }
  0xf5   :  { %v6470_v43 = vpop.f32.mrb[9].mxu0 }
  0xf6   :  { %v6472_v44 = vpop.f32.mrb[10].mxu1  ;;  %v978_v45 = vmax.f32 %v6468_v42, %v6470_v43 }
  0xf7   :  { %v6476_v46 = vpop.f32.mrb[11].mxu1 }
  0xf8   :  { %v6480_v48 = vpop.f32.mrb[10].mxu0 }
  0xf9   :  { %v6482_v49 = vpop.f32.mrb[11].mxu0 }
  0xfa   :  { %v6484_v50 = vpop.f32.mrb[12].mxu1  ;;  %v979_v51 = vmax.f32 %v6480_v48, %v6482_v49 }
  0xfb   :  { %v6488_v52 = vpop.f32.mrb[13].mxu1 }
  0xfc   :  { %v6492_v54 = vpop.f32.mrb[12].mxu0 }
  0xfd   :  { %v6494_v55 = vpop.f32.mrb[13].mxu0 }
  0xfe   :  { %v6496_v56 = vpop.f32.mrb[14].mxu1  ;;  %v980_v57 = vmax.f32 %v6492_v54, %v6494_v55 }
  0xff   :  { %10731 = vst [vmem:[#allocation5_spill] sm:$0xff] %v6496_v56  ;;  %v6500_v58 = vpop.f32.mrb[15].mxu1 }
 0x100   :  { %10732 = vst [vmem:[#allocation6_spill] sm:$0xff] %v6500_v58  ;;  %v6504_v60 = vpop.f32.mrb[14].mxu0 }
 0x101   :  { %v6506_v61 = vpop.f32.mrb[15].mxu0 }
 0x102   :  { %v681_v62 = vpop.f32.mrb[16].mxu1  ;;  %v981_v63 = vmax.f32 %v6504_v60, %v6506_v61 }
 0x103   :  { %v683_v0 = vpop.f32.mrb[17].mxu1 }
 0x104   :  { %v1023_v1 = vmax.f32 %v681_v62, %v683_v0  ;;  %v6510_v2 = vpop.f32.mrb[16].mxu0 }
 0x105   :  { %v6517_v4 = vpop.f32.mrb[17].mxu0 }
 0x106   :  { %v1072_v5 = vmax.f32 %v974_v21, %v1023_v1  ;;  %v687_v6 = vpop.f32.mrb[18].mxu1 }
 0x107   :  { %v689_v9 = vpop.f32.mrb[19].mxu1 }
 0x108   :  { %v1128_v10 = vadd.f32 %v6515_v3, %v1072_v5  ;;  %v1024_v11 = vmax.f32 %v687_v6, %v689_v9  ;;  %v6522_v12 = vpop.f32.mrb[18].mxu0 }
 0x109   :  { %v6524_v13 = vpop.f32.mrb[19].mxu0 }
 0x10a   :  { %v1073_v14 = vmax.f32 %v975_v27, %v1024_v11  ;;  %v693_v18 = vpop.f32.mrb[20].mxu1  ;;  %v6528_v24 = vmax.f32 %v1128_v10, 0.0 }
 0x10b   :  { %v695_v21 = vpop.f32.mrb[21].mxu1 }
 0x10c   :  { %10733 = vst [vmem:[#allocation7_spill] sm:$0xff] %v6528_v24  ;;  %v1129_v25 = vadd.f32 %v6515_v3, %v1073_v14  ;;  %v1025_v30 = vmax.f32 %v693_v18, %v695_v21  ;;  %v6531_v31 = vpop.f32.mrb[20].mxu0  ;;  %v2011_v9 = vrot.slane %v6528_v24, 4  ;;  %v1276_v10 = vrot.slane %v6528_v24, 1 }
 0x10d   :  { %v6533_v62 = vpop.f32.mrb[21].mxu0 }
 0x10e   :  { %v6535_v0 = vmax.f32 %v1129_v25, 0.0  ;;  %v1074_v1 = vmax.f32 %v976_v33, %v1025_v30  ;;  %v699_v5 = vpop.f32.mrb[22].mxu1 }
 0x10f   :  { %v701_v6 = vpop.f32.mrb[23].mxu1 }
 0x110   :  { %10734 = vst [vmem:[#allocation8_spill] sm:$0xff] %v6535_v0  ;;  %v1130_v11 = vadd.f32 %v6515_v3, %v1074_v1  ;;  %v1026_v14 = vmax.f32 %v699_v5, %v701_v6  ;;  %v2012_v18 = vrot.slane %v6535_v0, 4  ;;  %v1277_v21 = vrot.slane %v6535_v0, 1  ;;  %v6544_v25 = vpop.f32.mrb[22].mxu0 }
 0x111   :  { %v1522_v33 = vrot.slane %v6535_v0, 2  ;;  %v6547_v30 = vpop.f32.mrb[23].mxu0 }
 0x112   :  { %v6549_v7 = vmax.f32 %v1130_v11, 0.0  ;;  %v1075_v59 = vmax.f32 %v977_v39, %v1026_v14  ;;  %v705_v53 = vpop.f32.mrb[24].mxu1  ;;  %v2013_v1 = vsel %vm2010_vm1, %v2011_v9, %v2012_v18  ;;  %v1278_v5 = vsel %vm1275_vm2, %v1276_v10, %v1277_v21 }
 0x113   :  { %v707_v6 = vpop.f32.mrb[25].mxu1  ;;  %2108 = vrot.lane.b32.xlu0 %v2013_v1, %s5924_s18  ;;  %1373 = vrot.lane.b32.xlu1 %v1278_v5, %s5925_s19  ;;  %v1521_v39 = vrot.slane %v6528_v24, 2  ;;  %v1767_v9 = vrot.slane %v6535_v0, 3 }
 0x114   :  { %10735 = vst [vmem:[#allocation9_spill] sm:$0xff] %v6549_v7  ;;  %v1131_v36 = vadd.f32 %v6515_v3, %v1075_v59  ;;  %v1027_v37 = vmax.f32 %v705_v53, %v707_v6  ;;  %v6564_v14 = vpop.f32.mrb[24].mxu0  ;;  %v1279_v53 = vrot.slane %v6549_v7, 1  ;;  %v1766_v6 = vrot.slane %v6528_v24, 3 }
 0x115   :  { %v6567_v10 = vpop.f32.mrb[25].mxu0  ;;  %v1523_v41 = vsel %vm1520_vm3, %v1521_v39, %v1522_v33  ;;  %v1524_v39 = vrot.slane %v6549_v7, 2 }
 0x116   :  { %v6569_v1 = vmax.f32 %v1131_v36, 0.0  ;;  %v1076_v5 = vmax.f32 %v978_v45, %v1027_v37  ;;  %v711_v47 = vpop.f32.mrb[26].mxu1  ;;  %v1768_v37 = vsel %vm1765_vm4, %v1766_v6, %v1767_v9 }
 0x117   :  { %v713_v59 = vpop.f32.mrb[27].mxu1  ;;  %1618 = vrot.lane.b32.xlu1 %v1523_v41, %s5926_s20  ;;  %v1525_v49 = vsel %vm1520_vm3, %v1522_v33, %v1524_v39 }
 0x118   :  { %10736 = vst [vmem:[#allocation10_spill] sm:$0xff] %v6569_v1  ;;  %v1132_v36 = vadd.f32 %v6515_v3, %v1076_v5  ;;  %v1028_v29 = vmax.f32 %v711_v47, %v713_v59  ;;  %v10605_v42 = vrot.slane %v6569_v1, 1  ;;  %v1526_v43 = vrot.slane %v6569_v1, 2  ;;  %v6583_v45 = vpop.f32.mrb[26].mxu0 }
 0x119   :  { %v6587_v23 = vpop.f32.mrb[27].mxu0  ;;  %v1280_v47 = vsel %vm1275_vm2, %v1277_v21, %v1279_v53  ;;  %v1771_v11 = vrot.slane %v6569_v1, 3 }
 0x11a   :  { %v6589_v41 = vmax.f32 %v1132_v36, 0.0  ;;  %v1077_v17 = vmax.f32 %v979_v51, %v1028_v29  ;;  %v717_v5 = vpop.f32.mrb[28].mxu1  ;;  %v1282_v59 = vsel %vm1275_vm2, %v1279_v53, %v10605_v42  ;;  %v1527_v48 = vsel %vm1520_vm3, %v1524_v39, %v1526_v43 }
 0x11b   :  { %v719_v35 = vpop.f32.mrb[29].mxu1  ;;  %1863 = vrot.lane.b32.xlu1 %v1768_v37, %s5927_s21  ;;  %v5520_v6 = vpack.i.bf16 %v1282_v59, %v1280_v47  ;;  %v1769_v51 = vrot.slane %v6549_v7, 3  ;;  %v5525_v59 = vpack.i.bf16 %v1527_v48, %v1525_v49  ;;  %v10608_v39 = vrot.slane %v6569_v1, 4 }
 0x11c   :  { %10737 = vst [vmem:[#allocation11_spill] sm:$0xff] %v6589_v41  ;;  %v1133_v36 = vadd.f32 %v6515_v3, %v1077_v17  ;;  %v1029_v27 = vmax.f32 %v717_v5, %v719_v35  ;;  %v6602_v29 = vpop.f32.mrb[28].mxu0  ;;  %v1528_v35 = vrot.slane %v6589_v41, 2  ;;  %v2014_v48 = vrot.slane %v6549_v7, 4 }
 0x11d   :  { %5521 = vrot.lane.b32.xlu0 %v5520_v6, %s5925_s19  ;;  %v6607_v21 = vpop.f32.mrb[29].mxu0  ;;  %v1772_v33 = vsel %vm1765_vm4, %v1769_v51, %v1771_v11  ;;  %v1773_v5 = vrot.slane %v6589_v41, 3 }
 0x11e   :  { %v6609_v53 = vmax.f32 %v1133_v36, 0.0  ;;  %v1078_v37 = vmax.f32 %v980_v57, %v1029_v27  ;;  %v723_v17 = vpop.f32.mrb[30].mxu1  ;;  %v1770_v27 = vsel %vm1765_vm4, %v1767_v9, %v1769_v51  ;;  %v2017_v51 = vsel %vm2010_vm1, %v2014_v48, %v10608_v39 }
 0x11f   :  { %v725_v47 = vpop.f32.mrb[31].mxu1 }
 0x120   :  { %10738 = vst [vmem:[#allocation12_spill] sm:$0xff] %v6609_v53  ;;  %v1134_v36 = vadd.f32 %v6515_v3, %v1078_v37  ;;  %v1030_v19 = vmax.f32 %v723_v17, %v725_v47  ;;  %v10607_v54 = vrot.slane %v6609_v53, 2  ;;  %v10606_v55 = vrot.slane %v6609_v53, 3  ;;  %v6624_v57 = vpop.f32.mrb[30].mxu0 }
 0x121   :  { %5526 = vrot.lane.b32.xlu0 %v5525_v59, %s5926_s20  ;;  %v6629_v49 = vpop.f32.mrb[31].mxu0  ;;  %v1529_v37 = vsel %vm1520_vm3, %v1526_v43, %v1528_v35  ;;  %v5530_v59 = vpack.i.bf16 %v1772_v33, %v1770_v27  ;;  %v2015_v43 = vsel %vm2010_vm1, %v2012_v18, %v2014_v48  ;;  %v1774_v33 = vsel %vm1765_vm4, %v1771_v11, %v1773_v5 }
 0x122   :  { %v1079_v6 = vmax.f32 %v981_v63, %v1030_v19  ;;  %v1531_v17 = vsel %vm1520_vm3, %v1528_v35, %v10607_v54  ;;  %v729_v47 = vpop.f32.mrb[32].mxu1  ;;  %v6642_v8 = vmax.f32 %v1134_v36, 0.0  ;;  %v1776_v61 = vsel %vm1765_vm4, %v1773_v5, %v10606_v55 }
 0x123   :  { %v5545_v42 = vpack.i.bf16 %v1531_v17, %v1529_v37  ;;  %v731_v9 = vpop.f32.mrb[33].mxu1  ;;  %v1285_v63 = vrot.slane %v6609_v53, 1  ;;  %v10740_v36 = vmax.f32 %v6510_v2, %v6517_v4  ;;  %v1283_v37 = vrot.slane %v6589_v41, 1 }
 0x124   :  { %10739 = vst [vmem:[#allocation13_spill] sm:$0xff] %v6642_v8  ;;  %v1031_v60 = vmax.f32 %v729_v47, %v731_v9  ;;  %v6648_v19 = vpop.f32.mrb[32].mxu0  ;;  %v2020_v9 = vrot.slane %v6609_v53, 4  ;;  %v1135_v11 = vadd.f32 %v6515_v3, %v1079_v6  ;;  %v1287_v2 = vrot.slane %v6642_v8, 1 }
 0x125   :  { %5531 = vrot.lane.b32.xlu0 %v5530_v59, %s5927_s21  ;;  %5546 = vrot.lane.b32.xlu1 %v5545_v42, %s5926_s20  ;;  %v6655_v35 = vpop.f32.mrb[33].mxu0  ;;  %v5535_v59 = vpack.i.bf16 %v2017_v51, %v2015_v43  ;;  %v5550_v42 = vpack.i.bf16 %v1776_v61, %v1774_v33  ;;  %v1286_v5 = vsel %vm1275_vm2, %v1283_v37, %v1285_v63  ;;  %v2018_v51 = vrot.slane %v6589_v41, 4 }
 0x126   :  { %v1080_v27 = vmax.f32 %v10740_v36, %v1031_v60  ;;  %v735_v17 = vpop.f32.mrb[34].mxu1  ;;  %v10741_v61 = vrot.slane %v6569_v1, 1  ;;  %v10742_v6 = vmax.f32 %v6522_v12, %v6524_v13  ;;  %v1288_v47 = vsel %vm1275_vm2, %v1285_v63, %v1287_v2 }
 0x127   :  { %v737_v55 = vpop.f32.mrb[35].mxu1  ;;  %v2022_v54 = vrot.slane %v6642_v8, 4  ;;  %v10744_v13 = vrot.slane %v6569_v1, 4 }
 0x128   :  { %v1032_v4 = vmax.f32 %v735_v17, %v737_v55  ;;  %v6670_v48 = vpop.f32.mrb[34].mxu0  ;;  %v1284_v43 = vsel %vm1275_vm2, %v10741_v61, %v1283_v37  ;;  %v2021_v17 = vsel %vm2010_vm1, %v2018_v51, %v2020_v9 }
 0x129   :  { %5536 = vrot.lane.b32.xlu0 %v5535_v59, %s5924_s18  ;;  %5551 = vrot.lane.b32.xlu1 %v5550_v42, %s5927_s21  ;;  %v6675_v60 = vpop.f32.mrb[35].mxu0  ;;  %v5540_v55 = vpack.i.bf16 %v1286_v5, %v1284_v43  ;;  %v6686_v42 = vmax.f32 %v1135_v11, 0.0  ;;  %v2019_v5 = vsel %vm2010_vm1, %v10744_v13, %v2018_v51  ;;  %v10745_v11 = vmax.f32 %v6531_v31, %v6533_v62 }
 0x12a   :  { %v1081_v33 = vmax.f32 %v10742_v6, %v1032_v4  ;;  %v741_v36 = vpop.f32.mrb[36].mxu1  ;;  %v5555_v61 = vpack.i.bf16 %v2021_v17, %v2019_v5  ;;  %v10746_v62 = vmax.f32 %v6544_v25, %v6547_v30  ;;  %v10747_v17 = vrot.slane %v6609_v53, 2 }
 0x12b   :  { %v743_v18 = vpop.f32.mrb[37].mxu1  ;;  %10743 = vst [vmem:[#allocation14_spill] sm:$0xff] %v6686_v42  ;;  %v1777_v13 = vrot.slane %v6642_v8, 3 }
 0x12c   :  { %v1033_v39 = vmax.f32 %v741_v36, %v743_v18  ;;  %v6690_v37 = vpop.f32.mrb[36].mxu0  ;;  %v1532_v18 = vrot.slane %v6642_v8, 2  ;;  %v1289_v36 = vrot.slane %v6686_v42, 1  ;;  %v1137_v6 = vadd.f32 %v6515_v3, %v1081_v33 }
 0x12d   :  { %5541 = vrot.lane.b32.xlu0 %v5540_v55, %s5925_s19  ;;  %1383 = vrot.lane.b32.xlu1 %v1288_v47, %s5925_s19  ;;  %v6694_v12 = vpop.f32.mrb[37].mxu0  ;;  %v2023_v47 = vsel %vm2010_vm1, %v2020_v9, %v2022_v54 }
 0x12e   :  { %v1082_v4 = vmax.f32 %v10745_v11, %v1033_v39  ;;  %v747_v63 = vpop.f32.mrb[38].mxu1  ;;  %v1533_v9 = vsel %vm1520_vm3, %v10747_v17, %v1532_v18 }
 0x12f   :  { %v749_v43 = vpop.f32.mrb[39].mxu1 }
 0x130   :  { %v1034_v55 = vmax.f32 %v747_v63, %v749_v43  ;;  %v6707_v59 = vpop.f32.mrb[38].mxu0  ;;  %v1136_v63 = vadd.f32 %v6515_v3, %v1080_v27  ;;  %v1534_v43 = vrot.slane %v6686_v42, 2  ;;  %v10749_v27 = vrot.slane %v6609_v53, 3 }
 0x131   :  { %5556 = vrot.lane.b32.xlu0 %v5555_v61, %s5924_s18  ;;  %2118 = vrot.lane.b32.xlu1 %v2023_v47, %s5924_s18  ;;  %v6711_v31 = vpop.f32.mrb[39].mxu0  ;;  %v1290_v61 = vsel %vm1275_vm2, %v1287_v2, %v1289_v36 }
 0x132   :  { %v6716_v39 = vmax.f32 %v10746_v62, %v1034_v55  ;;  %v753_v51 = vpop.f32.mrb[40].mxu1  ;;  %v10748_v55 = vmax.f32 %v6564_v14, %v6567_v10  ;;  %v1778_v2 = vsel %vm1765_vm4, %v10749_v27, %v1777_v13  ;;  %v1535_v14 = vsel %vm1520_vm3, %v1532_v18, %v1534_v43 }
 0x133   :  { %v755_v5 = vpop.f32.mrb[41].mxu1  ;;  %v10751_v27 = vmax.f32 %v6583_v45, %v6587_v23  ;;  %v1138_v45 = vadd.f32 %v6515_v3, %v1082_v4 }
 0x134   :  { %v1035_v25 = vmax.f32 %v753_v51, %v755_v5  ;;  %v6727_v30 = vpop.f32.mrb[40].mxu0  ;;  %v2024_v51 = vrot.slane %v6686_v42, 4  ;;  %v1779_v5 = vrot.slane %v6686_v42, 3 }
 0x135   :  { %1628 = vrot.lane.b32.xlu0 %v1533_v9, %s5926_s20  ;;  %1385 = vrot.lane.b32.xlu1 %v1290_v61, %s5925_s19  ;;  %v6731_v47 = vpop.f32.mrb[41].mxu0  ;;  %v6745_v61 = vmax.f32 %v1136_v63, 0.0 }
 0x136   :  { %v6736_v62 = vmax.f32 %v10748_v55, %v1035_v25  ;;  %v759_v17 = vpop.f32.mrb[42].mxu1  ;;  %v2025_v9 = vsel %vm2010_vm1, %v2022_v54, %v2024_v51  ;;  %v1780_v33 = vsel %vm1765_vm4, %v1777_v13, %v1779_v5  ;;  %v10753_v54 = vmax.f32 %v6602_v29, %v6607_v21 }
 0x137   :  { %v761_v11 = vpop.f32.mrb[43].mxu1  ;;  %10750 = vst [vmem:[#allocation15_spill] sm:$0xff] %v6745_v61  ;;  %v6792_v29 = vmax.f32 %v1138_v45, 0.0  ;;  %v10755_v21 = vmax.f32 %v6624_v57, %v6629_v49  ;;  %v1139_v49 = vadd.f32 %v6515_v3, %v6716_v39 }
 0x138   :  { %v1036_v10 = vmax.f32 %v759_v17, %v761_v11  ;;  %v6749_v25 = vpop.f32.mrb[42].mxu0  ;;  %v6764_v17 = vmax.f32 %v1137_v6, 0.0 }
 0x139   :  { %1873 = vrot.lane.b32.xlu0 %v1778_v2, %s5927_s21  ;;  %1630 = vrot.lane.b32.xlu1 %v1535_v14, %s5926_s20  ;;  %v6753_v55 = vpop.f32.mrb[43].mxu0  ;;  %v1781_v2 = vrot.slane %v6745_v61, 3  ;;  %v1291_v14 = vrot.slane %v6745_v61, 1  ;;  %10754 = vst [vmem:[#allocation17_spill] sm:$0xff] %v6792_v29 }
 0x13a   :  { %v6758_v24 = vmax.f32 %v10751_v27, %v1036_v10  ;;  %v765_v63 = vpop.f32.mrb[44].mxu1  ;;  %10752 = vst [vmem:[#allocation16_spill] sm:$0xff] %v6764_v17  ;;  %v1536_v10 = vrot.slane %v6745_v61, 2 }
 0x13b   :  { %v767_v18 = vpop.f32.mrb[45].mxu1 }
 0x13c   :  { %v1037_v8 = vmax.f32 %v765_v63, %v767_v18  ;;  %v6768_v42 = vpop.f32.mrb[44].mxu0  ;;  %v1293_v18 = vrot.slane %v6764_v17, 1 }
 0x13d   :  { %2120 = vrot.lane.b32.xlu0 %v2025_v9, %s5924_s18  ;;  %1875 = vrot.lane.b32.xlu1 %v1780_v33, %s5927_s21  ;;  %v6772_v23 = vpop.f32.mrb[45].mxu0  ;;  %v1782_v9 = vsel %vm1765_vm4, %v1779_v5, %v1781_v2  ;;  %v1292_v33 = vsel %vm1275_vm2, %v1289_v36, %v1291_v14  ;;  %v2026_v36 = vrot.slane %v6745_v61, 4 }
 0x13e   :  { %v6778_v6 = vmax.f32 %v10753_v54, %v1037_v8  ;;  %v771_v13 = vpop.f32.mrb[46].mxu1 }
 0x13f   :  { %v773_v27 = vpop.f32.mrb[47].mxu1 }
 0x140   :  { %v1038_v11 = vmax.f32 %v771_v13, %v773_v27  ;;  %v6786_v4 = vpop.f32.mrb[46].mxu0  ;;  %v1537_v27 = vsel %vm1520_vm3, %v1534_v43, %v1536_v10  ;;  %v10756_v43 = vmax.f32 %v6648_v19, %v6655_v35  ;;  %v1538_v13 = vrot.slane %v6764_v17, 2 }
 0x141   :  { %1877 = vrot.lane.b32.xlu0 %v1782_v9, %s5927_s21  ;;  %1387 = vrot.lane.b32.xlu1 %v1292_v33, %s5925_s19  ;;  %v6790_v8 = vpop.f32.mrb[47].mxu0  ;;  %v1294_v9 = vsel %vm1275_vm2, %v1291_v14, %v1293_v18  ;;  %v1783_v33 = vrot.slane %v6764_v17, 3  ;;  %v6830_v35 = vmax.f32 %v1139_v49, 0.0 }
 0x142   :  { %v6797_v54 = vmax.f32 %v10755_v21, %v1038_v11  ;;  %v777_v5 = vpop.f32.mrb[48].mxu1  ;;  %v1295_v11 = vrot.slane %v6792_v29, 1 }
 0x143   :  { %v779_v63 = vpop.f32.mrb[49].mxu1  ;;  %10757 = vst [vmem:[#allocation18_spill] sm:$0xff] %v6830_v35 }
 0x144   :  { %v1039_v45 = vmax.f32 %v777_v5, %v779_v63  ;;  %v6805_v53 = vpop.f32.mrb[48].mxu0 }
 0x145   :  { %1632 = vrot.lane.b32.xlu1 %v1537_v27, %s5926_s20  ;;  %1389 = vrot.lane.b32.xlu0 %v1294_v9, %s5925_s19  ;;  %v6809_v57 = vpop.f32.mrb[49].mxu0  ;;  %v2027_v27 = vsel %vm2010_vm1, %v2024_v51, %v2026_v36  ;;  %v1784_v9 = vsel %vm1765_vm4, %v1781_v2, %v1783_v33  ;;  %v10758_v51 = vmax.f32 %v6670_v48, %v6675_v60 }
 0x146   :  { %v6817_v14 = vmax.f32 %v10756_v43, %v1039_v45  ;;  %v783_v21 = vpop.f32.mrb[50].mxu1  ;;  %v1296_v45 = vsel %vm1275_vm2, %v1293_v18, %v1295_v11  ;;  %v1140_v60 = vadd.f32 %v6515_v3, %v6736_v62 }
 0x147   :  { %v785_v63 = vpop.f32.mrb[51].mxu1 }
 0x148   :  { %v1040_v61 = vmax.f32 %v783_v21, %v785_v63  ;;  %v6824_v39 = vpop.f32.mrb[50].mxu0  ;;  %v1539_v63 = vsel %vm1520_vm3, %v1536_v10, %v1538_v13  ;;  %v10759_v10 = vmax.f32 %v6690_v37, %v6694_v12  ;;  %v1540_v21 = vrot.slane %v6792_v29, 2 }
 0x149   :  { %2122 = vrot.lane.b32.xlu1 %v2027_v27, %s5924_s18  ;;  %1879 = vrot.lane.b32.xlu0 %v1784_v9, %s5927_s21  ;;  %v6828_v19 = vpop.f32.mrb[51].mxu0  ;;  %v2028_v27 = vrot.slane %v6764_v17, 4  ;;  %v1785_v9 = vrot.slane %v6792_v29, 3  ;;  %v6868_v12 = vmax.f32 %v1140_v60, 0.0 }
 0x14a   :  { %v789_v43 = vpop.f32.mrb[52].mxu1  ;;  %v6836_v2 = vmax.f32 %v10758_v51, %v1040_v61  ;;  %v1297_v61 = vrot.slane %v6830_v35, 1 }
 0x14b   :  { %v791_v5 = vpop.f32.mrb[53].mxu1  ;;  %10760 = vst [vmem:[#allocation19_spill] sm:$0xff] %v6868_v12 }
 0x14c   :  { %v1041_v49 = vmax.f32 %v789_v43, %v791_v5  ;;  %v6843_v41 = vpop.f32.mrb[52].mxu0 }
 0x14d   :  { %1634 = vrot.lane.b32.xlu1 %v1539_v63, %s5926_s20  ;;  %1391 = vrot.lane.b32.xlu0 %v1296_v45, %s5925_s19  ;;  %v6847_v48 = vpop.f32.mrb[53].mxu0  ;;  %v2029_v63 = vsel %vm2010_vm1, %v2026_v36, %v2028_v27  ;;  %v1786_v45 = vsel %vm1765_vm4, %v1783_v33, %v1785_v9  ;;  %v10761_v36 = vmax.f32 %v6707_v59, %v6711_v31 }
 0x14e   :  { %v795_v18 = vpop.f32.mrb[54].mxu1  ;;  %v6855_v51 = vmax.f32 %v10759_v10, %v1041_v49  ;;  %v1298_v49 = vsel %vm1275_vm2, %v1295_v11, %v1297_v61  ;;  %v1141_v31 = vadd.f32 %v6515_v3, %v6758_v24 }
 0x14f   :  { %v797_v5 = vpop.f32.mrb[55].mxu1 }
 0x150   :  { %v1042_v17 = vmax.f32 %v795_v18, %v797_v5  ;;  %v6862_v62 = vpop.f32.mrb[54].mxu0  ;;  %v1541_v5 = vsel %vm1520_vm3, %v1538_v13, %v1540_v21  ;;  %v10762_v13 = vmax.f32 %v6727_v30, %v6731_v47  ;;  %v1542_v18 = vrot.slane %v6830_v35, 2 }
 0x151   :  { %2124 = vrot.lane.b32.xlu1 %v2029_v63, %s5924_s18  ;;  %1881 = vrot.lane.b32.xlu0 %v1786_v45, %s5927_s21  ;;  %v6866_v37 = vpop.f32.mrb[55].mxu0  ;;  %v2030_v63 = vrot.slane %v6792_v29, 4  ;;  %v1787_v45 = vrot.slane %v6830_v35, 3  ;;  %v6906_v47 = vmax.f32 %v1141_v31, 0.0 }
 0x152   :  { %v801_v10 = vpop.f32.mrb[56].mxu1  ;;  %v6874_v33 = vmax.f32 %v10761_v36, %v1042_v17  ;;  %v1299_v17 = vrot.slane %v6868_v12, 1 }
 0x153   :  { %v803_v43 = vpop.f32.mrb[57].mxu1  ;;  %10763 = vst [vmem:[#allocation20_spill] sm:$0xff] %v6906_v47 }
 0x154   :  { %v1043_v60 = vmax.f32 %v801_v10, %v803_v43  ;;  %v6881_v0 = vpop.f32.mrb[56].mxu0  ;;  %v1789_v43 = vrot.slane %v6868_v12, 3 }
 0x155   :  { %1636 = vrot.lane.b32.xlu1 %v1541_v5, %s5926_s20  ;;  %1393 = vrot.lane.b32.xlu0 %v1298_v49, %s5925_s19  ;;  %v6885_v59 = vpop.f32.mrb[57].mxu0  ;;  %v2031_v5 = vsel %vm2010_vm1, %v2028_v27, %v2030_v63  ;;  %v1788_v49 = vsel %vm1765_vm4, %v1785_v9, %v1787_v45  ;;  %v10764_v27 = vmax.f32 %v6749_v25, %v6753_v55 }
 0x156   :  { %v807_v11 = vpop.f32.mrb[58].mxu1  ;;  %v6893_v36 = vmax.f32 %v10762_v13, %v1043_v60  ;;  %v1300_v60 = vsel %vm1275_vm2, %v1297_v61, %v1299_v17  ;;  %v1142_v55 = vadd.f32 %v6515_v3, %v6778_v6 }
 0x157   :  { %v809_v10 = vpop.f32.mrb[59].mxu1 }
 0x158   :  { %v1044_v29 = vmax.f32 %v807_v11, %v809_v10  ;;  %v6900_v24 = vpop.f32.mrb[58].mxu0  ;;  %v1544_v11 = vrot.slane %v6868_v12, 2 }
 0x159   :  { %2126 = vrot.lane.b32.xlu1 %v2031_v5, %s5924_s18  ;;  %1883 = vrot.lane.b32.xlu0 %v1788_v49, %s5927_s21  ;;  %v6904_v30 = vpop.f32.mrb[59].mxu0  ;;  %v1543_v5 = vsel %vm1520_vm3, %v1540_v21, %v1542_v18  ;;  %v2032_v49 = vrot.slane %v6830_v35, 4  ;;  %v10765_v21 = vmax.f32 %v6768_v42, %v6772_v23  ;;  %v6944_v23 = vmax.f32 %v1142_v55, 0.0 }
 0x15a   :  { %v813_v13 = vpop.f32.mrb[60].mxu1  ;;  %v6912_v9 = vmax.f32 %v10764_v27, %v1044_v29  ;;  %v1301_v29 = vrot.slane %v6906_v47, 1 }
 0x15b   :  { %v815_v10 = vpop.f32.mrb[61].mxu1  ;;  %10766 = vst [vmem:[#allocation21_spill] sm:$0xff] %v6944_v23 }
 0x15c   :  { %v1045_v31 = vmax.f32 %v813_v13, %v815_v10  ;;  %v6919_v7 = vpop.f32.mrb[60].mxu0  ;;  %v1791_v13 = vrot.slane %v6906_v47, 3 }
 0x15d   :  { %1638 = vrot.lane.b32.xlu1 %v1543_v5, %s5926_s20  ;;  %1395 = vrot.lane.b32.xlu0 %v1300_v60, %s5925_s19  ;;  %v6923_v25 = vpop.f32.mrb[61].mxu0  ;;  %v2033_v5 = vsel %vm2010_vm1, %v2030_v63, %v2032_v49  ;;  %v1790_v60 = vsel %vm1765_vm4, %v1787_v45, %v1789_v43  ;;  %v10767_v63 = vmax.f32 %v6786_v4, %v6790_v8 }
 0x15e   :  { %v819_v61 = vpop.f32.mrb[62].mxu1  ;;  %v6931_v27 = vmax.f32 %v10765_v21, %v1045_v31  ;;  %v1302_v31 = vsel %vm1275_vm2, %v1299_v17, %v1301_v29  ;;  %v1143_v8 = vadd.f32 %v6515_v3, %v6797_v54 }
 0x15f   :  { %v821_v10 = vpop.f32.mrb[63].mxu1 }
 0x160   :  { %v1046_v35 = vmax.f32 %v819_v61, %v821_v10  ;;  %v6938_v6 = vpop.f32.mrb[62].mxu0  ;;  %v1546_v61 = vrot.slane %v6906_v47, 2 }
 0x161   :  { %2128 = vrot.lane.b32.xlu1 %v2033_v5, %s5924_s18  ;;  %1885 = vrot.lane.b32.xlu0 %v1790_v60, %s5927_s21  ;;  %v6942_v42 = vpop.f32.mrb[63].mxu0  ;;  %v1545_v5 = vsel %vm1520_vm3, %v1542_v18, %v1544_v11  ;;  %v2034_v60 = vrot.slane %v6868_v12, 4  ;;  %v10768_v18 = vmax.f32 %v6805_v53, %v6809_v57  ;;  %v6982_v57 = vmax.f32 %v1143_v8, 0.0 }
 0x162   :  { %v825_v21 = vpop.f32.mrb[64].mxu1  ;;  %v6950_v45 = vmax.f32 %v10767_v63, %v1046_v35  ;;  %v1303_v35 = vrot.slane %v6944_v23, 1 }
 0x163   :  { %v827_v10 = vpop.f32.mrb[65].mxu1  ;;  %10769 = vst [vmem:[#allocation22_spill] sm:$0xff] %v6982_v57 }
 0x164   :  { %v1047_v55 = vmax.f32 %v825_v21, %v827_v10  ;;  %v6957_v1 = vpop.f32.mrb[64].mxu0  ;;  %v1793_v21 = vrot.slane %v6944_v23, 3 }
 0x165   :  { %1640 = vrot.lane.b32.xlu1 %v1545_v5, %s5926_s20  ;;  %1397 = vrot.lane.b32.xlu0 %v1302_v31, %s5925_s19  ;;  %v6961_v4 = vpop.f32.mrb[65].mxu0  ;;  %v2035_v5 = vsel %vm2010_vm1, %v2032_v49, %v2034_v60  ;;  %v1792_v31 = vsel %vm1765_vm4, %v1789_v43, %v1791_v13  ;;  %v10770_v49 = vmax.f32 %v6824_v39, %v6828_v19 }
 0x166   :  { %v831_v17 = vpop.f32.mrb[66].mxu1  ;;  %v6969_v63 = vmax.f32 %v10768_v18, %v1047_v55  ;;  %v1304_v55 = vsel %vm1275_vm2, %v1301_v29, %v1303_v35  ;;  %v1144_v19 = vadd.f32 %v6515_v3, %v6817_v14 }
 0x167   :  { %v833_v10 = vpop.f32.mrb[67].mxu1 }
 0x168   :  { %v1048_v12 = vmax.f32 %v831_v17, %v833_v10  ;;  %v6976_v54 = vpop.f32.mrb[66].mxu0  ;;  %v1548_v17 = vrot.slane %v6944_v23, 2 }
 0x169   :  { %2130 = vrot.lane.b32.xlu1 %v2035_v5, %s5924_s18  ;;  %1887 = vrot.lane.b32.xlu0 %v1792_v31, %s5927_s21  ;;  %v6980_v53 = vpop.f32.mrb[67].mxu0  ;;  %v1547_v5 = vsel %vm1520_vm3, %v1544_v11, %v1546_v61  ;;  %v2036_v31 = vrot.slane %v6906_v47, 4  ;;  %v10771_v11 = vmax.f32 %v6843_v41, %v6847_v48  ;;  %v7020_v48 = vmax.f32 %v1144_v19, 0.0 }
 0x16a   :  { %v837_v18 = vpop.f32.mrb[68].mxu1  ;;  %v6988_v43 = vmax.f32 %v10770_v49, %v1048_v12  ;;  %v1305_v12 = vrot.slane %v6982_v57, 1 }
 0x16b   :  { %v839_v10 = vpop.f32.mrb[69].mxu1  ;;  %10772 = vst [vmem:[#allocation23_spill] sm:$0xff] %v7020_v48 }
 0x16c   :  { %v1049_v8 = vmax.f32 %v837_v18, %v839_v10  ;;  %v6995_v58 = vpop.f32.mrb[68].mxu0  ;;  %v1795_v18 = vrot.slane %v6982_v57, 3 }
 0x16d   :  { %1642 = vrot.lane.b32.xlu1 %v1547_v5, %s5926_s20  ;;  %1399 = vrot.lane.b32.xlu0 %v1304_v55, %s5925_s19  ;;  %v6999_v39 = vpop.f32.mrb[69].mxu0  ;;  %v2037_v5 = vsel %vm2010_vm1, %v2034_v60, %v2036_v31  ;;  %v1794_v55 = vsel %vm1765_vm4, %v1791_v13, %v1793_v21  ;;  %v10773_v60 = vmax.f32 %v6862_v62, %v6866_v37 }
 0x16e   :  { %v843_v29 = vpop.f32.mrb[70].mxu1  ;;  %v7007_v49 = vmax.f32 %v10771_v11, %v1049_v8  ;;  %v1306_v8 = vsel %vm1275_vm2, %v1303_v35, %v1305_v12  ;;  %v1145_v37 = vadd.f32 %v6515_v3, %v6836_v2 }
 0x16f   :  { %v845_v10 = vpop.f32.mrb[71].mxu1 }
 0x170   :  { %v1050_v47 = vmax.f32 %v843_v29, %v845_v10  ;;  %v7014_v14 = vpop.f32.mrb[70].mxu0  ;;  %v1550_v29 = vrot.slane %v6982_v57, 2 }
 0x171   :  { %2132 = vrot.lane.b32.xlu1 %v2037_v5, %s5924_s18  ;;  %1889 = vrot.lane.b32.xlu0 %v1794_v55, %s5927_s21  ;;  %v7018_v41 = vpop.f32.mrb[71].mxu0  ;;  %v1549_v5 = vsel %vm1520_vm3, %v1546_v61, %v1548_v17  ;;  %v2038_v55 = vrot.slane %v6944_v23, 4  ;;  %v10774_v61 = vmax.f32 %v6881_v0, %v6885_v59  ;;  %v7058_v59 = vmax.f32 %v1145_v37, 0.0 }
 0x172   :  { %v849_v11 = vpop.f32.mrb[72].mxu1  ;;  %v7026_v13 = vmax.f32 %v10773_v60, %v1050_v47  ;;  %v1307_v47 = vrot.slane %v7020_v48, 1 }
 0x173   :  { %v851_v10 = vpop.f32.mrb[73].mxu1  ;;  %10776 = vst [vmem:[#allocation25_spill] sm:$0xff] %v7058_v59 }
 0x174   :  { %v1051_v19 = vmax.f32 %v849_v11, %v851_v10  ;;  %v7033_v56 = vpop.f32.mrb[72].mxu0  ;;  %v1797_v11 = vrot.slane %v7020_v48, 3 }
 0x175   :  { %1644 = vrot.lane.b32.xlu1 %v1549_v5, %s5926_s20  ;;  %1401 = vrot.lane.b32.xlu0 %v1306_v8, %s5925_s19  ;;  %v7037_v62 = vpop.f32.mrb[73].mxu0  ;;  %v2039_v5 = vsel %vm2010_vm1, %v2036_v31, %v2038_v55  ;;  %v1796_v8 = vsel %vm1765_vm4, %v1793_v21, %v1795_v18  ;;  %v10777_v31 = vmax.f32 %v6900_v24, %v6904_v30 }
 0x176   :  { %v855_v35 = vpop.f32.mrb[74].mxu1  ;;  %v7045_v60 = vmax.f32 %v10774_v61, %v1051_v19  ;;  %v1308_v19 = vsel %vm1275_vm2, %v1305_v12, %v1307_v47  ;;  %v1146_v30 = vadd.f32 %v6515_v3, %v6855_v51 }
 0x177   :  { %v857_v10 = vpop.f32.mrb[75].mxu1 }
 0x178   :  { %10775 = vst [vmem:[#allocation24_spill] sm:$0xff] %v7045_v60  ;;  %v1052_v23 = vmax.f32 %v855_v35, %v857_v10  ;;  %v7052_v2 = vpop.f32.mrb[74].mxu0  ;;  %v1552_v35 = vrot.slane %v7020_v48, 2 }
 0x179   :  { %2134 = vrot.lane.b32.xlu1 %v2039_v5, %s5924_s18  ;;  %1891 = vrot.lane.b32.xlu0 %v1796_v8, %s5927_s21  ;;  %v7056_v0 = vpop.f32.mrb[75].mxu0  ;;  %v1551_v5 = vsel %vm1520_vm3, %v1548_v17, %v1550_v29  ;;  %v2040_v8 = vrot.slane %v6982_v57, 4  ;;  %v10778_v17 = vmax.f32 %v6919_v7, %v6923_v25  ;;  %v7096_v25 = vmax.f32 %v1146_v30, 0.0 }
 0x17a   :  { %v861_v61 = vpop.f32.mrb[76].mxu1  ;;  %v7064_v21 = vmax.f32 %v10777_v31, %v1052_v23  ;;  %v1309_v23 = vrot.slane %v7058_v59, 1 }
 0x17b   :  { %v863_v10 = vpop.f32.mrb[77].mxu1  ;;  %10780 = vst [vmem:[#allocation27_spill] sm:$0xff] %v7096_v25 }
 0x17c   :  { %v1053_v37 = vmax.f32 %v861_v61, %v863_v10  ;;  %v7071_v60 = vpop.f32.mrb[76].mxu0  ;;  %v1799_v61 = vrot.slane %v7058_v59, 3 }
 0x17d   :  { %1646 = vrot.lane.b32.xlu1 %v1551_v5, %s5926_s20  ;;  %1403 = vrot.lane.b32.xlu0 %v1308_v19, %s5925_s19  ;;  %v7075_v24 = vpop.f32.mrb[77].mxu0  ;;  %v2041_v5 = vsel %vm2010_vm1, %v2038_v55, %v2040_v8  ;;  %v1798_v19 = vsel %vm1765_vm4, %v1795_v18, %v1797_v11  ;;  %v10781_v55 = vmax.f32 %v6938_v6, %v6942_v42  ;;  %v1311_v42 = vrot.slane %v7096_v25, 1 }
 0x17e   :  { %v867_v12 = vpop.f32.mrb[78].mxu1  ;;  %v7083_v31 = vmax.f32 %v10778_v17, %v1053_v37  ;;  %v1310_v37 = vsel %vm1275_vm2, %v1307_v47, %v1309_v23  ;;  %v1147_v6 = vadd.f32 %v6515_v3, %v6874_v33  ;;  %v1554_v33 = vrot.slane %v7058_v59, 2 }
 0x17f   :  { %v869_v10 = vpop.f32.mrb[79].mxu1 }
 0x180   :  { %10779 = vst [vmem:[#allocation26_spill] sm:$0xff] %v7083_v31  ;;  %v1054_v57 = vmax.f32 %v867_v12, %v869_v10  ;;  %v7090_v51 = vpop.f32.mrb[78].mxu0 }
 0x181   :  { %2136 = vrot.lane.b32.xlu1 %v2041_v5, %s5924_s18  ;;  %1893 = vrot.lane.b32.xlu0 %v1798_v19, %s5927_s21  ;;  %v7094_v7 = vpop.f32.mrb[79].mxu0  ;;  %v1553_v5 = vsel %vm1520_vm3, %v1550_v29, %v1552_v35  ;;  %v2042_v19 = vrot.slane %v7020_v48, 4  ;;  %v10783_v29 = vmax.f32 %v6957_v1, %v6961_v4  ;;  %v7132_v1 = vmax.f32 %v1147_v6, 0.0 }
 0x182   :  { %v873_v17 = vpop.f32.mrb[80].mxu1  ;;  %v7102_v18 = vmax.f32 %v10781_v55, %v1054_v57  ;;  %v1312_v4 = vsel %vm1275_vm2, %v1309_v23, %v1311_v42  ;;  %v1801_v6 = vrot.slane %v7096_v25, 3 }
 0x183   :  { %v875_v10 = vpop.f32.mrb[81].mxu1  ;;  %10784 = vst [vmem:[#allocation29_spill] sm:$0xff] %v7132_v1 }
 0x184   :  { %v1055_v30 = vmax.f32 %v873_v17, %v875_v10  ;;  %v7109_v31 = vpop.f32.mrb[80].mxu0 }
 0x185   :  { %v7111_v47 = vpop.permute.xlu1 %1373  ;;  %1648 = vrot.lane.b32.xlu1 %v1553_v5, %s5926_s20  ;;  %1405 = vrot.lane.b32.xlu0 %v1310_v37, %s5925_s19  ;;  %v7123_v17 = vpop.f32.mrb[81].mxu0  ;;  %v2043_v5 = vsel %vm2010_vm1, %v2040_v8, %v2042_v19  ;;  %v1800_v37 = vsel %vm1765_vm4, %v1797_v11, %v1799_v61 }
 0x186   :  { %10782 = vst [vmem:[#allocation28_spill] sm:$0xff] %v7111_v47  ;;  %v879_v57 = vpop.f32.mrb[82].mxu1  ;;  %v7121_v55 = vmax.f32 %v10783_v29, %v1055_v30  ;;  %v10785_v29 = vmax.f32 %v6976_v54, %v6980_v53  ;;  %v7140_v8 = vpop.permute.xlu0 %2108  ;;  %v1148_v54 = vadd.f32 %v6515_v3, %v6893_v36  ;;  %v1313_v53 = vrot.slane %v7132_v1, 1 }
 0x187   :  { %v881_v10 = vpop.f32.mrb[83].mxu1  ;;  %10786 = vst [vmem:[#allocation30_spill] sm:$0xff] %v7140_v8 }
 0x188   :  { %v1056_v47 = vmax.f32 %v879_v57, %v881_v10  ;;  %v1555_v57 = vsel %vm1520_vm3, %v1552_v35, %v1554_v33  ;;  %v2044_v10 = vrot.slane %v7058_v59, 4  ;;  %v7164_v3 = vmax.f32 %v1148_v54, 0.0 }
 0x189   :  { %2138 = vrot.lane.b32.xlu1 %v2043_v5, %s5924_s18  ;;  %1895 = vrot.lane.b32.xlu0 %v1800_v37, %s5927_s21  ;;  %v7142_v48 = vpop.permute.xlu1 %1618  ;;  %v1803_v54 = vrot.slane %v7132_v1, 3 }
 0x18a   :  { %v885_v30 = vpop.f32.mrb[84].mxu1  ;;  %v7138_v12 = vmax.f32 %v10785_v29, %v1056_v47  ;;  %10787 = vst [vmem:[#allocation31_spill] sm:$0xff] %v7142_v48  ;;  %v10788_v47 = vmax.f32 %v6995_v58, %v6999_v39  ;;  %10789 = vst [vmem:[#allocation32_spill] sm:$0xff] %v7164_v3  ;;  %v1314_v58 = vsel %vm1275_vm2, %v1311_v42, %v1313_v53  ;;  %v1315_v42 = vrot.slane %v7164_v3, 1 }
 0x18b   :  { %v887_v11 = vpop.f32.mrb[85].mxu1 }
 0x18c   :  { %v1057_v5 = vmax.f32 %v885_v30, %v887_v11  ;;  %v2045_v30 = vsel %vm2010_vm1, %v2042_v19, %v2044_v10  ;;  %v1802_v11 = vsel %vm1765_vm4, %v1799_v61, %v1801_v6 }
 0x18d   :  { %1650 = vrot.lane.b32.xlu1 %v1555_v57, %s5926_s20  ;;  %1407 = vrot.lane.b32.xlu0 %v1312_v4, %s5925_s19  ;;  %v1556_v4 = vrot.slane %v7096_v25, 2  ;;  %v7166_v36 = vpop.permute.xlu1 %1863 }
 0x18e   :  { %v891_v23 = vpop.f32.mrb[86].mxu1  ;;  %v7155_v37 = vmax.f32 %v10788_v47, %v1057_v5  ;;  %10790 = vst [vmem:[#allocation33_spill] sm:$0xff] %v7166_v36  ;;  %v10791_v5 = vmax.f32 %v7014_v14, %v7018_v41  ;;  %v7184_v14 = vld [vmem:[%s10593_s2] ss:$0 sm:$0xff] }
 0x18f   :  { %v7157_v35 = vpop.permute.xlu0 %5521  ;;  %v893_v29 = vpop.f32.mrb[87].mxu1  ;;  %v1149_v41 = vadd.f32 %v7184_v14, %v6912_v9 }
 0x190   :  { %v1058_v57 = vmax.f32 %v891_v23, %v893_v29  ;;  %v1557_v23 = vsel %vm1520_vm3, %v1554_v33, %v1556_v4  ;;  %v2046_v29 = vrot.slane %v7096_v25, 4 }
 0x191   :  { %2140 = vrot.lane.b32.xlu1 %v2045_v30, %s5924_s18  ;;  %1897 = vrot.lane.b32.xlu0 %v1802_v11, %s5927_s21  ;;  %v10792_v11 = vmax.f32 %v7033_v56, %v7037_v62  ;;  %v7203_v36 = vmax.f32 %v1149_v41, 0.0  ;;  %v1316_v56 = vsel %vm1275_vm2, %v1313_v53, %v1315_v42  ;;  %v1150_v41 = vadd.f32 %v7184_v14, %v6931_v27 }
 0x192   :  { %v897_v39 = vpop.f32.mrb[88].mxu1  ;;  %v7172_v19 = vmax.f32 %v10791_v5, %v1058_v57 }
 0x193   :  { %v7174_v61 = vpop.permute.xlu0 %5526  ;;  %v899_v47 = vpop.f32.mrb[89].mxu1  ;;  %10793 = vst [vmem:[#allocation34_spill] sm:$0xff] %v7203_v36  ;;  %v7237_v25 = vmax.f32 %v1150_v41, 0.0  ;;  %v1807_v41 = vrot.slane %v7203_v36, 3 }
 0x194   :  { %v1059_v30 = vmax.f32 %v897_v39, %v899_v47  ;;  %v1804_v47 = vsel %vm1765_vm4, %v1801_v6, %v1803_v54 }
 0x195   :  { %1652 = vrot.lane.b32.xlu1 %v1557_v23, %s5926_s20  ;;  %1409 = vrot.lane.b32.xlu0 %v1314_v58, %s5925_s19  ;;  %v2047_v58 = vsel %vm2010_vm1, %v2044_v10, %v2046_v29  ;;  %v1558_v23 = vrot.slane %v7132_v1, 2  ;;  %v10794_v10 = vmax.f32 %v7052_v2, %v7056_v0  ;;  %v1317_v2 = vrot.slane %v7203_v36, 1  ;;  %10797 = vst [vmem:[#allocation36_spill] sm:$0xff] %v7237_v25 }
 0x196   :  { %v903_v33 = vpop.f32.mrb[90].mxu1  ;;  %v7192_v57 = vmax.f32 %v10792_v11, %v1059_v30 }
 0x197   :  { %v7194_v39 = vpop.permute.xlu0 %5531  ;;  %v7196_v5 = vpop.permute.xlu1 %5546  ;;  %v1559_v48 = vsel %vm1520_vm3, %v1556_v4, %v1558_v23  ;;  %v10795_v4 = vmax.f32 %v7071_v60, %v7075_v24  ;;  %v1318_v59 = vsel %vm1275_vm2, %v1315_v42, %v1317_v2 }
 0x198   :  { %v905_v8 = vpop.f32.mrb[91].mxu1 }
 0x199   :  { %2142 = vrot.lane.b32.xlu1 %v2047_v58, %s5924_s18  ;;  %1899 = vrot.lane.b32.xlu0 %v1804_v47, %s5927_s21  ;;  %v1060_v9 = vmax.f32 %v903_v33, %v905_v8  ;;  %v2048_v47 = vrot.slane %v7132_v1, 4  ;;  %v1805_v8 = vrot.slane %v7164_v3, 3 }
 0x19a   :  { %v909_v62 = vpop.f32.mrb[92].mxu1 }
 0x19b   :  { %v7206_v30 = vpop.permute.xlu0 %5536  ;;  %v7208_v11 = vpop.permute.xlu1 %5551  ;;  %v7213_v6 = vmax.f32 %v10794_v10, %v1060_v9 }
 0x19c   :  { %v911_v58 = vpop.f32.mrb[93].mxu1 }
 0x19d   :  { %1654 = vrot.lane.b32.xlu1 %v1559_v48, %s5926_s20  ;;  %1411 = vrot.lane.b32.xlu0 %v1316_v56, %s5925_s19  ;;  %v1061_v53 = vmax.f32 %v909_v62, %v911_v58  ;;  %v2049_v48 = vsel %vm2010_vm1, %v2046_v29, %v2048_v47  ;;  %v1806_v56 = vsel %vm1765_vm4, %v1803_v54, %v1805_v8  ;;  %v1560_v58 = vrot.slane %v7164_v3, 2 }
 0x19e   :  { %v915_v33 = vpop.f32.mrb[94].mxu1  ;;  %v10798_v29 = vmax.f32 %v7090_v51, %v7094_v7  ;;  %v1562_v7 = vrot.slane %v7203_v36, 2 }
 0x19f   :  { %v7223_v0 = vpop.permute.xlu0 %5541  ;;  %v7225_v9 = vpop.permute.xlu1 %1383  ;;  %v7230_v10 = vmax.f32 %v10795_v4, %v1061_v53  ;;  %v2050_v53 = vrot.slane %v7164_v3, 4 }
 0x1a0   :  { %v917_v62 = vpop.f32.mrb[95].mxu1 }
 0x1a1   :  { %10796 = vst [vmem:[#allocation35_spill] sm:$0xff] %v7230_v10  ;;  %2144 = vrot.lane.b32.xlu1 %v2049_v48, %s5924_s18  ;;  %1901 = vrot.lane.b32.xlu0 %v1806_v56, %s5927_s21  ;;  %v1062_v27 = vmax.f32 %v915_v33, %v917_v62  ;;  %v1561_v48 = vsel %vm1520_vm3, %v1558_v23, %v1560_v58  ;;  %v1319_v56 = vrot.slane %v7237_v25, 1 }
 0x1a2   :  { %v921_v1 = vpop.f32.mrb[96].mxu1  ;;  %v2051_v51 = vsel %vm2010_vm1, %v2048_v47, %v2050_v53  ;;  %v1151_v23 = vadd.f32 %v7184_v14, %v6950_v45  ;;  %v10800_v47 = vmax.f32 %v6421_v15, %v6423_v16  ;;  %v10802_v15 = vmax.f32 %v6430_v20, %v6432_v22 }
 0x1a3   :  { %v7240_v60 = vpop.permute.xlu0 %5556  ;;  %v7242_v24 = vpop.permute.xlu1 %2118  ;;  %v7247_v54 = vmax.f32 %v10798_v29, %v1062_v27  ;;  %v10804_v22 = vmax.f32 %v6439_v26, %v6441_v28  ;;  %v1153_v26 = vadd.f32 %v7184_v14, %v6988_v43  ;;  %v10807_v28 = vmax.f32 %v6448_v32, %v6450_v34 }
 0x1a4   :  { %v923_v4 = vpop.f32.mrb[97].mxu1  ;;  %v1154_v34 = vadd.f32 %v7184_v14, %v7007_v49 }
 0x1a5   :  { %v1063_v33 = vmax.f32 %v921_v1, %v923_v4  ;;  %1656 = vrot.lane.b32.xlu1 %v1561_v48, %s5926_s20  ;;  %1413 = vrot.lane.b32.xlu0 %v1318_v59, %s5925_s19  ;;  %v10799_v1 = vmax.f32 %v7109_v31, %v7123_v17  ;;  %v1808_v4 = vsel %vm1765_vm4, %v1805_v8, %v1807_v41  ;;  %v2052_v31 = vrot.slane %v7203_v36, 4 }
 0x1a6   :  { %v927_v42 = vpop.f32.mrb[98].mxu1  ;;  %v7280_v17 = vmax.f32 %v1151_v23, 0.0  ;;  %v7339_v32 = vmax.f32 %v1153_v26, 0.0 }
 0x1a7   :  { %v929_v62 = vpop.f32.mrb[99].mxu1  ;;  %v7255_v10 = vpop.permute.xlu0 %1628  ;;  %v7266_v59 = vmax.f32 %v10799_v1, %v1063_v33  ;;  %v1564_v1 = vrot.slane %v7237_v25, 2 }
 0x1a8   :  { %v1064_v27 = vmax.f32 %v927_v42, %v929_v62  ;;  %v7261_v29 = vpop.permute.xlu1 %1385  ;;  %v1320_v42 = vsel %vm1275_vm2, %v1317_v2, %v1319_v56  ;;  %10801 = vst [vmem:[#allocation37_spill] sm:$0xff] %v7280_v17  ;;  %v1321_v20 = vrot.slane %v7280_v17, 1  ;;  %10809 = vst [vmem:[#allocation42_spill] sm:$0xff] %v7339_v32 }
 0x1a9   :  { %2146 = vrot.lane.b32.xlu1 %v2051_v51, %s5924_s18  ;;  %1903 = vrot.lane.b32.xlu0 %v1808_v4, %s5927_s21  ;;  %v1563_v51 = vsel %vm1520_vm3, %v1560_v58, %v1562_v7  ;;  %v2053_v4 = vsel %vm2010_vm1, %v2050_v53, %v2052_v31  ;;  %v1152_v58 = vadd.f32 %v7184_v14, %v6969_v63 }
 0x1aa   :  { %v7274_v48 = vmax.f32 %v10800_v47, %v1064_v27  ;;  %v933_v45 = vpop.f32.mrb[100].mxu1  ;;  %v1809_v47 = vrot.slane %v7237_v25, 3 }
 0x1ab   :  { %v935_v62 = vpop.f32.mrb[101].mxu1  ;;  %v7277_v3 = vpop.permute.xlu0 %1873 }
 0x1ac   :  { %v1065_v8 = vmax.f32 %v933_v45, %v935_v62  ;;  %v7282_v33 = vpop.permute.xlu1 %1630  ;;  %v1810_v63 = vsel %vm1765_vm4, %v1807_v41, %v1809_v47 }
 0x1ad   :  { %1658 = vrot.lane.b32.xlu1 %v1563_v51, %s5926_s20  ;;  %1415 = vrot.lane.b32.xlu0 %v1320_v42, %s5925_s19  ;;  %v1565_v42 = vsel %vm1520_vm3, %v1562_v7, %v1564_v1  ;;  %v7314_v7 = vmax.f32 %v1152_v58, 0.0 }
 0x1ae   :  { %v7291_v16 = vmax.f32 %v10802_v15, %v1065_v8  ;;  %v939_v2 = vpop.f32.mrb[102].mxu1 }
 0x1af   :  { %v941_v27 = vpop.f32.mrb[103].mxu1  ;;  %v7293_v23 = vpop.permute.xlu0 %2120  ;;  %10806 = vst [vmem:[#allocation40_spill] sm:$0xff] %v7314_v7  ;;  %v1323_v43 = vrot.slane %v7314_v7, 1  ;;  %v1813_v49 = vrot.slane %v7314_v7, 3 }
 0x1b0   :  { %10803 = vst [vmem:[#allocation38_spill] sm:$0xff] %v7291_v16  ;;  %v1066_v45 = vmax.f32 %v939_v2, %v941_v27  ;;  %v7299_v62 = vpop.permute.xlu1 %1875  ;;  %v2054_v2 = vrot.slane %v7237_v25, 4  ;;  %v10855_v16 = vld [vmem:[#allocation8_spill] sm:$0xff] }
 0x1b1   :  { %2148 = vrot.lane.b32.xlu1 %v2053_v4, %s5924_s18  ;;  %1660 = vrot.lane.b32.xlu0 %v1565_v42, %s5926_s20  ;;  %v1322_v4 = vsel %vm1275_vm2, %v1319_v56, %v1321_v20  ;;  %v1566_v42 = vrot.slane %v7280_v17, 2 }
 0x1b2   :  { %v7308_v53 = vmax.f32 %v10804_v22, %v1066_v45  ;;  %v945_v8 = vpop.f32.mrb[104].mxu1  ;;  %v2055_v56 = vsel %vm2010_vm1, %v2052_v31, %v2054_v2  ;;  %v10810_v31 = vmax.f32 %v6460_v38, %v6464_v40  ;;  %v7358_v38 = vmax.f32 %v1154_v34, 0.0 }
 0x1b3   :  { %v947_v51 = vpop.f32.mrb[105].mxu1  ;;  %v7310_v15 = vpop.permute.xlu0 %1877  ;;  %v10813_v40 = vmax.f32 %v6472_v44, %v6476_v46  ;;  %v1568_v34 = vrot.slane %v7314_v7, 2  ;;  %v1155_v44 = vadd.f32 %v7184_v14, %v7026_v13  ;;  %v10815_v46 = vmax.f32 %v6484_v50, %v6488_v52 }
 0x1b4   :  { %10805 = vst [vmem:[#allocation39_spill] sm:$0xff] %v7308_v53  ;;  %v1067_v27 = vmax.f32 %v945_v8, %v947_v51  ;;  %v7316_v36 = vpop.permute.xlu1 %1387  ;;  %10812 = vst [vmem:[#allocation44_spill] sm:$0xff] %v7358_v38  ;;  %v2058_v13 = vrot.slane %v7314_v7, 4  ;;  %v10636_v50 = vrot.slane %v7358_v38, 3 }
 0x1b5   :  { %1905 = vrot.lane.b32.xlu0 %v1810_v63, %s5927_s21  ;;  %1417 = vrot.lane.b32.xlu1 %v1322_v4, %s5925_s19  ;;  %v1567_v63 = vsel %vm1520_vm3, %v1564_v1, %v1566_v42  ;;  %v1811_v4 = vrot.slane %v7280_v17, 3  ;;  %v7393_v52 = vmax.f32 %v1155_v44, 0.0  ;;  %v1815_v44 = vrot.slane %v7339_v32, 3 }
 0x1b6   :  { %v7327_v41 = vmax.f32 %v10807_v28, %v1067_v27  ;;  %v951_v58 = vpop.f32.mrb[106].mxu1 }
 0x1b7   :  { %v953_v45 = vpop.f32.mrb[107].mxu1  ;;  %v7329_v22 = vpop.permute.xlu0 %1389  ;;  %v1812_v26 = vsel %vm1765_vm4, %v1809_v47, %v1811_v4  ;;  %10817 = vst [vmem:[#allocation47_spill] sm:$0xff] %v7393_v52 }
 0x1b8   :  { %10808 = vst [vmem:[#allocation41_spill] sm:$0xff] %v7327_v41  ;;  %v1068_v8 = vmax.f32 %v951_v58, %v953_v45  ;;  %v7332_v51 = vpop.permute.xlu1 %1632  ;;  %v2056_v45 = vrot.slane %v7280_v17, 4  ;;  %v2060_v41 = vrot.slane %v7339_v32, 4 }
 0x1b9   :  { %2150 = vrot.lane.b32.xlu0 %v2055_v56, %s5924_s18  ;;  %1662 = vrot.lane.b32.xlu1 %v1567_v63, %s5926_s20  ;;  %v1324_v63 = vsel %vm1275_vm2, %v1321_v20, %v1323_v43 }
 0x1ba   :  { %v7346_v27 = vmax.f32 %v10810_v31, %v1068_v8  ;;  %v957_v28 = vpop.f32.mrb[108].mxu1 }
 0x1bb   :  { %v959_v1 = vpop.f32.mrb[109].mxu1  ;;  %v7348_v58 = vpop.permute.xlu0 %1879 }
 0x1bc   :  { %10811 = vst [vmem:[#allocation43_spill] sm:$0xff] %v7346_v27  ;;  %v1069_v25 = vmax.f32 %v957_v28, %v959_v1  ;;  %v7351_v56 = vpop.permute.xlu1 %2122  ;;  %v1325_v28 = vrot.slane %v7339_v32, 1 }
 0x1bd   :  { %1907 = vrot.lane.b32.xlu1 %v1812_v26, %s5927_s21  ;;  %1419 = vrot.lane.b32.xlu0 %v1324_v63, %s5925_s19  ;;  %v2057_v26 = vsel %vm2010_vm1, %v2054_v2, %v2056_v45  ;;  %v1814_v63 = vsel %vm1765_vm4, %v1811_v4, %v1813_v49  ;;  %v1327_v2 = vrot.slane %v7358_v38, 1 }
 0x1be   :  { %v7363_v8 = vmax.f32 %v10813_v40, %v1069_v25  ;;  %v963_v31 = vpop.f32.mrb[110].mxu1 }
 0x1bf   :  { %v965_v1 = vpop.f32.mrb[111].mxu1  ;;  %v7366_v47 = vpop.permute.xlu0 %1391 }
 0x1c0   :  { %10814 = vst [vmem:[#allocation45_spill] sm:$0xff] %v7363_v8  ;;  %v1070_v20 = vmax.f32 %v963_v31, %v965_v1  ;;  %v7368_v17 = vpop.permute.xlu1 %1634  ;;  %v1326_v31 = vsel %vm1275_vm2, %v1323_v43, %v1325_v28  ;;  %v10818_v43 = vld [vmem:[#allocation24_spill] sm:$0xff] }
 0x1c1   :  { %2152 = vrot.lane.b32.xlu1 %v2057_v26, %s5924_s18  ;;  %1909 = vrot.lane.b32.xlu0 %v1814_v63, %s5927_s21  ;;  %v1569_v63 = vsel %vm1520_vm3, %v1566_v42, %v1568_v34  ;;  %v1328_v42 = vsel %vm1275_vm2, %v1325_v28, %v1327_v2  ;;  %v1329_v28 = vrot.slane %v7393_v52, 1 }
 0x1c2   :  { %v7380_v25 = vmax.f32 %v10815_v46, %v1070_v20  ;;  %v969_v40 = vpop.f32.mrb[112].mxu1  ;;  %v1156_v20 = vadd.f32 %v7184_v14, %v10818_v43  ;;  %v10819_v46 = vld [vmem:[#allocation5_spill] sm:$0xff] }
 0x1c3   :  { %v971_v4 = vpop.f32.mrb[113].mxu1  ;;  %v7384_v1 = vpop.permute.xlu0 %1881 }
 0x1c4   :  { %10816 = vst [vmem:[#allocation46_spill] sm:$0xff] %v7380_v25  ;;  %v1071_v8 = vmax.f32 %v969_v40, %v971_v4  ;;  %v7386_v26 = vpop.permute.xlu1 %2124  ;;  %v10820_v25 = vld [vmem:[#allocation6_spill] sm:$0xff]  ;;  %v7412_v43 = vmax.f32 %v1156_v20, 0.0  ;;  %v1157_v20 = vadd.f32 %v7184_v14, %v7064_v21 }
 0x1c5   :  { %1664 = vrot.lane.b32.xlu1 %v1569_v63, %s5926_s20  ;;  %1421 = vrot.lane.b32.xlu0 %v1326_v31, %s5925_s19  ;;  %v10821_v40 = vmax.f32 %v10819_v46, %v10820_v25  ;;  %v2059_v31 = vsel %vm2010_vm1, %v2056_v45, %v2058_v13  ;;  %v1570_v63 = vrot.slane %v7339_v32, 2 }
 0x1c6   :  { %10823 = vst [vmem:[#allocation5_spill] sm:$0xff] %v7412_v43 }
 0x1c7   :  { %v7400_v4 = vmax.f32 %v10821_v40, %v1071_v8  ;;  %v7403_v27 = vpop.permute.xlu0 %1393  ;;  %v1818_v8 = vsel %vm1765_vm4, %v1815_v44, %v10636_v50  ;;  %v1571_v45 = vsel %vm1520_vm3, %v1568_v34, %v1570_v63  ;;  %v1330_v40 = vsel %vm1275_vm2, %v1327_v2, %v1329_v28 }
 0x1c8   :  { %v7405_v7 = vpop.permute.xlu1 %1636  ;;  %v7437_v34 = vmax.f32 %v1157_v20, 0.0 }
 0x1c9   :  { %10822 = vst [vmem:[#allocation24_spill] sm:$0xff] %v7400_v4  ;;  %2154 = vrot.lane.b32.xlu1 %v2059_v31, %s5924_s18  ;;  %1423 = vrot.lane.b32.xlu0 %v1328_v42, %s5925_s19  ;;  %v1331_v42 = vrot.slane %v7412_v43, 1  ;;  %v1816_v4 = vsel %vm1765_vm4, %v1813_v49, %v1815_v44  ;;  %v2061_v49 = vsel %vm2010_vm1, %v2058_v13, %v2060_v41  ;;  %v1572_v44 = vrot.slane %v7358_v38, 2 }
 0x1ca   :  { %10827 = vst [vmem:[#allocation50_spill] sm:$0xff] %v7437_v34 }
 0x1cb   :  { %v7418_v25 = vpop.permute.xlu0 %1883  ;;  %v1332_v2 = vsel %vm1275_vm2, %v1329_v28, %v1331_v42  ;;  %v1573_v13 = vsel %vm1520_vm3, %v1570_v63, %v1572_v44  ;;  %v1574_v63 = vrot.slane %v7393_v52, 2 }
 0x1cc   :  { %10824 = vst [vmem:[#allocation6_spill] sm:$0xff] %v7418_v25  ;;  %v7420_v46 = vpop.permute.xlu1 %2126 }
 0x1cd   :  { %1666 = vrot.lane.b32.xlu1 %v1571_v45, %s5926_s20  ;;  %1913 = vrot.lane.b32.xlu0 %v1818_v8, %s5927_s21  ;;  %v10828_v8 = vld [vmem:[#allocation26_spill] sm:$0xff]  ;;  %v10638_v45 = vrot.slane %v7412_v43, 3 }
 0x1ce   :  { %v1158_v21 = vadd.f32 %v7184_v14, %v10828_v8 }
 0x1cf   :  { %v7429_v31 = vpop.permute.xlu0 %1395 }
 0x1d0   :  { %10825 = vst [vmem:[#allocation48_spill] sm:$0xff] %v7429_v31  ;;  %v7431_v50 = vpop.permute.xlu1 %1638  ;;  %v7452_v20 = vmax.f32 %v1158_v21, 0.0  ;;  %v1159_v21 = vadd.f32 %v7184_v14, %v7102_v18  ;;  %v1160_v18 = vadd.f32 %v7184_v14, %v7121_v55 }
 0x1d1   :  { %10826 = vst [vmem:[#allocation49_spill] sm:$0xff] %v7431_v50  ;;  %1911 = vrot.lane.b32.xlu1 %v1816_v4, %s5927_s21  ;;  %1425 = vrot.lane.b32.xlu0 %v1330_v40, %s5925_s19  ;;  %v1819_v4 = vrot.slane %v7393_v52, 3  ;;  %v1333_v40 = vrot.slane %v7437_v34, 1 }
 0x1d2   :  { %10831 = vst [vmem:[#allocation52_spill] sm:$0xff] %v7452_v20 }
 0x1d3   :  { %v7443_v53 = vpop.permute.xlu0 %1885  ;;  %v1822_v28 = vsel %vm1765_vm4, %v1819_v4, %v10638_v45 }
 0x1d4   :  { %10829 = vst [vmem:[#allocation26_spill] sm:$0xff] %v7443_v53  ;;  %v7445_v31 = vpop.permute.xlu1 %2128  ;;  %v2062_v53 = vrot.slane %v7358_v38, 4 }
 0x1d5   :  { %10830 = vst [vmem:[#allocation51_spill] sm:$0xff] %v7445_v31  ;;  %2156 = vrot.lane.b32.xlu1 %v2061_v49, %s5924_s18  ;;  %1427 = vrot.lane.b32.xlu0 %v1332_v2, %s5925_s19  ;;  %v1334_v2 = vsel %vm1275_vm2, %v1331_v42, %v1333_v40  ;;  %v1335_v49 = vrot.slane %v7452_v20, 1  ;;  %v10640_v31 = vrot.slane %v7437_v34, 3 }
 0x1d7   :  { %v7458_v8 = vpop.permute.xlu0 %1397  ;;  %v1336_v42 = vsel %vm1275_vm2, %v1333_v40, %v1335_v49 }
 0x1d8   :  { %10832 = vst [vmem:[#allocation53_spill] sm:$0xff] %v7458_v8  ;;  %v7460_v32 = vpop.permute.xlu1 %1640 }
 0x1d9   :  { %10833 = vst [vmem:[#allocation54_spill] sm:$0xff] %v7460_v32  ;;  %1668 = vrot.lane.b32.xlu1 %v1573_v13, %s5926_s20  ;;  %1917 = vrot.lane.b32.xlu0 %v1822_v28, %s5927_s21  ;;  %v2063_v32 = vsel %vm2010_vm1, %v2060_v41, %v2062_v53  ;;  %v7478_v28 = vmax.f32 %v1159_v21, 0.0  ;;  %v10639_v13 = vrot.slane %v7452_v20, 3  ;;  %v1575_v41 = vsel %vm1520_vm3, %v1572_v44, %v1574_v63 }
 0x1da   :  { %v10842_v44 = vrot.slane %v7358_v38, 3 }
 0x1db   :  { %v7470_v45 = vpop.permute.xlu0 %1887  ;;  %10836 = vst [vmem:[#allocation57_spill] sm:$0xff] %v7478_v28  ;;  %v1826_v55 = vsel %vm1765_vm4, %v10640_v31, %v10639_v13  ;;  %v1337_v40 = vrot.slane %v7478_v28, 1 }
 0x1dc   :  { %10834 = vst [vmem:[#allocation55_spill] sm:$0xff] %v7470_v45  ;;  %v7472_v8 = vpop.permute.xlu1 %2130 }
 0x1dd   :  { %10835 = vst [vmem:[#allocation56_spill] sm:$0xff] %v7472_v8  ;;  %2158 = vrot.lane.b32.xlu1 %v2063_v32, %s5924_s18  ;;  %1429 = vrot.lane.b32.xlu0 %v1334_v2, %s5925_s19  ;;  %v7492_v32 = vmax.f32 %v1160_v18, 0.0  ;;  %v1161_v18 = vadd.f32 %v7184_v14, %v7138_v12  ;;  %v1338_v13 = vsel %vm1275_vm2, %v1335_v49, %v1337_v40 }
 0x1de   :  { %v1162_v12 = vadd.f32 %v7184_v14, %v7155_v37  ;;  %v5548_v37 = vunpack.i.l.bf16 %v7196_v5 }
 0x1df   :  { %v7484_v45 = vpop.permute.xlu0 %1399  ;;  %10839 = vst [vmem:[#allocation60_spill] sm:$0xff] %v7492_v32  ;;  %v1339_v31 = vrot.slane %v7492_v32, 1 }
 0x1e0   :  { %10837 = vst [vmem:[#allocation58_spill] sm:$0xff] %v7484_v45  ;;  %v7486_v8 = vpop.permute.xlu1 %1642  ;;  %v5543_v45 = vunpack.i.l.bf16 %v7223_v0 }
 0x1e1   :  { %10838 = vst [vmem:[#allocation59_spill] sm:$0xff] %v7486_v8  ;;  %1670 = vrot.lane.b32.xlu1 %v1575_v41, %s5926_s20  ;;  %1431 = vrot.lane.b32.xlu0 %v1336_v42, %s5925_s19  ;;  %v1820_v41 = vsel %vm1765_vm4, %v10842_v44, %v1819_v4  ;;  %v2064_v42 = vrot.slane %v7393_v52, 4  ;;  %v1576_v44 = vrot.slane %v7412_v43, 2  ;;  %v7521_v52 = vmax.f32 %v1161_v18, 0.0 }
 0x1e2   :  { %v1340_v49 = vsel %vm1275_vm2, %v1337_v40, %v1339_v31  ;;  %v1578_v8 = vrot.slane %v7437_v34, 2 }
 0x1e3   :  { %v7500_v21 = vpop.permute.xlu0 %1889  ;;  %v2065_v4 = vsel %vm2010_vm1, %v2062_v53, %v2064_v42  ;;  %10845 = vst [vmem:[#allocation65_spill] sm:$0xff] %v7521_v52  ;;  %v1341_v40 = vrot.slane %v7521_v52, 1  ;;  %v10850_v53 = vrot.slane %v7492_v32, 3 }
 0x1e4   :  { %10840 = vst [vmem:[#allocation61_spill] sm:$0xff] %v7500_v21  ;;  %v7502_v2 = vpop.permute.xlu1 %2132 }
 0x1e5   :  { %10841 = vst [vmem:[#allocation62_spill] sm:$0xff] %v7502_v2  ;;  %1915 = vrot.lane.b32.xlu1 %v1820_v41, %s5927_s21  ;;  %1921 = vrot.lane.b32.xlu0 %v1826_v55, %s5927_s21  ;;  %v7542_v55 = vmax.f32 %v1162_v12, 0.0  ;;  %v5523_v12 = vunpack.i.l.bf16 %v7157_v35 }
 0x1e7   :  { %v7514_v21 = vpop.permute.xlu0 %1401  ;;  %10849 = vst [vmem:[#allocation67_spill] sm:$0xff] %v7542_v55 }
 0x1e8   :  { %10843 = vst [vmem:[#allocation63_spill] sm:$0xff] %v7514_v21  ;;  %v7517_v38 = vpop.permute.xlu1 %1644  ;;  %v10847_v21 = vld [vmem:[#allocation10_spill] sm:$0xff] }
 0x1e9   :  { %10844 = vst [vmem:[#allocation64_spill] sm:$0xff] %v7517_v38  ;;  %2160 = vrot.lane.b32.xlu1 %v2065_v4, %s5924_s18  ;;  %1433 = vrot.lane.b32.xlu0 %v1338_v13, %s5925_s19  ;;  %v2259_v18 = vsel %vm2255_vm5, %v10847_v21, %v5543_v45  ;;  %v1577_v4 = vsel %vm1520_vm3, %v1574_v63, %v1576_v44  ;;  %v10643_v13 = vrot.slane %v7478_v28, 3 }
 0x1ea   :  { %v2309_v63 = vsel %vm2305_vm6, %v2259_v18, %v5548_v37  ;;  %v5528_v18 = vunpack.i.l.bf16 %v7174_v61  ;;  %v5558_v37 = vunpack.i.l.bf16 %v7240_v60 }
 0x1eb   :  { %v7529_v41 = vpop.permute.xlu0 %1891  ;;  %v1830_v45 = vsel %vm1765_vm4, %v10643_v13, %v10850_v53  ;;  %v5529_v53 = vunpack.i.h.bf16 %v7174_v61  ;;  %v5538_v61 = vunpack.i.l.bf16 %v7206_v30 }
 0x1ec   :  { %10846 = vst [vmem:[#allocation66_spill] sm:$0xff] %v7529_v41  ;;  %v7534_v38 = vpop.permute.xlu1 %2134  ;;  %v5524_v41 = vunpack.i.h.bf16 %v7157_v35  ;;  %v5534_v35 = vunpack.i.h.bf16 %v7194_v39 }
 0x1ed   :  { %10848 = vst [vmem:[#allocation10_spill] sm:$0xff] %v7534_v38  ;;  %1672 = vrot.lane.b32.xlu1 %v1577_v4, %s5926_s20  ;;  %1435 = vrot.lane.b32.xlu0 %v1340_v49, %s5925_s19  ;;  %v10852_v4 = vrot.slane %v7412_v43, 4  ;;  %v5553_v38 = vunpack.i.l.bf16 %v7208_v11 }
 0x1ef   :  { %v7550_v21 = vpop.permute.xlu0 %1403  ;;  %v2067_v49 = vsel %vm2010_vm1, %v2064_v42, %v10852_v4  ;;  %v1342_v42 = vsel %vm1275_vm2, %v1339_v31, %v1341_v40  ;;  %v5533_v4 = vunpack.i.l.bf16 %v7194_v39  ;;  %v2359_v13 = vsel %vm2355_vm7, %v2309_v63, %v5553_v38 }
 0x1f0   :  { %10851 = vst [vmem:[#allocation68_spill] sm:$0xff] %v7550_v21  ;;  %v7558_v2 = vpop.permute.xlu1 %1646  ;;  %v2257_v31 = vsel %vm2255_vm5, %v10855_v16, %v5523_v12  ;;  %v1579_v39 = vsel %vm1520_vm3, %v1576_v44, %v1578_v8  ;;  %v7585_v21 = vsel %vm2405_vm8, %v2359_v13, %v5558_v37  ;;  %v10857_v12 = vrot.slane %v7542_v55, 1 }
 0x1f1   :  { %10853 = vst [vmem:[#allocation69_spill] sm:$0xff] %v7558_v2  ;;  %2162 = vrot.lane.b32.xlu1 %v2067_v49, %s5924_s18  ;;  %1925 = vrot.lane.b32.xlu0 %v1830_v45, %s5927_s21  ;;  %v5539_v2 = vunpack.i.h.bf16 %v7206_v30  ;;  %v10854_v49 = vld [vmem:[#allocation9_spill] sm:$0xff]  ;;  %v2307_v38 = vsel %vm2305_vm6, %v2257_v31, %v5528_v18  ;;  %v10644_v30 = vrot.slane %v7542_v55, 3  ;;  %v10645_v37 = vrot.slane %v7521_v52, 3 }
 0x1f2   :  { %v2258_v45 = vsel %vm2255_vm5, %v10854_v49, %v5524_v41  ;;  %10856 = vst [vmem:[#allocation9_spill] sm:$0xff] %v7585_v21  ;;  %v2357_v41 = vsel %vm2355_vm7, %v2307_v38, %v5533_v4  ;;  %v1344_v44 = vsel %vm1275_vm2, %v1341_v40, %v10857_v12  ;;  %v10647_v4 = vrot.slane %v7585_v21, 6 }
 0x1f3   :  { %v7573_v25 = vpop.permute.xlu0 %1893  ;;  %v2308_v63 = vsel %vm2305_vm6, %v2258_v45, %v5529_v53  ;;  %v7596_v18 = vsel %vm2405_vm8, %v2357_v41, %v5538_v61  ;;  %v10860_v49 = vrot.slane %v7437_v34, 3  ;;  %v10861_v40 = vrot.slane %v7412_v43, 3 }
 0x1f4   :  { %v7579_v50 = vpop.permute.xlu1 %2136  ;;  %v2358_v16 = vsel %vm2355_vm7, %v2308_v63, %v5534_v35  ;;  %10858 = vst [vmem:[#allocation8_spill] sm:$0xff] %v7596_v18  ;;  %v2499_v45 = vrot.slane %v7596_v18, 6  ;;  %v1164_v38 = vadd.f32 %v7184_v14, %v7192_v57  ;;  %v10863_v12 = vrot.slane %v7412_v43, 4  ;;  %v10864_v57 = vld [vmem:[#allocation11_spill] sm:$0xff]  ;;  %v10866_v43 = vld [vmem:[#allocation12_spill] sm:$0xff] }
 0x1f5   :  { %1674 = vrot.lane.b32.xlu1 %v1579_v39, %s5926_s20  ;;  %1437 = vrot.lane.b32.xlu0 %v1342_v42, %s5925_s19  ;;  %v7599_v13 = vsel %vm2405_vm8, %v2358_v16, %v5539_v2  ;;  %v1163_v42 = vadd.f32 %v7184_v14, %v7172_v19  ;;  %v1824_v61 = vsel %vm1765_vm4, %v10861_v40, %v10860_v49  ;;  %v2068_v2 = vrot.slane %v7437_v34, 4 }
 0x1f6   :  { %10859 = vst [vmem:[#allocation70_spill] sm:$0xff] %v7599_v13  ;;  %v1834_v19 = vsel %vm1765_vm4, %v10645_v37, %v10644_v30  ;;  %v2500_v31 = vrot.slane %v7599_v13, 6  ;;  %v5544_v39 = vunpack.i.h.bf16 %v7223_v0  ;;  %v1580_v49 = vrot.slane %v7452_v20, 2 }
 0x1f7   :  { %v7601_v53 = vpop.permute.xlu0 %1405  ;;  %v7629_v41 = vmax.f32 %v1163_v42, 0.0  ;;  %v7644_v40 = vmax.f32 %v1164_v38, 0.0  ;;  %v5549_v30 = vunpack.i.h.bf16 %v7196_v5 }
 0x1f8   :  { %v7607_v35 = vpop.permute.xlu1 %1648  ;;  %v2503_v0 = vsel %vm2498_vm9, %v2500_v31, %v10647_v4  ;;  %v2260_v42 = vsel %vm2255_vm5, %v10864_v57, %v5544_v39  ;;  %v2261_v4 = vsel %vm2255_vm5, %v10866_v43, %v7225_v9  ;;  %v5554_v9 = vunpack.i.h.bf16 %v7208_v11 }
 0x1f9   :  { %1919 = vrot.lane.b32.xlu1 %v1824_v61, %s5927_s21  ;;  %1439 = vrot.lane.b32.xlu0 %v1344_v44, %s5925_s19  ;;  %10862 = vst [vmem:[#allocation71_spill] sm:$0xff] %v7629_v41  ;;  %v2069_v44 = vsel %vm2010_vm1, %v10863_v12, %v2068_v2  ;;  %10865 = vst [vmem:[#allocation11_spill] sm:$0xff] %v7644_v40  ;;  %v2501_v61 = vsel %vm2498_vm9, %v2499_v45, %v2500_v31  ;;  %v1345_v39 = vrot.slane %v7629_v41, 1 }
 0x1fa   :  { %v5560_v37 = vpack.i.bf16 %v2503_v0, %v2501_v61  ;;  %v2310_v38 = vsel %vm2305_vm6, %v2260_v42, %v5549_v30  ;;  %v2311_v5 = vsel %vm2305_vm6, %v2261_v4, %v7255_v10  ;;  %v5559_v45 = vunpack.i.h.bf16 %v7240_v60 }
 0x1fb   :  { %v7627_v63 = vpop.permute.xlu0 %1895  ;;  %v2361_v43 = vsel %vm2355_vm7, %v2311_v5, %v7277_v3  ;;  %v2360_v30 = vsel %vm2355_vm7, %v2310_v38, %v5554_v9  ;;  %v10867_v4 = vrot.slane %v7542_v55, 1  ;;  %v1582_v11 = vrot.slane %v7478_v28, 2 }
 0x1fc   :  { %v7631_v16 = vpop.permute.xlu1 %2138  ;;  %v7680_v3 = vsel %vm2405_vm8, %v2361_v43, %v7242_v24  ;;  %v7689_v57 = vsel %vm2405_vm8, %v2360_v30, %v5559_v45  ;;  %v10650_v38 = vrot.slane %v7629_v41, 3  ;;  %v1165_v45 = vadd.f32 %v7184_v14, %v7213_v6 }
 0x1fd   :  { %2164 = vrot.lane.b32.xlu1 %v2069_v44, %s5924_s18  ;;  %1929 = vrot.lane.b32.xlu0 %v1834_v19, %s5927_s21  ;;  %v1581_v19 = vsel %vm1520_vm3, %v1578_v8, %v1580_v49  ;;  %v2070_v44 = vrot.slane %v7452_v20, 4  ;;  %v10651_v8 = vrot.slane %v7644_v40, 1  ;;  %10868 = vst [vmem:[#allocation12_spill] sm:$0xff] %v7680_v3  ;;  %10869 = vst [vmem:[#allocation72_spill] sm:$0xff] %v7689_v57  ;;  %v10653_v61 = vrot.slane %v7680_v3, 4 }
 0x1fe   :  { %v1583_v24 = vsel %vm1520_vm3, %v1580_v49, %v1582_v11  ;;  %v2712_v5 = vrot.slane %v7689_v57, 4  ;;  %v2072_v49 = vrot.slane %v7478_v28, 4  ;;  %v2504_v6 = vrot.slane %v7689_v57, 6 }
 0x1ff   :  { %v7648_v12 = vpop.permute.xlu0 %1407  ;;  %v2071_v10 = vsel %vm2010_vm1, %v2068_v2, %v2070_v44  ;;  %v1348_v60 = vsel %vm1275_vm2, %v1345_v39, %v10651_v8  ;;  %v10649_v2 = vrot.slane %v7644_v40, 3  ;;  %v7729_v30 = vmax.f32 %v1165_v45, 0.0 }
 0x200   :  { %v7653_v34 = vpop.permute.xlu1 %1650 }
 0x201   :  { %1676 = vrot.lane.b32.xlu1 %v1581_v19, %s5926_s20  ;;  %5561 = vrot.lane.b32.xlu0 %v5560_v37, %s5928_s24  ;;  %v1346_v37 = vsel %vm1275_vm2, %v10867_v4, %v1345_v39  ;;  %v2711_v39 = vrot.slane %v7585_v21, 4  ;;  %v1838_v9 = vsel %vm1765_vm4, %v10650_v38, %v10649_v2  ;;  %v10870_v4 = vrot.slane %v7478_v28, 3  ;;  %10872 = vst [vmem:[#allocation73_spill] sm:$0xff] %v7729_v30 }
 0x203   :  { %v7668_v31 = vpop.permute.xlu0 %1897  ;;  %v2713_v2 = vsel %vm2010_vm1, %v2711_v39, %v2712_v5  ;;  %v10874_v39 = vld [vmem:[#allocation35_spill] sm:$0xff] }
 0x204   :  { %v7671_v0 = vpop.permute.xlu1 %2140 }
 0x205   :  { %2166 = vrot.lane.b32.xlu1 %v2071_v10, %s5924_s18  ;;  %1441 = vrot.lane.b32.xlu0 %v1346_v37, %s5925_s19  ;;  %v10871_v37 = vrot.slane %v7452_v20, 3 }
 0x207   :  { %v7691_v42 = vpop.permute.xlu0 %1409 }
 0x208   :  { %v7694_v19 = vpop.permute.xlu1 %1652 }
 0x209   :  { %1678 = vrot.lane.b32.xlu1 %v1583_v24, %s5926_s20  ;;  %1443 = vrot.lane.b32.xlu0 %v1348_v60, %s5925_s19  ;;  %v1828_v60 = vsel %vm1765_vm4, %v10871_v37, %v10870_v4  ;;  %v2715_v24 = vsel %vm2010_vm1, %v2712_v5, %v10653_v61  ;;  %v2073_v4 = vsel %vm2010_vm1, %v2070_v44, %v2072_v49  ;;  %v1584_v37 = vrot.slane %v7492_v32, 2 }
 0x20a   :  { %v5565_v8 = vpack.i.bf16 %v2715_v24, %v2713_v2  ;;  %v10873_v61 = vrot.slane %v7680_v3, 6  ;;  %v1166_v2 = vadd.f32 %v7184_v14, %v10874_v39  ;;  %v10875_v5 = vrot.slane %v7585_v21, 6 }
 0x20b   :  { %v7707_v43 = vpop.permute.xlu0 %1899  ;;  %v1585_v28 = vsel %vm1520_vm3, %v1582_v11, %v1584_v37  ;;  %v10658_v39 = vmov 0.0|0.0  }
 0x20c   :  { %v7713_v10 = vpop.permute.xlu1 %2142  ;;  %5357 = vmatprep.subr.bf16.mxu0 %v10658_v39  ;;  %v1586_v39 = vrot.slane %v7521_v52, 2 }
 0x20d   :  { %1923 = vrot.lane.b32.xlu1 %v1828_v60, %s5927_s21  ;;  %1933 = vrot.lane.b32.xlu0 %v1838_v9, %s5927_s21  ;;  %v2507_v60 = vsel %vm2498_vm9, %v2504_v6, %v10873_v61  ;;  %v2505_v9 = vsel %vm2498_vm9, %v10875_v5, %v2504_v6  ;;  %v2074_v61 = vrot.slane %v7492_v32, 4  ;;  %v3430_v6 = vld [vmem:[%s10594_s3 + $0x8] sm:$0xff] }
 0x20e   :  { %v5570_v44 = vpack.i.bf16 %v2507_v60, %v2505_v9  ;;  %v7760_v60 = vmax.f32 %v1166_v2, 0.0  ;;  %v10877_v5 = vld [vmem:[#allocation14_spill] sm:$0xff]  ;;  %v10878_v2 = vrot.slane %v7644_v40, 1 }
 0x20f   :  { %v7727_v38 = vpop.permute.xlu0 %1411  ;;  %v2075_v21 = vsel %vm2010_vm1, %v2072_v49, %v2074_v61  ;;  %v3431_v49 = vld [vmem:[%s10594_s3 + $0x10] sm:$0xff] }
 0x210   :  { %v7731_v20 = vpop.permute.xlu1 %1654  ;;  %10876 = vst [vmem:[#allocation35_spill] sm:$0xff] %v7760_v60 }
 0x211   :  { %2168 = vrot.lane.b32.xlu1 %v2073_v4, %s5924_s18  ;;  %5566 = vrot.lane.b32.xlu0 %v5565_v8, %s5929_s25  ;;  %v1349_v4 = vrot.slane %v7729_v30, 1  ;;  %v3429_v8 = vld [vmem:[%s10594_s3] sm:$0xff] }
 0x212   :  { %v5358_v11 = vpack.c.bf16 %v3430_v6, %v3429_v8  ;;  %v10880_v6 = vmov 0.0|0.0  }
 0x213   :  { %v7745_v45 = vpop.permute.xlu0 %1901  ;;  %v1350_v13 = vsel %vm1275_vm2, %v10878_v2, %v1349_v4 }
 0x214   :  { %v7747_v24 = vpop.permute.xlu1 %2144  ;;  %5359 = vmatpush1.bf16.msra.mxu0 %v5358_v11  ;;  %v3432_v11 = vld [vmem:[%s10594_s3 + $0x18] sm:$0xff] }
 0x215   :  { %1680 = vrot.lane.b32.xlu1 %v1585_v28, %s5926_s20  ;;  %5571 = vrot.lane.b32.xlu0 %v5570_v44, %s5928_s24  ;;  %v2263_v28 = vsel %vm2255_vm5, %v10877_v5, %v7316_v36  ;;  %v10879_v36 = vld [vmem:[#allocation13_spill] sm:$0xff] }
 0x216   :  { %v2313_v44 = vsel %vm2305_vm6, %v2263_v28, %v7332_v51  ;;  %v2262_v8 = vsel %vm2255_vm5, %v10879_v36, %v7261_v29  ;;  %5360 = vmatprep.subr.bf16.mxu0 %v10880_v6  ;;  %v5361_v29 = vpack.c.bf16 %v3432_v11, %v3431_v49  ;;  %v1587_v51 = vsel %vm1520_vm3, %v1584_v37, %v1586_v39 }
 0x217   :  { %v7766_v9 = vpop.permute.xlu0 %1413  ;;  %v1588_v49 = vrot.slane %v7542_v55, 2 }
 0x218   :  { %v7770_v57 = vpop.permute.xlu1 %1656  ;;  %5362 = vmatpush1.bf16.msra.mxu0 %v5361_v29  ;;  %v10662_v29 = vrot.slane %v7760_v60, 3 }
 0x219   :  { %2170 = vrot.lane.b32.xlu1 %v2075_v21, %s5924_s18  ;;  %1445 = vrot.lane.b32.xlu0 %v1350_v13, %s5925_s19  ;;  %v2312_v21 = vsel %vm2305_vm6, %v2262_v8, %v7282_v33  ;;  %v2363_v13 = vsel %vm2355_vm7, %v2313_v44, %v7310_v15  ;;  %v3433_v33 = vld [vmem:[%s10594_s3 + $0x20] sm:$0xff]  ;;  %v10883_v15 = vrot.slane %v7760_v60, 1 }
 0x21a   :  { %v2362_v28 = vsel %vm2355_vm7, %v2312_v21, %v7299_v62  ;;  %v7800_v2 = vsel %vm2405_vm8, %v2363_v13, %v7351_v56  ;;  %v3434_v62 = vld [vmem:[%s10594_s3 + $0x28] sm:$0xff]  ;;  %5363 = vmatprep.subr.bf16.mxu0 %v10880_v6  ;;  %v10885_v21 = vrot.slane %v7521_v52, 3 }
 0x21b   :  { %v7794_v5 = vpop.permute.xlu0 %1903  ;;  %10882 = vst [vmem:[#allocation13_spill] sm:$0xff] %v7800_v2  ;;  %v1352_v56 = vsel %vm1275_vm2, %v1349_v4, %v10883_v15  ;;  %v5364_v44 = vpack.c.bf16 %v3434_v62, %v3433_v33  ;;  %v7819_v37 = vsel %vm2405_vm8, %v2362_v28, %v7293_v23  ;;  %v10886_v4 = vrot.slane %v7492_v32, 3  ;;  %v3435_v33 = vld [vmem:[%s10594_s3 + $0x30] sm:$0xff]  ;;  %v3436_v62 = vld [vmem:[%s10594_s3 + $0x38] sm:$0xff] }
 0x21c   :  { %10881 = vst [vmem:[#allocation14_spill] sm:$0xff] %v7794_v5  ;;  %v7802_v36 = vpop.permute.xlu1 %2146  ;;  %10884 = vst [vmem:[#allocation74_spill] sm:$0xff] %v7819_v37  ;;  %v2716_v23 = vrot.slane %v7819_v37, 4  ;;  %v10663_v28 = vrot.slane %v7729_v30, 3  ;;  %v10889_v32 = vrot.slane %v7800_v2, 4  ;;  %v2078_v5 = vrot.slane %v7542_v55, 4 }
 0x21d   :  { %1682 = vrot.lane.b32.xlu1 %v1587_v51, %s5926_s20  ;;  %3133 = vrot.lane.b32.xlu0 %v7800_v2, %s5924_s18  ;;  %v2076_v51 = vrot.slane %v7521_v52, 4  ;;  %v1832_v13 = vsel %vm1765_vm4, %v10886_v4, %v10885_v21 }
 0x21e   :  { %5365 = vmatpush1.bf16.msra.mxu0 %v5364_v44  ;;  %v1842_v44 = vsel %vm1765_vm4, %v10663_v28, %v10662_v29  ;;  %v2719_v52 = vsel %vm2010_vm1, %v2716_v23, %v10889_v32  ;;  %v10890_v29 = vrot.slane %v7680_v3, 4 }
 0x21f   :  { %v7821_v8 = vpop.permute.xlu0 %1415  ;;  %v2077_v21 = vsel %vm2010_vm1, %v2074_v61, %v2076_v51  ;;  %5366 = vmatprep.subr.bf16.mxu0 %v10880_v6  ;;  %v3437_v61 = vld [vmem:[%s10594_s3 + $0x40] sm:$0xff] }
 0x220   :  { %v7826_v11 = vpop.permute.xlu1 %1658  ;;  %v2717_v28 = vsel %vm2010_vm1, %v10890_v29, %v2716_v23 }
 0x221   :  { %1927 = vrot.lane.b32.xlu1 %v1832_v13, %s5927_s21  ;;  %1447 = vrot.lane.b32.xlu0 %v1352_v56, %s5925_s19  ;;  %v5367_v56 = vpack.c.bf16 %v3436_v62, %v3435_v33  ;;  %v3438_v33 = vld [vmem:[%s10594_s3 + $0x48] sm:$0xff]  ;;  %v2508_v62 = vrot.slane %v7819_v37, 6 }
 0x222   :  { %v5370_v32 = vpack.c.bf16 %v3438_v33, %v3437_v61 }
 0x223   :  { %v7844_v15 = vpop.permute.xlu0 %1660  ;;  %5368 = vmatpush1.bf16.msra.mxu0 %v5367_v56 }
 0x224   :  { %10887 = vst [vmem:[#allocation75_spill] sm:$0xff] %v7844_v15  ;;  %v7849_v13 = vpop.permute.xlu1 %2148  ;;  %5369 = vmatprep.subr.bf16.mxu0 %v10880_v6  ;;  %v10892_v15 = vrot.slane %v7800_v2, 6 }
 0x225   :  { %10888 = vst [vmem:[#allocation76_spill] sm:$0xff] %v7849_v13  ;;  %2172 = vrot.lane.b32.xlu1 %v2077_v21, %s5924_s18  ;;  %1937 = vrot.lane.b32.xlu0 %v1842_v44, %s5927_s21  ;;  %v5575_v21 = vpack.i.bf16 %v2719_v52, %v2717_v28  ;;  %v1167_v44 = vadd.f32 %v7184_v14, %v7247_v54  ;;  %v3439_v52 = vld [vmem:[%s10594_s3 + $0x50] sm:$0xff]  ;;  %v3440_v54 = vld [vmem:[%s10594_s3 + $0x58] sm:$0xff] }
 0x226   :  { %v1589_v13 = vsel %vm1520_vm3, %v1586_v39, %v1588_v49  ;;  %v2511_v29 = vsel %vm2498_vm9, %v2508_v62, %v10892_v15  ;;  %v10893_v39 = vrot.slane %v7680_v3, 6  ;;  %v5373_v28 = vpack.c.bf16 %v3440_v54, %v3439_v52  ;;  %v10894_v15 = vld [vmem:[#allocation15_spill] sm:$0xff] }
 0x227   :  { %v7872_v4 = vpop.permute.xlu0 %1905  ;;  %5371 = vmatpush1.bf16.msra.mxu0 %v5370_v32  ;;  %v2264_v56 = vsel %vm2255_vm5, %v10894_v15, %v7329_v22  ;;  %v7901_v33 = vmax.f32 %v1167_v44, 0.0  ;;  %v1590_v32 = vrot.slane %v7629_v41, 2  ;;  %v3441_v22 = vld [vmem:[%s10594_s3 + $0x60] sm:$0xff]  ;;  %v3442_v44 = vld [vmem:[%s10594_s3 + $0x68] sm:$0xff]  ;;  %v1168_v52 = vadd.f32 %v7184_v14, %v7266_v59  ;;  %v3444_v14 = vld [vmem:[%s10594_s3 + $0x78] sm:$0xff] }
 0x228   :  { %v7877_v18 = vpop.permute.xlu1 %1417  ;;  %v2509_v23 = vsel %vm2498_vm9, %v10893_v39, %v2508_v62  ;;  %5372 = vmatprep.subr.bf16.mxu0 %v10880_v6  ;;  %v2079_v62 = vsel %vm2010_vm1, %v2076_v51, %v2078_v5  ;;  %v5376_v51 = vpack.c.bf16 %v3442_v44, %v3441_v22  ;;  %v10899_v22 = vrot.slane %v7629_v41, 3 }
 0x229   :  { %10891 = vst [vmem:[#allocation77_spill] sm:$0xff] %v7877_v18  ;;  %1684 = vrot.lane.b32.xlu1 %v1589_v13, %s5926_s20  ;;  %5576 = vrot.lane.b32.xlu0 %v5575_v21, %s5929_s25  ;;  %v5580_v61 = vpack.i.bf16 %v2511_v29, %v2509_v23  ;;  %10895 = vst [vmem:[#allocation15_spill] sm:$0xff] %v7901_v33  ;;  %v2314_v21 = vsel %vm2305_vm6, %v2264_v56, %v7368_v17  ;;  %v2080_v56 = vrot.slane %v7629_v41, 4  ;;  %v8049_v41 = vld [vmem:[%s10593_s2] ss:$0 sm:$0xff] }
 0x22a   :  { %v2364_v17 = vsel %vm2355_vm7, %v2314_v21, %v7348_v58  ;;  %v1591_v23 = vsel %vm1520_vm3, %v1588_v49, %v1590_v32  ;;  %v3443_v58 = vld [vmem:[%s10594_s3 + $0x70] sm:$0xff]  ;;  %v10900_v44 = vrot.slane %v7542_v55, 3 }
 0x22b   :  { %v7898_v13 = vpop.permute.xlu0 %2150  ;;  %5374 = vmatpush1.bf16.msra.mxu0 %v5373_v28  ;;  %v7926_v54 = vsel %vm2405_vm8, %v2364_v17, %v7386_v26  ;;  %v1353_v28 = vrot.slane %v7901_v33, 1  ;;  %v5379_v59 = vpack.c.bf16 %v3444_v14, %v3443_v58  ;;  %v10897_v26 = vld [vmem:[#allocation16_spill] sm:$0xff] }
 0x22c   :  { %v7905_v18 = vpop.permute.xlu1 %1662  ;;  %5375 = vmatprep.subr.bf16.mxu0 %v10880_v6  ;;  %10896 = vst [vmem:[#allocation78_spill] sm:$0xff] %v7926_v54  ;;  %v2265_v49 = vsel %vm2255_vm5, %v10897_v26, %v7366_v47  ;;  %v1836_v17 = vsel %vm1765_vm4, %v10900_v44, %v10899_v22  ;;  %v10901_v47 = vrot.slane %v7760_v60, 1  ;;  %v1592_v22 = vrot.slane %v7644_v40, 2 }
 0x22d   :  { %2174 = vrot.lane.b32.xlu1 %v2079_v62, %s5924_s18  ;;  %5581 = vrot.lane.b32.xlu0 %v5580_v61, %s5928_s24  ;;  %v7948_v61 = vmax.f32 %v1168_v52, 0.0  ;;  %v2315_v21 = vsel %vm2305_vm6, %v2265_v49, %v7405_v7  ;;  %v3445_v7 = vld [vmem:[%s10594_s3 + $0x80] sm:$0xff]  ;;  %v3446_v52 = vld [vmem:[%s10594_s3 + $0x88] sm:$0xff]  ;;  %v2081_v49 = vsel %vm2010_vm1, %v2078_v5, %v2080_v56 }
 0x22e   :  { %v5382_v14 = vpack.c.bf16 %v3446_v52, %v3445_v7  ;;  %v1593_v52 = vsel %vm1520_vm3, %v1590_v32, %v1592_v22 }
 0x22f   :  { %v7919_v29 = vpop.permute.xlu0 %1419  ;;  %5377 = vmatpush1.bf16.msra.mxu0 %v5376_v51  ;;  %10898 = vst [vmem:[#allocation16_spill] sm:$0xff] %v7948_v61  ;;  %v1354_v51 = vsel %vm1275_vm2, %v10901_v47, %v1353_v28  ;;  %v10665_v44 = vrot.slane %v7948_v61, 1  ;;  %v2082_v47 = vrot.slane %v7644_v40, 4 }
 0x230   :  { %v7928_v39 = vpop.permute.xlu1 %1907  ;;  %5378 = vmatprep.subr.bf16.mxu0 %v10880_v6 }
 0x231   :  { %1686 = vrot.lane.b32.xlu1 %v1591_v23, %s5926_s20  ;;  %3135 = vrot.lane.b32.xlu0 %v7926_v54, %s5924_s18  ;;  %v2365_v23 = vsel %vm2355_vm7, %v2315_v21, %v7384_v1  ;;  %v3447_v1 = vld [vmem:[%s10594_s3 + $0x90] sm:$0xff]  ;;  %v1356_v5 = vsel %vm1275_vm2, %v1353_v28, %v10665_v44  ;;  %v3449_v28 = vld [vmem:[%s10594_s3 + $0xa0] sm:$0xff] }
 0x232   :  { %v7977_v26 = vsel %vm2405_vm8, %v2365_v23, %v7420_v46  ;;  %v3448_v46 = vld [vmem:[%s10594_s3 + $0x98] sm:$0xff]  ;;  %v3450_v23 = vld [vmem:[%s10594_s3 + $0xa8] sm:$0xff] }
 0x233   :  { %v7944_v15 = vpop.permute.xlu0 %1909  ;;  %5380 = vmatpush1.bf16.msra.mxu0 %v5379_v59  ;;  %10903 = vst [vmem:[#allocation80_spill] sm:$0xff] %v7977_v26  ;;  %v5385_v21 = vpack.c.bf16 %v3448_v46, %v3447_v1  ;;  %v10667_v1 = vrot.slane %v7948_v61, 3  ;;  %v5388_v32 = vpack.c.bf16 %v3450_v23, %v3449_v28  ;;  %v10907_v23 = vrot.slane %v7800_v2, 4 }
 0x234   :  { %v7952_v62 = vpop.permute.xlu1 %2152  ;;  %5381 = vmatprep.subr.bf16.mxu0 %v10880_v6 }
 0x235   :  { %1931 = vrot.lane.b32.xlu1 %v1836_v17, %s5927_s21  ;;  %1449 = vrot.lane.b32.xlu0 %v1354_v51, %s5925_s19 }
 0x237   :  { %v7972_v58 = vpop.permute.xlu0 %1421  ;;  %5383 = vmatpush1.bf16.msra.mxu0 %v5382_v14  ;;  %v2720_v14 = vrot.slane %v7926_v54, 4 }
 0x238   :  { %10902 = vst [vmem:[#allocation79_spill] sm:$0xff] %v7972_v58  ;;  %v7979_v59 = vpop.permute.xlu1 %1664  ;;  %5384 = vmatprep.subr.bf16.mxu0 %v10880_v6 }
 0x239   :  { %2176 = vrot.lane.b32.xlu1 %v2081_v49, %s5924_s18  ;;  %3137 = vrot.lane.b32.xlu0 %v7977_v26, %s5924_s18  ;;  %v10668_v49 = vrot.slane %v7901_v33, 3 }
 0x23b   :  { %v7996_v17 = vpop.permute.xlu0 %1423  ;;  %5386 = vmatpush1.bf16.msra.mxu0 %v5385_v21  ;;  %v1846_v51 = vsel %vm1765_vm4, %v10668_v49, %v10667_v1  ;;  %v10906_v21 = vrot.slane %v7977_v26, 4  ;;  %v3451_v1 = vld [vmem:[%s10594_s3 + $0xb0] sm:$0xff]  ;;  %v3452_v49 = vld [vmem:[%s10594_s3 + $0xb8] sm:$0xff] }
 0x23c   :  { %v8001_v7 = vpop.permute.xlu1 %2154  ;;  %5387 = vmatprep.subr.bf16.mxu0 %v10880_v6 }
 0x23d   :  { %1688 = vrot.lane.b32.xlu1 %v1593_v52, %s5926_s20  ;;  %1451 = vrot.lane.b32.xlu0 %v1356_v5, %s5925_s19  ;;  %v2083_v5 = vsel %vm2010_vm1, %v2080_v56, %v2082_v47  ;;  %v2723_v28 = vsel %vm2010_vm1, %v2720_v14, %v10906_v21  ;;  %v2512_v56 = vrot.slane %v7926_v54, 6  ;;  %v2721_v52 = vsel %vm2010_vm1, %v10907_v23, %v2720_v14 }
 0x23e   :  { %v1169_v14 = vadd.f32 %v8049_v41, %v7274_v48  ;;  %v10910_v23 = vrot.slane %v7729_v30, 2  ;;  %v10913_v48 = vld [vmem:[#allocation17_spill] sm:$0xff] }
 0x23f   :  { %v8015_v46 = vpop.permute.xlu0 %1913  ;;  %5389 = vmatpush1.bf16.msra.mxu0 %v5388_v32 }
 0x240   :  { %10904 = vst [vmem:[#allocation81_spill] sm:$0xff] %v8015_v46  ;;  %v8020_v44 = vpop.permute.xlu1 %1666  ;;  %5390 = vmatprep.subr.bf16.mxu0 %v10880_v6  ;;  %v1595_v55 = vsel %vm1520_vm3, %v1592_v22, %v10910_v23  ;;  %v10915_v23 = vmov 0.0   ;;  %v10946_v46 = vld [vmem:[#allocation39_spill] sm:$0xff] }
 0x241   :  { %10905 = vst [vmem:[#allocation82_spill] sm:$0xff] %v8020_v44  ;;  %2178 = vrot.lane.b32.xlu1 %v2083_v5, %s5924_s18  ;;  %1941 = vrot.lane.b32.xlu0 %v1846_v51, %s5927_s21  ;;  %v5585_v5 = vpack.i.bf16 %v2723_v28, %v2721_v52  ;;  %v5391_v51 = vpack.c.bf16 %v3452_v49, %v3451_v1  ;;  %v10912_v49 = vrot.slane %v7800_v2, 6  ;;  %v10954_v44 = vld [vmem:[#allocation59_spill] sm:$0xff] }
 0x242   :  { %v2266_v28 = vsel %vm2255_vm5, %v10913_v48, %v7403_v27  ;;  %v10920_v27 = vrot.slane %v7644_v40, 3  ;;  %v10922_v48 = vld [vmem:[#allocation6_spill] sm:$0xff] }
 0x243   :  { %v8043_v21 = vpop.permute.xlu0 %1425  ;;  %v2513_v1 = vsel %vm2498_vm9, %v10912_v49, %v2512_v56  ;;  %5392 = vmatpush1.bf16.msra.mxu0 %v5391_v51  ;;  %v10919_v51 = vrot.slane %v7729_v30, 3 }
 0x244   :  { %10908 = vst [vmem:[#allocation83_spill] sm:$0xff] %v8043_v21  ;;  %v8053_v32 = vpop.permute.xlu1 %1911  ;;  %v10911_v21 = vrot.slane %v7977_v26, 6  ;;  %3636 = vmatprep.subr.mxu0 %v10915_v23  ;;  %v10924_v23 = vld [vmem:[#allocation51_spill] sm:$0xff] }
 0x245   :  { %10909 = vst [vmem:[#allocation84_spill] sm:$0xff] %v8053_v32  ;;  %1690 = vrot.lane.b32.xlu1 %v1595_v55, %s5926_s20  ;;  %5586 = vrot.lane.b32.xlu0 %v5585_v5, %s5929_s25  ;;  %v3453_v55 = vld [vmem:[%s10594_s3 + $0xc0] sm:$0xff]  ;;  %v1840_v49 = vsel %vm1765_vm4, %v10920_v27, %v10919_v51  ;;  %s5931_s3 = smov 120  }
 0x246   :  { %v2515_v52 = vsel %vm2498_vm9, %v2512_v56, %v10911_v21  ;;  %v8075_v21 = vmax.f32 %v1169_v14, 0.0  ;;  %v10917_v5 = vld [vmem:[#allocation49_spill] sm:$0xff]  ;;  %v10921_v14 = vld [vmem:[#allocation38_spill] sm:$0xff] }
 0x247   :  { %v8069_v6 = vpop.permute.xlu0 %1427  ;;  %v5590_v22 = vpack.i.bf16 %v2515_v52, %v2513_v1  ;;  %v2316_v32 = vsel %vm2305_vm6, %v2266_v28, %v10917_v5  ;;  %v2084_v52 = vrot.slane %v7729_v30, 4  ;;  %3637 = vmatpush1.msra.mxu0 %v3453_v55  ;;  %v1170_v1 = vadd.f32 %v8049_v41, %v10921_v14  ;;  %v10927_v14 = vld [vmem:[#allocation48_spill] sm:$0xff] }
 0x248   :  { %10914 = vst [vmem:[#allocation17_spill] sm:$0xff] %v8069_v6  ;;  %10916 = vst [vmem:[#allocation85_spill] sm:$0xff] %v8075_v21  ;;  %v8079_v56 = vpop.permute.xlu1 %2156  ;;  %v2366_v28 = vsel %vm2355_vm7, %v2316_v32, %v10922_v48  ;;  %v2922_v32 = vrot.slane %v7680_v3, 2  ;;  %v10932_v6 = vrot.slane %v7948_v61, 1 }
 0x249   :  { %10918 = vst [vmem:[#allocation49_spill] sm:$0xff] %v8079_v56  ;;  %1935 = vrot.lane.b32.xlu1 %v1840_v49, %s5927_s21  ;;  %5591 = vrot.lane.b32.xlu0 %v5590_v22, %s5928_s24  ;;  %v8097_v40 = vsel %vm2405_vm8, %v2366_v28, %v10924_v23  ;;  %v2085_v27 = vsel %vm2010_vm1, %v2082_v47, %v2084_v52  ;;  %v2923_v49 = vrot.slane %v7819_v37, 2  ;;  %v1357_v22 = vrot.slane %v8075_v21, 1  ;;  %v10928_v23 = vld [vmem:[#allocation18_spill] sm:$0xff] }
 0x24a   :  { %10925 = vst [vmem:[#allocation6_spill] sm:$0xff] %v8097_v40  ;;  %v8108_v55 = vmax.f32 %v1170_v1, 0.0  ;;  %v2267_v48 = vsel %vm2255_vm5, %v10928_v23, %v10927_v14  ;;  %v10930_v47 = vld [vmem:[#allocation54_spill] sm:$0xff]  ;;  %v1596_v1 = vrot.slane %v7760_v60, 2 }
 0x24b   :  { %v8093_v5 = vpop.permute.xlu0 %1917  ;;  %v2317_v37 = vsel %vm2305_vm6, %v2267_v48, %v10930_v47  ;;  %v1358_v56 = vsel %vm1275_vm2, %v10932_v6, %v1357_v22  ;;  %v10933_v14 = vld [vmem:[#allocation26_spill] sm:$0xff]  ;;  %v2086_v48 = vrot.slane %v7760_v60, 4  ;;  %v10935_v47 = vld [vmem:[#allocation56_spill] sm:$0xff]  ;;  %v10938_v6 = vrot.slane %v7729_v30, 2 }
 0x24c   :  { %10923 = vst [vmem:[#allocation38_spill] sm:$0xff] %v8093_v5  ;;  %v8099_v51 = vpop.permute.xlu1 %1668  ;;  %10926 = vst [vmem:[#allocation51_spill] sm:$0xff] %v8108_v55  ;;  %v2367_v23 = vsel %vm2355_vm7, %v2317_v37, %v10933_v14  ;;  %v2925_v30 = vrot.slane %v7800_v2, 2  ;;  %v2516_v14 = vrot.slane %v8097_v40, 6 }
 0x24d   :  { %2180 = vrot.lane.b32.xlu1 %v2085_v27, %s5924_s18  ;;  %3139 = vrot.lane.b32.xlu0 %v8097_v40, %s5924_s18  ;;  %v2924_v27 = vsel %vm1520_vm3, %v2922_v32, %v2923_v49  ;;  %v8133_v32 = vsel %vm2405_vm8, %v2367_v23, %v10935_v47 }
 0x24e   :  { %10936 = vst [vmem:[#allocation26_spill] sm:$0xff] %v8133_v32 }
 0x24f   :  { %v8113_v28 = vpop.permute.xlu0 %1429 }
 0x250   :  { %10929 = vst [vmem:[#allocation48_spill] sm:$0xff] %v8113_v28  ;;  %v8117_v5 = vpop.permute.xlu1 %2158 }
 0x251   :  { %10931 = vst [vmem:[#allocation18_spill] sm:$0xff] %v8117_v5  ;;  %3005 = vrot.lane.b32.xlu1 %v2924_v27, %s5931_s3  ;;  %1453 = vrot.lane.b32.xlu0 %v1358_v56, %s5925_s19  ;;  %v1597_v5 = vsel %vm1520_vm3, %v10938_v6, %v1596_v1  ;;  %v1359_v27 = vrot.slane %v8108_v55, 1  ;;  %v2087_v56 = vsel %vm2010_vm1, %v2084_v52, %v2086_v48  ;;  %v10676_v6 = vrot.slane %v8108_v55, 3 }
 0x252   :  { %v1598_v52 = vrot.slane %v7901_v33, 2 }
 0x253   :  { %v8128_v3 = vpop.permute.xlu0 %1431  ;;  %v1360_v47 = vsel %vm1275_vm2, %v1357_v22, %v1359_v27  ;;  %v2926_v22 = vsel %vm1520_vm3, %v2923_v49, %v2925_v30 }
 0x254   :  { %10934 = vst [vmem:[#allocation54_spill] sm:$0xff] %v8128_v3  ;;  %v8135_v28 = vpop.permute.xlu1 %1670 }
 0x255   :  { %10937 = vst [vmem:[#allocation56_spill] sm:$0xff] %v8135_v28  ;;  %1692 = vrot.lane.b32.xlu1 %v1597_v5, %s5926_s20  ;;  %3141 = vrot.lane.b32.xlu0 %v8133_v32, %s5924_s18  ;;  %v2724_v5 = vrot.slane %v8097_v40, 4 }
 0x257   :  { %v8144_v37 = vpop.permute.xlu0 %1921 }
 0x258   :  { %10939 = vst [vmem:[#allocation86_spill] sm:$0xff] %v8144_v37  ;;  %v8148_v23 = vpop.permute.xlu1 %1915  ;;  %v10677_v37 = vrot.slane %v8075_v21, 3 }
 0x259   :  { %10940 = vst [vmem:[#allocation87_spill] sm:$0xff] %v8148_v23  ;;  %2182 = vrot.lane.b32.xlu1 %v2087_v56, %s5924_s18  ;;  %1455 = vrot.lane.b32.xlu0 %v1360_v47, %s5925_s19  ;;  %v10943_v47 = vrot.slane %v8133_v32, 4 }
 0x25a   :  { %v1850_v56 = vsel %vm1765_vm4, %v10677_v37, %v10676_v6  ;;  %v1171_v6 = vadd.f32 %v8049_v41, %v10946_v46 }
 0x25b   :  { %v8157_v3 = vpop.permute.xlu0 %1433  ;;  %v2727_v2 = vsel %vm2010_vm1, %v2724_v5, %v10943_v47  ;;  %v1599_v47 = vsel %vm1520_vm3, %v1596_v1, %v1598_v52 }
 0x25c   :  { %10941 = vst [vmem:[#allocation88_spill] sm:$0xff] %v8157_v3  ;;  %v8161_v23 = vpop.permute.xlu1 %2160  ;;  %v10944_v3 = vrot.slane %v7977_v26, 4  ;;  %v8198_v1 = vmax.f32 %v1171_v6, 0.0 }
 0x25d   :  { %10942 = vst [vmem:[#allocation89_spill] sm:$0xff] %v8161_v23  ;;  %3007 = vrot.lane.b32.xlu1 %v2926_v22, %s5931_s3  ;;  %1945 = vrot.lane.b32.xlu0 %v1850_v56, %s5927_s21  ;;  %v10948_v22 = vrot.slane %v8133_v32, 6 }
 0x25e   :  { %v2725_v49 = vsel %vm2010_vm1, %v10944_v3, %v2724_v5  ;;  %v10949_v3 = vrot.slane %v7977_v26, 6 }
 0x25f   :  { %v8178_v23 = vpop.permute.xlu0 %1435  ;;  %v5595_v28 = vpack.i.bf16 %v2727_v2, %v2725_v49  ;;  %v2519_v56 = vsel %vm2498_vm9, %v2516_v14, %v10948_v22  ;;  %v10950_v2 = vld [vmem:[#allocation53_spill] sm:$0xff]  ;;  %v10951_v49 = vld [vmem:[#allocation19_spill] sm:$0xff] }
 0x260   :  { %10945 = vst [vmem:[#allocation90_spill] sm:$0xff] %v8178_v23  ;;  %v8182_v37 = vpop.permute.xlu1 %1672  ;;  %v2517_v5 = vsel %vm2498_vm9, %v10949_v3, %v2516_v14  ;;  %v2268_v46 = vsel %vm2255_vm5, %v10951_v49, %v10950_v2  ;;  %10953 = vst [vmem:[#allocation19_spill] sm:$0xff] %v8198_v1  ;;  %v2088_v3 = vrot.slane %v7901_v33, 4  ;;  %v10961_v49 = vld [vmem:[#allocation62_spill] sm:$0xff] }
 0x261   :  { %10947 = vst [vmem:[#allocation39_spill] sm:$0xff] %v8182_v37  ;;  %1694 = vrot.lane.b32.xlu1 %v1599_v47, %s5926_s20  ;;  %5596 = vrot.lane.b32.xlu0 %v5595_v28, %s5929_s25  ;;  %v5600_v37 = vpack.i.bf16 %v2519_v56, %v2517_v5  ;;  %v2318_v22 = vsel %vm2305_vm6, %v2268_v46, %v10954_v44  ;;  %v10956_v28 = vrot.slane %v7901_v33, 3  ;;  %v10957_v47 = vrot.slane %v7760_v60, 3  ;;  %v10958_v56 = vld [vmem:[#allocation41_spill] sm:$0xff]  ;;  %v10959_v5 = vld [vmem:[#allocation55_spill] sm:$0xff] }
 0x262   :  { %v1172_v6 = vadd.f32 %v8049_v41, %v10958_v56  ;;  %v2368_v44 = vsel %vm2355_vm7, %v2318_v22, %v10959_v5  ;;  %v10966_v56 = vld [vmem:[#allocation20_spill] sm:$0xff] }
 0x263   :  { %v8196_v23 = vpop.permute.xlu0 %1925  ;;  %v1844_v14 = vsel %vm1765_vm4, %v10957_v47, %v10956_v28  ;;  %v8220_v46 = vsel %vm2405_vm8, %v2368_v44, %v10961_v49  ;;  %v2089_v28 = vsel %vm2010_vm1, %v2086_v48, %v2088_v3  ;;  %v2927_v47 = vrot.slane %v7926_v54, 2  ;;  %v10968_v49 = vld [vmem:[#allocation64_spill] sm:$0xff] }
 0x264   :  { %10952 = vst [vmem:[#allocation53_spill] sm:$0xff] %v8196_v23  ;;  %v8202_v58 = vpop.permute.xlu1 %2162  ;;  %10962 = vst [vmem:[#allocation55_spill] sm:$0xff] %v8220_v46  ;;  %v8230_v22 = vmax.f32 %v1172_v6, 0.0  ;;  %v1600_v6 = vrot.slane %v7948_v61, 2  ;;  %v10684_v23 = vrot.slane %v8198_v1, 3 }
 0x265   :  { %10955 = vst [vmem:[#allocation59_spill] sm:$0xff] %v8202_v58  ;;  %1939 = vrot.lane.b32.xlu1 %v1844_v14, %s5927_s21  ;;  %5601 = vrot.lane.b32.xlu0 %v5600_v37, %s5928_s24  ;;  %v1361_v37 = vrot.slane %v8198_v1, 1  ;;  %v10965_v14 = vld [vmem:[#allocation58_spill] sm:$0xff]  ;;  %v2928_v54 = vsel %vm1520_vm3, %v2925_v30, %v2927_v47 }
 0x266   :  { %10964 = vst [vmem:[#allocation91_spill] sm:$0xff] %v8230_v22  ;;  %v2269_v5 = vsel %vm2255_vm5, %v10966_v56, %v10965_v14 }
 0x267   :  { %v8216_v2 = vpop.permute.xlu0 %1437  ;;  %v2319_v48 = vsel %vm2305_vm6, %v2269_v5, %v10968_v49  ;;  %v10972_v5 = vld [vmem:[#allocation10_spill] sm:$0xff] }
 0x268   :  { %10960 = vst [vmem:[#allocation41_spill] sm:$0xff] %v8216_v2  ;;  %v8222_v60 = vpop.permute.xlu1 %1674  ;;  %v10970_v2 = vld [vmem:[#allocation61_spill] sm:$0xff] }
 0x269   :  { %10963 = vst [vmem:[#allocation62_spill] sm:$0xff] %v8222_v60  ;;  %2184 = vrot.lane.b32.xlu1 %v2089_v28, %s5924_s18  ;;  %3143 = vrot.lane.b32.xlu0 %v8220_v46, %s5924_s18  ;;  %v1362_v28 = vsel %vm1275_vm2, %v1359_v27, %v1361_v37  ;;  %v2369_v14 = vsel %vm2355_vm7, %v2319_v48, %v10970_v2  ;;  %v10981_v60 = vld [vmem:[#allocation43_spill] sm:$0xff] }
 0x26a   :  { %v8253_v49 = vsel %vm2405_vm8, %v2369_v14, %v10972_v5  ;;  %v1601_v27 = vsel %vm1520_vm3, %v1598_v52, %v1600_v6  ;;  %v2929_v52 = vrot.slane %v7977_v26, 2 }
 0x26b   :  { %v8235_v44 = vpop.permute.xlu0 %1439  ;;  %10973 = vst [vmem:[#allocation61_spill] sm:$0xff] %v8253_v49 }
 0x26c   :  { %10967 = vst [vmem:[#allocation58_spill] sm:$0xff] %v8235_v44  ;;  %v8239_v33 = vpop.permute.xlu1 %1919  ;;  %v10681_v44 = vrot.slane %v8230_v22, 1 }
 0x26d   :  { %10969 = vst [vmem:[#allocation20_spill] sm:$0xff] %v8239_v33  ;;  %3009 = vrot.lane.b32.xlu1 %v2928_v54, %s5931_s3  ;;  %1457 = vrot.lane.b32.xlu0 %v1362_v28, %s5925_s19  ;;  %v2090_v54 = vrot.slane %v7948_v61, 4 }
 0x26e   :  { %v1364_v48 = vsel %vm1275_vm2, %v1361_v37, %v10681_v44  ;;  %v1602_v37 = vrot.slane %v8075_v21, 2  ;;  %v2520_v44 = vrot.slane %v8220_v46, 6 }
 0x26f   :  { %v8248_v56 = vpop.permute.xlu0 %1929  ;;  %v2091_v5 = vsel %vm2010_vm1, %v2088_v3, %v2090_v54  ;;  %v2930_v3 = vsel %vm1520_vm3, %v2927_v47, %v2929_v52 }
 0x270   :  { %10971 = vst [vmem:[#allocation64_spill] sm:$0xff] %v8248_v56  ;;  %v8255_v30 = vpop.permute.xlu1 %2164  ;;  %v2728_v56 = vrot.slane %v8220_v46, 4 }
 0x271   :  { %10974 = vst [vmem:[#allocation10_spill] sm:$0xff] %v8255_v30  ;;  %1696 = vrot.lane.b32.xlu1 %v1601_v27, %s5926_s20  ;;  %3145 = vrot.lane.b32.xlu0 %v8253_v49, %s5924_s18  ;;  %v10683_v27 = vrot.slane %v8230_v22, 3 }
 0x273   :  { %v8262_v2 = vpop.permute.xlu0 %5561 }
 0x274   :  { %v8268_v14 = vpop.permute.xlu1 %1676 }
 0x275   :  { %10975 = vst [vmem:[#allocation92_spill] sm:$0xff] %v8268_v14  ;;  %2186 = vrot.lane.b32.xlu1 %v2091_v5, %s5924_s18  ;;  %1459 = vrot.lane.b32.xlu0 %v1364_v48, %s5925_s19  ;;  %v1854_v48 = vsel %vm1765_vm4, %v10684_v23, %v10683_v27  ;;  %v10978_v5 = vrot.slane %v8253_v49, 4  ;;  %v1173_v27 = vadd.f32 %v8049_v41, %v10981_v60  ;;  %v10989_v14 = vld [vmem:[#allocation69_spill] sm:$0xff] }
 0x277   :  { %v8277_v30 = vpop.permute.xlu0 %1441  ;;  %v2731_v26 = vsel %vm2010_vm1, %v2728_v56, %v10978_v5  ;;  %v1603_v5 = vsel %vm1520_vm3, %v1600_v6, %v1602_v37  ;;  %v8318_v6 = vmax.f32 %v1173_v27, 0.0 }
 0x278   :  { %10976 = vst [vmem:[#allocation93_spill] sm:$0xff] %v8277_v30  ;;  %v8281_v28 = vpop.permute.xlu1 %2166  ;;  %v10979_v30 = vrot.slane %v8133_v32, 4 }
 0x279   :  { %10977 = vst [vmem:[#allocation94_spill] sm:$0xff] %v8281_v28  ;;  %3011 = vrot.lane.b32.xlu1 %v2930_v3, %s5931_s3  ;;  %1949 = vrot.lane.b32.xlu0 %v1854_v48, %s5927_s21  ;;  %v10983_v3 = vrot.slane %v8253_v49, 6 }
 0x27a   :  { %v2729_v47 = vsel %vm2010_vm1, %v10979_v30, %v2728_v56  ;;  %v10984_v56 = vrot.slane %v8133_v32, 6 }
 0x27b   :  { %v8298_v33 = vpop.permute.xlu0 %1443  ;;  %v5605_v28 = vpack.i.bf16 %v2731_v26, %v2729_v47  ;;  %v2523_v48 = vsel %vm2498_vm9, %v2520_v44, %v10983_v3  ;;  %v10985_v26 = vld [vmem:[#allocation63_spill] sm:$0xff]  ;;  %v10986_v47 = vld [vmem:[#allocation21_spill] sm:$0xff] }
 0x27c   :  { %10980 = vst [vmem:[#allocation95_spill] sm:$0xff] %v8298_v33  ;;  %v8302_v23 = vpop.permute.xlu1 %1678  ;;  %v2521_v30 = vsel %vm2498_vm9, %v10984_v56, %v2520_v44  ;;  %v2270_v60 = vsel %vm2255_vm5, %v10986_v47, %v10985_v26  ;;  %10988 = vst [vmem:[#allocation21_spill] sm:$0xff] %v8318_v6  ;;  %v2092_v56 = vrot.slane %v8075_v21, 4 }
 0x27d   :  { %10982 = vst [vmem:[#allocation43_spill] sm:$0xff] %v8302_v23  ;;  %1698 = vrot.lane.b32.xlu1 %v1603_v5, %s5926_s20  ;;  %5606 = vrot.lane.b32.xlu0 %v5605_v28, %s5929_s25  ;;  %v5610_v23 = vpack.i.bf16 %v2523_v48, %v2521_v30  ;;  %v2320_v3 = vsel %vm2305_vm6, %v2270_v60, %v10989_v14  ;;  %v10990_v28 = vrot.slane %v8075_v21, 3  ;;  %v10991_v5 = vrot.slane %v7948_v61, 3  ;;  %v10992_v48 = vld [vmem:[#allocation45_spill] sm:$0xff]  ;;  %v10993_v30 = vld [vmem:[#allocation66_spill] sm:$0xff] }
 0x27e   :  { %v1174_v27 = vadd.f32 %v8049_v41, %v10992_v48  ;;  %v2370_v14 = vsel %vm2355_vm7, %v2320_v3, %v10993_v30  ;;  %v10998_v48 = vld [vmem:[#allocation22_spill] sm:$0xff] }
 0x27f   :  { %v8316_v33 = vpop.permute.xlu0 %1933  ;;  %v1848_v44 = vsel %vm1765_vm4, %v10991_v5, %v10990_v28  ;;  %v8340_v47 = vsel %vm2405_vm8, %v2370_v14, %v7579_v50  ;;  %v2093_v28 = vsel %vm2010_vm1, %v2090_v54, %v2092_v56  ;;  %v2931_v5 = vrot.slane %v8097_v40, 2 }
 0x280   :  { %10987 = vst [vmem:[#allocation63_spill] sm:$0xff] %v8316_v33  ;;  %v8322_v58 = vpop.permute.xlu1 %1923  ;;  %10994 = vst [vmem:[#allocation69_spill] sm:$0xff] %v8340_v47  ;;  %v8350_v3 = vmax.f32 %v1174_v27, 0.0  ;;  %v1604_v27 = vrot.slane %v8108_v55, 2 }
 0x281   :  { %1943 = vrot.lane.b32.xlu1 %v1848_v44, %s5927_s21  ;;  %5611 = vrot.lane.b32.xlu0 %v5610_v23, %s5928_s24  ;;  %v1365_v23 = vrot.slane %v8318_v6, 1  ;;  %v10997_v44 = vld [vmem:[#allocation68_spill] sm:$0xff]  ;;  %v2932_v21 = vsel %vm1520_vm3, %v2929_v52, %v2931_v5 }
 0x282   :  { %10996 = vst [vmem:[#allocation66_spill] sm:$0xff] %v8350_v3  ;;  %v2271_v50 = vsel %vm2255_vm5, %v10998_v48, %v10997_v44  ;;  %v1367_v61 = vrot.slane %v8350_v3, 1 }
 0x283   :  { %v8336_v26 = vpop.permute.xlu0 %5566  ;;  %v2321_v54 = vsel %vm2305_vm6, %v2271_v50, %v7607_v35  ;;  %v2094_v35 = vrot.slane %v8108_v55, 4 }
 0x284   :  { %v8342_v60 = vpop.permute.xlu1 %2168  ;;  %v2371_v44 = vsel %vm2355_vm7, %v2321_v54, %v7573_v25 }
 0x285   :  { %10995 = vst [vmem:[#allocation45_spill] sm:$0xff] %v8342_v60  ;;  %2188 = vrot.lane.b32.xlu1 %v2093_v28, %s5924_s18  ;;  %3147 = vrot.lane.b32.xlu0 %v8340_v47, %s5924_s18  ;;  %v10999_v28 = vrot.slane %v8230_v22, 1  ;;  %v8375_v52 = vsel %vm2405_vm8, %v2371_v44, %v7631_v16  ;;  %v1368_v16 = vsel %vm1275_vm2, %v1365_v23, %v1367_v61  ;;  %v2933_v44 = vrot.slane %v8133_v32, 2 }
 0x286   :  { %11001 = vst [vmem:[#allocation22_spill] sm:$0xff] %v8375_v52 }
 0x287   :  { %v8355_v30 = vpop.permute.xlu0 %5571  ;;  %v1366_v40 = vsel %vm1275_vm2, %v10999_v28, %v1365_v23  ;;  %v1605_v28 = vsel %vm1520_vm3, %v1602_v37, %v1604_v27  ;;  %v10689_v37 = vrot.slane %v8350_v3, 3  ;;  %v2934_v23 = vsel %vm1520_vm3, %v2931_v5, %v2933_v44 }
 0x288   :  { %v8359_v14 = vpop.permute.xlu1 %1680 }
 0x289   :  { %3013 = vrot.lane.b32.xlu1 %v2932_v21, %s5931_s3  ;;  %1461 = vrot.lane.b32.xlu0 %v1366_v40, %s5925_s19  ;;  %v2095_v40 = vsel %vm2010_vm1, %v2092_v56, %v2094_v35  ;;  %v1606_v56 = vrot.slane %v8198_v1, 2  ;;  %v2524_v21 = vrot.slane %v8340_v47, 6 }
 0x28b   :  { %v8370_v48 = vpop.permute.xlu0 %1445 }
 0x28c   :  { %11000 = vst [vmem:[#allocation68_spill] sm:$0xff] %v8370_v48  ;;  %v8377_v50 = vpop.permute.xlu1 %2170  ;;  %v10690_v48 = vrot.slane %v8318_v6, 3 }
 0x28d   :  { %11002 = vst [vmem:[#allocation96_spill] sm:$0xff] %v8377_v50  ;;  %1700 = vrot.lane.b32.xlu1 %v1605_v28, %s5926_s20  ;;  %3149 = vrot.lane.b32.xlu0 %v8375_v52, %s5924_s18  ;;  %v2732_v28 = vrot.slane %v8340_v47, 4 }
 0x28f   :  { %v8384_v25 = vpop.permute.xlu0 %3133 }
 0x290   :  { %v8388_v54 = vpop.permute.xlu1 %1682 }
 0x291   :  { %11003 = vst [vmem:[#allocation97_spill] sm:$0xff] %v8388_v54  ;;  %2190 = vrot.lane.b32.xlu1 %v2095_v40, %s5924_s18  ;;  %1463 = vrot.lane.b32.xlu0 %v1368_v16, %s5925_s19  ;;  %v1858_v40 = vsel %vm1765_vm4, %v10690_v48, %v10689_v37  ;;  %v11006_v16 = vrot.slane %v8375_v52, 4 }
 0x293   :  { %v8397_v33 = vpop.permute.xlu0 %1447  ;;  %v2735_v32 = vsel %vm2010_vm1, %v2732_v28, %v11006_v16  ;;  %v1607_v16 = vsel %vm1520_vm3, %v1604_v27, %v1606_v56 }
 0x294   :  { %11004 = vst [vmem:[#allocation98_spill] sm:$0xff] %v8397_v33  ;;  %v8401_v54 = vpop.permute.xlu1 %1927  ;;  %v11007_v33 = vrot.slane %v8253_v49, 4 }
 0x295   :  { %11005 = vst [vmem:[#allocation99_spill] sm:$0xff] %v8401_v54  ;;  %3015 = vrot.lane.b32.xlu1 %v2934_v23, %s5931_s3  ;;  %1953 = vrot.lane.b32.xlu0 %v1858_v40, %s5927_s21  ;;  %v11008_v54 = vld [vmem:[#allocation46_spill] sm:$0xff]  ;;  %v11010_v23 = vrot.slane %v8375_v52, 6 }
 0x296   :  { %v2733_v5 = vsel %vm2010_vm1, %v11007_v33, %v2732_v28  ;;  %v1175_v50 = vadd.f32 %v8049_v41, %v11008_v54  ;;  %v11011_v33 = vrot.slane %v8253_v49, 6 }
 0x297   :  { %v8420_v60 = vpop.permute.xlu0 %1937  ;;  %v5615_v37 = vpack.i.bf16 %v2735_v32, %v2733_v5  ;;  %v2527_v40 = vsel %vm2498_vm9, %v2524_v21, %v11010_v23  ;;  %v11012_v32 = vld [vmem:[#allocation23_spill] sm:$0xff] }
 0x298   :  { %11009 = vst [vmem:[#allocation46_spill] sm:$0xff] %v8420_v60  ;;  %v8422_v48 = vpop.permute.xlu1 %2172  ;;  %v2525_v28 = vsel %vm2498_vm9, %v11011_v33, %v2524_v21  ;;  %v8433_v41 = vmax.f32 %v1175_v50, 0.0  ;;  %v2272_v54 = vsel %vm2255_vm5, %v11012_v32, %v7601_v53  ;;  %v11014_v21 = vrot.slane %v8198_v1, 3 }
 0x299   :  { %1702 = vrot.lane.b32.xlu1 %v1607_v16, %s5926_s20  ;;  %5616 = vrot.lane.b32.xlu0 %v5615_v37, %s5929_s25  ;;  %v5620_v27 = vpack.i.bf16 %v2527_v40, %v2525_v28  ;;  %v2322_v23 = vsel %vm2305_vm6, %v2272_v54, %v7653_v34  ;;  %v11013_v16 = vld [vmem:[#allocation25_spill] sm:$0xff]  ;;  %v11015_v50 = vrot.slane %v8108_v55, 3  ;;  %v2096_v53 = vrot.slane %v8198_v1, 4 }
 0x29a   :  { %v2273_v37 = vsel %vm2255_vm5, %v11013_v16, %v7648_v12  ;;  %v2372_v34 = vsel %vm2355_vm7, %v2322_v23, %v7627_v63  ;;  %v10691_v28 = vrot.slane %v8433_v41, 1  ;;  %v2937_v55 = vrot.slane %v8253_v49, 2  ;;  %v11031_v49 = vld [vmem:[#allocation31_spill] sm:$0xff] }
 0x29b   :  { %v8438_v5 = vpop.permute.xlu0 %5576  ;;  %v1852_v33 = vsel %vm1765_vm4, %v11015_v50, %v11014_v21  ;;  %v2323_v40 = vsel %vm2305_vm6, %v2273_v37, %v7694_v19  ;;  %v8464_v32 = vsel %vm2405_vm8, %v2372_v34, %v7671_v0  ;;  %v2097_v19 = vsel %vm2010_vm1, %v2094_v35, %v2096_v53 }
 0x29c   :  { %v8445_v60 = vpop.permute.xlu1 %1684  ;;  %11016 = vst [vmem:[#allocation23_spill] sm:$0xff] %v8464_v32  ;;  %v2373_v54 = vsel %vm2355_vm7, %v2323_v40, %v7668_v31  ;;  %v1370_v35 = vsel %vm1275_vm2, %v1367_v61, %v10691_v28  ;;  %v2736_v21 = vrot.slane %v8464_v32, 4  ;;  %v2098_v34 = vrot.slane %v8230_v22, 4 }
 0x29d   :  { %1947 = vrot.lane.b32.xlu1 %v1852_v33, %s5927_s21  ;;  %5621 = vrot.lane.b32.xlu0 %v5620_v27, %s5928_s24  ;;  %v2935_v27 = vrot.slane %v8220_v46, 2  ;;  %v8474_v63 = vsel %vm2405_vm8, %v2373_v54, %v7713_v10  ;;  %v1608_v10 = vrot.slane %v8230_v22, 2  ;;  %v2528_v54 = vrot.slane %v8464_v32, 6 }
 0x29e   :  { %11017 = vst [vmem:[#allocation25_spill] sm:$0xff] %v8474_v63  ;;  %v2738_v23 = vrot.slane %v8474_v63, 4  ;;  %v11021_v46 = vrot.slane %v8474_v63, 6 }
 0x29f   :  { %v8459_v12 = vpop.permute.xlu0 %5581  ;;  %v2936_v37 = vsel %vm1520_vm3, %v2933_v44, %v2935_v27  ;;  %v1609_v44 = vsel %vm1520_vm3, %v1606_v56, %v1608_v10  ;;  %v11020_v56 = vld [vmem:[#allocation29_spill] sm:$0xff] }
 0x2a0   :  { %v8468_v16 = vpop.permute.xlu1 %2174  ;;  %v2739_v61 = vsel %vm2010_vm1, %v2736_v21, %v2738_v23  ;;  %v2275_v33 = vsel %vm2255_vm5, %v11020_v56, %v7727_v38 }
 0x2a1   :  { %2192 = vrot.lane.b32.xlu1 %v2097_v19, %s5924_s18  ;;  %3151 = vrot.lane.b32.xlu0 %v8464_v32, %s5924_s18  ;;  %v11019_v19 = vrot.slane %v8375_v52, 4 }
 0x2a3   :  { %v8479_v0 = vpop.permute.xlu0 %3135 }
 0x2a4   :  { %v8482_v31 = vpop.permute.xlu1 %1686 }
 0x2a5   :  { %3017 = vrot.lane.b32.xlu1 %v2936_v37, %s5931_s3  ;;  %1465 = vrot.lane.b32.xlu0 %v1370_v35, %s5925_s19  ;;  %v2737_v37 = vsel %vm2010_vm1, %v11019_v19, %v2736_v21  ;;  %v2325_v21 = vsel %vm2305_vm6, %v2275_v33, %v7770_v57  ;;  %v11023_v19 = vrot.slane %v8375_v52, 6 }
 0x2a6   :  { %v5625_v28 = vpack.i.bf16 %v2739_v61, %v2737_v37  ;;  %v11022_v61 = vld [vmem:[#allocation27_spill] sm:$0xff]  ;;  %v2375_v57 = vsel %vm2355_vm7, %v2325_v21, %v7745_v45 }
 0x2a7   :  { %v8492_v50 = vpop.permute.xlu0 %1449  ;;  %v2274_v38 = vsel %vm2255_vm5, %v11022_v61, %v7691_v42  ;;  %v8541_v42 = vsel %vm2405_vm8, %v2375_v57, %v7802_v36 }
 0x2a8   :  { %11018 = vst [vmem:[#allocation100_spill] sm:$0xff] %v8492_v50  ;;  %v8495_v40 = vpop.permute.xlu1 %1931  ;;  %v2531_v50 = vsel %vm2498_vm9, %v2528_v54, %v11021_v46  ;;  %v2324_v37 = vsel %vm2305_vm6, %v2274_v38, %v7731_v20  ;;  %11024 = vst [vmem:[#allocation29_spill] sm:$0xff] %v8541_v42  ;;  %v11026_v38 = vrot.slane %v8318_v6, 3 }
 0x2a9   :  { %1704 = vrot.lane.b32.xlu1 %v1609_v44, %s5926_s20  ;;  %3153 = vrot.lane.b32.xlu0 %v8474_v63, %s5924_s18  ;;  %v2099_v44 = vsel %vm2010_vm1, %v2096_v53, %v2098_v34  ;;  %v2529_v53 = vsel %vm2498_vm9, %v11023_v19, %v2528_v54  ;;  %v2374_v20 = vsel %vm2355_vm7, %v2324_v37, %v7707_v43  ;;  %v11027_v19 = vrot.slane %v8230_v22, 3 }
 0x2aa   :  { %v5630_v46 = vpack.i.bf16 %v2531_v50, %v2529_v53  ;;  %v8549_v45 = vsel %vm2405_vm8, %v2374_v20, %v7747_v24 }
 0x2ab   :  { %v8507_v35 = vpop.permute.xlu0 %3137  ;;  %11025 = vst [vmem:[#allocation27_spill] sm:$0xff] %v8549_v45  ;;  %v2740_v21 = vrot.slane %v8549_v45, 4  ;;  %v1856_v53 = vsel %vm1765_vm4, %v11027_v19, %v11026_v38  ;;  %v11029_v38 = vld [vmem:[#allocation7_spill] sm:$0xff] }
 0x2ac   :  { %v8512_v1 = vpop.permute.xlu1 %2176 }
 0x2ad   :  { %2194 = vrot.lane.b32.xlu1 %v2099_v44, %s5924_s18  ;;  %5626 = vrot.lane.b32.xlu0 %v5625_v28, %s5929_s25  ;;  %v2938_v28 = vsel %vm1520_vm3, %v2935_v27, %v2937_v55  ;;  %v1610_v44 = vrot.slane %v8318_v6, 2  ;;  %v10695_v27 = vrot.slane %v8541_v42, 4  ;;  %v2741_v57 = vsel %vm2010_vm1, %v2738_v23, %v2740_v21 }
 0x2af   :  { %v8531_v56 = vpop.permute.xlu0 %1451  ;;  %v1611_v36 = vsel %vm1520_vm3, %v1608_v10, %v1610_v44  ;;  %v2100_v10 = vrot.slane %v8318_v6, 4  ;;  %v2743_v37 = vsel %vm2010_vm1, %v2740_v21, %v10695_v27  ;;  %v11030_v6 = vrot.slane %v8541_v42, 6  ;;  %v11032_v21 = vld [vmem:[#allocation33_spill] sm:$0xff] }
 0x2b0   :  { %v8535_v33 = vpop.permute.xlu1 %1688  ;;  %v5635_v20 = vpack.i.bf16 %v2743_v37, %v2741_v57  ;;  %v11033_v57 = vld [vmem:[#allocation32_spill] sm:$0xff] }
 0x2b1   :  { %3019 = vrot.lane.b32.xlu1 %v2938_v28, %s5931_s3  ;;  %5631 = vrot.lane.b32.xlu0 %v5630_v46, %s5928_s24  ;;  %v2532_v46 = vrot.slane %v8549_v45, 6  ;;  %v2101_v27 = vsel %vm2010_vm1, %v2098_v34, %v2100_v10  ;;  %v2276_v34 = vsel %vm2255_vm5, %v11033_v57, %v7766_v9 }
 0x2b3   :  { %v8551_v50 = vpop.permute.xlu0 %1941  ;;  %v2535_v22 = vsel %vm2498_vm9, %v2532_v46, %v11030_v6  ;;  %v11035_v6 = vrot.slane %v8474_v63, 6 }
 0x2b4   :  { %v8554_v54 = vpop.permute.xlu1 %2178 }
 0x2b5   :  { %1706 = vrot.lane.b32.xlu1 %v1611_v36, %s5926_s20  ;;  %3155 = vrot.lane.b32.xlu0 %v8549_v45, %s5924_s18  ;;  %v11028_v36 = vld [vmem:[#allocation28_spill] sm:$0xff] }
 0x2b6   :  { %v2256_v19 = vsel %vm2255_vm5, %v11029_v38, %v11028_v36  ;;  %v11034_v36 = vld [vmem:[#allocation34_spill] sm:$0xff] }
 0x2b7   :  { %v8561_v43 = vpop.permute.xlu0 %5586  ;;  %v2306_v23 = vsel %vm2305_vm6, %v2256_v19, %v11031_v49  ;;  %v2277_v38 = vsel %vm2255_vm5, %v11034_v36, %v7821_v8  ;;  %v2326_v49 = vsel %vm2305_vm6, %v2276_v34, %v7826_v11  ;;  %v5563_v19 = vunpack.i.l.bf16 %v8262_v2 }
 0x2b8   :  { %v8564_v61 = vpop.permute.xlu1 %1690  ;;  %v2356_v37 = vsel %vm2355_vm7, %v2306_v23, %v11032_v21  ;;  %v5568_v8 = vunpack.i.l.bf16 %v8336_v26  ;;  %v1612_v36 = vrot.slane %v8350_v3, 2 }
 0x2b9   :  { %1951 = vrot.lane.b32.xlu1 %v1856_v53, %s5927_s21  ;;  %3157 = vrot.lane.b32.xlu0 %v8541_v42, %s5924_s18  ;;  %v2939_v53 = vrot.slane %v8340_v47, 2  ;;  %v2533_v47 = vsel %vm2498_vm9, %v11035_v6, %v2532_v46 }
 0x2ba   :  { %v5640_v21 = vpack.i.bf16 %v2535_v22, %v2533_v47  ;;  %v11038_v22 = vld [vmem:[#allocation30_spill] sm:$0xff] }
 0x2bb   :  { %v8580_v28 = vpop.permute.xlu0 %5591  ;;  %v2940_v46 = vsel %vm1520_vm3, %v2937_v55, %v2939_v53  ;;  %v11039_v47 = vld [vmem:[#allocation14_spill] sm:$0xff] }
 0x2bc   :  { %v8585_v24 = vpop.permute.xlu1 %1935  ;;  %v2376_v34 = vsel %vm2355_vm7, %v2326_v49, %v11039_v47 }
 0x2bd   :  { %2196 = vrot.lane.b32.xlu1 %v2101_v27, %s5924_s18  ;;  %5636 = vrot.lane.b32.xlu0 %v5635_v20, %s5929_s25  ;;  %v11036_v27 = vld [vmem:[#allocation75_spill] sm:$0xff] }
 0x2be   :  { %v2327_v20 = vsel %vm2305_vm6, %v2277_v38, %v11036_v27  ;;  %v11040_v38 = vld [vmem:[#allocation76_spill] sm:$0xff] }
 0x2bf   :  { %v8612_v23 = vpop.permute.xlu0 %3139  ;;  %v2377_v9 = vsel %vm2355_vm7, %v2327_v20, %v7872_v4  ;;  %v2406_v4 = vsel %vm2405_vm8, %v2356_v37, %v11038_v22  ;;  %v8633_v55 = vsel %vm2405_vm8, %v2376_v34, %v11040_v38  ;;  %v1613_v37 = vsel %vm1520_vm3, %v1610_v44, %v1612_v36 }
 0x2c0   :  { %v8617_v57 = vpop.permute.xlu1 %2180  ;;  %v8623_v11 = vsel %vm2405_vm8, %v2377_v9, %v7898_v13  ;;  %11041 = vst [vmem:[#allocation7_spill] sm:$0xff] %v8633_v55  ;;  %v3259_v6 = vsel %vm108_vm0, %v2406_v4, %v5563_v19  ;;  %v2102_v9 = vrot.slane %v8350_v3, 4  ;;  %v2744_v19 = vrot.slane %v8633_v55, 4 }
 0x2c1   :  { %11037 = vst [vmem:[#allocation28_spill] sm:$0xff] %v8623_v11  ;;  %3021 = vrot.lane.b32.xlu1 %v2940_v46, %s5931_s3  ;;  %5641 = vrot.lane.b32.xlu0 %v5640_v21, %s5928_s24  ;;  %v10700_v27 = vrot.slane %v8623_v11, 4  ;;  %v3302_v20 = vsel %vm3301_vm10, %v3259_v6, %v5568_v8  ;;  %v2536_v34 = vrot.slane %v8633_v55, 6  ;;  %v11042_v38 = vrot.slane %v8541_v42, 4 }
 0x2c2   :  { %v2103_v4 = vsel %vm2010_vm1, %v2100_v10, %v2102_v9 }
 0x2c3   :  { %v8636_v13 = vpop.permute.xlu0 %1453  ;;  %v2747_v47 = vsel %vm2010_vm1, %v2744_v19, %v10700_v27  ;;  %v2745_v6 = vsel %vm2010_vm1, %v11042_v38, %v2744_v19  ;;  %v11044_v19 = vrot.slane %v8623_v11, 6  ;;  %v11046_v38 = vld [vmem:[#allocation77_spill] sm:$0xff] }
 0x2c4   :  { %v3006_v21 = vpop.permute.xlu1 %3005 }
 0x2c5   :  { %v3345_v49 = vsel %vm3344_vm11, %v3302_v20, %v3006_v21  ;;  %v3387_v46 = vsel %vm2405_vm8, %v3006_v21, %v8384_v25  ;;  %1708 = vrot.lane.b32.xlu1 %v1613_v37, %s5926_s20  ;;  %3159 = vrot.lane.b32.xlu0 %v8633_v55, %s5924_s18  ;;  %v10701_v25 = vrot.slane %v8375_v52, 2  ;;  %v5564_v20 = vunpack.i.h.bf16 %v8262_v2  ;;  %v11048_v37 = vld [vmem:[#allocation8_spill] sm:$0xff] }
 0x2c6   :  { %5156 = vmatprep.mubr.msk.f32.mxu0 %vm3461_vm12, %v3387_v46  ;;  %v5645_v21 = vpack.i.bf16 %v2747_v47, %v2745_v6  ;;  %v2539_v2 = vsel %vm2498_vm9, %v2536_v34, %v11044_v19  ;;  %v11047_v6 = vld [vmem:[#allocation36_spill] sm:$0xff] }
 0x2c7   :  { %3653 = vmatmul.mubr.f32.vlgmr.msra.gmra.mrb[82].mxu0 %v3345_v49  ;;  %v8650_v8 = vpop.permute.xlu0 %3141  ;;  %v11043_v49 = vld [vmem:[#allocation37_spill] sm:$0xff]  ;;  %v2942_v44 = vsel %vm1520_vm3, %v2939_v53, %v10701_v25  ;;  %v3260_v19 = vsel %vm108_vm0, %v11048_v37, %v5564_v20 }
 0x2c8   :  { %v8653_v22 = vpop.permute.xlu1 %1692  ;;  %v2279_v46 = vsel %vm2255_vm5, %v11043_v49, %v7919_v29  ;;  %v11045_v29 = vrot.slane %v8541_v42, 6  ;;  %v2278_v49 = vsel %vm2255_vm5, %v11047_v6, %v11046_v38 }
 0x2c9   :  { %2198 = vrot.lane.b32.xlu1 %v2103_v4, %s5924_s18  ;;  %3161 = vrot.lane.b32.xlu0 %v8623_v11, %s5924_s18  ;;  %v5569_v4 = vunpack.i.h.bf16 %v8336_v26  ;;  %v2329_v47 = vsel %vm2305_vm6, %v2279_v46, %v7979_v59  ;;  %v10703_v59 = vrot.slane %v8433_v41, 3 }
 0x2ca   :  { %v2537_v26 = vsel %vm2498_vm9, %v11045_v29, %v2536_v34  ;;  %v11049_v34 = vrot.slane %v8433_v41, 2 }
 0x2cb   :  { %v8668_v10 = vpop.permute.xlu0 %1455  ;;  %v5650_v25 = vpack.i.bf16 %v2539_v2, %v2537_v26  ;;  %v3303_v38 = vsel %vm3301_vm10, %v3260_v19, %v5569_v4  ;;  %v2943_v19 = vrot.slane %v8464_v32, 2 }
 0x2cc   :  { %v8675_v27 = vpop.permute.xlu1 %2182  ;;  %v1615_v29 = vsel %vm1520_vm3, %v1612_v36, %v11049_v34 }
 0x2cd   :  { %3023 = vrot.lane.b32.xlu1 %v2942_v44, %s5931_s3  ;;  %5646 = vrot.lane.b32.xlu0 %v5645_v21, %s5929_s25  ;;  %v2328_v44 = vsel %vm2305_vm6, %v2278_v49, %v7905_v18  ;;  %v2379_v21 = vsel %vm2355_vm7, %v2329_v47, %v7944_v15 }
 0x2ce   :  { %v8708_v2 = vsel %vm2405_vm8, %v2379_v21, %v8001_v7  ;;  %v2378_v15 = vsel %vm2355_vm7, %v2328_v44, %v7928_v39  ;;  %v10702_v39 = vrot.slane %v8433_v41, 4 }
 0x2cf   :  { %v8693_v53 = vpop.permute.xlu0 %1945  ;;  %11050 = vst [vmem:[#allocation31_spill] sm:$0xff] %v8708_v2  ;;  %v8720_v36 = vsel %vm2405_vm8, %v2378_v15, %v7952_v62  ;;  %v10705_v26 = vrot.slane %v8708_v2, 6 }
 0x2d0   :  { %v3008_v46 = vpop.permute.xlu1 %3007  ;;  %11051 = vst [vmem:[#allocation33_spill] sm:$0xff] %v8720_v36  ;;  %v2748_v62 = vrot.slane %v8720_v36, 4  ;;  %v2105_v49 = vsel %vm2010_vm1, %v2102_v9, %v10702_v39  ;;  %v2540_v21 = vrot.slane %v8720_v36, 6 }
 0x2d1   :  { %v3388_v20 = vsel %vm2405_vm8, %v3008_v46, %v8479_v0  ;;  %1710 = vrot.lane.b32.xlu1 %v1615_v29, %s5926_s20  ;;  %5651 = vrot.lane.b32.xlu0 %v5650_v25, %s5928_s24  ;;  %v3346_v18 = vsel %vm3344_vm11, %v3303_v38, %v3008_v46  ;;  %v10704_v0 = vrot.slane %v8708_v2, 4  ;;  %v11052_v25 = vrot.slane %v8350_v3, 3  ;;  %v11060_v3 = vld [vmem:[#allocation70_spill] sm:$0xff] }
 0x2d2   :  { %5157 = vmatprep.mubr.msk.f32.mxu0 %vm3461_vm12, %v3388_v20  ;;  %v11053_v46 = vrot.slane %v8623_v11, 4  ;;  %v5573_v29 = vunpack.i.l.bf16 %v8355_v30  ;;  %v2945_v20 = vrot.slane %v8474_v63, 2 }
 0x2d3   :  { %3658 = vmatmul.mubr.f32.gmra.mrb[84].mxu0 %v3346_v18  ;;  %v8722_v7 = vpop.permute.xlu0 %5596  ;;  %v1860_v4 = vsel %vm1765_vm4, %v11052_v25, %v10703_v59  ;;  %v2751_v44 = vsel %vm2010_vm1, %v2748_v62, %v10704_v0  ;;  %v11054_v18 = vld [vmem:[#allocation42_spill] sm:$0xff]  ;;  %v5578_v25 = vunpack.i.l.bf16 %v8438_v5 }
 0x2d4   :  { %v8725_v37 = vpop.permute.xlu1 %1694  ;;  %v2749_v34 = vsel %vm2010_vm1, %v11053_v46, %v2748_v62  ;;  %v2281_v15 = vsel %vm2255_vm5, %v11054_v18, %v7996_v17  ;;  %v2543_v62 = vsel %vm2498_vm9, %v2540_v21, %v10705_v26  ;;  %v11056_v17 = vrot.slane %v8623_v11, 6  ;;  %v11058_v18 = vld [vmem:[#allocation40_spill] sm:$0xff] }
 0x2d5   :  { %1955 = vrot.lane.b32.xlu1 %v1860_v4, %s5927_s21  ;;  %3163 = vrot.lane.b32.xlu0 %v8720_v36, %s5924_s18  ;;  %v5655_v38 = vpack.i.bf16 %v2751_v44, %v2749_v34  ;;  %v2331_v44 = vsel %vm2305_vm6, %v2281_v15, %v8099_v51  ;;  %v11057_v34 = vld [vmem:[#allocation79_spill] sm:$0xff]  ;;  %v2946_v0 = vsel %vm1520_vm3, %v2943_v19, %v2945_v20  ;;  %v11061_v15 = vld [vmem:[#allocation82_spill] sm:$0xff] }
 0x2d6   :  { %v2541_v46 = vsel %vm2498_vm9, %v11056_v17, %v2540_v21  ;;  %v2280_v59 = vsel %vm2255_vm5, %v11058_v18, %v11057_v34  ;;  %v3261_v51 = vsel %vm108_vm0, %v11060_v3, %v5573_v29  ;;  %v2947_v17 = vrot.slane %v8549_v45, 2  ;;  %v11063_v34 = vld [vmem:[#allocation18_spill] sm:$0xff] }
 0x2d7   :  { %v8737_v47 = vpop.permute.xlu0 %5601  ;;  %v5660_v26 = vpack.i.bf16 %v2543_v62, %v2541_v46  ;;  %v3304_v21 = vsel %vm3301_vm10, %v3261_v51, %v5578_v25  ;;  %v11066_v25 = vld [vmem:[#allocation49_spill] sm:$0xff]  ;;  %v5574_v46 = vunpack.i.h.bf16 %v8355_v30 }
 0x2d8   :  { %v8740_v6 = vpop.permute.xlu1 %1939 }
 0x2d9   :  { %2200 = vrot.lane.b32.xlu1 %v2105_v49, %s5924_s18  ;;  %3165 = vrot.lane.b32.xlu0 %v8708_v2, %s5924_s18  ;;  %v11055_v49 = vrot.slane %v8375_v52, 2 }
 0x2db   :  { %v8757_v9 = vpop.permute.xlu0 %3143  ;;  %v2944_v39 = vsel %vm1520_vm3, %v11055_v49, %v2943_v19 }
 0x2dc   :  { %v8764_v4 = vpop.permute.xlu1 %2184 }
 0x2dd   :  { %3025 = vrot.lane.b32.xlu1 %v2944_v39, %s5931_s3  ;;  %5656 = vrot.lane.b32.xlu0 %v5655_v38, %s5929_s25  ;;  %v2330_v39 = vsel %vm2305_vm6, %v2280_v59, %v11061_v15  ;;  %v11062_v38 = vld [vmem:[#allocation81_spill] sm:$0xff]  ;;  %v11065_v59 = vld [vmem:[#allocation84_spill] sm:$0xff]  ;;  %v2951_v15 = vrot.slane %v8633_v55, 2 }
 0x2de   :  { %v2381_v63 = vsel %vm2355_vm7, %v2331_v44, %v11062_v38  ;;  %v2380_v29 = vsel %vm2355_vm7, %v2330_v39, %v11065_v59  ;;  %v5579_v38 = vunpack.i.h.bf16 %v8438_v5 }
 0x2df   :  { %v8782_v49 = vpop.permute.xlu0 %1457  ;;  %v8795_v18 = vsel %vm2405_vm8, %v2381_v63, %v11063_v34  ;;  %v8807_v62 = vsel %vm2405_vm8, %v2380_v29, %v11066_v25  ;;  %v11071_v29 = vld [vmem:[#allocation9_spill] sm:$0xff] }
 0x2e0   :  { %11059 = vst [vmem:[#allocation32_spill] sm:$0xff] %v8782_v49  ;;  %v3010_v32 = vpop.permute.xlu1 %3009  ;;  %11064 = vst [vmem:[#allocation34_spill] sm:$0xff] %v8795_v18  ;;  %v2544_v30 = vrot.slane %v8807_v62, 6  ;;  %v3262_v25 = vsel %vm108_vm0, %v11071_v29, %v5574_v46  ;;  %v11074_v45 = vrot.slane %v8795_v18, 6  ;;  %v11077_v29 = vld [vmem:[#allocation83_spill] sm:$0xff] }
 0x2e1   :  { %v3389_v19 = vsel %vm2405_vm8, %v3010_v32, %v8507_v35  ;;  %3027 = vrot.lane.b32.xlu1 %v2946_v0, %s5931_s3  ;;  %5661 = vrot.lane.b32.xlu0 %v5660_v26, %s5928_s24  ;;  %v3347_v3 = vsel %vm3344_vm11, %v3304_v21, %v3010_v32  ;;  %11067 = vst [vmem:[#allocation75_spill] sm:$0xff] %v8807_v62  ;;  %v10709_v35 = vrot.slane %v8795_v18, 4  ;;  %v2949_v32 = vrot.slane %v8541_v42, 2 }
 0x2e2   :  { %5158 = vmatprep.mubr.msk.f32.mxu0 %vm3461_vm12, %v3389_v19  ;;  %v2948_v0 = vsel %vm1520_vm3, %v2945_v20, %v2947_v17  ;;  %v2752_v26 = vrot.slane %v8807_v62, 4  ;;  %v11069_v19 = vrot.slane %v8708_v2, 4  ;;  %v3305_v55 = vsel %vm3301_vm10, %v3262_v25, %v5579_v38  ;;  %v11078_v25 = vld [vmem:[#allocation44_spill] sm:$0xff] }
 0x2e3   :  { %3663 = vmatmul.mubr.f32.gmra.mrb[86].mxu0 %v3347_v3  ;;  %v8809_v63 = vpop.permute.xlu0 %3145  ;;  %v2950_v21 = vsel %vm1520_vm3, %v2947_v17, %v2949_v32  ;;  %v2952_v59 = vsel %vm1520_vm3, %v2949_v32, %v2951_v15  ;;  %v2953_v42 = vrot.slane %v8623_v11, 2  ;;  %v11076_v38 = vrot.slane %v8708_v2, 6  ;;  %v11090_v11 = vld [vmem:[#allocation50_spill] sm:$0xff] }
 0x2e4   :  { %v8812_v44 = vpop.permute.xlu1 %1696  ;;  %v2755_v34 = vsel %vm2010_vm1, %v2752_v26, %v10709_v35  ;;  %v2753_v3 = vsel %vm2010_vm1, %v11069_v19, %v2752_v26  ;;  %v11073_v35 = vld [vmem:[#allocation47_spill] sm:$0xff]  ;;  %v2547_v26 = vsel %vm2498_vm9, %v2544_v30, %v11074_v45 }
 0x2e5   :  { %3029 = vrot.lane.b32.xlu1 %v2948_v0, %s5931_s3  ;;  %3167 = vrot.lane.b32.xlu0 %v8807_v62, %s5924_s18  ;;  %v5665_v17 = vpack.i.bf16 %v2755_v34, %v2753_v3  ;;  %v11072_v0 = vld [vmem:[#allocation17_spill] sm:$0xff]  ;;  %v11075_v19 = vld [vmem:[#allocation39_spill] sm:$0xff]  ;;  %v2545_v34 = vsel %vm2498_vm9, %v11076_v38, %v2544_v30 }
 0x2e6   :  { %v5670_v3 = vpack.i.bf16 %v2547_v26, %v2545_v34  ;;  %v11083_v26 = vld [vmem:[#allocation87_spill] sm:$0xff] }
 0x2e7   :  { %v8821_v51 = vpop.permute.xlu0 %1459 }
 0x2e8   :  { %11068 = vst [vmem:[#allocation30_spill] sm:$0xff] %v8821_v51  ;;  %v8826_v20 = vpop.permute.xlu1 %2186  ;;  %v2961_v51 = vrot.slane %v8795_v18, 2 }
 0x2e9   :  { %3031 = vrot.lane.b32.xlu1 %v2950_v21, %s5931_s3  ;;  %3169 = vrot.lane.b32.xlu0 %v8795_v18, %s5924_s18  ;;  %v2283_v21 = vsel %vm2255_vm5, %v11073_v35, %v11072_v0 }
 0x2ea   :  { %v2333_v32 = vsel %vm2305_vm6, %v2283_v21, %v11075_v19  ;;  %v11080_v21 = vld [vmem:[#allocation56_spill] sm:$0xff]  ;;  %v11081_v19 = vld [vmem:[#allocation59_spill] sm:$0xff] }
 0x2eb   :  { %v8839_v5 = vpop.permute.xlu0 %1949 }
 0x2ec   :  { %11070 = vst [vmem:[#allocation14_spill] sm:$0xff] %v8839_v5  ;;  %v3012_v39 = vpop.permute.xlu1 %3011 }
 0x2ed   :  { %3033 = vrot.lane.b32.xlu1 %v2952_v59, %s5931_s3  ;;  %5666 = vrot.lane.b32.xlu0 %v5665_v17, %s5929_s25  ;;  %v3390_v46 = vsel %vm2405_vm8, %v3012_v39, %v8612_v23  ;;  %v3348_v35 = vsel %vm3344_vm11, %v3305_v55, %v3012_v39  ;;  %v2282_v59 = vsel %vm2255_vm5, %v11078_v25, %v11077_v29  ;;  %v11079_v17 = vld [vmem:[#allocation38_spill] sm:$0xff]  ;;  %v2955_v39 = vrot.slane %v8720_v36, 2 }
 0x2ee   :  { %5159 = vmatprep.mubr.msk.f32.mxu0 %vm3461_vm12, %v3390_v46  ;;  %v2383_v0 = vsel %vm2355_vm7, %v2333_v32, %v11079_v17  ;;  %v2954_v55 = vsel %vm1520_vm3, %v2951_v15, %v2953_v42  ;;  %v2332_v30 = vsel %vm2305_vm6, %v2282_v59, %v11080_v21  ;;  %v2957_v59 = vrot.slane %v8708_v2, 2  ;;  %v11088_v2 = vld [vmem:[#allocation72_spill] sm:$0xff] }
 0x2ef   :  { %3668 = vmatmul.mubr.f32.gmra.mrb[88].mxu0 %v3348_v35  ;;  %v8863_v45 = vpop.permute.xlu0 %5606  ;;  %v8878_v46 = vsel %vm2405_vm8, %v2383_v0, %v11081_v19  ;;  %v2382_v32 = vsel %vm2355_vm7, %v2332_v30, %v11083_v26  ;;  %v11084_v35 = vld [vmem:[#allocation89_spill] sm:$0xff]  ;;  %v2956_v25 = vsel %vm1520_vm3, %v2953_v42, %v2955_v39  ;;  %v5583_v17 = vunpack.i.l.bf16 %v8459_v12 }
 0x2f0   :  { %v8870_v23 = vpop.permute.xlu1 %1698  ;;  %11082 = vst [vmem:[#allocation76_spill] sm:$0xff] %v8878_v46  ;;  %v8886_v38 = vsel %vm2405_vm8, %v2382_v32, %v11084_v35  ;;  %v10716_v34 = vrot.slane %v8878_v46, 4  ;;  %v5588_v30 = vunpack.i.l.bf16 %v8561_v43  ;;  %v2958_v19 = vsel %vm1520_vm3, %v2955_v39, %v2957_v59 }
 0x2f1   :  { %3035 = vrot.lane.b32.xlu1 %v2954_v55, %s5931_s3  ;;  %5671 = vrot.lane.b32.xlu0 %v5670_v3, %s5928_s24  ;;  %11085 = vst [vmem:[#allocation37_spill] sm:$0xff] %v8886_v38  ;;  %v2756_v3 = vrot.slane %v8886_v38, 4  ;;  %v2959_v55 = vrot.slane %v8807_v62, 2  ;;  %v2548_v32 = vrot.slane %v8886_v38, 6  ;;  %v11086_v35 = vrot.slane %v8795_v18, 4 }
 0x2f2   :  { %v3263_v36 = vsel %vm108_vm0, %v11088_v2, %v5583_v17  ;;  %v11091_v49 = vrot.slane %v8878_v46, 6 }
 0x2f3   :  { %v8888_v15 = vpop.permute.xlu0 %5611  ;;  %v2759_v26 = vsel %vm2010_vm1, %v2756_v3, %v10716_v34  ;;  %v2960_v62 = vsel %vm1520_vm3, %v2957_v59, %v2959_v55  ;;  %v11089_v34 = vld [vmem:[#allocation54_spill] sm:$0xff]  ;;  %v3306_v52 = vsel %vm3301_vm10, %v3263_v36, %v5588_v30  ;;  %v11093_v36 = vrot.slane %v8795_v18, 6  ;;  %v11094_v30 = vld [vmem:[#allocation48_spill] sm:$0xff] }
 0x2f4   :  { %v8891_v29 = vpop.permute.xlu1 %1943 }
 0x2f5   :  { %3037 = vrot.lane.b32.xlu1 %v2956_v25, %s5931_s3  ;;  %3171 = vrot.lane.b32.xlu0 %v8886_v38, %s5924_s18  ;;  %v2757_v25 = vsel %vm2010_vm1, %v11086_v35, %v2756_v3  ;;  %v2551_v3 = vsel %vm2498_vm9, %v2548_v32, %v11091_v49  ;;  %v11092_v35 = vld [vmem:[#allocation92_spill] sm:$0xff] }
 0x2f6   :  { %v5675_v39 = vpack.i.bf16 %v2759_v26, %v2757_v25  ;;  %v11095_v26 = vld [vmem:[#allocation5_spill] sm:$0xff]  ;;  %v11096_v25 = vld [vmem:[#allocation86_spill] sm:$0xff] }
 0x2f7   :  { %v8900_v0 = vpop.permute.xlu0 %3147 }
 0x2f8   :  { %v8905_v42 = vpop.permute.xlu1 %2188 }
 0x2f9   :  { %3039 = vrot.lane.b32.xlu1 %v2958_v19, %s5931_s3  ;;  %3173 = vrot.lane.b32.xlu0 %v8878_v46, %s5924_s18  ;;  %v2285_v19 = vsel %vm2255_vm5, %v11090_v11, %v11089_v34  ;;  %v2549_v34 = vsel %vm2498_vm9, %v11093_v36, %v2548_v32 }
 0x2fa   :  { %v2335_v59 = vsel %vm2305_vm6, %v2285_v19, %v11092_v35  ;;  %v5680_v17 = vpack.i.bf16 %v2551_v3, %v2549_v34  ;;  %v11097_v19 = vld [vmem:[#allocation62_spill] sm:$0xff]  ;;  %v11100_v3 = vld [vmem:[#allocation20_spill] sm:$0xff] }
 0x2fb   :  { %v8918_v21 = vpop.permute.xlu0 %1461  ;;  %v11098_v35 = vld [vmem:[#allocation94_spill] sm:$0xff] }
 0x2fc   :  { %11087 = vst [vmem:[#allocation77_spill] sm:$0xff] %v8918_v21  ;;  %v3014_v5 = vpop.permute.xlu1 %3013 }
 0x2fd   :  { %3041 = vrot.lane.b32.xlu1 %v2960_v62, %s5931_s3  ;;  %5676 = vrot.lane.b32.xlu0 %v5675_v39, %s5929_s25  ;;  %v3391_v2 = vsel %vm2405_vm8, %v3014_v5, %v8650_v8  ;;  %v3349_v11 = vsel %vm3344_vm11, %v3306_v52, %v3014_v5  ;;  %v2284_v62 = vsel %vm2255_vm5, %v11095_v26, %v11094_v30  ;;  %v2963_v5 = vrot.slane %v8886_v38, 2 }
 0x2fe   :  { %5160 = vmatprep.mubr.msk.f32.mxu0 %vm3461_vm12, %v3391_v2  ;;  %v2385_v39 = vsel %vm2355_vm7, %v2335_v59, %v11096_v25  ;;  %v2962_v52 = vsel %vm1520_vm3, %v2959_v55, %v2961_v51  ;;  %v2334_v32 = vsel %vm2305_vm6, %v2284_v62, %v11097_v19  ;;  %v5584_v55 = vunpack.i.h.bf16 %v8459_v12  ;;  %v11104_v12 = vld [vmem:[#allocation90_spill] sm:$0xff] }
 0x2ff   :  { %3673 = vmatmul.mubr.f32.gmra.mrb[90].mxu0 %v3349_v11  ;;  %v8942_v49 = vpop.permute.xlu0 %3149  ;;  %v8957_v2 = vsel %vm2405_vm8, %v2385_v39, %v11098_v35  ;;  %v2384_v59 = vsel %vm2355_vm7, %v2334_v32, %v11100_v3  ;;  %v11101_v11 = vld [vmem:[#allocation10_spill] sm:$0xff]  ;;  %v5589_v26 = vunpack.i.h.bf16 %v8561_v43  ;;  %v2964_v25 = vsel %vm1520_vm3, %v2961_v51, %v2963_v5  ;;  %v11107_v43 = vld [vmem:[#allocation12_spill] sm:$0xff] }
 0x300   :  { %v8949_v8 = vpop.permute.xlu1 %1700  ;;  %11099 = vst [vmem:[#allocation36_spill] sm:$0xff] %v8957_v2  ;;  %v8965_v36 = vsel %vm2405_vm8, %v2384_v59, %v11101_v11  ;;  %v10720_v30 = vrot.slane %v8957_v2, 4  ;;  %v3264_v35 = vsel %vm108_vm0, %v11107_v43, %v5584_v55  ;;  %v11109_v43 = vld [vmem:[#allocation52_spill] sm:$0xff] }
 0x301   :  { %3043 = vrot.lane.b32.xlu1 %v2962_v52, %s5931_s3  ;;  %5681 = vrot.lane.b32.xlu0 %v5680_v17, %s5928_s24  ;;  %11102 = vst [vmem:[#allocation8_spill] sm:$0xff] %v8965_v36  ;;  %v2965_v17 = vrot.slane %v8878_v46, 2  ;;  %v2760_v39 = vrot.slane %v8965_v36, 4  ;;  %v11105_v52 = vld [vmem:[#allocation57_spill] sm:$0xff]  ;;  %v2967_v51 = vrot.slane %v8965_v36, 2 }
 0x302   :  { %v2287_v19 = vsel %vm2255_vm5, %v11105_v52, %v11104_v12 }
 0x303   :  { %v8968_v34 = vpop.permute.xlu0 %1463  ;;  %v2966_v11 = vsel %vm1520_vm3, %v2963_v5, %v2965_v17  ;;  %v2763_v38 = vsel %vm2010_vm1, %v2760_v39, %v10720_v30  ;;  %v2337_v12 = vsel %vm2305_vm6, %v2287_v19, %v8359_v14  ;;  %v11108_v5 = vld [vmem:[#allocation88_spill] sm:$0xff]  ;;  %v11110_v14 = vrot.slane %v8878_v46, 4 }
 0x304   :  { %11103 = vst [vmem:[#allocation42_spill] sm:$0xff] %v8968_v34  ;;  %v8972_v62 = vpop.permute.xlu1 %2190  ;;  %v11126_v34 = vld [vmem:[#allocation99_spill] sm:$0xff] }
 0x305   :  { %3045 = vrot.lane.b32.xlu1 %v2964_v25, %s5931_s3  ;;  %3175 = vrot.lane.b32.xlu0 %v8965_v36, %s5924_s18  ;;  %v3307_v25 = vsel %vm3301_vm10, %v3264_v35, %v5589_v26  ;;  %v2286_v26 = vsel %vm2255_vm5, %v11109_v43, %v11108_v5  ;;  %v2552_v35 = vrot.slane %v8965_v36, 6  ;;  %v2761_v19 = vsel %vm2010_vm1, %v11110_v14, %v2760_v39  ;;  %v11112_v5 = vld [vmem:[#allocation53_spill] sm:$0xff] }
 0x306   :  { %v2387_v43 = vsel %vm2355_vm7, %v2337_v12, %v11112_v5  ;;  %v2969_v36 = vrot.slane %v8957_v2, 2  ;;  %v11113_v39 = vrot.slane %v8957_v2, 6 }
 0x307   :  { %v8983_v32 = vpop.permute.xlu0 %1953 }
 0x308   :  { %11106 = vst [vmem:[#allocation79_spill] sm:$0xff] %v8983_v32  ;;  %v3016_v59 = vpop.permute.xlu1 %3015  ;;  %v11125_v32 = vrot.slane %v8957_v2, 4 }
 0x309   :  { %3047 = vrot.lane.b32.xlu1 %v2966_v11, %s5931_s3  ;;  %3177 = vrot.lane.b32.xlu0 %v8957_v2, %s5924_s18  ;;  %v3392_v55 = vsel %vm2405_vm8, %v3016_v59, %v8757_v9  ;;  %v3350_v52 = vsel %vm3344_vm11, %v3307_v25, %v3016_v59  ;;  %v11111_v11 = vld [vmem:[#allocation43_spill] sm:$0xff]  ;;  %v2968_v9 = vsel %vm1520_vm3, %v2965_v17, %v2967_v51  ;;  %v11116_v17 = vld [vmem:[#allocation96_spill] sm:$0xff] }
 0x30a   :  { %5161 = vmatprep.mubr.msk.f32.mxu0 %vm3461_vm12, %v3392_v55  ;;  %v2336_v30 = vsel %vm2305_vm6, %v2286_v26, %v11111_v11  ;;  %v5685_v59 = vpack.i.bf16 %v2763_v38, %v2761_v19  ;;  %v2555_v26 = vsel %vm2498_vm9, %v2552_v35, %v11113_v39  ;;  %v9031_v38 = vsel %vm2405_vm8, %v2387_v43, %v11116_v17  ;;  %v11119_v39 = vld [vmem:[#allocation58_spill] sm:$0xff] }
 0x30b   :  { %3678 = vmatmul.mubr.f32.gmra.mrb[92].mxu0 %v3350_v52  ;;  %v9012_v3 = vpop.permute.xlu0 %5616  ;;  %v2386_v25 = vsel %vm2355_vm7, %v2336_v30, %v8322_v58  ;;  %v11114_v52 = vld [vmem:[#allocation45_spill] sm:$0xff]  ;;  %v11117_v58 = vrot.slane %v8878_v46, 6  ;;  %v2766_v11 = vrot.slane %v9031_v38, 4  ;;  %v5598_v17 = vunpack.i.l.bf16 %v8722_v7 }
 0x30c   :  { %v9019_v55 = vpop.permute.xlu1 %1702  ;;  %v9027_v14 = vsel %vm2405_vm8, %v2386_v25, %v11114_v52  ;;  %v2970_v25 = vsel %vm1520_vm3, %v2967_v51, %v2969_v36 }
 0x30d   :  { %11115 = vst [vmem:[#allocation40_spill] sm:$0xff] %v9027_v14  ;;  %3049 = vrot.lane.b32.xlu1 %v2968_v9, %s5931_s3  ;;  %5686 = vrot.lane.b32.xlu0 %v5685_v59, %s5929_s25  ;;  %v2553_v30 = vsel %vm2498_vm9, %v11117_v58, %v2552_v35  ;;  %v2971_v43 = vrot.slane %v9027_v14, 2  ;;  %v2764_v9 = vrot.slane %v9027_v14, 4  ;;  %v5593_v59 = vunpack.i.l.bf16 %v8580_v28 }
 0x30e   :  { %v5690_v19 = vpack.i.bf16 %v2555_v26, %v2553_v30  ;;  %v11120_v26 = vld [vmem:[#allocation65_spill] sm:$0xff] }
 0x30f   :  { %v9038_v12 = vpop.permute.xlu0 %5621  ;;  %v2289_v52 = vsel %vm2255_vm5, %v11120_v26, %v11119_v39  ;;  %v2972_v51 = vsel %vm1520_vm3, %v2969_v36, %v2971_v43  ;;  %v2767_v30 = vsel %vm2010_vm1, %v2764_v9, %v2766_v11  ;;  %v11124_v39 = vld [vmem:[#allocation97_spill] sm:$0xff]  ;;  %v2765_v36 = vsel %vm2010_vm1, %v11125_v32, %v2764_v9 }
 0x310   :  { %v9041_v5 = vpop.permute.xlu1 %1947  ;;  %v2339_v18 = vsel %vm2305_vm6, %v2289_v52, %v8445_v60  ;;  %v2973_v32 = vrot.slane %v9031_v38, 2 }
 0x311   :  { %11118 = vst [vmem:[#allocation70_spill] sm:$0xff] %v9041_v5  ;;  %3051 = vrot.lane.b32.xlu1 %v2970_v25, %s5931_s3  ;;  %5691 = vrot.lane.b32.xlu0 %v5690_v19, %s5928_s24  ;;  %v11122_v25 = vld [vmem:[#allocation41_spill] sm:$0xff]  ;;  %v11123_v19 = vld [vmem:[#allocation60_spill] sm:$0xff] }
 0x312   :  { %v2288_v46 = vsel %vm2255_vm5, %v11123_v19, %v11122_v25  ;;  %v5695_v25 = vpack.i.bf16 %v2767_v30, %v2765_v36  ;;  %v11127_v19 = vld [vmem:[#allocation74_spill] sm:$0xff]  ;;  %v5594_v30 = vunpack.i.h.bf16 %v8580_v28  ;;  %v5599_v36 = vunpack.i.h.bf16 %v8722_v7 }
 0x313   :  { %v9049_v35 = vpop.permute.xlu0 %3151  ;;  %v2338_v26 = vsel %vm2305_vm6, %v2288_v46, %v11124_v39  ;;  %v3265_v60 = vsel %vm108_vm0, %v11127_v19, %v5593_v59  ;;  %v2556_v28 = vrot.slane %v9027_v14, 6 }
 0x314   :  { %v9055_v58 = vpop.permute.xlu1 %2192  ;;  %v2388_v21 = vsel %vm2355_vm7, %v2338_v26, %v11126_v34  ;;  %v3308_v5 = vsel %vm3301_vm10, %v3265_v60, %v5598_v17 }
 0x315   :  { %11121 = vst [vmem:[#allocation82_spill] sm:$0xff] %v9055_v58  ;;  %3053 = vrot.lane.b32.xlu1 %v2972_v51, %s5931_s3  ;;  %3179 = vrot.lane.b32.xlu0 %v9027_v14, %s5924_s18  ;;  %v9080_v52 = vsel %vm2405_vm8, %v2388_v21, %v8422_v48  ;;  %v11129_v51 = vld [vmem:[#allocation64_spill] sm:$0xff] }
 0x316   :  { %11128 = vst [vmem:[#allocation81_spill] sm:$0xff] %v9080_v52  ;;  %v2389_v46 = vsel %vm2355_vm7, %v2339_v18, %v11129_v51  ;;  %v2975_v17 = vrot.slane %v9080_v52, 2  ;;  %v11130_v51 = vld [vmem:[#allocation93_spill] sm:$0xff] }
 0x317   :  { %v9074_v58 = vpop.permute.xlu0 %1465  ;;  %v9088_v34 = vsel %vm2405_vm8, %v2389_v46, %v8468_v16  ;;  %v2974_v16 = vsel %vm1520_vm3, %v2971_v43, %v2973_v32  ;;  %v11131_v46 = vld [vmem:[#allocation67_spill] sm:$0xff] }
 0x318   :  { %v3018_v39 = vpop.permute.xlu1 %3017  ;;  %v10724_v9 = vrot.slane %v9088_v34, 4  ;;  %v2976_v43 = vsel %vm1520_vm3, %v2973_v32, %v2975_v17  ;;  %v2977_v60 = vrot.slane %v9088_v34, 2 }
 0x319   :  { %5696 = vrot.lane.b32.xlu1 %v5695_v25, %s5929_s25  ;;  %3181 = vrot.lane.b32.xlu0 %v9031_v38, %s5924_s18  ;;  %v3393_v48 = vsel %vm2405_vm8, %v3018_v39, %v8809_v63  ;;  %v3351_v21 = vsel %vm3344_vm11, %v3308_v5, %v3018_v39  ;;  %v2768_v63 = vrot.slane %v9080_v52, 4  ;;  %v2290_v39 = vsel %vm2255_vm5, %v11131_v46, %v11130_v51  ;;  %v11134_v5 = vld [vmem:[#allocation13_spill] sm:$0xff] }
 0x31a   :  { %5162 = vmatprep.mubr.msk.f32.mxu0 %vm3461_vm12, %v3393_v48  ;;  %v2340_v7 = vsel %vm2305_vm6, %v2290_v39, %v8482_v31  ;;  %v11132_v48 = vld [vmem:[#allocation95_spill] sm:$0xff]  ;;  %v11135_v39 = vrot.slane %v9031_v38, 6 }
 0x31b   :  { %3683 = vmatmul.mubr.f32.gmra.mrb[94].mxu0 %v3351_v21  ;;  %v9097_v18 = vpop.permute.xlu0 %3153  ;;  %v2771_v19 = vsel %vm2010_vm1, %v2768_v63, %v10724_v9  ;;  %v2769_v32 = vsel %vm2010_vm1, %v2766_v11, %v2768_v63  ;;  %v11133_v21 = vld [vmem:[#allocation71_spill] sm:$0xff]  ;;  %v2390_v9 = vsel %vm2355_vm7, %v2340_v7, %v8495_v40  ;;  %v2978_v11 = vsel %vm1520_vm3, %v2975_v17, %v2977_v60 }
 0x31c   :  { %v9100_v59 = vpop.permute.xlu1 %1704  ;;  %v5705_v46 = vpack.i.bf16 %v2771_v19, %v2769_v32  ;;  %v9141_v14 = vsel %vm2405_vm8, %v2390_v9, %v8512_v1  ;;  %v11136_v17 = vrot.slane %v8957_v2, 6 }
 0x31d   :  { %3183 = vrot.lane.b32.xlu1 %v9080_v52, %s5924_s18  ;;  %3055 = vrot.lane.b32.xlu0 %v2974_v16, %s5931_s3  ;;  %v2291_v16 = vsel %vm2255_vm5, %v11133_v21, %v11132_v48  ;;  %v2559_v48 = vsel %vm2498_vm9, %v2556_v28, %v11135_v39  ;;  %v2979_v32 = vrot.slane %v9141_v14, 2  ;;  %v2560_v39 = vrot.slane %v9080_v52, 6 }
 0x31e   :  { %v2341_v40 = vsel %vm2305_vm6, %v2291_v16, %v8535_v33  ;;  %v11137_v33 = vld [vmem:[#allocation63_spill] sm:$0xff] }
 0x31f   :  { %v9110_v26 = vpop.permute.xlu0 %5626  ;;  %v2391_v19 = vsel %vm2355_vm7, %v2341_v40, %v11137_v33 }
 0x320   :  { %v9113_v25 = vpop.permute.xlu1 %2194 }
 0x321   :  { %3185 = vrot.lane.b32.xlu1 %v9088_v34, %s5924_s18  ;;  %3057 = vrot.lane.b32.xlu0 %v2976_v43, %s5931_s3  ;;  %v3266_v43 = vsel %vm108_vm0, %v11134_v5, %v5594_v30  ;;  %v2557_v5 = vsel %vm2498_vm9, %v11136_v17, %v2556_v28  ;;  %v10726_v28 = vrot.slane %v9088_v34, 6 }
 0x322   :  { %v3309_v63 = vsel %vm3301_vm10, %v3266_v43, %v5599_v36  ;;  %v5700_v36 = vpack.i.bf16 %v2559_v48, %v2557_v5  ;;  %v2980_v43 = vsel %vm1520_vm3, %v2977_v60, %v2979_v32  ;;  %v2772_v48 = vrot.slane %v9141_v14, 4  ;;  %v11141_v60 = vld [vmem:[#allocation73_spill] sm:$0xff] }
 0x323   :  { %v9135_v51 = vpop.permute.xlu0 %5631  ;;  %v5603_v5 = vunpack.i.l.bf16 %v8737_v47  ;;  %v2563_v33 = vsel %vm2498_vm9, %v2560_v39, %v10726_v28  ;;  %v11144_v28 = vld [vmem:[#allocation78_spill] sm:$0xff] }
 0x324   :  { %v3020_v31 = vpop.permute.xlu1 %3019 }
 0x325   :  { %5706 = vrot.lane.b32.xlu1 %v5705_v46, %s5929_s25  ;;  %3059 = vrot.lane.b32.xlu0 %v2978_v11, %s5931_s3  ;;  %v3394_v1 = vsel %vm2405_vm8, %v3020_v31, %v8900_v0  ;;  %v3352_v9 = vsel %vm3344_vm11, %v3309_v63, %v3020_v31  ;;  %v9168_v0 = vsel %vm2405_vm8, %v2391_v19, %v8554_v54  ;;  %v11138_v11 = vld [vmem:[#allocation68_spill] sm:$0xff]  ;;  %v11139_v54 = vld [vmem:[#allocation11_spill] sm:$0xff] }
 0x326   :  { %5163 = vmatprep.mubr.msk.f32.mxu0 %vm3461_vm12, %v3394_v1  ;;  %v10727_v16 = vrot.slane %v9168_v0, 4  ;;  %v2981_v31 = vrot.slane %v9168_v0, 2  ;;  %v2292_v63 = vsel %vm2255_vm5, %v11139_v54, %v11138_v11  ;;  %v11140_v1 = vld [vmem:[#allocation98_spill] sm:$0xff] }
 0x327   :  { %3688 = vmatmul.mubr.f32.gmra.mrb[96].mxu0 %v3352_v9  ;;  %v9159_v30 = vpop.permute.xlu0 %3155  ;;  %v2342_v40 = vsel %vm2305_vm6, %v2292_v63, %v8564_v61  ;;  %v2293_v9 = vsel %vm2255_vm5, %v11141_v60, %v11140_v1  ;;  %v5608_v61 = vunpack.i.l.bf16 %v8863_v45 }
 0x328   :  { %v9163_v7 = vpop.permute.xlu1 %1706  ;;  %v2392_v17 = vsel %vm2355_vm7, %v2342_v40, %v8585_v24  ;;  %v2982_v11 = vsel %vm1520_vm3, %v2979_v32, %v2981_v31  ;;  %v2775_v24 = vsel %vm2010_vm1, %v2772_v48, %v10727_v16  ;;  %v2343_v54 = vsel %vm2305_vm6, %v2293_v9, %v8653_v22  ;;  %v11145_v9 = vld [vmem:[#allocation46_spill] sm:$0xff] }
 0x329   :  { %3187 = vrot.lane.b32.xlu1 %v9141_v14, %s5924_s18  ;;  %5701 = vrot.lane.b32.xlu0 %v5700_v36, %s5928_s24  ;;  %v9204_v19 = vsel %vm2405_vm8, %v2392_v17, %v8617_v57  ;;  %v11142_v57 = vrot.slane %v9088_v34, 4  ;;  %v11143_v40 = vrot.slane %v9031_v38, 6  ;;  %v3267_v22 = vsel %vm108_vm0, %v11144_v28, %v5603_v5 }
 0x32a   :  { %v2393_v16 = vsel %vm2355_vm7, %v2343_v54, %v11145_v9  ;;  %v2983_v2 = vrot.slane %v9204_v19, 2  ;;  %v2566_v5 = vrot.slane %v9168_v0, 6  ;;  %v11146_v54 = vld [vmem:[#allocation100_spill] sm:$0xff] }
 0x32b   :  { %v9174_v21 = vpop.permute.xlu0 %3157  ;;  %v2773_v63 = vsel %vm2010_vm1, %v11142_v57, %v2772_v48  ;;  %v2561_v32 = vsel %vm2498_vm9, %v11143_v40, %v2560_v39  ;;  %v9234_v48 = vsel %vm2405_vm8, %v2393_v16, %v8675_v27  ;;  %v11147_v57 = vld [vmem:[#allocation35_spill] sm:$0xff] }
 0x32c   :  { %v9177_v46 = vpop.permute.xlu1 %1951  ;;  %v5715_v60 = vpack.i.bf16 %v2775_v24, %v2773_v63  ;;  %v5710_v17 = vpack.i.bf16 %v2563_v33, %v2561_v32  ;;  %v2984_v16 = vsel %vm1520_vm3, %v2981_v31, %v2983_v2  ;;  %v2985_v24 = vrot.slane %v9234_v48, 2  ;;  %v5897_v31 = vld [vmem:[%s10593_s2] ss:$0 sm:$0xff] }
 0x32d   :  { %3189 = vrot.lane.b32.xlu1 %v9168_v0, %s5924_s18  ;;  %3061 = vrot.lane.b32.xlu0 %v2980_v43, %s5931_s3  ;;  %v2776_v63 = vrot.slane %v9204_v19, 4  ;;  %v11148_v32 = vld [vmem:[#allocation24_spill] sm:$0xff] }
 0x32f   :  { %v9197_v36 = vpop.permute.xlu0 %5636 }
 0x330   :  { %v9207_v43 = vpop.permute.xlu1 %2196 }
 0x331   :  { %3191 = vrot.lane.b32.xlu1 %v9204_v19, %s5924_s18  ;;  %3063 = vrot.lane.b32.xlu0 %v2982_v11, %s5931_s3  ;;  %v3310_v11 = vsel %vm3301_vm10, %v3267_v22, %v5608_v61  ;;  %v10730_v61 = vrot.slane %v9234_v48, 4  ;;  %v5604_v22 = vunpack.i.h.bf16 %v8737_v47 }
 0x333   :  { %v9224_v1 = vpop.permute.xlu0 %5641  ;;  %v2779_v47 = vsel %vm2010_vm1, %v2776_v63, %v10730_v61 }
 0x334   :  { %v3022_v52 = vpop.permute.xlu1 %3021 }
 0x335   :  { %5716 = vrot.lane.b32.xlu1 %v5715_v60, %s5929_s25  ;;  %5711 = vrot.lane.b32.xlu0 %v5710_v17, %s5928_s24  ;;  %v3395_v39 = vsel %vm2405_vm8, %v3022_v52, %v8942_v49  ;;  %v3353_v28 = vsel %vm3344_vm11, %v3310_v11, %v3022_v52  ;;  %v2294_v49 = vsel %vm2255_vm5, %v11147_v57, %v11146_v54  ;;  %v2564_v52 = vrot.slane %v9141_v14, 6  ;;  %v11151_v57 = vld [vmem:[#allocation15_spill] sm:$0xff] }
 0x336   :  { %5164 = vmatprep.mubr.msk.f32.mxu0 %vm3461_vm12, %v3395_v39  ;;  %v2344_v40 = vsel %vm2305_vm6, %v2294_v49, %v8725_v37  ;;  %v1176_v60 = vadd.f32 %v5897_v31, %v11148_v32  ;;  %v5609_v39 = vunpack.i.h.bf16 %v8863_v45  ;;  %v11150_v54 = vrot.slane %v9088_v34, 6  ;;  %v11152_v32 = vld [vmem:[#allocation80_spill] sm:$0xff] }
 0x337   :  { %3693 = vmatmul.mubr.f32.gmra.mrb[98].mxu0 %v3353_v28  ;;  %v9243_v33 = vpop.permute.xlu0 %3159  ;;  %v2394_v17 = vsel %vm2355_vm7, %v2344_v40, %v8740_v6  ;;  %v2567_v11 = vsel %vm2498_vm9, %v2564_v52, %v2566_v5  ;;  %v11149_v6 = vrot.slane %v9168_v0, 4 }
 0x338   :  { %v9246_v27 = vpop.permute.xlu1 %1708  ;;  %v9274_v37 = vsel %vm2405_vm8, %v2394_v17, %v8764_v4  ;;  %v2565_v45 = vsel %vm2498_vm9, %v11150_v54, %v2564_v52  ;;  %v3268_v17 = vsel %vm108_vm0, %v11152_v32, %v5604_v22 }
 0x339   :  { %3193 = vrot.lane.b32.xlu1 %v9234_v48, %s5924_s18  ;;  %3065 = vrot.lane.b32.xlu0 %v2984_v16, %s5931_s3  ;;  %v2986_v16 = vsel %vm1520_vm3, %v2983_v2, %v2985_v24  ;;  %v2777_v4 = vsel %vm2010_vm1, %v11149_v6, %v2776_v63  ;;  %v2295_v2 = vsel %vm2255_vm5, %v11151_v57, %v8531_v56  ;;  %v2987_v52 = vrot.slane %v9274_v37, 2 }
 0x33a   :  { %v5725_v40 = vpack.i.bf16 %v2779_v47, %v2777_v4  ;;  %v5720_v31 = vpack.i.bf16 %v2567_v11, %v2565_v45  ;;  %v2345_v63 = vsel %vm2305_vm6, %v2295_v2, %v8812_v44  ;;  %v3311_v61 = vsel %vm3301_vm10, %v3268_v17, %v5609_v39 }
 0x33b   :  { %v9267_v9 = vpop.permute.xlu0 %3161  ;;  %v2988_v47 = vsel %vm1520_vm3, %v2985_v24, %v2987_v52  ;;  %v11154_v45 = vrot.slane %v8433_v41, 1  ;;  %v5618_v17 = vunpack.i.l.bf16 %v9012_v3 }
 0x33c   :  { %v9277_v28 = vpop.permute.xlu1 %2198 }
 0x33d   :  { %3195 = vrot.lane.b32.xlu1 %v9274_v37, %s5924_s18  ;;  %3067 = vrot.lane.b32.xlu0 %v2986_v16, %s5931_s3  ;;  %v9299_v16 = vmax.f32 %v1176_v60, 0.0  ;;  %v2395_v60 = vsel %vm2355_vm7, %v2345_v63, %v8551_v50 }
 0x33e   :  { %v9317_v22 = vsel %vm2405_vm8, %v2395_v60, %v8826_v20  ;;  %v11153_v20 = vrot.slane %v8433_v41, 2  ;;  %v11156_v60 = vld [vmem:[#allocation16_spill] sm:$0xff] }
 0x33f   :  { %v9295_v49 = vpop.permute.xlu0 %5646  ;;  %v2989_v57 = vrot.slane %v9317_v22, 2  ;;  %v1861_v2 = vrot.slane %v9299_v16, 3  ;;  %v2106_v32 = vrot.slane %v9299_v16, 4 }
 0x340   :  { %v3024_v6 = vpop.permute.xlu1 %3023 }
 0x341   :  { %5726 = vrot.lane.b32.xlu1 %v5725_v40, %s5929_s25  ;;  %5721 = vrot.lane.b32.xlu0 %v5720_v31, %s5928_s24  ;;  %v3396_v56 = vsel %vm2405_vm8, %v3024_v6, %v9049_v35  ;;  %v3354_v11 = vsel %vm3344_vm11, %v3311_v61, %v3024_v6  ;;  %v1616_v35 = vrot.slane %v9299_v16, 2  ;;  %v1371_v61 = vrot.slane %v9299_v16, 1 }
 0x342   :  { %5165 = vmatprep.mubr.msk.f32.mxu0 %vm3461_vm12, %v3396_v56  ;;  %v5613_v40 = vunpack.i.l.bf16 %v8888_v15  ;;  %v2990_v6 = vsel %vm1520_vm3, %v2987_v52, %v2989_v57  ;;  %v11155_v56 = vrot.slane %v8433_v41, 3  ;;  %v5614_v52 = vunpack.i.h.bf16 %v8888_v15 }
 0x343   :  { %3698 = vmatmul.mubr.f32.gmra.mrb[100].mxu0 %v3354_v11  ;;  %v9313_v44 = vpop.permute.xlu0 %5651  ;;  %v1617_v54 = vsel %vm1520_vm3, %v11153_v20, %v1616_v35  ;;  %v1372_v24 = vsel %vm1275_vm2, %v11154_v45, %v1371_v61 }
 0x344   :  { %v9319_v39 = vpop.permute.xlu1 %1710  ;;  %v1862_v11 = vsel %vm1765_vm4, %v11155_v56, %v1861_v2  ;;  %v11158_v56 = vld [vmem:[#allocation6_spill] sm:$0xff] }
 0x345   :  { %3197 = vrot.lane.b32.xlu1 %v9317_v22, %s5924_s18  ;;  %3069 = vrot.lane.b32.xlu0 %v2988_v47, %s5931_s3  ;;  %v2296_v47 = vsel %vm2255_vm5, %v11156_v60, %v8636_v13 }
 0x346   :  { %v2346_v20 = vsel %vm2305_vm6, %v2296_v47, %v8870_v23 }
 0x347   :  { %v9327_v50 = vpop.permute.xlu0 %3163 }
 0x348   :  { %v9329_v4 = vpop.permute.xlu1 %1955 }
 0x349   :  { %1712 = vrot.lane.b32.xlu1 %v1617_v54, %s5926_s20  ;;  %1467 = vrot.lane.b32.xlu0 %v1372_v24, %s5925_s19  ;;  %v2396_v54 = vsel %vm2355_vm7, %v2346_v20, %v8891_v29  ;;  %v11157_v24 = vrot.slane %v8433_v41, 4  ;;  %v5619_v29 = vunpack.i.h.bf16 %v9012_v3  ;;  %v2568_v20 = vrot.slane %v9204_v19, 6 }
 0x34a   :  { %v9376_v23 = vsel %vm2405_vm8, %v2396_v54, %v8905_v42  ;;  %v5623_v42 = vunpack.i.l.bf16 %v9038_v12 }
 0x34b   :  { %v9342_v31 = vpop.permute.xlu0 %3165  ;;  %v2107_v13 = vsel %vm2010_vm1, %v11157_v24, %v2106_v32  ;;  %v2782_v24 = vrot.slane %v9317_v22, 4 }
 0x34c   :  { %v9346_v63 = vpop.permute.xlu1 %2200 }
 0x34d   :  { %3071 = vrot.lane.b32.xlu1 %v2990_v6, %s5931_s3  ;;  %1957 = vrot.lane.b32.xlu0 %v1862_v11, %s5927_s21  ;;  %v3269_v6 = vsel %vm108_vm0, %v11158_v56, %v5613_v40  ;;  %v2570_v11 = vrot.slane %v9234_v48, 6 }
 0x34e   :  { %v3312_v60 = vsel %vm3301_vm10, %v3269_v6, %v5618_v17  ;;  %v11159_v17 = vld [vmem:[#allocation26_spill] sm:$0xff] }
 0x34f   :  { %v9364_v45 = vpop.permute.xlu0 %5656  ;;  %v3270_v54 = vsel %vm108_vm0, %v11159_v17, %v5614_v52  ;;  %v2571_v6 = vsel %vm2498_vm9, %v2568_v20, %v2570_v11 }
 0x350   :  { %v3026_v15 = vpop.permute.xlu1 %3025 }
 0x351   :  { %2202 = vrot.lane.b32.xlu1 %v2107_v13, %s5924_s18  ;;  %3199 = vrot.lane.b32.xlu0 %v9376_v23, %s5924_s18  ;;  %v3397_v47 = vsel %vm2405_vm8, %v3026_v15, %v9097_v18  ;;  %v3355_v40 = vsel %vm3344_vm11, %v3312_v60, %v3026_v15  ;;  %v5628_v13 = vunpack.i.l.bf16 %v9110_v26  ;;  %v3313_v18 = vsel %vm3301_vm10, %v3270_v54, %v5619_v29  ;;  %v11160_v60 = vld [vmem:[#allocation85_spill] sm:$0xff]  ;;  %v11161_v54 = vld [vmem:[#allocation55_spill] sm:$0xff] }
 0x352   :  { %5166 = vmatprep.mubr.msk.f32.mxu0 %vm3461_vm12, %v3397_v47  ;;  %v2297_v47 = vsel %vm2255_vm5, %v11160_v60, %v8668_v10  ;;  %v2569_v29 = vsel %vm2498_vm9, %v2566_v5, %v2568_v20  ;;  %v3271_v10 = vsel %vm108_vm0, %v11161_v54, %v5623_v42  ;;  %v2991_v60 = vrot.slane %v9376_v23, 2 }
 0x353   :  { %3703 = vmatmul.mubr.f32.gmra.mrb[102].mxu0 %v3355_v40  ;;  %v9389_v3 = vpop.permute.xlu0 %5661  ;;  %v2780_v40 = vrot.slane %v9274_v37, 4  ;;  %v5730_v17 = vpack.i.bf16 %v2571_v6, %v2569_v29  ;;  %v11162_v20 = vrot.slane %v9234_v48, 4 }
 0x354   :  { %v3028_v56 = vpop.permute.xlu1 %3027 }
 0x355   :  { %1714 = vrot.lane.b32.xlu1 %v1616_v35, %s5926_s20  ;;  %1469 = vrot.lane.b32.xlu0 %v1371_v61, %s5925_s19  ;;  %v3398_v15 = vsel %vm2405_vm8, %v3028_v56, %v9159_v30  ;;  %v3356_v52 = vsel %vm3344_vm11, %v3313_v18, %v3028_v56  ;;  %v2347_v35 = vsel %vm2305_vm6, %v2297_v47, %v8949_v8  ;;  %v5624_v61 = vunpack.i.h.bf16 %v9038_v12 }
 0x356   :  { %5167 = vmatprep.mubr.msk.f32.mxu0 %vm3461_vm12, %v3398_v15  ;;  %v5629_v56 = vunpack.i.h.bf16 %v9110_v26  ;;  %v3314_v15 = vsel %vm3301_vm10, %v3271_v10, %v5628_v13  ;;  %v2783_v8 = vsel %vm2010_vm1, %v2780_v40, %v2782_v24  ;;  %v2397_v26 = vsel %vm2355_vm7, %v2347_v35, %v8693_v53 }
 0x357   :  { %3708 = vmatmul.mubr.f32.gmra.mrb[104].mxu0 %v3356_v52  ;;  %v9415_v30 = vpop.permute.xlu0 %3167  ;;  %v2781_v42 = vsel %vm2010_vm1, %v11162_v20, %v2780_v40  ;;  %v9438_v13 = vsel %vm2405_vm8, %v2397_v26, %v8972_v62  ;;  %v11163_v52 = vld [vmem:[#allocation61_spill] sm:$0xff]  ;;  %v5638_v53 = vunpack.i.l.bf16 %v9197_v36  ;;  %v2992_v40 = vsel %vm1520_vm3, %v2989_v57, %v2991_v60  ;;  %v11165_v26 = vld [vmem:[#allocation32_spill] sm:$0xff]  ;;  %v11166_v20 = vld [vmem:[#allocation51_spill] sm:$0xff] }
 0x358   :  { %v3030_v18 = vpop.permute.xlu1 %3029  ;;  %v3272_v47 = vsel %vm108_vm0, %v11163_v52, %v5624_v61  ;;  %v2574_v61 = vrot.slane %v9317_v22, 6  ;;  %v2993_v54 = vrot.slane %v9438_v13, 2  ;;  %v2786_v10 = vrot.slane %v9438_v13, 4  ;;  %v11168_v52 = vld [vmem:[#allocation19_spill] sm:$0xff] }
 0x359   :  { %1959 = vrot.lane.b32.xlu1 %v1861_v2, %s5927_s21  ;;  %5731 = vrot.lane.b32.xlu0 %v5730_v17, %s5928_s24  ;;  %v3399_v12 = vsel %vm2405_vm8, %v3030_v18, %v9174_v21  ;;  %v3357_v5 = vsel %vm3344_vm11, %v3314_v15, %v3030_v18  ;;  %v5633_v2 = vunpack.i.l.bf16 %v9135_v51  ;;  %v5735_v21 = vpack.i.bf16 %v2783_v8, %v2781_v42  ;;  %v11164_v18 = vld [vmem:[#allocation69_spill] sm:$0xff]  ;;  %s5932_s21 = smov 64  }
 0x35a   :  { %5168 = vmatprep.mubr.msk.f32.mxu0 %vm3461_vm12, %v3399_v12  ;;  %v3315_v35 = vsel %vm3301_vm10, %v3272_v47, %v5629_v56  ;;  %v5634_v57 = vunpack.i.h.bf16 %v9135_v51  ;;  %v5639_v8 = vunpack.i.h.bf16 %v9197_v36  ;;  %v2298_v42 = vsel %vm2255_vm5, %v11166_v20, %v11165_v26 }
 0x35b   :  { %3713 = vmatmul.mubr.f32.gmra.mrb[106].mxu0 %v3357_v5  ;;  %v9441_v6 = vpop.permute.xlu0 %3169  ;;  %v3273_v15 = vsel %vm108_vm0, %v11164_v18, %v5633_v2  ;;  %v11167_v2 = vld [vmem:[#allocation30_spill] sm:$0xff] }
 0x35c   :  { %v3032_v29 = vpop.permute.xlu1 %3031  ;;  %v3316_v5 = vsel %vm3301_vm10, %v3273_v15, %v5638_v53  ;;  %v2299_v47 = vsel %vm2255_vm5, %v11168_v52, %v11167_v2  ;;  %v2348_v53 = vsel %vm2305_vm6, %v2298_v42, %v9019_v55  ;;  %v5644_v52 = vunpack.i.h.bf16 %v9224_v1 }
 0x35d   :  { %3073 = vrot.lane.b32.xlu1 %v2992_v40, %s5931_s3  ;;  %5736 = vrot.lane.b32.xlu0 %v5735_v21, %s5929_s25  ;;  %v3400_v62 = vsel %vm2405_vm8, %v3032_v29, %v9243_v33  ;;  %v3358_v17 = vsel %vm3344_vm11, %v3315_v35, %v3032_v29  ;;  %v2572_v33 = vrot.slane %v9274_v37, 6  ;;  %v2784_v21 = vrot.slane %v9376_v23, 4 }
 0x35e   :  { %5169 = vmatprep.mubr.msk.f32.mxu0 %vm3461_vm12, %v3400_v62  ;;  %v5643_v35 = vunpack.i.l.bf16 %v9224_v1 }
 0x35f   :  { %3718 = vmatmul.mubr.f32.gmra.mrb[108].mxu0 %v3358_v17  ;;  %v9460_v56 = vpop.permute.xlu0 %5666  ;;  %v2575_v29 = vsel %vm2498_vm9, %v2572_v33, %v2574_v61  ;;  %v11170_v17 = vld [vmem:[#allocation22_spill] sm:$0xff]  ;;  %v2787_v18 = vsel %vm2010_vm1, %v2784_v21, %v2786_v10 }
 0x360   :  { %v3034_v12 = vpop.permute.xlu1 %3033  ;;  %v3274_v55 = vsel %vm108_vm0, %v11170_v17, %v5634_v57 }
 0x361   :  { %2204 = vrot.lane.b32.xlu1 %v2106_v32, %s5924_s18  ;;  %3201 = vrot.lane.b32.xlu0 %v9438_v13, %s5924_s18  ;;  %v3401_v51 = vsel %vm2405_vm8, %v3034_v12, %v9267_v9  ;;  %v3359_v36 = vsel %vm3344_vm11, %v3316_v5, %v3034_v12  ;;  %v2994_v32 = vsel %vm1520_vm3, %v2991_v60, %v2993_v54  ;;  %v11169_v9 = vld [vmem:[#allocation70_spill] sm:$0xff]  ;;  %v5648_v5 = vunpack.i.l.bf16 %v9295_v49 }
 0x362   :  { %5170 = vmatprep.mubr.msk.f32.mxu0 %vm3461_vm12, %v3401_v51  ;;  %v2398_v40 = vsel %vm2355_vm7, %v2348_v53, %v11169_v9  ;;  %v11171_v60 = vld [vmem:[#allocation82_spill] sm:$0xff]  ;;  %v2349_v12 = vsel %vm2305_vm6, %v2299_v47, %v9100_v59  ;;  %v3317_v20 = vsel %vm3301_vm10, %v3274_v55, %v5639_v8  ;;  %v2573_v51 = vsel %vm2498_vm9, %v2570_v11, %v2572_v33  ;;  %v11173_v53 = vld [vmem:[#allocation23_spill] sm:$0xff]  ;;  %v11174_v55 = vld [vmem:[#allocation25_spill] sm:$0xff] }
 0x363   :  { %3723 = vmatmul.mubr.f32.gmra.mrb[110].mxu0 %v3359_v36  ;;  %v9494_v62 = vpop.permute.xlu0 %5671  ;;  %v9503_v15 = vsel %vm2405_vm8, %v2398_v40, %v11171_v60  ;;  %v2785_v59 = vsel %vm2010_vm1, %v2782_v24, %v2784_v21  ;;  %v5740_v8 = vpack.i.bf16 %v2575_v29, %v2573_v51  ;;  %v11172_v36 = vld [vmem:[#allocation14_spill] sm:$0xff]  ;;  %v5649_v24 = vunpack.i.h.bf16 %v9295_v49 }
 0x364   :  { %v3036_v26 = vpop.permute.xlu1 %3035  ;;  %v2399_v2 = vsel %vm2355_vm7, %v2349_v12, %v11172_v36  ;;  %v5745_v47 = vpack.i.bf16 %v2787_v18, %v2785_v59  ;;  %v2995_v11 = vrot.slane %v9503_v15, 2  ;;  %v2578_v40 = vrot.slane %v9438_v13, 6  ;;  %v11178_v36 = vld [vmem:[#allocation21_spill] sm:$0xff] }
 0x365   :  { %3203 = vrot.lane.b32.xlu1 %v9503_v15, %s5924_s18  ;;  %3075 = vrot.lane.b32.xlu0 %v2994_v32, %s5931_s3  ;;  %v3402_v57 = vsel %vm2405_vm8, %v3036_v26, %v9327_v50  ;;  %v3360_v42 = vsel %vm3344_vm11, %v3317_v20, %v3036_v26  ;;  %v3275_v32 = vsel %vm108_vm0, %v11173_v53, %v5643_v35  ;;  %v5653_v35 = vunpack.i.l.bf16 %v9313_v44  ;;  %v11175_v20 = vld [vmem:[#allocation77_spill] sm:$0xff] }
 0x366   :  { %5171 = vmatprep.mubr.msk.f32.mxu0 %vm3461_vm12, %v3402_v57  ;;  %v9532_v33 = vsel %vm2405_vm8, %v2399_v2, %v9113_v25  ;;  %v3318_v29 = vsel %vm3301_vm10, %v3275_v32, %v5648_v5  ;;  %v2576_v25 = vrot.slane %v9376_v23, 6  ;;  %v3276_v18 = vsel %vm108_vm0, %v11174_v55, %v5644_v52  ;;  %v11176_v57 = vld [vmem:[#allocation91_spill] sm:$0xff] }
 0x367   :  { %3728 = vmatmul.mubr.f32.gmra.mrb[112].mxu0 %v3360_v42  ;;  %v9525_v50 = vpop.permute.xlu0 %3171  ;;  %v2997_v49 = vrot.slane %v9532_v33, 2  ;;  %v5658_v60 = vunpack.i.l.bf16 %v9364_v45  ;;  %v2996_v5 = vsel %vm1520_vm3, %v2993_v54, %v2995_v11  ;;  %v3319_v26 = vsel %vm3301_vm10, %v3276_v18, %v5649_v24 }
 0x368   :  { %v3038_v21 = vpop.permute.xlu1 %3037  ;;  %v2300_v42 = vsel %vm2255_vm5, %v11176_v57, %v11175_v20  ;;  %v2788_v2 = vrot.slane %v9503_v15, 4  ;;  %v5654_v53 = vunpack.i.h.bf16 %v9313_v44  ;;  %v11181_v20 = vld [vmem:[#allocation79_spill] sm:$0xff] }
 0x369   :  { %5746 = vrot.lane.b32.xlu1 %v5745_v47, %s5929_s25  ;;  %5741 = vrot.lane.b32.xlu0 %v5740_v8, %s5928_s24  ;;  %v3403_v1 = vsel %vm2405_vm8, %v3038_v21, %v9342_v31  ;;  %v3361_v9 = vsel %vm3344_vm11, %v3318_v29, %v3038_v21  ;;  %v2790_v31 = vrot.slane %v9532_v33, 4  ;;  %v11177_v8 = vld [vmem:[#allocation42_spill] sm:$0xff]  ;;  %v2350_v52 = vsel %vm2305_vm6, %v2300_v42, %v9163_v7  ;;  %v11179_v21 = vld [vmem:[#allocation27_spill] sm:$0xff] }
 0x36a   :  { %5172 = vmatprep.mubr.msk.f32.mxu0 %vm3461_vm12, %v3403_v1  ;;  %v2301_v54 = vsel %vm2255_vm5, %v11178_v36, %v11177_v8  ;;  %v2579_v47 = vsel %vm2498_vm9, %v2576_v25, %v2578_v40  ;;  %v2998_v24 = vsel %vm1520_vm3, %v2995_v11, %v2997_v49  ;;  %v3277_v7 = vsel %vm108_vm0, %v11179_v21, %v5653_v35  ;;  %v11183_v21 = vld [vmem:[#allocation66_spill] sm:$0xff] }
 0x36b   :  { %3733 = vmatmul.mubr.f32.gmra.mrb[114].mxu0 %v3361_v9  ;;  %v9546_v17 = vpop.permute.xlu0 %3173  ;;  %v5659_v1 = vunpack.i.h.bf16 %v9364_v45  ;;  %v2791_v44 = vsel %vm2010_vm1, %v2788_v2, %v2790_v31  ;;  %v2351_v55 = vsel %vm2305_vm6, %v2301_v54, %v9246_v27  ;;  %v2789_v11 = vsel %vm2010_vm1, %v2786_v10, %v2788_v2 }
 0x36c   :  { %v3040_v12 = vpop.permute.xlu1 %3039  ;;  %v2577_v27 = vsel %vm2498_vm9, %v2574_v61, %v2576_v25  ;;  %v5663_v35 = vunpack.i.l.bf16 %v9389_v3  ;;  %v2401_v57 = vsel %vm2355_vm7, %v2351_v55, %v11181_v20  ;;  %v5668_v10 = vunpack.i.l.bf16 %v9460_v56 }
 0x36d   :  { %3205 = vrot.lane.b32.xlu1 %v9532_v33, %s5924_s18  ;;  %3077 = vrot.lane.b32.xlu0 %v2996_v5, %s5931_s3  ;;  %v3404_v51 = vsel %vm2405_vm8, %v3040_v12, %v9415_v30  ;;  %v3362_v59 = vsel %vm3344_vm11, %v3319_v26, %v3040_v12  ;;  %v2400_v30 = vsel %vm2355_vm7, %v2350_v52, %v9177_v46  ;;  %v2582_v8 = vrot.slane %v9532_v33, 6  ;;  %v11182_v52 = vld [vmem:[#allocation7_spill] sm:$0xff] }
 0x36e   :  { %5173 = vmatprep.mubr.msk.f32.mxu0 %vm3461_vm12, %v3404_v51  ;;  %v9587_v29 = vsel %vm2405_vm8, %v2400_v30, %v9207_v43  ;;  %v3320_v46 = vsel %vm3301_vm10, %v3277_v7, %v5658_v60  ;;  %v5755_v60 = vpack.i.bf16 %v2791_v44, %v2789_v11  ;;  %v5750_v12 = vpack.i.bf16 %v2579_v47, %v2577_v27 }
 0x36f   :  { %3738 = vmatmul.mubr.f32.gmra.mrb[116].mxu0 %v3362_v59  ;;  %v9578_v32 = vpop.permute.xlu0 %5676  ;;  %v2999_v26 = vrot.slane %v9587_v29, 2  ;;  %v9621_v25 = vsel %vm2405_vm8, %v2401_v57, %v9277_v28  ;;  %v2580_v36 = vrot.slane %v9503_v15, 6  ;;  %v2792_v54 = vrot.slane %v9587_v29, 4 }
 0x370   :  { %v3042_v9 = vpop.permute.xlu1 %3041  ;;  %v5664_v28 = vunpack.i.h.bf16 %v9389_v3  ;;  %v3279_v47 = vsel %vm108_vm0, %v11182_v52, %v5663_v35  ;;  %v3001_v30 = vrot.slane %v9621_v25, 2  ;;  %v2302_v3 = vsel %vm2255_vm5, %v11183_v21, %v9074_v58 }
 0x371   :  { %3207 = vrot.lane.b32.xlu1 %v9587_v29, %s5924_s18  ;;  %3079 = vrot.lane.b32.xlu0 %v2998_v24, %s5931_s3  ;;  %v3405_v43 = vsel %vm2405_vm8, %v3042_v9, %v9441_v6  ;;  %v3363_v45 = vsel %vm3344_vm11, %v3320_v46, %v3042_v9  ;;  %v11180_v6 = vld [vmem:[#allocation29_spill] sm:$0xff]  ;;  %v3000_v24 = vsel %vm1520_vm3, %v2997_v49, %v2999_v26  ;;  %v5673_v9 = vunpack.i.l.bf16 %v9494_v62  ;;  %v11184_v46 = vld [vmem:[#allocation28_spill] sm:$0xff] }
 0x372   :  { %5174 = vmatprep.mubr.msk.f32.mxu0 %vm3461_vm12, %v3405_v43  ;;  %v3278_v5 = vsel %vm108_vm0, %v11180_v6, %v5654_v53  ;;  %v3322_v15 = vsel %vm3301_vm10, %v3279_v47, %v5668_v10  ;;  %v2352_v29 = vsel %vm2305_vm6, %v2302_v3, %v9319_v39  ;;  %v2583_v49 = vsel %vm2498_vm9, %v2580_v36, %v2582_v8  ;;  %v11186_v8 = vld [vmem:[#allocation31_spill] sm:$0xff] }
 0x373   :  { %3743 = vmatmul.mubr.f32.gmra.mrb[118].mxu0 %v3363_v45  ;;  %v9610_v18 = vpop.permute.xlu0 %5681  ;;  %v3321_v61 = vsel %vm3301_vm10, %v3278_v5, %v5659_v1  ;;  %v2793_v58 = vsel %vm2010_vm1, %v2790_v31, %v2792_v54  ;;  %v2402_v1 = vsel %vm2355_vm7, %v2352_v29, %v9329_v4  ;;  %v3280_v44 = vsel %vm108_vm0, %v11184_v46, %v5664_v28  ;;  %v11189_v46 = vld [vmem:[#allocation37_spill] sm:$0xff] }
 0x374   :  { %v3044_v42 = vpop.permute.xlu1 %3043  ;;  %v2452_v39 = vsel %vm2405_vm8, %v2402_v1, %v9346_v63  ;;  %v5678_v55 = vunpack.i.l.bf16 %v9578_v32  ;;  %v3002_v33 = vsel %vm1520_vm3, %v2999_v26, %v3001_v30  ;;  %v2581_v63 = vsel %vm2498_vm9, %v2578_v40, %v2580_v36 }
 0x375   :  { %5756 = vrot.lane.b32.xlu1 %v5755_v60, %s5929_s25  ;;  %5751 = vrot.lane.b32.xlu0 %v5750_v12, %s5928_s24  ;;  %v3406_v51 = vsel %vm2405_vm8, %v3044_v42, %v9525_v50  ;;  %v3364_v59 = vsel %vm3344_vm11, %v3321_v61, %v3044_v42  ;;  %v5669_v50 = vunpack.i.h.bf16 %v9460_v56  ;;  %v5765_v11 = vpack.i.bf16 %v2792_v54, %v2793_v58  ;;  %v11185_v60 = vld [vmem:[#allocation33_spill] sm:$0xff] }
 0x376   :  { %5175 = vmatprep.mubr.msk.f32.mxu0 %vm3461_vm12, %v3406_v51  ;;  %v5760_v35 = vpack.i.bf16 %v2583_v49, %v2581_v63  ;;  %v3281_v12 = vsel %vm108_vm0, %v11185_v60, %v5673_v9  ;;  %v3003_v6 = vrot.slane %v2452_v39, 2  ;;  %v5674_v40 = vunpack.i.h.bf16 %v9494_v62 }
 0x377   :  { %3748 = vmatmul.mubr.f32.gmra.mrb[120].mxu0 %v3364_v59  ;;  %v3176_v2 = vpop.permute.xlu0 %3175  ;;  %v3323_v31 = vsel %vm3301_vm10, %v3280_v44, %v5669_v50  ;;  %v3324_v26 = vsel %vm3301_vm10, %v3281_v12, %v5678_v55  ;;  %v5679_v42 = vunpack.i.h.bf16 %v9578_v32  ;;  %v5683_v51 = vunpack.i.l.bf16 %v9610_v18  ;;  %v11187_v50 = vld [vmem:[#allocation75_spill] sm:$0xff] }
 0x378   :  { %v3046_v53 = vpop.permute.xlu1 %3045  ;;  %v3282_v36 = vsel %vm108_vm0, %v11186_v8, %v5674_v40  ;;  %v5684_v52 = vunpack.i.h.bf16 %v9610_v18  ;;  %v9726_v8 = vld [vmem:[%s10595_s4] ss:$0 sm:$0xff] }
 0x379   :  { %3209 = vrot.lane.b32.xlu1 %v9621_v25, %s5924_s18  ;;  %3081 = vrot.lane.b32.xlu0 %v3000_v24, %s5931_s3  ;;  %v3407_v7 = vsel %vm2405_vm8, %v3046_v53, %v9546_v17  ;;  %v3365_v56 = vsel %vm3344_vm11, %v3322_v15, %v3046_v53  ;;  %v3004_v25 = vsel %vm1520_vm3, %v3001_v30, %v3003_v6 }
 0x37a   :  { %5176 = vmatprep.mubr.msk.f32.mxu0 %vm3461_vm12, %v3407_v7  ;;  %v3325_v62 = vsel %vm3301_vm10, %v3282_v36, %v5679_v42  ;;  %v3283_v53 = vsel %vm108_vm0, %v11187_v50, %v5683_v51 }
 0x37b   :  { %3752 = vmatmul.mubr.f32.gmra.mrb[122].mxu0 %v3365_v56  ;;  %v3178_v17 = vpop.permute.xlu0 %3177  ;;  %v11188_v56 = vld [vmem:[#allocation34_spill] sm:$0xff] }
 0x37c   :  { %v3048_v43 = vpop.permute.xlu1 %3047  ;;  %v3284_v18 = vsel %vm108_vm0, %v11188_v56, %v5684_v52 }
 0x37d   :  { %3211 = vrot.lane.b32.xlu1 %v2452_v39, %s5924_s18  ;;  %3083 = vrot.lane.b32.xlu0 %v3002_v33, %s5931_s3  ;;  %v3408_v4 = vsel %vm2405_vm8, %v3048_v43, %v3176_v2  ;;  %v3366_v45 = vsel %vm3344_vm11, %v3323_v31, %v3048_v43 }
 0x37e   :  { %5177 = vmatprep.mubr.msk.f32.mxu0 %vm3461_vm12, %v3408_v4 }
 0x37f   :  { %3756 = vmatmul.mubr.f32.gmra.mrb[124].mxu0 %v3366_v45  ;;  %v5687_v27 = vpop.permute.xlu0 %5686 }
 0x380   :  { %v3050_v5 = vpop.permute.xlu1 %3049  ;;  %v5688_v54 = vunpack.i.l.bf16 %v5687_v27  ;;  %v5689_v47 = vunpack.i.h.bf16 %v5687_v27 }
 0x381   :  { %5766 = vrot.lane.b32.xlu1 %v5765_v11, %s5929_s25  ;;  %5761 = vrot.lane.b32.xlu0 %v5760_v35, %s5928_s24  ;;  %v3409_v20 = vsel %vm2405_vm8, %v3050_v5, %v3178_v17  ;;  %v3367_v57 = vsel %vm3344_vm11, %v3324_v26, %v3050_v5  ;;  %v11190_v26 = vld [vmem:[#allocation76_spill] sm:$0xff]  ;;  %s5933_s24 = smov 48  }
 0x382   :  { %5178 = vmatprep.mubr.msk.f32.mxu0 %vm3461_vm12, %v3409_v20  ;;  %v3326_v21 = vsel %vm3301_vm10, %v3283_v53, %v5688_v54  ;;  %v3327_v58 = vsel %vm3301_vm10, %v3284_v18, %v5689_v47 }
 0x383   :  { %3760 = vmatmul.mubr.f32.gmra.mrb[126].mxu0 %v3367_v57  ;;  %v5692_v10 = vpop.permute.xlu0 %5691 }
 0x384   :  { %v3052_v61 = vpop.permute.xlu1 %3051  ;;  %v5693_v7 = vunpack.i.l.bf16 %v5692_v10  ;;  %v5694_v45 = vunpack.i.h.bf16 %v5692_v10 }
 0x385   :  { %3085 = vrot.lane.b32.xlu0 %v3004_v25, %s5931_s3  ;;  %v3368_v32 = vsel %vm3344_vm11, %v3325_v62, %v3052_v61 }
 0x386   :  { %v3285_v44 = vsel %vm108_vm0, %v11189_v46, %v5693_v7  ;;  %v3286_v20 = vsel %vm108_vm0, %v11190_v26, %v5694_v45 }
 0x387   :  { %v3180_v59 = vpop.permute.xlu0 %3179 }
 0x388   :  { %v3054_v28 = vpop.permute.xlu1 %3053  ;;  %v3410_v2 = vsel %vm2405_vm8, %v3052_v61, %v3180_v59  ;;  %v11191_v61 = vld [vmem:[#allocation8_spill] sm:$0xff] }
 0x389   :  { %3087 = vrot.lane.b32.xlu0 %v3003_v6, %s5931_s3  ;;  %5179 = vmatprep.mubr.msk.f32.mxu0 %vm3461_vm12, %v3410_v2  ;;  %v3369_v3 = vsel %vm3344_vm11, %v3326_v21, %v3054_v28 }
 0x38a   :  { %3764 = vmatmul.mubr.f32.gmra.mrb[128].mxu0 %v3368_v32 }
 0x38b   :  { %v3182_v30 = vpop.permute.xlu0 %3181 }
 0x38c   :  { %v5697_v24 = vpop.permute.xlu1 %5696  ;;  %v3411_v15 = vsel %vm2405_vm8, %v3054_v28, %v3182_v30  ;;  %v11192_v28 = vld [vmem:[#allocation36_spill] sm:$0xff] }
 0x38d   :  { %5180 = vmatprep.mubr.msk.f32.mxu0 %vm3461_vm12, %v3411_v15  ;;  %v5698_v29 = vunpack.i.l.bf16 %v5697_v24  ;;  %v5699_v11 = vunpack.i.h.bf16 %v5697_v24 }
 0x38e   :  { %3768 = vmatmul.mubr.f32.gmra.mrb[130].mxu0 %v3369_v3 }
 0x38f   :  { %v3056_v49 = vpop.permute.xlu0 %3055  ;;  %v3328_v55 = vsel %vm3301_vm10, %v3285_v44, %v5698_v29  ;;  %v3329_v42 = vsel %vm3301_vm10, %v3286_v20, %v5699_v11 }
 0x390   :  { %v3184_v1 = vpop.permute.xlu1 %3183  ;;  %v3370_v9 = vsel %vm3344_vm11, %v3327_v58, %v3056_v49 }
 0x391   :  { %v3412_v17 = vsel %vm2405_vm8, %v3056_v49, %v3184_v1 }
 0x392   :  { %5181 = vmatprep.mubr.msk.f32.mxu0 %vm3461_vm12, %v3412_v17 }
 0x393   :  { %3773 = vmatmul.mubr.f32.gmra.mrb[132].mxu0 %v3370_v9  ;;  %v3058_v39 = vpop.permute.xlu0 %3057  ;;  %v11193_v9 = vld [vmem:[#allocation40_spill] sm:$0xff] }
 0x394   :  { %v3186_v43 = vpop.permute.xlu1 %3185  ;;  %v3371_v33 = vsel %vm3344_vm11, %v3328_v55, %v3058_v39 }
 0x395   :  { %v3413_v31 = vsel %vm2405_vm8, %v3058_v39, %v3186_v43 }
 0x396   :  { %5182 = vmatprep.mubr.msk.f32.mxu0 %vm3461_vm12, %v3413_v31 }
 0x397   :  { %3778 = vmatmul.mubr.f32.gmra.mrb[134].mxu0 %v3371_v33  ;;  %v3060_v4 = vpop.permute.xlu0 %3059 }
 0x398   :  { %v5707_v63 = vpop.permute.xlu1 %5706  ;;  %v3372_v10 = vsel %vm3344_vm11, %v3329_v42, %v3060_v4 }
 0x399   :  { %v5708_v57 = vunpack.i.l.bf16 %v5707_v63  ;;  %v5709_v62 = vunpack.i.h.bf16 %v5707_v63 }
 0x39a   :  { %v3654_v27 = vpop.f32.mrb[82].mxu0 }
 0x39b   :  { %v3656_v35 = vpop.f32.mrb[83].mxu0  ;;  %v5702_v60 = vpop.permute.xlu0 %5701  ;;  %v3655_v52 = vadd.f32 %v9726_v8, %v3654_v27 }
 0x39c   :  { %v3188_v12 = vpop.permute.xlu1 %3187  ;;  %v5704_v6 = vunpack.i.h.bf16 %v5702_v60  ;;  %v5703_v5 = vunpack.i.l.bf16 %v5702_v60 }
 0x39d   :  { %v3414_v40 = vsel %vm2405_vm8, %v3060_v4, %v3188_v12  ;;  %v3858_v21 = vmax.f32 %v3655_v52, 0.0 }
 0x39e   :  { %5183 = vmatprep.mubr.msk.f32.mxu0 %vm3461_vm12, %v3414_v40  ;;  %v3287_v25 = vsel %vm108_vm0, %v11191_v61, %v5703_v5  ;;  %v3288_v2 = vsel %vm108_vm0, %v11192_v28, %v5704_v6  ;;  %v11194_v40 = vld [vmem:[#allocation81_spill] sm:$0xff] }
 0x39f   :  { %3783 = vmatmul.mubr.f32.gmra.mrb[136].mxu0 %v3372_v10  ;;  %v3062_v51 = vpop.permute.xlu0 %3061  ;;  %v3330_v59 = vsel %vm3301_vm10, %v3287_v25, %v5708_v57  ;;  %v3331_v30 = vsel %vm3301_vm10, %v3288_v2, %v5709_v62  ;;  %v3928_v46 = vrot.slane %v3858_v21, 1 }
 0x3a0   :  { %v3190_v36 = vpop.permute.xlu1 %3189  ;;  %v3373_v54 = vsel %vm3344_vm11, %v3330_v59, %v3062_v51 }
 0x3a1   :  { %v3415_v32 = vsel %vm2405_vm8, %v3062_v51, %v3190_v36 }
 0x3a2   :  { %5184 = vmatprep.mubr.msk.f32.mxu0 %vm3461_vm12, %v3415_v32 }
 0x3a3   :  { %3788 = vmatmul.mubr.f32.gmra.mrb[138].mxu0 %v3373_v54  ;;  %v3064_v47 = vpop.permute.xlu0 %3063 }
 0x3a4   :  { %v3192_v50 = vpop.permute.xlu1 %3191  ;;  %v3374_v53 = vsel %vm3344_vm11, %v3331_v30, %v3064_v47 }
 0x3a5   :  { %v3416_v24 = vsel %vm2405_vm8, %v3064_v47, %v3192_v50 }
 0x3a6   :  { %v3659_v15 = vpop.f32.mrb[84].mxu0  ;;  %5185 = vmatprep.mubr.msk.f32.mxu0 %vm3461_vm12, %v3416_v24 }
 0x3a7   :  { %v3660_v3 = vadd.f32 %v9726_v8, %v3659_v15  ;;  %v3661_v7 = vpop.f32.mrb[85].mxu0  ;;  %3793 = vmatmul.mubr.f32.gmra.mrb[140].mxu0 %v3374_v53  ;;  %v5712_v56 = vpop.permute.xlu0 %5711 }
 0x3a8   :  { %v5717_v18 = vpop.permute.xlu1 %5716  ;;  %v5714_v29 = vunpack.i.h.bf16 %v5712_v56  ;;  %v5713_v49 = vunpack.i.l.bf16 %v5712_v56 }
 0x3a9   :  { %v3859_v58 = vmax.f32 %v3660_v3, 0.0  ;;  %v5718_v1 = vunpack.i.l.bf16 %v5717_v18  ;;  %v5719_v39 = vunpack.i.h.bf16 %v5717_v18 }
 0x3aa   :  { %v3289_v17 = vsel %vm108_vm0, %v11193_v9, %v5713_v49  ;;  %v3290_v4 = vsel %vm108_vm0, %v9031_v38, %v5714_v29 }
 0x3ab   :  { %v3929_v44 = vrot.slane %v3859_v58, 1  ;;  %v3066_v55 = vpop.permute.xlu0 %3065  ;;  %v3332_v43 = vsel %vm3301_vm10, %v3289_v17, %v5718_v1  ;;  %v3333_v35 = vsel %vm3301_vm10, %v3290_v4, %v5719_v39 }
 0x3ac   :  { %v3194_v33 = vpop.permute.xlu1 %3193  ;;  %v3375_v31 = vsel %vm3344_vm11, %v3332_v43, %v3066_v55 }
 0x3ad   :  { %v3930_v45 = vsel %vm1275_vm2, %v3928_v46, %v3929_v44  ;;  %v3417_v63 = vsel %vm2405_vm8, %v3066_v55, %v3194_v33 }
 0x3ae   :  { %v9747_v11 = vmax.f32 %v3858_v21, %v3930_v45  ;;  %5186 = vmatprep.mubr.msk.f32.mxu0 %vm3461_vm12, %v3417_v63 }
 0x3af   :  { %3798 = vmatmul.mubr.f32.gmra.mrb[142].mxu0 %v3375_v31  ;;  %v3068_v27 = vpop.permute.xlu0 %3067 }
 0x3b0   :  { %v3196_v60 = vpop.permute.xlu1 %3195  ;;  %v3376_v12 = vsel %vm3344_vm11, %v3333_v35, %v3068_v27 }
 0x3b1   :  { %v3418_v6 = vsel %vm2405_vm8, %v3068_v27, %v3196_v60 }
 0x3b2   :  { %5187 = vmatprep.mubr.msk.f32.mxu0 %vm3461_vm12, %v3418_v6 }
 0x3b3   :  { %3803 = vmatmul.mubr.f32.gmra.mrb[144].mxu0 %v3376_v12  ;;  %v5722_v38 = vpop.permute.xlu0 %5721 }
 0x3b4   :  { %v5727_v5 = vpop.permute.xlu1 %5726  ;;  %v5723_v26 = vunpack.i.l.bf16 %v5722_v38  ;;  %v5724_v52 = vunpack.i.h.bf16 %v5722_v38 }
 0x3b5   :  { %v5728_v20 = vunpack.i.l.bf16 %v5727_v5  ;;  %v5729_v53 = vunpack.i.h.bf16 %v5727_v5 }
 0x3b6   :  { %v3664_v57 = vpop.f32.mrb[86].mxu0  ;;  %v3291_v42 = vsel %vm108_vm0, %v11194_v40, %v5723_v26  ;;  %v3292_v21 = vsel %vm108_vm0, %v9088_v34, %v5724_v52 }
 0x3b7   :  { %v3665_v10 = vadd.f32 %v9726_v8, %v3664_v57  ;;  %v3666_v61 = vpop.f32.mrb[87].mxu0  ;;  %v3070_v25 = vpop.permute.xlu0 %3069  ;;  %v3334_v51 = vsel %vm3301_vm10, %v3291_v42, %v5728_v20  ;;  %v3335_v9 = vsel %vm3301_vm10, %v3292_v21, %v5729_v53 }
 0x3b8   :  { %v3198_v59 = vpop.permute.xlu1 %3197  ;;  %v3377_v36 = vsel %vm3344_vm11, %v3334_v51, %v3070_v25 }
 0x3b9   :  { %v3860_v54 = vmax.f32 %v3665_v10, 0.0  ;;  %v3419_v28 = vsel %vm2405_vm8, %v3070_v25, %v3198_v59 }
 0x3ba   :  { %5188 = vmatprep.mubr.msk.f32.mxu0 %vm3461_vm12, %v3419_v28 }
 0x3bb   :  { %v3931_v2 = vrot.slane %v3860_v54, 1  ;;  %3808 = vmatmul.mubr.f32.gmra.mrb[146].mxu0 %v3377_v36  ;;  %v1468_v62 = vpop.permute.xlu0 %1467 }
 0x3bc   :  { %v1713_v32 = vpop.permute.xlu1 %1712  ;;  %v2303_v24 = vsel %vm2255_vm5, %v8433_v41, %v1468_v62 }
 0x3bd   :  { %v3932_v47 = vsel %vm1275_vm2, %v3929_v44, %v3931_v2  ;;  %v2353_v7 = vsel %vm2305_vm6, %v2303_v24, %v1713_v32 }
 0x3be   :  { %v9762_v30 = vmax.f32 %v3859_v58, %v3932_v47 }
 0x3bf   :  { %v1958_v50 = vpop.permute.xlu0 %1957 }
 0x3c0   :  { %v3072_v15 = vpop.permute.xlu1 %3071  ;;  %v2403_v49 = vsel %vm2355_vm7, %v2353_v7, %v1958_v50  ;;  %v4112_v31 = vrot.slane %v9762_v30, 6 }
 0x3c1   :  { %v3378_v34 = vsel %vm3344_vm11, %v3335_v9, %v3072_v15 }
 0x3c2   :  { %v3669_v3 = vpop.f32.mrb[88].mxu0 }
 0x3c3   :  { %v3670_v56 = vadd.f32 %v9726_v8, %v3669_v3  ;;  %v3671_v18 = vpop.f32.mrb[89].mxu0  ;;  %v3200_v29 = vpop.permute.xlu0 %3199 }
 0x3c4   :  { %v2203_v58 = vpop.permute.xlu1 %2202  ;;  %v3420_v1 = vsel %vm2405_vm8, %v3072_v15, %v3200_v29 }
 0x3c5   :  { %v3861_v17 = vmax.f32 %v3670_v56, 0.0  ;;  %v2453_v41 = vsel %vm2405_vm8, %v2403_v49, %v2203_v58  ;;  %5189 = vmatprep.mubr.msk.f32.mxu0 %vm3461_vm12, %v3420_v1 }
 0x3c6   :  { %3213 = vrot.lane.b32.xlu1 %v2453_v41, %s5924_s18  ;;  %3813 = vmatmul.mubr.f32.gmra.mrb[148].mxu0 %v3378_v34 }
 0x3c7   :  { %v3933_v46 = vrot.slane %v3861_v17, 1  ;;  %v1470_v44 = vpop.permute.xlu0 %1469 }
 0x3c8   :  { %v1715_v39 = vpop.permute.xlu1 %1714  ;;  %v2304_v12 = vsel %vm2255_vm5, %v9299_v16, %v1470_v44 }
 0x3c9   :  { %v4036_v55 = vsel %vm1275_vm2, %v3931_v2, %v3933_v46  ;;  %v2354_v40 = vsel %vm2305_vm6, %v2304_v12, %v1715_v39 }
 0x3ca   :  { %v4065_v43 = vmax.f32 %v3860_v54, %v4036_v55 }
 0x3cb   :  { %v5732_v33 = vpop.permute.xlu0 %5731 }
 0x3cc   :  { %v4113_v4 = vrot.slane %v4065_v43, 6  ;;  %v1960_v45 = vpop.permute.xlu1 %1959  ;;  %v5733_v63 = vunpack.i.l.bf16 %v5732_v33  ;;  %v5734_v26 = vunpack.i.h.bf16 %v5732_v33 }
 0x3cd   :  { %v2404_v25 = vsel %vm2355_vm7, %v2354_v40, %v1960_v45 }
 0x3ce   :  { %v4114_v27 = vsel %vm2498_vm9, %v4112_v31, %v4113_v4  ;;  %v3293_v5 = vsel %vm108_vm0, %v9141_v14, %v5733_v63  ;;  %v3294_v54 = vsel %vm108_vm0, %v9168_v0, %v5734_v26 }
 0x3cf   :  { %v9781_v35 = vmax.f32 %v9747_v11, %v4114_v27  ;;  %v5737_v60 = vpop.permute.xlu0 %5736 }
 0x3d0   :  { %v3074_v6 = vpop.permute.xlu1 %3073  ;;  %v5738_v38 = vunpack.i.l.bf16 %v5737_v60  ;;  %v5739_v42 = vunpack.i.h.bf16 %v5737_v60 }
 0x3d2   :  { %v3674_v20 = vpop.f32.mrb[90].mxu0  ;;  %v3336_v57 = vsel %vm3301_vm10, %v3293_v5, %v5738_v38  ;;  %v3337_v62 = vsel %vm3301_vm10, %v3294_v54, %v5739_v42 }
 0x3d3   :  { %v3675_v10 = vadd.f32 %v9726_v8, %v3674_v20  ;;  %v3676_v11 = vpop.f32.mrb[91].mxu0  ;;  %v3202_v61 = vpop.permute.xlu0 %3201  ;;  %v3379_v14 = vsel %vm3344_vm11, %v3336_v57, %v3074_v6 }
 0x3d4   :  { %v2205_v51 = vpop.permute.xlu1 %2204  ;;  %v3421_v16 = vsel %vm2405_vm8, %v3074_v6, %v3202_v61 }
 0x3d5   :  { %v3862_v59 = vmax.f32 %v3675_v10, 0.0  ;;  %v2454_v36 = vsel %vm2405_vm8, %v2404_v25, %v2205_v51  ;;  %5190 = vmatprep.mubr.msk.f32.mxu0 %vm3461_vm12, %v3421_v16 }
 0x3d6   :  { %3215 = vrot.lane.b32.xlu1 %v2454_v36, %s5924_s18  ;;  %3818 = vmatmul.mubr.f32.gmra.mrb[150].mxu0 %v3379_v14 }
 0x3d7   :  { %v3934_v28 = vrot.slane %v3862_v59, 1  ;;  %v3076_v2 = vpop.permute.xlu0 %3075 }
 0x3d8   :  { %v3204_v32 = vpop.permute.xlu1 %3203  ;;  %v3380_v52 = vsel %vm3344_vm11, %v3337_v62, %v3076_v2 }
 0x3d9   :  { %v3935_v47 = vsel %vm1275_vm2, %v3933_v46, %v3934_v28  ;;  %v3422_v50 = vsel %vm2405_vm8, %v3076_v2, %v3204_v32 }
 0x3da   :  { %v9802_v53 = vmax.f32 %v3861_v17, %v3935_v47  ;;  %5191 = vmatprep.mubr.msk.f32.mxu0 %vm3461_vm12, %v3422_v50 }
 0x3db   :  { %3823 = vmatmul.mubr.f32.gmra.mrb[152].mxu0 %v3380_v52  ;;  %v5742_v24 = vpop.permute.xlu0 %5741 }
 0x3dc   :  { %v4115_v15 = vrot.slane %v9802_v53, 6  ;;  %v5747_v0 = vpop.permute.xlu1 %5746  ;;  %v5744_v21 = vunpack.i.h.bf16 %v5742_v24  ;;  %v5743_v3 = vunpack.i.l.bf16 %v5742_v24 }
 0x3dd   :  { %v5748_v7 = vunpack.i.l.bf16 %v5747_v0  ;;  %v5749_v58 = vunpack.i.h.bf16 %v5747_v0 }
 0x3de   :  { %v4116_v56 = vsel %vm2498_vm9, %v4113_v4, %v4115_v15  ;;  %v3679_v18 = vpop.f32.mrb[92].mxu0  ;;  %v3295_v29 = vsel %vm108_vm0, %v9204_v19, %v5743_v3  ;;  %v3296_v44 = vsel %vm108_vm0, %v9234_v48, %v5744_v21 }
 0x3df   :  { %v9810_v49 = vmax.f32 %v9762_v30, %v4116_v56  ;;  %v3680_v1 = vadd.f32 %v9726_v8, %v3679_v18  ;;  %v3681_v9 = vpop.f32.mrb[93].mxu0  ;;  %v3078_v17 = vpop.permute.xlu0 %3077  ;;  %v3338_v41 = vsel %vm3301_vm10, %v3295_v29, %v5748_v7  ;;  %v3339_v43 = vsel %vm3301_vm10, %v3296_v44, %v5749_v58 }
 0x3e0   :  { %v3206_v34 = vpop.permute.xlu1 %3205  ;;  %v3381_v46 = vsel %vm3344_vm11, %v3338_v41, %v3078_v17 }
 0x3e1   :  { %v3863_v39 = vmax.f32 %v3680_v1, 0.0  ;;  %v3423_v55 = vsel %vm2405_vm8, %v3078_v17, %v3206_v34 }
 0x3e2   :  { %5192 = vmatprep.mubr.msk.f32.mxu0 %vm3461_vm12, %v3423_v55 }
 0x3e3   :  { %v3936_v19 = vrot.slane %v3863_v39, 1  ;;  %3828 = vmatmul.mubr.f32.gmra.mrb[154].mxu0 %v3381_v46  ;;  %v3080_v30 = vpop.permute.xlu0 %3079 }
 0x3e4   :  { %v3208_v33 = vpop.permute.xlu1 %3207  ;;  %v3382_v31 = vsel %vm3344_vm11, %v3339_v43, %v3080_v30 }
 0x3e5   :  { %v3937_v4 = vsel %vm1275_vm2, %v3934_v28, %v3936_v19  ;;  %v3424_v45 = vsel %vm2405_vm8, %v3080_v30, %v3208_v33 }
 0x3e6   :  { %v4011_v63 = vmax.f32 %v3862_v59, %v3937_v4  ;;  %5193 = vmatprep.mubr.msk.f32.mxu0 %vm3461_vm12, %v3424_v45 }
 0x3e7   :  { %3833 = vmatmul.mubr.f32.gmra.mrb[156].mxu0 %v3382_v31  ;;  %v5752_v48 = vpop.permute.xlu0 %5751 }
 0x3e8   :  { %v5757_v27 = vpop.permute.xlu1 %5756  ;;  %v5754_v60 = vunpack.i.h.bf16 %v5752_v48  ;;  %v5753_v12 = vunpack.i.l.bf16 %v5752_v48  ;;  %v4117_v2 = vrot.slane %v4011_v63, 6 }
 0x3e9   :  { %v5758_v6 = vunpack.i.l.bf16 %v5757_v27  ;;  %v5759_v5 = vunpack.i.h.bf16 %v5757_v27 }
 0x3ea   :  { %v3297_v38 = vsel %vm108_vm0, %v9274_v37, %v5753_v12  ;;  %v3298_v42 = vsel %vm108_vm0, %v9317_v22, %v5754_v60 }
 0x3eb   :  { %v3082_v26 = vpop.permute.xlu0 %3081  ;;  %v3340_v20 = vsel %vm3301_vm10, %v3297_v38, %v5758_v6  ;;  %v3341_v51 = vsel %vm3301_vm10, %v3298_v42, %v5759_v5 }
 0x3ec   :  { %v3210_v57 = vpop.permute.xlu1 %3209  ;;  %v3383_v40 = vsel %vm3344_vm11, %v3340_v20, %v3082_v26 }
 0x3ed   :  { %v3425_v10 = vsel %vm2405_vm8, %v3082_v26, %v3210_v57 }
 0x3ee   :  { %v3684_v11 = vpop.f32.mrb[94].mxu0  ;;  %5194 = vmatprep.mubr.msk.f32.mxu0 %vm3461_vm12, %v3425_v10 }
 0x3ef   :  { %v3685_v61 = vadd.f32 %v9726_v8, %v3684_v11  ;;  %v3686_v25 = vpop.f32.mrb[95].mxu0  ;;  %3838 = vmatmul.mubr.f32.gmra.mrb[158].mxu0 %v3383_v40  ;;  %v3084_v37 = vpop.permute.xlu0 %3083 }
 0x3f0   :  { %v3212_v16 = vpop.permute.xlu1 %3211  ;;  %v3384_v59 = vsel %vm3344_vm11, %v3341_v51, %v3084_v37 }
 0x3f1   :  { %v3864_v36 = vmax.f32 %v3685_v61, 0.0  ;;  %v3426_v14 = vsel %vm2405_vm8, %v3084_v37, %v3212_v16 }
 0x3f2   :  { %5195 = vmatprep.mubr.msk.f32.mxu0 %vm3461_vm12, %v3426_v14 }
 0x3f3   :  { %v3938_v22 = vrot.slane %v3864_v36, 1  ;;  %3843 = vmatmul.mubr.f32.gmra.mrb[160].mxu0 %v3384_v59 }
 0x3f5   :  { %v3939_v54 = vsel %vm1275_vm2, %v3936_v19, %v3938_v22 }
 0x3f6   :  { %v4012_v28 = vmax.f32 %v3863_v39, %v3939_v54 }
 0x3f8   :  { %v4118_v62 = vrot.slane %v4012_v28, 6 }
 0x3fa   :  { %v4119_v32 = vsel %vm2498_vm9, %v4117_v2, %v4118_v62  ;;  %v3689_v52 = vpop.f32.mrb[96].mxu0 }
 0x3fb   :  { %v9840_v47 = vmax.f32 %v9802_v53, %v4119_v32  ;;  %v3690_v50 = vadd.f32 %v9726_v8, %v3689_v52  ;;  %v3691_v24 = vpop.f32.mrb[97].mxu0 }
 0x3fd   :  { %v3865_v15 = vmax.f32 %v3690_v50, 0.0  ;;  %v4323_v33 = vrot.slane %v9840_v47, 4  ;;  %v4244_v31 = vrot.slane %v9840_v47, 2  ;;  %v4403_v10 = vrot.slane %v9840_v47, 6 }
 0x3ff   :  { %v3940_v0 = vrot.slane %v3865_v15, 1 }
 0x401   :  { %v4037_v21 = vsel %vm1275_vm2, %v3938_v22, %v3940_v0 }
 0x402   :  { %v4066_v3 = vmax.f32 %v3864_v36, %v4037_v21 }
 0x404   :  { %v4120_v7 = vrot.slane %v4066_v3, 6 }
 0x406   :  { %v4121_v56 = vsel %vm2498_vm9, %v4118_v62, %v4120_v7 }
 0x407   :  { %v9845_v18 = vmax.f32 %v4011_v63, %v4121_v56 }
 0x409   :  { %v4324_v39 = vrot.slane %v9845_v18, 4  ;;  %v4245_v43 = vrot.slane %v9845_v18, 2  ;;  %v4404_v57 = vrot.slane %v9845_v18, 6 }
 0x40a   :  { %v3694_v29 = vpop.f32.mrb[98].mxu0 }
 0x40b   :  { %v3695_v58 = vadd.f32 %v9726_v8, %v3694_v29  ;;  %v3696_v1 = vpop.f32.mrb[99].mxu0  ;;  %v4325_v27 = vsel %vm2010_vm1, %v4323_v33, %v4324_v39  ;;  %v4246_v38 = vsel %vm1520_vm3, %v4244_v31, %v4245_v43  ;;  %v4405_v61 = vsel %vm2498_vm9, %v4403_v10, %v4404_v57 }
 0x40d   :  { %v3866_v9 = vmax.f32 %v3695_v58, 0.0 }
 0x40f   :  { %v3941_v53 = vrot.slane %v3866_v9, 1 }
 0x411   :  { %v3942_v17 = vsel %vm1275_vm2, %v3940_v0, %v3941_v53  ;;  %v9875_v0 = vpop.permute.xlu1 %5766 }
 0x412   :  { %v4013_v41 = vmax.f32 %v3865_v15, %v3942_v17 }
 0x414   :  { %v4122_v34 = vrot.slane %v4013_v41, 6 }
 0x416   :  { %v4123_v46 = vsel %vm2498_vm9, %v4120_v7, %v4122_v34  ;;  %v3699_v44 = vpop.f32.mrb[100].mxu0 }
 0x417   :  { %v3700_v55 = vadd.f32 %v9726_v8, %v3699_v44  ;;  %v3701_v19 = vpop.f32.mrb[101].mxu0  ;;  %v4198_v30 = vmax.f32 %v4012_v28, %v4123_v46  ;;  %v9871_v28 = vpop.permute.xlu0 %5761 }
 0x418   :  { %v5763_v21 = vunpack.i.l.bf16 %v9871_v28 }
 0x419   :  { %v3867_v4 = vmax.f32 %v3700_v55, 0.0  ;;  %v5770_v45 = vpack.i.bf16 %v4198_v30, %v9845_v18  ;;  %v4326_v63 = vrot.slane %v4198_v30, 4  ;;  %v4247_v48 = vrot.slane %v4198_v30, 2 }
 0x41a   :  { %v4406_v60 = vrot.slane %v4198_v30, 6  ;;  %v3299_v55 = vsel %vm108_vm0, %v9376_v23, %v5763_v21 }
 0x41b   :  { %v3943_v12 = vrot.slane %v3867_v4, 1  ;;  %5771 = vrot.lane.b32.xlu1 %v5770_v45, %s5932_s21  ;;  %v4327_v6 = vsel %vm2010_vm1, %v4324_v39, %v4326_v63  ;;  %v4248_v5 = vsel %vm1520_vm3, %v4245_v43, %v4247_v48 }
 0x41c   :  { %v5780_v26 = vpack.i.bf16 %v4327_v6, %v4325_v27  ;;  %v5775_v20 = vpack.i.bf16 %v4248_v5, %v4246_v38  ;;  %v4407_v11 = vsel %vm2498_vm9, %v4404_v57, %v4406_v60 }
 0x41d   :  { %v3944_v40 = vsel %vm1275_vm2, %v3941_v53, %v3943_v12  ;;  %v5785_v25 = vpack.i.bf16 %v4407_v11, %v4405_v61  ;;  %v5768_v53 = vunpack.i.l.bf16 %v9875_v0 }
 0x41e   :  { %v4014_v42 = vmax.f32 %v3866_v9, %v3944_v40  ;;  %5781 = vrot.lane.b32.xlu0 %v5780_v26, %s5924_s18 }
 0x41f   :  { %5776 = vrot.lane.b32.xlu1 %v5775_v20, %s5926_s20  ;;  %v3342_v27 = vsel %vm3301_vm10, %v3299_v55, %v5768_v53 }
 0x420   :  { %v4124_v3 = vrot.slane %v4014_v42, 6 }
 0x423   :  { %5786 = vrot.lane.b32.xlu1 %v5785_v25, %s5933_s24 }
 0x426   :  { %v3704_v37 = vpop.f32.mrb[102].mxu0 }
 0x427   :  { %v3705_v51 = vadd.f32 %v9726_v8, %v3704_v37  ;;  %v3706_v16 = vpop.f32.mrb[103].mxu0 }
 0x428   :  { %v5764_v16 = vunpack.i.h.bf16 %v9871_v28 }
 0x429   :  { %v3868_v59 = vmax.f32 %v3705_v51, 0.0 }
 0x42a   :  { %v3709_v36 = vpop.f32.mrb[104].mxu0 }
 0x42b   :  { %v3945_v14 = vrot.slane %v3868_v59, 1  ;;  %v3710_v22 = vadd.f32 %v9726_v8, %v3709_v36  ;;  %v3711_v54 = vpop.f32.mrb[105].mxu0 }
 0x42d   :  { %v4038_v2 = vsel %vm1275_vm2, %v3943_v12, %v3945_v14  ;;  %v3869_v62 = vmax.f32 %v3710_v22, 0.0 }
 0x42e   :  { %v4067_v32 = vmax.f32 %v3867_v4, %v4038_v2  ;;  %v3714_v52 = vpop.f32.mrb[106].mxu0  ;;  %v3086_v4 = vpop.permute.xlu0 %3085 }
 0x42f   :  { %v3946_v50 = vrot.slane %v3869_v62, 1  ;;  %v3715_v24 = vadd.f32 %v9726_v8, %v3714_v52  ;;  %v3716_v15 = vpop.f32.mrb[107].mxu0  ;;  %v3385_v26 = vsel %vm3344_vm11, %v3342_v27, %v3086_v4 }
 0x430   :  { %v4125_v7 = vrot.slane %v4067_v32, 6  ;;  %v5769_v32 = vunpack.i.h.bf16 %v9875_v0 }
 0x431   :  { %v3947_v56 = vsel %vm1275_vm2, %v3945_v14, %v3946_v50  ;;  %v3870_v29 = vmax.f32 %v3715_v24, 0.0 }
 0x432   :  { %v4126_v58 = vsel %vm2498_vm9, %v4124_v3, %v4125_v7  ;;  %v4015_v1 = vmax.f32 %v3868_v59, %v3947_v56  ;;  %v3719_v9 = vpop.f32.mrb[108].mxu0 }
 0x433   :  { %v9881_v17 = vmax.f32 %v4013_v41, %v4126_v58  ;;  %v3948_v34 = vrot.slane %v3870_v29, 1  ;;  %v3720_v46 = vadd.f32 %v9726_v8, %v3719_v9  ;;  %v3721_v44 = vpop.f32.mrb[109].mxu0 }
 0x434   :  { %v4127_v39 = vrot.slane %v4015_v1, 6 }
 0x435   :  { %v3949_v19 = vsel %vm1275_vm2, %v3946_v50, %v3948_v34  ;;  %v3871_v30 = vmax.f32 %v3720_v46, 0.0 }
 0x436   :  { %v4128_v43 = vsel %vm2498_vm9, %v4125_v7, %v4127_v39  ;;  %v4016_v33 = vmax.f32 %v3869_v62, %v3949_v19  ;;  %v3724_v31 = vpop.f32.mrb[110].mxu0  ;;  %v3300_v7 = vsel %vm108_vm0, %v9438_v13, %v5764_v16  ;;  %vm4648_vm0 = vcmask 1040384  }
 0x437   :  { %v9888_v45 = vmax.f32 %v4014_v42, %v4128_v43  ;;  %v3950_v41 = vrot.slane %v3871_v30, 1  ;;  %v3725_v63 = vadd.f32 %v9726_v8, %v3724_v31  ;;  %v3726_v48 = vpop.f32.mrb[111].mxu0 }
 0x438   :  { %v3214_v60 = vpop.permute.xlu1 %3213  ;;  %v4129_v42 = vrot.slane %v4016_v33, 6 }
 0x439   :  { %v3951_v12 = vsel %vm1275_vm2, %v3948_v34, %v3950_v41  ;;  %v3872_v23 = vmax.f32 %v3725_v63, 0.0  ;;  %v3427_v6 = vsel %vm2405_vm8, %v3086_v4, %v3214_v60  ;;  %v3343_v34 = vsel %vm3301_vm10, %v3300_v7, %v5769_v32 }
 0x43a   :  { %v4017_v38 = vmax.f32 %v3870_v29, %v3951_v12  ;;  %v3729_v5 = vpop.f32.mrb[112].mxu0  ;;  %5196 = vmatprep.mubr.msk.f32.mxu0 %vm3461_vm12, %v3427_v6  ;;  %v3088_v29 = vpop.permute.xlu0 %3087 }
 0x43b   :  { %v3952_v20 = vrot.slane %v3872_v23, 1  ;;  %v3730_v57 = vadd.f32 %v9726_v8, %v3729_v5  ;;  %v3731_v40 = vpop.f32.mrb[113].mxu0  ;;  %3848 = vmatmul.mubr.f32.gmra.mrb[162].mxu0 %v3385_v26 }
 0x43c   :  { %v4130_v10 = vrot.slane %v4017_v38, 6 }
 0x43d   :  { %v4039_v11 = vsel %vm1275_vm2, %v3950_v41, %v3952_v20  ;;  %v3873_v61 = vmax.f32 %v3730_v57, 0.0 }
 0x43e   :  { %v4131_v25 = vsel %vm2498_vm9, %v4129_v42, %v4130_v10  ;;  %v4068_v37 = vmax.f32 %v3871_v30, %v4039_v11  ;;  %v3734_v51 = vpop.f32.mrb[114].mxu0  ;;  %v3386_v30 = vsel %vm3344_vm11, %v3343_v34, %v3088_v29 }
 0x43f   :  { %v9900_v59 = vmax.f32 %v4015_v1, %v4131_v25  ;;  %v3953_v36 = vrot.slane %v3873_v61, 1  ;;  %v3735_v14 = vadd.f32 %v9726_v8, %v3734_v51  ;;  %v3736_v22 = vpop.f32.mrb[115].mxu0 }
 0x440   :  { %v4132_v54 = vrot.slane %v4068_v37, 6 }
 0x441   :  { %v3954_v2 = vsel %vm1275_vm2, %v3952_v20, %v3953_v36  ;;  %v3874_v62 = vmax.f32 %v3735_v14, 0.0  ;;  %v4252_v43 = vrot.slane %v9900_v59, 2 }
 0x442   :  { %v4133_v52 = vsel %vm2498_vm9, %v4130_v10, %v4132_v54  ;;  %v4018_v50 = vmax.f32 %v3872_v23, %v3954_v2  ;;  %v3739_v24 = vpop.f32.mrb[116].mxu0 }
 0x443   :  { %v9906_v15 = vmax.f32 %v4016_v33, %v4133_v52  ;;  %v3955_v21 = vrot.slane %v3874_v62, 1  ;;  %v3740_v28 = vadd.f32 %v9726_v8, %v3739_v24  ;;  %v3741_v3 = vpop.f32.mrb[117].mxu0  ;;  %v4331_v33 = vrot.slane %v9900_v59, 4 }
 0x444   :  { %v4134_v56 = vrot.slane %v4018_v50, 6 }
 0x445   :  { %v3956_v58 = vsel %vm1275_vm2, %v3953_v36, %v3955_v21  ;;  %v3875_v1 = vmax.f32 %v3740_v28, 0.0  ;;  %v4253_v19 = vrot.slane %v9906_v15, 2  ;;  %v4332_v31 = vrot.slane %v9906_v15, 4 }
 0x446   :  { %v4135_v0 = vsel %vm2498_vm9, %v4132_v54, %v4134_v56  ;;  %v4019_v9 = vmax.f32 %v3873_v61, %v3956_v58  ;;  %v3744_v53 = vpop.f32.mrb[118].mxu0  ;;  %v4412_v23 = vrot.slane %v9906_v15, 6  ;;  %v4411_v36 = vrot.slane %v9900_v59, 6 }
 0x447   :  { %v9914_v46 = vmax.f32 %v4017_v38, %v4135_v0  ;;  %v4040_v44 = vrot.slane %v3875_v1, 1  ;;  %v3745_v39 = vadd.f32 %v9726_v8, %v3744_v53  ;;  %v3746_v55 = vpop.f32.mrb[119].mxu0  ;;  %v4254_v20 = vsel %vm1520_vm3, %v4252_v43, %v4253_v19 }
 0x448   :  { %v3216_v13 = vpop.permute.xlu1 %3215  ;;  %v4136_v38 = vrot.slane %v4019_v9, 6  ;;  %v4333_v10 = vsel %vm2010_vm1, %v4331_v33, %v4332_v31 }
 0x449   :  { %v4041_v4 = vsel %vm1275_vm2, %v3955_v21, %v4040_v44  ;;  %v3876_v41 = vmax.f32 %v3745_v39, 0.0  ;;  %v3428_v63 = vsel %vm2405_vm8, %v3088_v29, %v3216_v13  ;;  %v4255_v48 = vrot.slane %v9914_v46, 2 }
 0x44a   :  { %v4069_v27 = vmax.f32 %v3874_v62, %v4041_v4  ;;  %v3749_v60 = vpop.f32.mrb[120].mxu0  ;;  %5197 = vmatprep.mubr.msk.f32.mxu0 %vm3461_vm12, %v3428_v63  ;;  %v4334_v12 = vrot.slane %v9914_v46, 4  ;;  %v4414_v6 = vrot.slane %v9914_v46, 6  ;;  %v4413_v62 = vsel %vm2498_vm9, %v4411_v36, %v4412_v23 }
 0x44b   :  { %v4042_v5 = vrot.slane %v3876_v41, 1  ;;  %v3750_v26 = vpop.f32.mrb[121].mxu0  ;;  %3853 = vmatmul.mubr.f32.gmra.mrb[164].mxu0 %v3386_v30  ;;  %v4256_v57 = vsel %vm1520_vm3, %v4253_v19, %v4255_v48 }
 0x44c   :  { %v4137_v40 = vrot.slane %v4069_v27, 6  ;;  %v5790_v42 = vpack.i.bf16 %v4256_v57, %v4254_v20  ;;  %v4335_v11 = vsel %vm2010_vm1, %v4332_v31, %v4334_v12  ;;  %v4415_v14 = vsel %vm2498_vm9, %v4412_v23, %v4414_v6 }
 0x44d   :  { %v4043_v61 = vsel %vm1275_vm2, %v4040_v44, %v4042_v5  ;;  %v5795_v25 = vpack.i.bf16 %v4335_v11, %v4333_v10  ;;  %v5800_v32 = vpack.i.bf16 %v4415_v14, %v4413_v62 }
 0x44e   :  { %v4138_v37 = vsel %vm2498_vm9, %v4136_v38, %v4137_v40  ;;  %v4070_v51 = vmax.f32 %v3875_v1, %v4043_v61  ;;  %v3753_v16 = vpop.f32.mrb[122].mxu0  ;;  %5791 = vrot.lane.b32.xlu0 %v5790_v42, %s5926_s20 }
 0x44f   :  { %v9938_v22 = vmax.f32 %v4018_v50, %v4138_v37  ;;  %5796 = vrot.lane.b32.xlu1 %v5795_v25, %s5924_s18  ;;  %v3754_v54 = vpop.f32.mrb[123].mxu0 }
 0x450   :  { %v4139_v2 = vrot.slane %v4070_v51, 6 }
 0x452   :  { %v4140_v52 = vsel %vm2498_vm9, %v4137_v40, %v4139_v2  ;;  %v3757_v24 = vpop.f32.mrb[124].mxu0 }
 0x453   :  { %v9943_v21 = vmax.f32 %v4019_v9, %v4140_v52  ;;  %5801 = vrot.lane.b32.xlu1 %v5800_v32, %s5933_s24  ;;  %v3758_v28 = vpop.f32.mrb[125].mxu0 }
 0x454   :  { %v4242_v28 = vrot.slane %v9810_v49, 2 }
 0x456   :  { %v3761_v3 = vpop.f32.mrb[126].mxu0 }
 0x457   :  { %v3762_v7 = vpop.f32.mrb[127].mxu0  ;;  %v4401_v3 = vrot.slane %v9810_v49, 6 }
 0x45d   :  { %v3765_v56 = vpop.f32.mrb[128].mxu0 }
 0x45e   :  { %v3766_v50 = vpop.f32.mrb[129].mxu0 }
 0x461   :  { %v3769_v29 = vpop.f32.mrb[130].mxu0 }
 0x462   :  { %v3771_v58 = vpop.f32.mrb[131].mxu0  ;;  %v3770_v1 = vadd.f32 %v9726_v8, %v3769_v29  ;;  %v4241_v29 = vrot.slane %v9781_v35, 2 }
 0x464   :  { %v3877_v53 = vmax.f32 %v3770_v1, 0.0  ;;  %v4400_v1 = vrot.slane %v9781_v35, 6 }
 0x466   :  { %v3774_v0 = vpop.f32.mrb[132].mxu0  ;;  %v3957_v9 = vrot.slane %v3877_v53, 1 }
 0x467   :  { %v3775_v34 = vadd.f32 %v9726_v8, %v3774_v0  ;;  %v3776_v44 = vpop.f32.mrb[133].mxu0 }
 0x469   :  { %v3878_v39 = vmax.f32 %v3775_v34, 0.0 }
 0x46a   :  { %v3779_v55 = vpop.f32.mrb[134].mxu0 }
 0x46b   :  { %v3958_v19 = vrot.slane %v3878_v39, 1  ;;  %v3780_v13 = vadd.f32 %v9726_v8, %v3779_v55  ;;  %v3781_v30 = vpop.f32.mrb[135].mxu0 }
 0x46d   :  { %v3959_v43 = vsel %vm1275_vm2, %v3957_v9, %v3958_v19  ;;  %v3879_v33 = vmax.f32 %v3780_v13, 0.0  ;;  %v9975_v9 = vsel %vm1520_vm3, %v4241_v29, %v4242_v28 }
 0x46e   :  { %v4020_v31 = vmax.f32 %v3877_v53, %v3959_v43 }
 0x46f   :  { %v3960_v4 = vrot.slane %v3879_v33, 1 }
 0x471   :  { %v3961_v41 = vsel %vm1275_vm2, %v3958_v19, %v3960_v4  ;;  %v9978_v19 = vsel %vm2498_vm9, %v4400_v1, %v4401_v3 }
 0x472   :  { %v4021_v63 = vmax.f32 %v3878_v39, %v3961_v41  ;;  %v3784_v48 = vpop.f32.mrb[136].mxu0 }
 0x473   :  { %v3785_v27 = vadd.f32 %v9726_v8, %v3784_v48  ;;  %v3786_v60 = vpop.f32.mrb[137].mxu0 }
 0x474   :  { %v4141_v61 = vrot.slane %v4021_v63, 6 }
 0x475   :  { %v3880_v12 = vmax.f32 %v3785_v27, 0.0 }
 0x476   :  { %v3789_v23 = vpop.f32.mrb[138].mxu0 }
 0x477   :  { %v3962_v6 = vrot.slane %v3880_v12, 1  ;;  %v3790_v38 = vadd.f32 %v9726_v8, %v3789_v23  ;;  %v3791_v5 = vpop.f32.mrb[139].mxu0 }
 0x479   :  { %v4044_v26 = vsel %vm1275_vm2, %v3960_v4, %v3962_v6  ;;  %v3881_v20 = vmax.f32 %v3790_v38, 0.0 }
 0x47a   :  { %v4071_v57 = vmax.f32 %v3879_v33, %v4044_v26  ;;  %v3794_v40 = vpop.f32.mrb[140].mxu0 }
 0x47b   :  { %v3963_v42 = vrot.slane %v3881_v20, 1  ;;  %v3795_v10 = vadd.f32 %v9726_v8, %v3794_v40  ;;  %v3796_v11 = vpop.f32.mrb[141].mxu0 }
 0x47c   :  { %v4142_v25 = vrot.slane %v4071_v57, 6 }
 0x47d   :  { %v3964_v37 = vsel %vm1275_vm2, %v3962_v6, %v3963_v42  ;;  %v3882_v51 = vmax.f32 %v3795_v10, 0.0 }
 0x47e   :  { %v4143_v16 = vsel %vm2498_vm9, %v4141_v61, %v4142_v25  ;;  %v4022_v36 = vmax.f32 %v3880_v12, %v3964_v37 }
 0x47f   :  { %v9957_v14 = vmax.f32 %v4020_v31, %v4143_v16  ;;  %v3965_v54 = vrot.slane %v3882_v51, 1 }
 0x480   :  { %v4144_v2 = vrot.slane %v4022_v36, 6 }
 0x481   :  { %v3966_v62 = vsel %vm1275_vm2, %v3963_v42, %v3965_v54  ;;  %v4260_v58 = vrot.slane %v9957_v14, 2  ;;  %v4419_v0 = vrot.slane %v9957_v14, 6 }
 0x482   :  { %v4145_v32 = vsel %vm2498_vm9, %v4142_v25, %v4144_v2  ;;  %v4023_v52 = vmax.f32 %v3881_v20, %v3966_v62  ;;  %v3799_v24 = vpop.f32.mrb[142].mxu0 }
 0x483   :  { %v9963_v7 = vmax.f32 %v4021_v63, %v4145_v32  ;;  %v3800_v56 = vadd.f32 %v9726_v8, %v3799_v24  ;;  %v3801_v50 = vpop.f32.mrb[143].mxu0 }
 0x484   :  { %v4146_v12 = vrot.slane %v4023_v52, 6 }
 0x485   :  { %v3883_v53 = vmax.f32 %v3800_v56, 0.0  ;;  %v4261_v34 = vrot.slane %v9963_v7, 2  ;;  %v4420_v44 = vrot.slane %v9963_v7, 6  ;;  %v5880_v39 = vpack.i.bf16 %v9810_v49, %v9963_v7 }
 0x486   :  { %v3804_v55 = vpop.f32.mrb[144].mxu0 }
 0x487   :  { %v3967_v13 = vrot.slane %v3883_v53, 1  ;;  %v3805_v30 = vadd.f32 %v9726_v8, %v3804_v55  ;;  %v3806_v43 = vpop.f32.mrb[145].mxu0  ;;  %v9982_v33 = vsel %vm1520_vm3, %v4260_v58, %v4261_v34  ;;  %v9985_v31 = vsel %vm2498_vm9, %v4419_v0, %v4420_v44 }
 0x488   :  { %v5865_v4 = vpack.i.bf16 %v9975_v9, %v9982_v33  ;;  %v5870_v41 = vpack.i.bf16 %v9978_v19, %v9985_v31 }
 0x489   :  { %v3968_v63 = vsel %vm1275_vm2, %v3965_v54, %v3967_v13  ;;  %v3884_v48 = vmax.f32 %v3805_v30, 0.0 }
 0x48a   :  { %v4024_v27 = vmax.f32 %v3882_v51, %v3968_v63 }
 0x48b   :  { %v3969_v60 = vrot.slane %v3884_v48, 1 }
 0x48c   :  { %v4147_v23 = vrot.slane %v4024_v27, 6 }
 0x48d   :  { %v4045_v6 = vsel %vm1275_vm2, %v3967_v13, %v3969_v60 }
 0x48e   :  { %v4148_v38 = vsel %vm2498_vm9, %v4146_v12, %v4147_v23  ;;  %v4072_v5 = vmax.f32 %v3883_v53, %v4045_v6  ;;  %v3809_v26 = vpop.f32.mrb[146].mxu0  ;;  %v10024_v6 = vld [vmem:[%s10595_s4] ss:$0 sm:$0xff] }
 0x48f   :  { %v9994_v20 = vmax.f32 %v4022_v36, %v4148_v38  ;;  %v3810_v57 = vadd.f32 %v9726_v8, %v3809_v26  ;;  %v3811_v40 = vpop.f32.mrb[147].mxu0 }
 0x490   :  { %v4149_v42 = vrot.slane %v4072_v5, 6 }
 0x491   :  { %v3885_v10 = vmax.f32 %v3810_v57, 0.0  ;;  %v4263_v29 = vrot.slane %v9994_v20, 2 }
 0x492   :  { %v4150_v11 = vsel %vm2498_vm9, %v4147_v23, %v4149_v42 }
 0x493   :  { %v9998_v61 = vmax.f32 %v4023_v52, %v4150_v11  ;;  %v3970_v25 = vrot.slane %v3885_v10, 1  ;;  %v4422_v52 = vrot.slane %v9994_v20, 6 }
 0x495   :  { %v3971_v37 = vsel %vm1275_vm2, %v3969_v60, %v3970_v25  ;;  %v4423_v24 = vrot.slane %v9998_v61, 6  ;;  %v4264_v28 = vrot.slane %v9998_v61, 2  ;;  %v4343_v43 = vrot.slane %v9998_v61, 4 }
 0x496   :  { %v4025_v51 = vmax.f32 %v3884_v48, %v3971_v37  ;;  %v4342_v48 = vrot.slane %v9994_v20, 4 }
 0x497   :  { %v4265_v34 = vsel %vm1520_vm3, %v4263_v29, %v4264_v28 }
 0x498   :  { %v4151_v16 = vrot.slane %v4025_v51, 6  ;;  %v4344_v60 = vsel %vm2010_vm1, %v4342_v48, %v4343_v43  ;;  %v4250_v48 = vrot.slane %v9888_v45, 2 }
 0x499   :  { %v3814_v54 = vpop.f32.mrb[148].mxu0 }
 0x49a   :  { %v4152_v2 = vsel %vm2498_vm9, %v4149_v42, %v4151_v16  ;;  %v3815_v36 = vadd.f32 %v9726_v8, %v3814_v54  ;;  %v3816_v62 = vpop.f32.mrb[149].mxu0  ;;  %v4424_v8 = vsel %vm2498_vm9, %v4422_v52, %v4423_v24 }
 0x49b   :  { %v4210_v32 = vmax.f32 %v4024_v27, %v4152_v2 }
 0x49c   :  { %v3886_v3 = vmax.f32 %v3815_v36, 0.0 }
 0x49d   :  { %v5805_v56 = vpack.i.bf16 %v4210_v32, %v9998_v61  ;;  %v4425_v50 = vrot.slane %v4210_v32, 6  ;;  %v4266_v58 = vrot.slane %v4210_v32, 2  ;;  %v4345_v0 = vrot.slane %v4210_v32, 4 }
 0x49e   :  { %v3972_v1 = vrot.slane %v3886_v3, 1 }
 0x49f   :  { %5806 = vrot.lane.b32.xlu0 %v5805_v56, %s5932_s21  ;;  %v4426_v53 = vsel %vm2498_vm9, %v4423_v24, %v4425_v50  ;;  %v4267_v44 = vsel %vm1520_vm3, %v4264_v28, %v4266_v58  ;;  %v4346_v27 = vsel %vm2010_vm1, %v4343_v43, %v4345_v0  ;;  %v4328_v58 = vrot.slane %v9881_v17, 4 }
 0x4a0   :  { %v3973_v55 = vsel %vm1275_vm2, %v3970_v25, %v3972_v1  ;;  %v5820_v13 = vpack.i.bf16 %v4426_v53, %v4424_v8  ;;  %v5810_v30 = vpack.i.bf16 %v4267_v44, %v4265_v34  ;;  %v5815_v12 = vpack.i.bf16 %v4346_v27, %v4344_v60  ;;  %v4653_v27 = vld [vmem:[%s10596_s5] sm:$0xff]  ;;  %v4654_v60 = vld [vmem:[%s10596_s5 + $0x8] sm:$0xff] }
 0x4a1   :  { %v4026_v63 = vmax.f32 %v3885_v10, %v3973_v55  ;;  %v4329_v53 = vrot.slane %v9888_v45, 4  ;;  %v4408_v34 = vrot.slane %v9881_v17, 6 }
 0x4a2   :  { %5821 = vrot.lane.b32.xlu1 %v5820_v13, %s5933_s24 }
 0x4a3   :  { %5811 = vrot.lane.b32.xlu0 %v5810_v30, %s5926_s20  ;;  %v4153_v16 = vrot.slane %v4026_v63, 6 }
 0x4a7   :  { %5816 = vrot.lane.b32.xlu0 %v5815_v12, %s5924_s18 }
 0x4a9   :  { %v3819_v23 = vpop.f32.mrb[150].mxu0 }
 0x4aa   :  { %v3820_v38 = vadd.f32 %v10024_v6, %v3819_v23  ;;  %v3821_v5 = vpop.f32.mrb[151].mxu0 }
 0x4ac   :  { %v3887_v26 = vmax.f32 %v3820_v38, 0.0  ;;  %v5395_v38 = vpack.c.bf16 %v4654_v60, %v4653_v27 }
 0x4ae   :  { %v3974_v57 = vrot.slane %v3887_v26, 1  ;;  %v3824_v40 = vpop.f32.mrb[152].mxu0 }
 0x4af   :  { %v3825_v42 = vadd.f32 %v10024_v6, %v3824_v40  ;;  %v3826_v10 = vpop.f32.mrb[153].mxu0 }
 0x4b0   :  { %v4046_v11 = vsel %vm1275_vm2, %v3972_v1, %v3974_v57  ;;  %v4669_v1 = vld [vmem:[%s10596_s5 + $0x80] sm:$0xff]  ;;  %v4330_v10 = vsel %vm2010_vm1, %v4328_v58, %v4329_v53 }
 0x4b1   :  { %v4073_v25 = vmax.f32 %v3886_v3, %v4046_v11  ;;  %v3888_v37 = vmax.f32 %v3825_v42, 0.0  ;;  %v4249_v3 = vrot.slane %v9881_v17, 2 }
 0x4b3   :  { %v4154_v54 = vrot.slane %v4073_v25, 6  ;;  %v3975_v2 = vrot.slane %v3888_v37, 1 }
 0x4b5   :  { %v4155_v36 = vsel %vm2498_vm9, %v4153_v16, %v4154_v54  ;;  %v3976_v62 = vsel %vm1275_vm2, %v3974_v57, %v3975_v2 }
 0x4b6   :  { %v10031_v32 = vmax.f32 %v4025_v51, %v4155_v36  ;;  %v4027_v24 = vmax.f32 %v3887_v26, %v3976_v62  ;;  %v3829_v28 = vpop.f32.mrb[154].mxu0  ;;  %v4670_v51 = vld [vmem:[%s10596_s5 + $0x88] sm:$0xff]  ;;  %v4251_v36 = vsel %vm1520_vm3, %v4249_v3, %v4250_v48 }
 0x4b7   :  { %v3830_v52 = vadd.f32 %v10024_v6, %v3829_v28  ;;  %v3831_v56 = vpop.f32.mrb[155].mxu0  ;;  %v5393_v44 = vpack.c.bf16 %v4670_v51, %v4669_v1 }
 0x4b8   :  { %v4156_v50 = vrot.slane %v4027_v24, 6  ;;  %v4347_v12 = vrot.slane %v10031_v32, 4  ;;  %v4268_v23 = vrot.slane %v10031_v32, 2  ;;  %v4427_v11 = vrot.slane %v10031_v32, 6 }
 0x4b9   :  { %v3889_v29 = vmax.f32 %v3830_v52, 0.0  ;;  %5394 = vmatprep.subr.bf16.mxu1 %v5393_v44 }
 0x4ba   :  { %v4157_v0 = vsel %vm2498_vm9, %v4154_v54, %v4156_v50  ;;  %v3834_v8 = vpop.f32.mrb[156].mxu0  ;;  %5396 = vmatpush3.bf16.msra.mxu1 %v5395_v38 }
 0x4bb   :  { %v10045_v55 = vmax.f32 %v4026_v63, %v4157_v0  ;;  %v3977_v13 = vrot.slane %v3889_v29, 1  ;;  %v3835_v30 = vadd.f32 %v10024_v6, %v3834_v8  ;;  %v3836_v43 = vpop.f32.mrb[157].mxu0  ;;  %v4409_v63 = vrot.slane %v9888_v45, 6 }
 0x4bd   :  { %v3978_v5 = vsel %vm1275_vm2, %v3975_v2, %v3977_v13  ;;  %v3890_v26 = vmax.f32 %v3835_v30, 0.0  ;;  %v4348_v57 = vrot.slane %v10045_v55, 4  ;;  %v4269_v40 = vrot.slane %v10045_v55, 2 }
 0x4be   :  { %v4028_v42 = vmax.f32 %v3888_v37, %v3978_v5  ;;  %v4428_v25 = vrot.slane %v10045_v55, 6  ;;  %v4410_v52 = vsel %vm2498_vm9, %v4408_v34, %v4409_v63 }
 0x4bf   :  { %v3979_v16 = vrot.slane %v3890_v26, 1  ;;  %v4349_v54 = vsel %vm2010_vm1, %v4347_v12, %v4348_v57  ;;  %v4270_v2 = vsel %vm1520_vm3, %v4268_v23, %v4269_v40 }
 0x4c0   :  { %v5830_v62 = vpack.i.bf16 %v4330_v10, %v4349_v54  ;;  %v5825_v28 = vpack.i.bf16 %v4251_v36, %v4270_v2  ;;  %v4429_v37 = vsel %vm2498_vm9, %v4427_v11, %v4428_v25  ;;  %v4158_v0 = vrot.slane %v4028_v42, 6 }
 0x4c1   :  { %v3980_v56 = vsel %vm1275_vm2, %v3977_v13, %v3979_v16  ;;  %v5835_v50 = vpack.i.bf16 %v4410_v52, %v4429_v37 }
 0x4c2   :  { %v4029_v58 = vmax.f32 %v3889_v29, %v3980_v56  ;;  %v3839_v1 = vpop.f32.mrb[158].mxu0  ;;  %5831 = vrot.lane.b32.xlu0 %v5830_v62, %s5924_s18  ;;  %5826 = vrot.lane.b32.xlu1 %v5825_v28, %s5926_s20  ;;  %v4672_v28 = vld [vmem:[%s10596_s5 + $0x98] sm:$0xff] }
 0x4c3   :  { %v3840_v51 = vadd.f32 %v10024_v6, %v3839_v1  ;;  %v3841_v3 = vpop.f32.mrb[159].mxu0 }
 0x4c4   :  { %v4159_v8 = vrot.slane %v4029_v58, 6 }
 0x4c5   :  { %v3891_v53 = vmax.f32 %v3840_v51, 0.0 }
 0x4c6   :  { %v4160_v44 = vsel %vm2498_vm9, %v4158_v0, %v4159_v8  ;;  %v3844_v34 = vpop.f32.mrb[160].mxu0  ;;  %5836 = vrot.lane.b32.xlu0 %v5835_v50, %s5933_s24  ;;  %v4655_v50 = vld [vmem:[%s10596_s5 + $0x10] sm:$0xff] }
 0x4c7   :  { %v10075_v30 = vmax.f32 %v4027_v24, %v4160_v44  ;;  %v3981_v13 = vrot.slane %v3891_v53, 1  ;;  %v3845_v29 = vadd.f32 %v10024_v6, %v3844_v34  ;;  %v3846_v43 = vpop.f32.mrb[161].mxu0 }
 0x4c8   :  { %v5855_v43 = vpack.i.bf16 %v9914_v46, %v9906_v15  ;;  %v4675_v46 = vld [vmem:[%s10596_s5 + $0xb0] sm:$0xff] }
 0x4c9   :  { %v4047_v48 = vsel %vm1275_vm2, %v3979_v16, %v3981_v13  ;;  %v10079_v27 = vmax.f32 %v3845_v29, 0.0  ;;  %v4271_v25 = vrot.slane %v10075_v30, 2  ;;  %v4350_v16 = vrot.slane %v10075_v30, 4 }
 0x4ca   :  { %v4074_v60 = vmax.f32 %v3890_v26, %v4047_v48  ;;  %v4430_v44 = vrot.slane %v10075_v30, 6  ;;  %v4673_v48 = vld [vmem:[%s10596_s5 + $0xa0] sm:$0xff] }
 0x4cb   :  { %v10082_v12 = vrot.slane %v10079_v27, 1 }
 0x4cc   :  { %v4161_v23 = vrot.slane %v4074_v60, 6  ;;  %v4674_v60 = vld [vmem:[%s10596_s5 + $0xa8] sm:$0xff] }
 0x4cd   :  { %v3983_v63 = vsel %vm1275_vm2, %v3981_v13, %v10082_v12 }
 0x4ce   :  { %v4162_v38 = vsel %vm2498_vm9, %v4159_v8, %v4161_v23  ;;  %v10087_v24 = vmax.f32 %v3891_v53, %v3983_v63  ;;  %v5401_v63 = vpack.c.bf16 %v4674_v60, %v4673_v48 }
 0x4cf   :  { %v10089_v5 = vmax.f32 %v4028_v42, %v4162_v38  ;;  %v4671_v42 = vld [vmem:[%s10596_s5 + $0x90] sm:$0xff]  ;;  %v4658_v38 = vld [vmem:[%s10596_s5 + $0x28] sm:$0xff] }
 0x4d0   :  { %v4163_v57 = vrot.slane %v10087_v24, 6  ;;  %v5397_v56 = vpack.c.bf16 %v4672_v28, %v4671_v42  ;;  %v4662_v42 = vld [vmem:[%s10596_s5 + $0x48] sm:$0xff]  ;;  %v4257_v28 = vrot.slane %v9938_v22, 2 }
 0x4d1   :  { %v4272_v10 = vrot.slane %v10089_v5, 2  ;;  %v4351_v11 = vrot.slane %v10089_v5, 4  ;;  %v4431_v37 = vrot.slane %v10089_v5, 6 }
 0x4d2   :  { %v4164_v40 = vsel %vm2498_vm9, %v4161_v23, %v4163_v57  ;;  %5398 = vmatprep.subr.bf16.mxu1 %v5397_v56  ;;  %v4657_v23 = vld [vmem:[%s10596_s5 + $0x20] sm:$0xff]  ;;  %v4676_v57 = vld [vmem:[%s10596_s5 + $0xb8] sm:$0xff]  ;;  %v4336_v56 = vrot.slane %v9938_v22, 4 }
 0x4d3   :  { %v4215_v26 = vmax.f32 %v4029_v58, %v4164_v40  ;;  %v4273_v52 = vsel %vm1520_vm3, %v4271_v25, %v4272_v10  ;;  %v4656_v58 = vld [vmem:[%s10596_s5 + $0x18] sm:$0xff]  ;;  %v4352_v51 = vsel %vm2010_vm1, %v4350_v16, %v4351_v11  ;;  %v4432_v13 = vsel %vm2498_vm9, %v4430_v44, %v4431_v37  ;;  %v4677_v25 = vld [vmem:[%s10596_s5 + $0xc0] sm:$0xff]  ;;  %v4678_v16 = vld [vmem:[%s10596_s5 + $0xc8] sm:$0xff] }
 0x4d4   :  { %v5399_v0 = vpack.c.bf16 %v4656_v58, %v4655_v50  ;;  %v5403_v40 = vpack.c.bf16 %v4658_v38, %v4657_v23 }
 0x4d5   :  { %v5840_v54 = vpack.i.bf16 %v4215_v26, %v10089_v5  ;;  %v4274_v36 = vrot.slane %v4215_v26, 2  ;;  %v4353_v2 = vrot.slane %v4215_v26, 4  ;;  %v4433_v62 = vrot.slane %v4215_v26, 6  ;;  %v4659_v26 = vld [vmem:[%s10596_s5 + $0x30] sm:$0xff] }
 0x4d6   :  { %5400 = vmatpush3.bf16.msra.mxu1 %v5399_v0 }
 0x4d7   :  { %5841 = vrot.lane.b32.xlu0 %v5840_v54, %s5932_s21  ;;  %v4275_v1 = vsel %vm1520_vm3, %v4272_v10, %v4274_v36  ;;  %v4354_v3 = vsel %vm2010_vm1, %v4351_v11, %v4353_v2  ;;  %v4434_v34 = vsel %vm2498_vm9, %v4431_v37, %v4433_v62  ;;  %v5405_v10 = vpack.c.bf16 %v4676_v57, %v4675_v46  ;;  %v4660_v11 = vld [vmem:[%s10596_s5 + $0x38] sm:$0xff]  ;;  %v4661_v62 = vld [vmem:[%s10596_s5 + $0x40] sm:$0xff] }
 0x4d8   :  { %v5845_v8 = vpack.i.bf16 %v4275_v1, %v4273_v52  ;;  %v5850_v53 = vpack.i.bf16 %v4354_v3, %v4352_v51  ;;  %v5860_v29 = vpack.i.bf16 %v4434_v34, %v4432_v13  ;;  %5402 = vmatprep.subr.bf16.mxu1 %v5401_v63  ;;  %v4258_v54 = vrot.slane %v9943_v21, 2  ;;  %v10173_v1 = vpop.permute.xlu1 %5771  ;;  %v10175_v51 = vpop.permute.xlu0 %5781 }
 0x4d9   :  { %v5407_v36 = vpack.c.bf16 %v4660_v11, %v4659_v26  ;;  %v5409_v2 = vpack.c.bf16 %v4678_v16, %v4677_v25  ;;  %v4337_v37 = vrot.slane %v9943_v21, 4 }
 0x4da   :  { %5846 = vrot.lane.b32.xlu1 %v5845_v8, %s5926_s20  ;;  %5404 = vmatpush3.bf16.msra.mxu1 %v5403_v40  ;;  %v4259_v52 = vsel %vm1520_vm3, %v4257_v28, %v4258_v54 }
 0x4db   :  { %5851 = vrot.lane.b32.xlu0 %v5850_v53, %s5924_s18  ;;  %5406 = vmatprep.subr.bf16.mxu1 %v5405_v10  ;;  %v4338_v50 = vsel %vm2010_vm1, %v4336_v56, %v4337_v37 }
 0x4dc   :  { %v10178_v0 = vpop.permute.xlu0 %5791  ;;  %v5777_v8 = vpop.permute.xlu1 %5776 }
 0x4dd   :  { %v5794_v19 = vunpack.i.h.bf16 %v10178_v0 }
 0x4de   :  { %5861 = vrot.lane.b32.xlu1 %v5860_v29, %s5933_s24  ;;  %5408 = vmatpush3.bf16.msra.mxu1 %v5407_v36  ;;  %v5778_v36 = vunpack.i.l.bf16 %v5777_v8 }
 0x4df   :  { %5856 = vrot.lane.b32.xlu0 %v5855_v43, %s5932_s21  ;;  %5410 = vmatprep.subr.bf16.mxu1 %v5409_v2 }
 0x4e0   :  { %v10182_v29 = vpop.permute.xlu1 %5786 }
 0x4e2   :  { %4500 = vrot.lane.b32.xlu1 %v10045_v55, %s5932_s21  ;;  %v5411_v55 = vpack.c.bf16 %v4662_v42, %v4661_v62  ;;  %v4031_v62 = vmax.f32 %v10079_v27, %v10082_v12 }
 0x4e3   :  { %4486 = vrot.lane.b32.xlu0 %v9888_v45, %s5932_s21 }
 0x4e4   :  { %5412 = vmatpush3.bf16.msra.mxu1 %v5411_v55  ;;  %v10187_v38 = vpop.permute.xlu1 %5796 }
 0x4e5   :  { %v5798_v31 = vunpack.i.l.bf16 %v10187_v38 }
 0x4e6   :  { %4289 = vrot.lane.b32.xlu1 %v4259_v52, %s5926_s20 }
 0x4e8   :  { %v10191_v2 = vpop.permute.xlu1 %5801 }
 0x4ea   :  { %4370 = vrot.lane.b32.xlu1 %v4338_v50, %s5924_s18 }
 0x50e   :  { %v3849_v58 = vpop.f32.mrb[162].mxu0 }
 0x50f   :  { %v3851_v45 = vpop.f32.mrb[163].mxu0  ;;  %v3850_v3 = vadd.f32 %v10024_v6, %v3849_v58 }
 0x510   :  { %v4416_v45 = vrot.slane %v9938_v22, 6 }
 0x511   :  { %v3893_v53 = vmax.f32 %v3850_v3, 0.0  ;;  %v10180_v44 = vpop.permute.xlu0 %5806  ;;  %v4417_v3 = vrot.slane %v9943_v21, 6 }
 0x513   :  { %v4048_v34 = vrot.slane %v3893_v53, 1 }
 0x515   :  { %v4049_v60 = vsel %vm1275_vm2, %v10082_v12, %v4048_v34  ;;  %v5812_v63 = vpop.permute.xlu0 %5811 }
 0x516   :  { %v4075_v57 = vmax.f32 %v10079_v27, %v4049_v60  ;;  %v5814_v42 = vunpack.i.h.bf16 %v5812_v63  ;;  %v5813_v28 = vunpack.i.l.bf16 %v5812_v63  ;;  %v5822_v27 = vpop.permute.xlu1 %5821 }
 0x518   :  { %v4165_v25 = vrot.slane %v4075_v57, 6 }
 0x519   :  { %v5817_v16 = vpop.permute.xlu0 %5816 }
 0x51a   :  { %v5819_v55 = vunpack.i.h.bf16 %v5817_v16  ;;  %v5818_v56 = vunpack.i.l.bf16 %v5817_v16  ;;  %v5809_v16 = vunpack.i.h.bf16 %v10180_v44 }
 0x51e   :  { %v3854_v13 = vpop.f32.mrb[164].mxu0 }
 0x51f   :  { %v3855_v43 = vadd.f32 %v10024_v6, %v3854_v13  ;;  %v3856_v48 = vpop.f32.mrb[165].mxu0  ;;  %v5779_v6 = vunpack.i.h.bf16 %v5777_v8  ;;  %v5789_v13 = vunpack.i.h.bf16 %v10182_v29 }
 0x520   :  { %v4530_v48 = vsel %vm2305_vm6, %v9994_v20, %v5813_v28  ;;  %v5774_v28 = vunpack.i.h.bf16 %v10173_v1 }
 0x521   :  { %v3894_v23 = vmax.f32 %v3855_v43, 0.0  ;;  %v4524_v8 = vsel %vm2305_vm6, %v9845_v18, %v5779_v6  ;;  %v4531_v43 = vsel %vm2305_vm6, %v9998_v61, %v5814_v42  ;;  %v5788_v18 = vunpack.i.l.bf16 %v10182_v29  ;;  %v4680_v42 = vld [vmem:[%s10596_s5 + $0xd8] sm:$0xff] }
 0x522   :  { %v4544_v60 = vsel %vm2405_vm8, %v4530_v48, %v5818_v56  ;;  %v5784_v61 = vunpack.i.h.bf16 %v10175_v51  ;;  %v4664_v56 = vld [vmem:[%s10596_s5 + $0x58] sm:$0xff]  ;;  %v5799_v48 = vunpack.i.h.bf16 %v10187_v38 }
 0x523   :  { %v4050_v46 = vrot.slane %v3894_v23, 1 }
 0x525   :  { %v4051_v40 = vsel %vm1275_vm2, %v4048_v34, %v4050_v46  ;;  %v4077_v10 = vmax.f32 %v3894_v23, %v4050_v46  ;;  %v4545_v23 = vsel %vm2405_vm8, %v4531_v43, %v5819_v55  ;;  %v5824_v46 = vunpack.i.h.bf16 %v5822_v27 }
 0x526   :  { %v4076_v26 = vmax.f32 %v3893_v53, %v4051_v40  ;;  %v4340_v43 = vrot.slane %v9963_v7, 4  ;;  %v4320_v7 = vrot.slane %v9781_v35, 4 }
 0x527   :  { %v4168_v11 = vrot.slane %v4077_v10, 6  ;;  %v5783_v10 = vunpack.i.l.bf16 %v10175_v51  ;;  %v4560_v29 = vsel %vm4550_vm13, %v4545_v23, %v5824_v46  ;;  %v4527_v23 = vsel %vm2305_vm6, %v9906_v15, %v5794_v19 }
 0x528   :  { %v4166_v54 = vrot.slane %v4076_v26, 6  ;;  %v4418_v26 = vsel %vm2498_vm9, %v4416_v45, %v4417_v3  ;;  %v4575_v55 = vsel %vm4565_vm14, %v4560_v29, %v5809_v16  ;;  %v4541_v15 = vsel %vm2405_vm8, %v4527_v23, %v5799_v48 }
 0x52a   :  { %v4167_v52 = vsel %vm2498_vm9, %v4165_v25, %v4166_v54  ;;  %v4169_v37 = vsel %vm2498_vm9, %v4166_v54, %v4168_v11  ;;  %v4538_v25 = vsel %vm2405_vm8, %v4524_v8, %v5784_v61  ;;  %v5808_v54 = vunpack.i.l.bf16 %v10180_v44  ;;  %v4663_v44 = vld [vmem:[%s10596_s5 + $0x50] sm:$0xff] }
 0x52b   :  { %v10198_v50 = vmax.f32 %v10087_v24, %v4167_v52  ;;  %v4217_v58 = vmax.f32 %v4031_v62, %v4169_v37  ;;  %v4523_v24 = vsel %vm2305_vm6, %v9840_v47, %v5778_v36  ;;  %v5823_v47 = vunpack.i.l.bf16 %v5822_v27  ;;  %v4679_v62 = vld [vmem:[%s10596_s5 + $0xd0] sm:$0xff] }
 0x52c   :  { %v4537_v11 = vsel %vm2405_vm8, %v4523_v24, %v5783_v10  ;;  %v4553_v6 = vsel %vm4550_vm13, %v4538_v25, %v5789_v13  ;;  %v5773_v52 = vunpack.i.l.bf16 %v10173_v1  ;;  %v5415_v45 = vpack.c.bf16 %v4664_v56, %v4663_v44 }
 0x52d   :  { %4506 = vrot.lane.b32.xlu0 %v4217_v58, %s5932_s21  ;;  %v4276_v12 = vrot.slane %v10198_v50, 2  ;;  %v4355_v53 = vrot.slane %v10198_v50, 4  ;;  %v4356_v34 = vrot.slane %v4217_v58, 4  ;;  %v4435_v57 = vrot.slane %v10198_v50, 6 }
 0x52e   :  { %v4436_v40 = vrot.slane %v4217_v58, 6  ;;  %v4559_v20 = vsel %vm4550_vm13, %v4544_v60, %v5823_v47  ;;  %v4552_v51 = vsel %vm4550_vm13, %v4537_v11, %v5788_v18  ;;  %v5413_v58 = vpack.c.bf16 %v4680_v42, %v4679_v62 }
 0x52f   :  { %4303 = vrot.lane.b32.xlu1 %v4276_v12, %s5926_s20  ;;  %v4357_v63 = vsel %vm2010_vm1, %v4355_v53, %v4356_v34  ;;  %v4574_v37 = vsel %vm4565_vm14, %v4559_v20, %v5808_v54  ;;  %v4567_v3 = vsel %vm4565_vm14, %v4552_v51, %v5773_v52  ;;  %v4568_v8 = vsel %vm4565_vm14, %v4553_v6, %v5774_v28  ;;  %v4681_v6 = vld [vmem:[%s10596_s5 + $0xe0] sm:$0xff]  ;;  %v4666_v28 = vld [vmem:[%s10596_s5 + $0x68] sm:$0xff] }
 0x530   :  { %v4437_v36 = vsel %vm2498_vm9, %v4435_v57, %v4436_v40  ;;  %v4587_v1 = vrot.slane %v4574_v37, 4  ;;  %v4588_v27 = vrot.slane %v4575_v55, 4  ;;  %5414 = vmatprep.subr.bf16.mxu1 %v5413_v58  ;;  %v4584_v12 = vrot.slane %v4567_v3, 4  ;;  %v4684_v3 = vld [vmem:[%s10596_s5 + $0xf8] sm:$0xff] }
 0x531   :  { %4384 = vrot.lane.b32.xlu0 %v4357_v63, %s5924_s18  ;;  %5416 = vmatpush3.bf16.msra.mxu1 %v5415_v45  ;;  %v4585_v53 = vrot.slane %v4568_v8, 4  ;;  %v5803_v18 = vunpack.i.l.bf16 %v10191_v2  ;;  %v5804_v63 = vunpack.i.h.bf16 %v10191_v2  ;;  %v4321_v61 = vrot.slane %v9810_v49, 4  ;;  %v4683_v45 = vld [vmem:[%s10596_s5 + $0xf0] sm:$0xff] }
 0x532   :  { %v4589_v34 = vsel %vm2010_vm1, %v4587_v1, %v4588_v27  ;;  %v4667_v8 = vld [vmem:[%s10596_s5 + $0x70] sm:$0xff] }
 0x533   :  { %4450 = vrot.lane.b32.xlu1 %v4418_v26, %s5933_s24  ;;  %v4586_v9 = vsel %vm2010_vm1, %v4584_v12, %v4585_v53  ;;  %v4556_v26 = vsel %vm4550_vm13, %v4541_v15, %v5804_v63  ;;  %v5421_v53 = vpack.c.bf16 %v4684_v3, %v4683_v45  ;;  %v4322_v63 = vsel %vm2010_vm1, %v4320_v7, %v4321_v61 }
 0x534   :  { %v10269_v33 = vpop.permute.xlu0 %5831  ;;  %v5827_v24 = vpop.permute.xlu1 %5826  ;;  %v11195_v15 = vmov 0.0|0.0  }
 0x535   :  { %4464 = vrot.lane.b32.xlu0 %v4437_v36, %s5933_s24  ;;  %v5833_v46 = vunpack.i.l.bf16 %v10269_v33  ;;  %v5829_v47 = vunpack.i.h.bf16 %v5827_v24  ;;  %v5834_v11 = vunpack.i.h.bf16 %v10269_v33  ;;  %v4682_v36 = vld [vmem:[%s10596_s5 + $0xe8] sm:$0xff] }
 0x536   :  { %v5417_v44 = vpack.c.bf16 %v4682_v36, %v4681_v6 }
 0x537   :  { %5866 = vrot.lane.b32.xlu1 %v5865_v4, %s5926_s20  ;;  %v5793_v4 = vunpack.i.l.bf16 %v10178_v0  ;;  %v4339_v0 = vrot.slane %v9957_v14, 4 }
 0x538   :  { %v10273_v13 = vpop.permute.xlu0 %5836  ;;  %5418 = vmatprep.subr.bf16.mxu1 %v5417_v44 }
 0x539   :  { %4492 = vrot.lane.b32.xlu0 %v9943_v21, %s5932_s21  ;;  %v5885_v21 = vpack.i.bf16 %v4586_v9, %v4589_v34  ;;  %v4341_v40 = vsel %vm2010_vm1, %v4339_v0, %v4340_v43  ;;  %v5839_v62 = vunpack.i.h.bf16 %v10273_v13  ;;  %v4668_v34 = vld [vmem:[%s10596_s5 + $0x78] sm:$0xff] }
 0x53b   :  { %5871 = vrot.lane.b32.xlu1 %v5870_v41, %s5933_s24  ;;  %v5828_v41 = vunpack.i.l.bf16 %v5827_v24 }
 0x53d   :  { %5881 = vrot.lane.b32.xlu0 %v5880_v39, %s5932_s21  ;;  %v4526_v39 = vsel %vm2305_vm6, %v9900_v59, %v5793_v4  ;;  %v4532_v38 = vsel %vm2305_vm6, %v10031_v32, %v5828_v41  ;;  %v4525_v32 = vsel %vm2305_vm6, %v9881_v17, %v5829_v47  ;;  %v4665_v17 = vld [vmem:[%s10596_s5 + $0x60] sm:$0xff]  ;;  %v5423_v4 = vpack.c.bf16 %v4668_v34, %v4667_v8 }
 0x53e   :  { %v4540_v59 = vsel %vm2405_vm8, %v4526_v39, %v5798_v31  ;;  %v4546_v51 = vsel %vm2405_vm8, %v4532_v38, %v5833_v46  ;;  %v5419_v58 = vpack.c.bf16 %v4666_v28, %v4665_v17  ;;  %v4539_v41 = vsel %vm2405_vm8, %v4525_v32, %v5834_v11 }
 0x53f   :  { %v4555_v2 = vsel %vm4550_vm13, %v4540_v59, %v5803_v18  ;;  %v4554_v48 = vsel %vm4550_vm13, %v4539_v41, %v5839_v62 }
 0x540   :  { %5420 = vmatpush3.bf16.msra.mxu1 %v5419_v58 }
 0x541   :  { %5886 = vrot.lane.b32.xlu0 %v5885_v21, %s5929_s25  ;;  %5422 = vmatprep.subr.bf16.mxu1 %v5421_v53 }
 0x544   :  { %5424 = vmatpush3.bf16.msra.mxu1 %v5423_v4 }
 0x545   :  { %5425 = vmatprep.subr.bf16.mxu1 %v11195_v15 }
 0x549   :  { %v10282_v60 = vpop.permute.xlu0 %5841 }
 0x54a   :  { %v5843_v9 = vunpack.i.l.bf16 %v10282_v60 }
 0x54c   :  { %v5847_v57 = vpop.permute.xlu1 %5846 }
 0x54d   :  { %v5849_v10 = vunpack.i.h.bf16 %v5847_v57  ;;  %v5848_v20 = vunpack.i.l.bf16 %v5847_v57  ;;  %v5852_v29 = vpop.permute.xlu0 %5851 }
 0x54e   :  { %v5854_v25 = vunpack.i.h.bf16 %v5852_v29  ;;  %v5853_v16 = vunpack.i.l.bf16 %v5852_v29 }
 0x54f   :  { %v4534_v54 = vsel %vm2305_vm6, %v10089_v5, %v5849_v10  ;;  %v4533_v49 = vsel %vm2305_vm6, %v10075_v30, %v5848_v20  ;;  %v5838_v5 = vunpack.i.l.bf16 %v10273_v13  ;;  %v5844_v30 = vunpack.i.h.bf16 %v10282_v60 }
 0x550   :  { %v5862_v42 = vpop.permute.xlu1 %5861  ;;  %v4547_v52 = vsel %vm2405_vm8, %v4533_v49, %v5853_v16  ;;  %v4548_v1 = vsel %vm2405_vm8, %v4534_v54, %v5854_v25 }
 0x551   :  { %v5864_v37 = vunpack.i.h.bf16 %v5862_v42  ;;  %v5863_v55 = vunpack.i.l.bf16 %v5862_v42  ;;  %v5857_v56 = vpop.permute.xlu0 %5856  ;;  %v4561_v31 = vsel %vm4550_vm13, %v4546_v51, %v5838_v5 }
 0x552   :  { %v5859_v27 = vunpack.i.h.bf16 %v5857_v56  ;;  %v5858_v12 = vunpack.i.l.bf16 %v5857_v56 }
 0x553   :  { %v4562_v33 = vsel %vm4550_vm13, %v4547_v52, %v5863_v55  ;;  %v4563_v21 = vsel %vm4550_vm13, %v4548_v1, %v5864_v37 }
 0x554   :  { %v4570_v24 = vsel %vm4565_vm14, %v4555_v2, %v5858_v12  ;;  %v4571_v13 = vsel %vm4565_vm14, %v4556_v26, %v5859_v27  ;;  %v4501_v19 = vpop.permute.xlu1 %4500  ;;  %v4577_v18 = vsel %vm4565_vm14, %v4562_v33, %v5843_v9  ;;  %v4578_v60 = vsel %vm4565_vm14, %v4563_v21, %v5844_v30 }
 0x555   :  { %v4576_v43 = vsel %vm4565_vm14, %v4561_v31, %v4501_v19  ;;  %v4487_v39 = vpop.permute.xlu0 %4486  ;;  %v4608_v46 = vrot.slane %v4570_v24, 4  ;;  %v4609_v47 = vrot.slane %v4571_v13, 4  ;;  %v4611_v38 = vrot.slane %v4577_v18, 4  ;;  %v4685_v19 = vld [vmem:[%s10596_s5 + $0x100] sm:$0xff]  ;;  %v4686_v31 = vld [vmem:[%s10596_s5 + $0x108] sm:$0xff] }
 0x556   :  { %v5890_v23 = vpack.i.bf16 %v4576_v43, %v4341_v40  ;;  %v4569_v0 = vsel %vm4565_vm14, %v4554_v48, %v4487_v39  ;;  %v4612_v57 = vrot.slane %v4578_v60, 4 }
 0x557   :  { %v5875_v59 = vpack.i.bf16 %v4569_v0, %v4322_v63  ;;  %v4610_v2 = vsel %vm2010_vm1, %v4608_v46, %v4609_v47  ;;  %v5426_v63 = vpack.c.bf16 %v4686_v31, %v4685_v19  ;;  %v4687_v47 = vld [vmem:[%s10596_s5 + $0x110] sm:$0xff]  ;;  %v4867_v19 = vld [vmem:[%s10598_s7 + $0x68] sm:$0xff] }
 0x558   :  { %5891 = vrot.lane.b32.xlu0 %v5890_v23, %s5924_s18  ;;  %v4613_v7 = vsel %vm2010_vm1, %v4611_v38, %v4612_v57  ;;  %v4290_v40 = vpop.permute.xlu1 %4289  ;;  %v4689_v57 = vld [vmem:[%s10596_s5 + $0x120] sm:$0xff]  ;;  %vm5935_vm1 = vmmov 0  }
 0x559   :  { %5876 = vrot.lane.b32.xlu1 %v5875_v59, %s5924_s18  ;;  %v4528_v54 = vsel %vm2305_vm6, %v9938_v22, %v4290_v40  ;;  %v4688_v59 = vld [vmem:[%s10596_s5 + $0x118] sm:$0xff]  ;;  %v4691_v40 = vld [vmem:[%s10596_s5 + $0x130] sm:$0xff] }
 0x55a   :  { %v5429_v38 = vpack.c.bf16 %v4688_v59, %v4687_v47  ;;  %v4949_v47 = vld [vmem:[%s10600_s9 + $0x8] sm:$0xff] }
 0x55c   :  { %4614 = vrot.lane.b32.xlu0 %v4610_v2, %s5934_s23  ;;  %v4371_v61 = vpop.permute.xlu1 %4370  ;;  %v4690_v2 = vld [vmem:[%s10596_s5 + $0x128] sm:$0xff] }
 0x55d   :  { %4616 = vrot.lane.b32.xlu1 %v4613_v7, %s5934_s23  ;;  %v4542_v51 = vsel %vm2405_vm8, %v4528_v54, %v4371_v61  ;;  %v5432_v7 = vpack.c.bf16 %v4690_v2, %v4689_v57  ;;  %v4692_v61 = vld [vmem:[%s10596_s5 + $0x138] sm:$0xff]  ;;  %v4698_v54 = vld [vmem:[%s10596_s5 + $0x168] sm:$0xff] }
 0x59f   :  { %v4507_v10 = vpop.permute.xlu0 %4506 }
 0x5a1   :  { %v4304_v20 = vpop.permute.xlu1 %4303 }
 0x5a2   :  { %v4535_v26 = vsel %vm2305_vm6, %v10198_v50, %v4304_v20  ;;  %v4693_v20 = vld [vmem:[%s10596_s5 + $0x140] sm:$0xff] }
 0x5a3   :  { %v4385_v29 = vpop.permute.xlu0 %4384 }
 0x5a4   :  { %v4549_v11 = vsel %vm2405_vm8, %v4535_v26, %v4385_v29  ;;  %v4694_v29 = vld [vmem:[%s10596_s5 + $0x148] sm:$0xff] }
 0x5a5   :  { %v4451_v16 = vpop.permute.xlu1 %4450  ;;  %v5438_v26 = vpack.c.bf16 %v4694_v29, %v4693_v20  ;;  %v4952_v20 = vld [vmem:[%s10600_s9 + $0x20] sm:$0xff]  ;;  %v4953_v29 = vld [vmem:[%s10600_s9 + $0x28] sm:$0xff] }
 0x5a6   :  { %v4557_v6 = vsel %vm4550_vm13, %v4542_v51, %v4451_v16  ;;  %v4699_v51 = vld [vmem:[%s10596_s5 + $0x170] sm:$0xff] }
 0x5a7   :  { %v4465_v25 = vpop.permute.xlu0 %4464 }
 0x5a8   :  { %v4564_v32 = vsel %vm4550_vm13, %v4549_v11, %v4465_v25  ;;  %v4695_v11 = vld [vmem:[%s10596_s5 + $0x150] sm:$0xff]  ;;  %v4696_v25 = vld [vmem:[%s10596_s5 + $0x158] sm:$0xff] }
 0x5a9   :  { %v4579_v49 = vsel %vm4565_vm14, %v4564_v32, %v4507_v10  ;;  %v5867_v62 = vpop.permute.xlu1 %5866  ;;  %v5435_v10 = vpack.c.bf16 %v4692_v61, %v4691_v40  ;;  %v5441_v16 = vpack.c.bf16 %v4696_v25, %v4695_v11  ;;  %v4697_v32 = vld [vmem:[%s10596_s5 + $0x160] sm:$0xff]  ;;  %v4950_v40 = vld [vmem:[%s10600_s9 + $0x10] sm:$0xff]  ;;  %v4951_v61 = vld [vmem:[%s10600_s9 + $0x18] sm:$0xff] }
 0x5aa   :  { %4624 = vrot.lane.b32.xlu1 %v4579_v49, %s5932_s21  ;;  %v5869_v30 = vunpack.i.h.bf16 %v5867_v62  ;;  %v5868_v42 = vunpack.i.l.bf16 %v5867_v62  ;;  %v5444_v49 = vpack.c.bf16 %v4698_v54, %v4697_v32  ;;  %v4954_v11 = vld [vmem:[%s10600_s9 + $0x30] sm:$0xff]  ;;  %v4955_v25 = vld [vmem:[%s10600_s9 + $0x38] sm:$0xff]  ;;  %v4956_v32 = vld [vmem:[%s10600_s9 + $0x40] sm:$0xff] }
 0x5ab   :  { %v4493_v36 = vpop.permute.xlu0 %4492  ;;  %v4957_v54 = vld [vmem:[%s10600_s9 + $0x48] sm:$0xff] }
 0x5ac   :  { %v4572_v50 = vsel %vm4565_vm14, %v4557_v6, %v4493_v36  ;;  %v4522_v28 = vsel %vm2305_vm6, %v9781_v35, %v5869_v30  ;;  %v4529_v52 = vsel %vm2305_vm6, %v9957_v14, %v5868_v42  ;;  %v4700_v6 = vld [vmem:[%s10596_s5 + $0x178] sm:$0xff] }
 0x5ad   :  { %4622 = vrot.lane.b32.xlu0 %v4572_v50, %s5932_s21  ;;  %v5872_v44 = vpop.permute.xlu1 %5871  ;;  %v5447_v36 = vpack.c.bf16 %v4700_v6, %v4699_v51  ;;  %v4701_v50 = vld [vmem:[%s10596_s5 + $0x180] sm:$0xff]  ;;  %v4958_v51 = vld [vmem:[%s10600_s9 + $0x50] sm:$0xff]  ;;  %v4959_v6 = vld [vmem:[%s10600_s9 + $0x58] sm:$0xff] }
 0x5ae   :  { %v5874_v58 = vunpack.i.h.bf16 %v5872_v44  ;;  %v5873_v45 = vunpack.i.l.bf16 %v5872_v44 }
 0x5af   :  { %v5882_v17 = vpop.permute.xlu0 %5881 }
 0x5b0   :  { %v5883_v1 = vunpack.i.l.bf16 %v5882_v17  ;;  %v5884_v34 = vunpack.i.h.bf16 %v5882_v17  ;;  %v4702_v17 = vld [vmem:[%s10596_s5 + $0x188] sm:$0xff] }
 0x5b1   :  { %v5450_v62 = vpack.c.bf16 %v4702_v17, %v4701_v50  ;;  %v4960_v50 = vld [vmem:[%s10600_s9 + $0x60] sm:$0xff]  ;;  %v4961_v17 = vld [vmem:[%s10600_s9 + $0x68] sm:$0xff] }
 0x5b3   :  { %v5887_v5 = vpop.permute.xlu0 %5886 }
 0x5b4   :  { %v5889_v27 = vunpack.i.h.bf16 %v5887_v5  ;;  %v5888_v12 = vunpack.i.l.bf16 %v5887_v5 }
 0x5ca   :  { %v5892_v22 = vpop.permute.xlu0 %5891 }
 0x5cb   :  { %v5894_v37 = vunpack.i.h.bf16 %v5892_v22  ;;  %v5893_v55 = vunpack.i.l.bf16 %v5892_v22  ;;  %v5877_v56 = vpop.permute.xlu1 %5876 }
 0x5cc   :  { %v5879_v3 = vunpack.i.h.bf16 %v5877_v56  ;;  %v5878_v8 = vunpack.i.l.bf16 %v5877_v56  ;;  %v4855_v56 = vld [vmem:[%s10598_s7 + $0x8] sm:$0xff] }
 0x5cd   :  { %v4543_v53 = vsel %vm2405_vm8, %v4529_v52, %v5893_v55  ;;  %v4631_v24 = vsel %vm2405_vm8, %v5888_v12, %v5894_v37  ;;  %v4854_v55 = vld [vmem:[%s10598_s7] sm:$0xff] }
 0x5ce   :  { %v4558_v9 = vsel %vm4550_vm13, %v4543_v53, %v5873_v45  ;;  %v4536_v35 = vsel %vm2405_vm8, %v4522_v28, %v5878_v8  ;;  %v10374_v21 = vpop.permute.xlu0 %4614  ;;  %v4630_v4 = vsel %vm2405_vm8, %v5889_v27, %v5879_v3  ;;  %v5453_v45 = vpack.c.bf16 %v4855_v56, %v4854_v55  ;;  %v4857_v3 = vld [vmem:[%s10598_s7 + $0x18] sm:$0xff]  ;;  %v4860_v53 = vld [vmem:[%s10598_s7 + $0x30] sm:$0xff] }
 0x5cf   :  { %v4573_v33 = vsel %vm4565_vm14, %v4558_v9, %v5883_v1  ;;  %v4551_v14 = vsel %vm4550_vm13, %v4536_v35, %v5874_v58  ;;  %v4617_v13 = vpop.permute.xlu1 %4616  ;;  %v4633_v23 = vsel %vm4632_vm15, %v4630_v4, %v10374_v21  ;;  %v4856_v58 = vld [vmem:[%s10598_s7 + $0x10] sm:$0xff]  ;;  %v4858_v1 = vld [vmem:[%s10598_s7 + $0x20] sm:$0xff]  ;;  %v4865_v4 = vld [vmem:[%s10598_s7 + $0x58] sm:$0xff] }
 0x5d0   :  { %v4634_v41 = vsel %vm4632_vm15, %v4631_v24, %v4617_v13  ;;  %v4566_v43 = vsel %vm4565_vm14, %v4551_v14, %v5884_v34  ;;  %v4629_v39 = vsel %vm3301_vm10, %v4573_v33, %v5888_v12  ;;  %v5456_v8 = vpack.c.bf16 %v4857_v3, %v4856_v58  ;;  %v4861_v34 = vld [vmem:[%s10598_s7 + $0x38] sm:$0xff]  ;;  %v4862_v35 = vld [vmem:[%s10598_s7 + $0x40] sm:$0xff]  ;;  %v4863_v33 = vld [vmem:[%s10598_s7 + $0x48] sm:$0xff] }
 0x5d1   :  { %v4641_v48 = vrot.slane %v4634_v41, 3  ;;  %v4628_v18 = vsel %vm3301_vm10, %v4566_v43, %v5889_v27  ;;  %v4640_v60 = vrot.slane %v4629_v39, 3  ;;  %v4859_v27 = vld [vmem:[%s10598_s7 + $0x28] sm:$0xff]  ;;  %v5462_v9 = vpack.c.bf16 %v4861_v34, %v4860_v53  ;;  %v4868_v41 = vld [vmem:[%s10598_s7 + $0x70] sm:$0xff]  ;;  %v4869_v43 = vld [vmem:[%s10598_s7 + $0x78] sm:$0xff] }
 0x5d2   :  { %v5459_v12 = vpack.c.bf16 %v4859_v27, %v4858_v1  ;;  %v5465_v14 = vpack.c.bf16 %v4863_v33, %v4862_v35  ;;  %v5474_v39 = vpack.c.bf16 %v4869_v43, %v4868_v41 }
 0x5d3   :  { %v4650_v0 = vsel %vm4648_vm0, %v4633_v23, %v4641_v48  ;;  %v4649_v46 = vsel %vm4648_vm0, %v4628_v18, %v4640_v60  ;;  %v11196_v48 = vmov 0.0  }
 0x5d4   :  { %4777 = vmatprep.mubr.f32.mxu1 %v4650_v0 }
 0x5d5   :  { %4778 = vmatmul.mubr.f32.vlgmr.msra.gmra.mrb[114].mxu1 %v4649_v46  ;;  %v4948_v46 = vld [vmem:[%s10600_s9] sm:$0xff] }
 0x5d6   :  { %5427 = vmatpush1.bf16.msra.mxu1 %v5426_v63  ;;  %v5198_v63 = vld [vmem:[%s10597_s6] ss:$0 sm:$0xff]  ;;  %v5477_v2 = vpack.c.bf16 %v4949_v47, %v4948_v46 }
 0x5d7   :  { %5428 = vmatprep.subr.bf16.mxu1 %v11195_v15 }
 0x5da   :  { %5430 = vmatpush1.bf16.msra.mxu1 %v5429_v38 }
 0x5db   :  { %5431 = vmatprep.subr.bf16.mxu1 %v11195_v15 }
 0x5de   :  { %5433 = vmatpush1.bf16.msra.mxu1 %v5432_v7 }
 0x5df   :  { %5434 = vmatprep.subr.bf16.mxu1 %v11195_v15 }
 0x5e2   :  { %5436 = vmatpush1.bf16.msra.mxu1 %v5435_v10  ;;  %v5480_v10 = vpack.c.bf16 %v4951_v61, %v4950_v40 }
 0x5e3   :  { %5437 = vmatprep.subr.bf16.mxu1 %v11195_v15 }
 0x5e6   :  { %5439 = vmatpush1.bf16.msra.mxu1 %v5438_v26  ;;  %v5483_v26 = vpack.c.bf16 %v4953_v29, %v4952_v20 }
 0x5e7   :  { %5440 = vmatprep.subr.bf16.mxu1 %v11195_v15 }
 0x5ea   :  { %5442 = vmatpush1.bf16.msra.mxu1 %v5441_v16  ;;  %v5486_v16 = vpack.c.bf16 %v4955_v25, %v4954_v11 }
 0x5eb   :  { %5443 = vmatprep.subr.bf16.mxu1 %v11195_v15 }
 0x5ee   :  { %5445 = vmatpush1.bf16.msra.mxu1 %v5444_v49  ;;  %v5489_v49 = vpack.c.bf16 %v4957_v54, %v4956_v32 }
 0x5ef   :  { %5446 = vmatprep.subr.bf16.mxu1 %v11195_v15 }
 0x5f2   :  { %5448 = vmatpush1.bf16.msra.mxu1 %v5447_v36  ;;  %v5492_v36 = vpack.c.bf16 %v4959_v6, %v4958_v51 }
 0x5f3   :  { %5449 = vmatprep.subr.bf16.mxu1 %v11195_v15 }
 0x5f6   :  { %5451 = vmatpush1.bf16.msra.mxu1 %v5450_v62  ;;  %v5495_v62 = vpack.c.bf16 %v4961_v17, %v4960_v50 }
 0x5f7   :  { %5452 = vmatprep.subr.bf16.mxu1 %v11195_v15 }
 0x61c   :  { %v4625_v5 = vpop.permute.xlu1 %4624 }
 0x61d   :  { %v4636_v30 = vsel %vm4565_vm14, %v4617_v13, %v4625_v5  ;;  %v4643_v42 = vrot.slane %v4625_v5, 3  ;;  %v4866_v13 = vld [vmem:[%s10598_s7 + $0x60] sm:$0xff]  ;;  %v4962_v5 = vld [vmem:[%s10600_s9 + $0x70] sm:$0xff] }
 0x61e   :  { %v4642_v44 = vrot.slane %v4636_v30, 3  ;;  %v5471_v31 = vpack.c.bf16 %v4867_v19, %v4866_v13  ;;  %v4963_v30 = vld [vmem:[%s10600_s9 + $0x78] sm:$0xff]  ;;  %s5899_s9 = scalar_lea.vmem %s5049_s28, 32 }
 0x61f   :  { %v4623_v22 = vpop.permute.xlu0 %4622  ;;  %p5900_p0 = scmp.ne.s32.totalorder %s5049_s28, %s5899_s9  ;;  %p5905_p2 = scmp.lt.s32.totalorder %s5899_s9, %s5899_s9 }
 0x620   :  { %v4635_v28 = vsel %vm4565_vm14, %v10374_v21, %v4623_v22  ;;  %v4652_v52 = vsel %vm4648_vm0, %v4623_v22, %v4643_v42  ;;  %v4864_v21 = vld [vmem:[%s10598_s7 + $0x50] sm:$0xff]  ;;  %v5498_v42 = vpack.c.bf16 %v4963_v30, %v4962_v5 }
 0x621   :  { %5199 = vmatprep.mubr.msk.f32.mxu1 %vm2305_vm6, %v4652_v52  ;;  %v4651_v37 = vsel %vm4648_vm0, %v4635_v28, %v4642_v44  ;;  %v5468_v24 = vpack.c.bf16 %v4865_v4, %v4864_v21  ;;  %v5200_v44 = vld [vmem:[%s10599_s8] ss:$0 sm:$0xff]  ;;  %p5906_p3 = por %p5905_p2, %p5904_p1 }
 0x622   :  { %4848 = vmatmul.mubr.f32.vlgmr.msra.gmra.mrb[116].mxu1 %v4651_v37 }
 0x623   :  { %5454 = vmatpush3.bf16.msra.mxu1 %v5453_v45  ;;  %5303 = vmatprep.mubr.msk.f32.mxu1 %vm5935_vm1, %v11196_v48  ;;  %p5907_p4 = pnand %p5906_p3, %p5900_p0 }
 0x624   :  { %5455 = vmatprep.subr.bf16.mxu1 %v11195_v15 }
 0x627   :  { %5457 = vmatpush3.bf16.msra.mxu1 %v5456_v8 }
 0x628   :  { %5458 = vmatprep.subr.bf16.mxu1 %v11195_v15 }
 0x62b   :  { %5460 = vmatpush3.bf16.msra.mxu1 %v5459_v12 }
 0x62c   :  { %5461 = vmatprep.subr.bf16.mxu1 %v11195_v15 }
 0x62f   :  { %5463 = vmatpush3.bf16.msra.mxu1 %v5462_v9 }
 0x630   :  { %5464 = vmatprep.subr.bf16.mxu1 %v11195_v15 }
 0x633   :  { %5466 = vmatpush3.bf16.msra.mxu1 %v5465_v14 }
 0x634   :  { %5467 = vmatprep.subr.bf16.mxu1 %v11195_v15 }
 0x637   :  { %5469 = vmatpush3.bf16.msra.mxu1 %v5468_v24 }
 0x638   :  { %5470 = vmatprep.subr.bf16.mxu1 %v11195_v15 }
 0x63b   :  { %5472 = vmatpush3.bf16.msra.mxu1 %v5471_v31 }
 0x63c   :  { %5473 = vmatprep.subr.bf16.mxu1 %v11195_v15 }
 0x63f   :  { %5475 = vmatpush3.bf16.msra.mxu1 %v5474_v39 }
 0x640   :  { %5476 = vmatprep.subr.bf16.mxu1 %v11195_v15 }
 0x6a8   :  { %v5234_v18 = vpop.f32.mrb[114].mxu1 }
 0x6a9   :  { %v5235_v60 = vpop.f32.mrb[115].mxu1 }
 0x6aa   :  { %v5236_v23 = vadd.f32 %v5235_v60, %v5234_v18 }
 0x6ac   :  { %v4780_v0 = vadd.f32 %v5236_v23, %v5198_v63 }
 0x6f5   :  { %v4849_v59 = vpop.f32.mrb[116].mxu1 }
 0x6f6   :  { %v4850_v38 = vadd.f32 %v4849_v59, %v4780_v0  ;;  %v4851_v57 = vpop.f32.mrb[117].mxu1 }
 0x6f8   :  { %v4853_v7 = vmax.f32 %v4850_v38, 0.0 }
 0x6fa   :  { %5304 = vmatmul.mubr.f32.vlgmr.msra.gmra.mrb[118].mxu1 %v4853_v7 }
 0x6fb   :  { %5478 = vmatpush3.bf16.msra.mxu1 %v5477_v2  ;;  %5338 = vmatprep.mubr.msk.f32.mxu1 %vm5935_vm1, %v11196_v48 }
 0x6fc   :  { %5479 = vmatprep.subr.bf16.mxu1 %v11195_v15 }
 0x6ff   :  { %5481 = vmatpush3.bf16.msra.mxu1 %v5480_v10 }
 0x700   :  { %5482 = vmatprep.subr.bf16.mxu1 %v11195_v15 }
 0x703   :  { %5484 = vmatpush3.bf16.msra.mxu1 %v5483_v26 }
 0x704   :  { %5485 = vmatprep.subr.bf16.mxu1 %v11195_v15 }
 0x707   :  { %5487 = vmatpush3.bf16.msra.mxu1 %v5486_v16 }
 0x708   :  { %5488 = vmatprep.subr.bf16.mxu1 %v11195_v15 }
 0x70b   :  { %5490 = vmatpush3.bf16.msra.mxu1 %v5489_v49 }
 0x70c   :  { %5491 = vmatprep.subr.bf16.mxu1 %v11195_v15 }
 0x70f   :  { %5493 = vmatpush3.bf16.msra.mxu1 %v5492_v36 }
 0x710   :  { %5494 = vmatprep.subr.bf16.mxu1 %v11195_v15 }
 0x713   :  { %5496 = vmatpush3.bf16.msra.mxu1 %v5495_v62 }
 0x714   :  { %5497 = vmatprep.subr.bf16.mxu1 %v11195_v15  ;;  %v5201_v15 = vld [vmem:[%s10601_s10] ss:$0 sm:$0xff] }
 0x717   :  { %5499 = vmatpush3.bf16.msra.mxu1 %v5498_v42 }
 0x7cd   :  { %v4943_v22 = vpop.f32.mrb[118].mxu1 }
 0x7ce   :  { %v4944_v28 = vadd.f32 %v5200_v44, %v4943_v22  ;;  %v5305_v52 = vpop.f32.mrb[119].mxu1 }
 0x7d0   :  { %v4947_v37 = vmax.f32 %v4944_v28, 0.0 }
 0x7d2   :  { %5339 = vmatmul.mubr.f32.vlgmr.msra.gmra.mrb[120].mxu1 %v4947_v37 }
 0x8a5   :  { %v5037_v55 = vpop.f32.mrb[120].mxu1 }
 0x8a6   :  { %v5038_v56 = vadd.f32 %v5201_v15, %v5037_v55  ;;  %v5340_v58 = vpop.f32.mrb[121].mxu1 }
 0x8a8   :  { %5041 = vst [vmem:[#allocation2] sm:$0x3] %v5038_v56 }
 0x8a9   :  { %5910 = shalt.err (!%p5907_p4)
}
 0x8aa   :  { %s5911_s30 = scalar_lea.hbm %s10602_s11, 32 }
 0x8ab   :  { %p5912_p5 = scmp.ne.s32.totalorder %s10602_s11, %s5911_s30  ;;  %p5915_p6 = scmp.lt.u32.totalorder %s5911_s30, %s10602_s11 }
 0x8ad   :  { %p5917_p7 = pnand %p5915_p6, %p5912_p5 }
 0x8af   :  { %5920 = shalt.err (!%p5917_p7)
}
 0x8b0   :  { %5051 = dma.vmem_to_hbm [thread:$0]  %s5049_s28, 32, %s10602_s11, [#allocation3]  }
 0x8b1   :  { %5921 = dma.done.wait [#allocation3], 32  }
 0x8b2   :  { %5922 = vsyncadd [#allocation3], 4294967264 }
 0x8b3   :  { %5055 = vsyncpa [#allocation3], 1 }

</bundles_post_ra>
